<compile_context>
chip_gen: v7x
topology: tpu7x:2x2x1
jax: 0.10.0
libtpu: 0.0.40
codegen_flags: <defaults>
</compile_context>

<pallas_src>
import jax
import jax.numpy as jnp
import numpy as np
from jax.experimental import pallas as pl
from jax.experimental.pallas import tpu as pltpu


def _round_up(x, m):
    return (x + m - 1) // m * m


def _tap_ranges(l_in, l_out, k_len, s, p, d):
    """Static per-tap (k, i_lo, n, phase, b0): inputs i_lo..i_lo+n-1 feed outputs
    o = (b0 + j)*s + phase for j in [0, n), via the relation o = i*s - p + k*d."""
    taps = []
    for k in range(k_len):
        off = k * d - p
        i_lo = max(0, -(off // s))                     # ceil(-off / s)
        i_hi = min(l_in - 1, (l_out - 1 - off) // s)
        n = i_hi - i_lo + 1
        if n <= 0:
            continue
        o0 = i_lo * s + off
        taps.append((k, i_lo, n, o0 % s, o0 // s))
    return taps


def precompute_layer(w_pt, in_dhw, stride, padding, dilation, in_cols_pad):
    """Weight-only preprocessing for one ConvTranspose3d layer (runs once, in XLA).

    w_pt: (Cin, Cout, KD, KH, KW) -- PyTorch ConvTranspose3d weight layout.
    Returns (plan, weight_mats): a static Python plan plus the per-phase fused weight
    matrices (f32, rows padded to `in_cols_pad`, columns padded to a multiple of 128).
    """
    Cin, Cout, KD, KH, KW = w_pt.shape
    D, H, W = in_dhw
    s, p, d = stride, padding, dilation
    Do = (D - 1) * s - 2 * p + d * (KD - 1) + 1
    Ho = (H - 1) * s - 2 * p + d * (KH - 1) + 1
    Wo = (W - 1) * s - 2 * p + d * (KW - 1) + 1
    L_in, L_out = H * W * Cin, Ho * Wo * Cout
    L_out_pad = _round_up(L_out, 128)                  # lane-dense output columns

    # One-hot transposed-conv index maps along H and W:  o == i*s - p + k*d.
    def axis_map(l_in_, l_out_, k_len):
        m = np.zeros((l_in_, k_len, l_out_), np.float32)
        for i in range(l_in_):
            for k in range(k_len):
                o = i * s - p + k * d
                if 0 <= o < l_out_:
                    m[i, k, o] = 1.0
        return jnp.asarray(m)

    # Fold the H/W stencil + channel contraction into one matrix per depth tap kd:
    #   B[kd, (ih*W + iw)*Cin + ci, (oh*Wo + ow)*Cout + co]
    B = jnp.einsum('coahw,bhq,ewr->abecqro', w_pt.astype(jnp.float32),
                   axis_map(H, Ho, KH), axis_map(W, Wo, KW))
    B = B.reshape(KD, L_in, L_out)
    B = jnp.pad(B, ((0, 0), (0, in_cols_pad - L_in), (0, L_out_pad - L_out)))

    taps = _tap_ranges(D, Do, KD, s, p, d)
    Db = -(-Do // s)

    # Output blocks (phase, b) never written by any tap -> must be zeroed explicitly.
    covered = set()
    for (kd, i_lo, n, ph, b0) in taps:
        for j in range(n):
            covered.add((ph, b0 + j))
    zero_out_blocks = [(ph, b) for ph in range(s) for b in range(Db)
                       if (ph, b) not in covered]
    zero_depth_rows = [b * s + ph for (ph, b) in zero_out_blocks if b * s + ph < Do]

    # Group depth taps by output phase; stack same-phase taps along K (one dot/phase).
    groups = {}
    for (kd, i_lo, n, ph, b0) in taps:
        groups.setdefault(ph, []).append((kd, i_lo, n, b0))

    phase_plan, weight_mats = [], []
    for ph in range(s):
        group = groups.get(ph, [])
        fusable = bool(group) and all(
            (t[2], t[3]) == (group[0][2], group[0][3]) for t in group)
        if fusable:
            w_ph = (B[group[0][0]] if len(group) == 1 else
                    jnp.concatenate([B[kd] for (kd, *_r) in group], axis=0))
            phase_plan.append(dict(kind='fused', n=group[0][2], b0=group[0][3],
                                   i_los=tuple(t[1] for t in group),
                                   widx=len(weight_mats)))
            weight_mats.append(w_ph)
        elif group:
            # General path (unused for this configuration): per-tap matrices.
            tlist = []
            for (kd, i_lo, n, b0) in group:
                tlist.append(dict(i_lo=i_lo, n=n, b0=b0, widx=len(weight_mats)))
                weight_mats.append(B[kd])
            phase_plan.append(dict(kind='taps', taps=tlist))
        else:
            phase_plan.append(dict(kind='empty'))

    plan = dict(s=s, D=D, Do=Do, Db=Db, Ho=Ho, Wo=Wo, Cout=Cout,
                L_in_pad=in_cols_pad, L_out=L_out, L_out_pad=L_out_pad,
                phase_plan=phase_plan, zero_out_blocks=zero_out_blocks,
                zero_depth_rows=zero_depth_rows)
    return plan, weight_mats


def _make_fused_kernel(plans, n_weights, batch):
    """Whole-network kernel.  refs = (x, *weights, out, *intermediate_scratch).

    Row convention: matmul M rows and scratch rows are (depth, batch)-ordered,
    row = depth_index * batch + batch_index, so batch is folded into the MXU M dim
    and every slice below is a contiguous static slice.
    """
    N = batch

    def kernel(*refs):
        x_ref = refs[0]
        w_refs = refs[1:1 + n_weights]
        o_ref = refs[1 + n_weights]
        mids = refs[2 + n_weights:]

        def run_layer(src, plan, mid_ref, out_ref):
            s, Db, Do, Lp = plan['s'], plan['Db'], plan['Do'], plan['L_out_pad']
            zero_rows = jnp.zeros((N, Lp), jnp.float32)

            def phase_dot(i_los, n, widx):
                # LHS = depth windows concatenated along lanes (128-aligned pieces),
                # rows (depth, batch)-ordered -> one MXU dot per phase, M = n*N.
                pieces = [src[il * N:(il + n) * N, :] for il in i_los]
                lhs = pieces[0] if len(pieces) == 1 else jnp.concatenate(pieces, -1)
                return jnp.dot(lhs, w_refs[widx][...],
                               preferred_element_type=jnp.float32)   # (n*N, Lp)

            for ph, entry in enumerate(plan['phase_plan']):
                if entry['kind'] == 'fused':
                    b0, n = entry['b0'], entry['n']
                    val = phase_dot(entry['i_los'], n, entry['widx'])
                    if out_ref is not None:
                        # Final layer: one contiguous, lane-dense store per phase.
                        out_ref[ph, b0 * N:(b0 + n) * N, :] = val
                    else:
                        # Intermediate: de-interleave into depth order (od = b*s + ph)
                        # with a short static loop of row-block stores (stays in VMEM).
                        for j in range(n):
                            od = (b0 + j) * s + ph
                            mid_ref[od * N:(od + 1) * N, :] = val[j * N:(j + 1) * N, :]
                elif entry['kind'] == 'taps':
                    # General fallback (not taken here): same-phase taps with different
                    # valid ranges -> zero-init the phase rows, then accumulate.
                    for b in range(Db):
                        od = b * s + ph
                        if out_ref is not None:
                            out_ref[ph, b * N:(b + 1) * N, :] = zero_rows
                        elif od < Do:
                            mid_ref[od * N:(od + 1) * N, :] = zero_rows
                    for t in entry['taps']:
                        val = phase_dot((t['i_lo'],), t['n'], t['widx'])
                        for j in range(t['n']):
                            b = t['b0'] + j
                            blk = val[j * N:(j + 1) * N, :]
                            if out_ref is not None:
                                out_ref[ph, b * N:(b + 1) * N, :] += blk
                            else:
                                od = b * s + ph
                                mid_ref[od * N:(od + 1) * N, :] += blk

            # Rows no tap writes: zero them (final layer: they are cropped but must not
            # be uninitialized; intermediates: genuine structural zeros of the deconv).
            if out_ref is not None:
                for (ph, b) in plan['zero_out_blocks']:
                    out_ref[ph, b * N:(b + 1) * N, :] = zero_rows
            else:
                for od in plan['zero_depth_rows']:
                    mid_ref[od * N:(od + 1) * N, :] = zero_rows

        src = x_ref
        for li, plan in enumerate(plans):
            is_last = li == len(plans) - 1
            run_layer(src, plan,
                      None if is_last else mids[li],
                      o_ref if is_last else None)
            if not is_last:
                src = mids[li]

    return kernel


def build_forward(weights, in_dhw, stride, padding, dilation):
    """Builds the forward fn for the whole DeConv3d stack (weights: PyTorch layout)."""
    plans, weight_mats = [], []
    dhw = in_dhw
    in_cols_pad = _round_up(dhw[1] * dhw[2] * weights[0].shape[0], 128)
    for w in weights:
        plan, mats = precompute_layer(w, dhw, stride, padding, dilation, in_cols_pad)
        off = len(weight_mats)
        for e in plan['phase_plan']:
            if e['kind'] == 'fused':
                e['widx'] += off
            elif e['kind'] == 'taps':
                for t in e['taps']:
                    t['widx'] += off
        weight_mats.extend(mats)
        plans.append(plan)
        dhw = (plan['Do'], plan['Ho'], plan['Wo'])
        in_cols_pad = plan['L_out_pad']

    def forward(x_ncdhw):
        N = x_ncdhw.shape[0]
        D0, H0, W0 = in_dhw
        Cin0 = weights[0].shape[0]
        L0, L0p = H0 * W0 * Cin0, plans[0]['L_in_pad']

        # NCDHW -> (depth*batch, H*W*Cin), zero-padded to a 128-aligned column count.
        x2 = jnp.transpose(x_ncdhw.astype(jnp.float32),
                           (2, 0, 3, 4, 1)).reshape(D0 * N, L0)
        x2 = jnp.pad(x2, ((0, 0), (0, L0p - L0)))

        last = plans[-1]
        s, Db, Lp = last['s'], last['Db'], last['L_out_pad']
        Do, Ho, Wo, Cout = last['Do'], last['Ho'], last['Wo'], last['Cout']

        vspecs = [pl.BlockSpec(memory_space=pltpu.MemorySpace.VMEM)
                  for _ in range(1 + len(weight_mats))]
        out = pl.pallas_call(
            _make_fused_kernel(plans, len(weight_mats), N),
            out_shape=jax.ShapeDtypeStruct((s, Db * N, Lp), jnp.float32),
            in_specs=vspecs,
            out_specs=pl.BlockSpec(memory_space=pltpu.MemorySpace.VMEM),
            scratch_shapes=[pltpu.VMEM((p['Do'] * N, p['L_out_pad']), jnp.float32)
                            for p in plans[:-1]],
            compiler_params=pltpu.CompilerParams(vmem_limit_bytes=32 * 1024 * 1024),
        )(x2, *weight_mats)

        # (phase, block*batch, lanes) -> NCDHW; crop padded lanes & padded depth rows.
        out = out[:, :, :Ho * Wo * Cout].reshape(s, Db, N, Ho, Wo, Cout)
        out = jnp.transpose(out, (2, 5, 1, 0, 3, 4)).reshape(N, Cout, Db * s, Ho, Wo)
        return out[:, :, :Do]

    return forward


def deconv3d_ref(x_ndhwc, w_pt, stride, padding, dilation):
    """Pure-JAX reference (lax conv with lhs_dilation == transposed conv), f32."""
    Cin, Cout, KD, KH, KW = w_pt.shape
    w_dhwio = jnp.transpose(jnp.flip(w_pt, axis=(2, 3, 4)), (2, 3, 4, 0, 1))
    d, p, s = dilation, padding, stride
    pads = [(d * (KD - 1) - p,) * 2, (d * (KH - 1) - p,) * 2, (d * (KW - 1) - p,) * 2]
    return jax.lax.conv_general_dilated(
        x_ndhwc, w_dhwio, window_strides=(1, 1, 1), padding=pads,
        lhs_dilation=(s, s, s), rhs_dilation=(d, d, d),
        dimension_numbers=("NDHWC", "DHWIO", "NDHWC"),
        precision=jax.lax.Precision.HIGHEST)


if __name__ == "__main__":
    # Module hyper-params (small, consistent with the test module's constructor).
    num_layers = 2
    in_channels, out_channels = 4, 8
    kernel_size, stride, padding, dilation = 3, 2, 1, 1
    N, D, H, W = 2, 4, 4, 4

    key = jax.random.PRNGKey(0)
    kx, k1, k2 = jax.random.split(key, 3)
    x_ncdhw = jax.random.normal(kx, (N, in_channels, D, H, W), jnp.float32)

    # Deterministic synthetic weights: layer0 (Cin->Cout), layer1.. (Cout->Cout).
    weights = [
        0.1 * jax.random.normal(
            k1, (in_channels, out_channels, kernel_size, kernel_size, kernel_size),
            jnp.float32),
        0.1 * jax.random.normal(
            k2, (out_channels, out_channels, kernel_size, kernel_size, kernel_size),
            jnp.float32),
    ]
    assert len(weights) == num_layers

    fwd = jax.jit(build_forward(weights, (D, H, W), stride, padding, dilation))
    y = jax.block_until_ready(fwd(x_ncdhw))

    # Output spatial size per layer: (L-1)*s - 2p + d*(k-1) + 1 : 4 -> 7 -> 13
    assert y.shape == (N, out_channels, 13, 13, 13), y.shape

    # f32 MXU operands + f32 accumulation -> tight agreement with the f32 reference.
    x_ndhwc = jnp.transpose(x_ncdhw, (0, 2, 3, 4, 1))
    yr = x_ndhwc
    for w in weights:
        yr = deconv3d_ref(yr, w, stride, padding, dilation)
    yr = jnp.transpose(yr, (0, 4, 1, 2, 3))
    err = float(jnp.max(jnp.abs(y - yr)))
    assert err < 1e-3, f"max abs error {err}"

    print("KERNEL_OK")
</pallas_src>

<mosaic_0001>
module attributes {stable_mosaic.version = 11 : i64} {
  func.func @kernel(%arg0: memref<8x128xf32, #tpu.memory_space<vmem>>, %arg1: memref<128x512xf32, #tpu.memory_space<vmem>>, %arg2: memref<256x512xf32, #tpu.memory_space<vmem>>, %arg3: memref<512x1408xf32, #tpu.memory_space<vmem>>, %arg4: memref<1024x1408xf32, #tpu.memory_space<vmem>>, %arg5: memref<2x14x1408xf32, #tpu.memory_space<vmem>>, %arg6: memref<14x512xf32, #tpu.memory_space<vmem>>) attributes {dimension_semantics = [], scalar_prefetch = 0 : i64, scratch_operands = 1 : i64, tpu.core_type = #tpu.core_type<tc>} {
    %c0 = arith.constant 0 : index
    %c0_0 = arith.constant 0 : index
    %0 = vector.load %arg0[%c0, %c0_0] : memref<8x128xf32, #tpu.memory_space<vmem>>, vector<8x128xf32>
    %c0_1 = arith.constant 0 : index
    %c0_2 = arith.constant 0 : index
    %1 = vector.load %arg1[%c0_1, %c0_2] : memref<128x512xf32, #tpu.memory_space<vmem>>, vector<128x512xf32>
    %cst = arith.constant dense<0.000000e+00> : vector<8x512xf32>
    %2 = tpu.matmul %0, %1, %cst {dimension_numbers = #tpu.dot_dimension_numbers<[1], [0], [0], [1], [0, 0, 1, 1], [], []>} : vector<8x128xf32>, vector<128x512xf32>, vector<8x512xf32> -> vector<8x512xf32>
    %3 = vector.extract_strided_slice %2 {offsets = [0, 0], sizes = [2, 512], strides = [1, 1]} : vector<8x512xf32> to vector<2x512xf32>
    %c0_3 = arith.constant 0 : index
    %c0_4 = arith.constant 0 : index
    %4 = vector.load %arg6[%c0_3, %c0_4] : memref<14x512xf32, #tpu.memory_space<vmem>>, vector<2x512xf32>
    tpu.vector_store %arg6[%c0_3, %c0_4], %3 {strides = array<i32>} : memref<14x512xf32, #tpu.memory_space<vmem>>, vector<2x512xf32>,
    %5 = vector.extract_strided_slice %2 {offsets = [2, 0], sizes = [2, 512], strides = [1, 1]} : vector<8x512xf32> to vector<2x512xf32>
    %c4 = arith.constant 4 : index
    %c0_5 = arith.constant 0 : index
    %6 = vector.load %arg6[%c4, %c0_5] : memref<14x512xf32, #tpu.memory_space<vmem>>, vector<2x512xf32>
    tpu.vector_store %arg6[%c4, %c0_5], %5 {strides = array<i32>} : memref<14x512xf32, #tpu.memory_space<vmem>>, vector<2x512xf32>,
    %7 = vector.extract_strided_slice %2 {offsets = [4, 0], sizes = [2, 512], strides = [1, 1]} : vector<8x512xf32> to vector<2x512xf32>
    %c8 = arith.constant 8 : index
    %c0_6 = arith.constant 0 : index
    %8 = vector.load %arg6[%c8, %c0_6] : memref<14x512xf32, #tpu.memory_space<vmem>>, vector<2x512xf32>
    tpu.vector_store %arg6[%c8, %c0_6], %7 {strides = array<i32>} : memref<14x512xf32, #tpu.memory_space<vmem>>, vector<2x512xf32>,
    %9 = vector.extract_strided_slice %2 {offsets = [6, 0], sizes = [2, 512], strides = [1, 1]} : vector<8x512xf32> to vector<2x512xf32>
    %c12 = arith.constant 12 : index
    %c0_7 = arith.constant 0 : index
    %10 = vector.load %arg6[%c12, %c0_7] : memref<14x512xf32, #tpu.memory_space<vmem>>, vector<2x512xf32>
    tpu.vector_store %arg6[%c12, %c0_7], %9 {strides = array<i32>} : memref<14x512xf32, #tpu.memory_space<vmem>>, vector<2x512xf32>,
    %c2 = arith.constant 2 : index
    %c0_8 = arith.constant 0 : index
    %11 = vector.load %arg0[%c2, %c0_8] : memref<8x128xf32, #tpu.memory_space<vmem>>, vector<6x128xf32>
    %c0_9 = arith.constant 0 : index
    %c0_10 = arith.constant 0 : index
    %12 = vector.load %arg0[%c0_9, %c0_10] : memref<8x128xf32, #tpu.memory_space<vmem>>, vector<6x128xf32>
    %13 = tpu.concatenate %11, %12 in 1 : vector<6x128xf32>, vector<6x128xf32> -> vector<6x256xf32>
    %c0_11 = arith.constant 0 : index
    %c0_12 = arith.constant 0 : index
    %14 = vector.load %arg2[%c0_11, %c0_12] : memref<256x512xf32, #tpu.memory_space<vmem>>, vector<256x512xf32>
    %cst_13 = arith.constant dense<0.000000e+00> : vector<6x512xf32>
    %15 = tpu.matmul %13, %14, %cst_13 {dimension_numbers = #tpu.dot_dimension_numbers<[1], [0], [0], [1], [0, 0, 1, 1], [], []>} : vector<6x256xf32>, vector<256x512xf32>, vector<6x512xf32> -> vector<6x512xf32>
    %16 = vector.extract_strided_slice %15 {offsets = [0, 0], sizes = [2, 512], strides = [1, 1]} : vector<6x512xf32> to vector<2x512xf32>
    %c2_14 = arith.constant 2 : index
    %c0_15 = arith.constant 0 : index
    %17 = vector.load %arg6[%c2_14, %c0_15] : memref<14x512xf32, #tpu.memory_space<vmem>>, vector<2x512xf32>
    tpu.vector_store %arg6[%c2_14, %c0_15], %16 {strides = array<i32>} : memref<14x512xf32, #tpu.memory_space<vmem>>, vector<2x512xf32>,
    %18 = vector.extract_strided_slice %15 {offsets = [2, 0], sizes = [2, 512], strides = [1, 1]} : vector<6x512xf32> to vector<2x512xf32>
    %c6 = arith.constant 6 : index
    %c0_16 = arith.constant 0 : index
    %19 = vector.load %arg6[%c6, %c0_16] : memref<14x512xf32, #tpu.memory_space<vmem>>, vector<2x512xf32>
    tpu.vector_store %arg6[%c6, %c0_16], %18 {strides = array<i32>} : memref<14x512xf32, #tpu.memory_space<vmem>>, vector<2x512xf32>,
    %20 = vector.extract_strided_slice %15 {offsets = [4, 0], sizes = [2, 512], strides = [1, 1]} : vector<6x512xf32> to vector<2x512xf32>
    %c10 = arith.constant 10 : index
    %c0_17 = arith.constant 0 : index
    %21 = vector.load %arg6[%c10, %c0_17] : memref<14x512xf32, #tpu.memory_space<vmem>>, vector<2x512xf32>
    tpu.vector_store %arg6[%c10, %c0_17], %20 {strides = array<i32>} : memref<14x512xf32, #tpu.memory_space<vmem>>, vector<2x512xf32>,
    %cst_18 = arith.constant 0.000000e+00 : f32
    %22 = vector.broadcast %cst_18 : f32 to vector<2x1408xf32>
    %c0_19 = arith.constant 0 : index
    %c0_20 = arith.constant 0 : index
    %23 = vector.load %arg6[%c0_19, %c0_20] : memref<14x512xf32, #tpu.memory_space<vmem>>, vector<14x512xf32>
    %c0_21 = arith.constant 0 : index
    %c0_22 = arith.constant 0 : index
    %24 = vector.load %arg3[%c0_21, %c0_22] : memref<512x1408xf32, #tpu.memory_space<vmem>>, vector<512x1408xf32>
    %cst_23 = arith.constant dense<0.000000e+00> : vector<14x1408xf32>
    %25 = tpu.matmul %23, %24, %cst_23 {dimension_numbers = #tpu.dot_dimension_numbers<[1], [0], [0], [1], [0, 0, 1, 1], [], []>} : vector<14x512xf32>, vector<512x1408xf32>, vector<14x1408xf32> -> vector<14x1408xf32>
    %c0_24 = arith.constant 0 : index
    %c0_25 = arith.constant 0 : index
    %c0_26 = arith.constant 0 : index
    %26 = vector.load %arg5[%c0_24, %c0_25, %c0_26] : memref<2x14x1408xf32, #tpu.memory_space<vmem>>, vector<1x14x1408xf32>
    %27 = vector.shape_cast %26 : vector<1x14x1408xf32> to vector<14x1408xf32>
    %28 = vector.shape_cast %25 : vector<14x1408xf32> to vector<1x14x1408xf32>
    tpu.vector_store %arg5[%c0_24, %c0_25, %c0_26], %28 {strides = array<i32>} : memref<2x14x1408xf32, #tpu.memory_space<vmem>>, vector<1x14x1408xf32>,
    %c2_27 = arith.constant 2 : index
    %c0_28 = arith.constant 0 : index
    %29 = vector.load %arg6[%c2_27, %c0_28] : memref<14x512xf32, #tpu.memory_space<vmem>>, vector<12x512xf32>
    %c0_29 = arith.constant 0 : index
    %c0_30 = arith.constant 0 : index
    %30 = vector.load %arg6[%c0_29, %c0_30] : memref<14x512xf32, #tpu.memory_space<vmem>>, vector<12x512xf32>
    %31 = tpu.concatenate %29, %30 in 1 : vector<12x512xf32>, vector<12x512xf32> -> vector<12x1024xf32>
    %c0_31 = arith.constant 0 : index
    %c0_32 = arith.constant 0 : index
    %32 = vector.load %arg4[%c0_31, %c0_32] : memref<1024x1408xf32, #tpu.memory_space<vmem>>, vector<1024x1408xf32>
    %cst_33 = arith.constant dense<0.000000e+00> : vector<12x1408xf32>
    %33 = tpu.matmul %31, %32, %cst_33 {dimension_numbers = #tpu.dot_dimension_numbers<[1], [0], [0], [1], [0, 0, 1, 1], [], []>} : vector<12x1024xf32>, vector<1024x1408xf32>, vector<12x1408xf32> -> vector<12x1408xf32>
    %c1 = arith.constant 1 : index
    %c0_34 = arith.constant 0 : index
    %c0_35 = arith.constant 0 : index
    %34 = vector.load %arg5[%c1, %c0_34, %c0_35] : memref<2x14x1408xf32, #tpu.memory_space<vmem>>, vector<1x12x1408xf32>
    %35 = vector.shape_cast %34 : vector<1x12x1408xf32> to vector<12x1408xf32>
    %36 = vector.shape_cast %33 : vector<12x1408xf32> to vector<1x12x1408xf32>
    tpu.vector_store %arg5[%c1, %c0_34, %c0_35], %36 {strides = array<i32>} : memref<2x14x1408xf32, #tpu.memory_space<vmem>>, vector<1x12x1408xf32>,
    %c1_36 = arith.constant 1 : index
    %c12_37 = arith.constant 12 : index
    %c0_38 = arith.constant 0 : index
    %37 = vector.load %arg5[%c1_36, %c12_37, %c0_38] : memref<2x14x1408xf32, #tpu.memory_space<vmem>>, vector<1x2x1408xf32>
    %38 = vector.shape_cast %37 : vector<1x2x1408xf32> to vector<2x1408xf32>
    %39 = vector.shape_cast %22 : vector<2x1408xf32> to vector<1x2x1408xf32>
    tpu.vector_store %arg5[%c1_36, %c12_37, %c0_38], %39 {strides = array<i32>} : memref<2x14x1408xf32, #tpu.memory_space<vmem>>, vector<1x2x1408xf32>,
    return
  }
}

</mosaic_0001>

<bundles_post_ra>
// kernel: forward.1
= control target key start
LH: loop header
LB: loop body
LE: loop exit
PB: predicated region body
PF: predicated region fallthrough
CT: control target
= control target key end

     0   :  { %10 = vsyncpa [#allocation4], 0  ;;  %s8918_s0 = inlined_call_operand.vmem [shape: f32[8,128], index: 0, kind: input, shape index: {}]   ;;  %s8919_s1 = inlined_call_operand.hbm [shape: f32[128,512], index: 1, kind: input, shape index: {}]   ;;  %s8920_s2 = inlined_call_operand.hbm [shape: f32[256,512], index: 2, kind: input, shape index: {}]   ;;  %s8921_s3 = inlined_call_operand.hbm [shape: f32[512,1408], index: 3, kind: input, shape index: {}]   ;;  %s8922_s4 = inlined_call_operand.hbm [shape: f32[1024,1408], index: 4, kind: input, shape index: {}]   ;;  %s8923_s5 = inlined_call_operand.vmem [shape: f32[2,14,1408], index: 5, kind: output, shape index: {}]  }
   0x1   :  { %11 = vsyncpa [#allocation6], 0 }
   0x2   :  { %12 = vsyncpa [#allocation9], 0  ;;  %s8430_s18 = smov [#allocation5]   ;;  %s8431_s20 = smov [#allocation3]  }
   0x3   :  { %s32_s19 = sshll.u32 %s8430_s18, 4  ;;  %s20_s21 = sshll.u32 %s8431_s20, 4  ;;  %s33_s19 = int_to_ptr.vmem [resolvable:$true] %s32_s19  ;;  %s8469_s21 = int_to_ptr.vmem [resolvable:$true] %s20_s21 }
   0x4   :  { %s8336_s24 = scalar_lea.hbm %s8920_s2, 16384 }
   0x5   :  { %p8337_p0 = scmp.ne.s32.totalorder %s8920_s2, %s8336_s24  ;;  %p8340_p1 = scmp.lt.u32.totalorder %s8336_s24, %s8920_s2 }
   0x7   :  { %p8342_p2 = pnand %p8340_p1, %p8337_p0 }
   0x9   :  { %8345 = shalt.err (!%p8342_p2)
}
   0xa   :  { %s8346_s29 = scalar_lea.vmem %s33_s19, 16384  ;;  %p8351_p4 = scmp.lt.s32.totalorder %s33_s19, %s33_s19 }
   0xb   :  { %p8347_p3 = scmp.ne.s32.totalorder %s33_s19, %s8346_s29  ;;  %p8352_p5 = scmp.lt.s32.totalorder %s8346_s29, %s8346_s29 }
   0xd   :  { %p8353_p6 = por %p8352_p5, %p8351_p4 }
   0xf   :  { %p8354_p7 = pnand %p8353_p6, %p8347_p3 }
  0x11   :  { %8357 = shalt.err (!%p8354_p7)
}
  0x12   :  { %s8432_s30 = smov 512   ;;  %s8433_s6 = smov 32  }
  0x13   :  { %38 = dma.hbm_to_vmem [thread:$0]  %s8920_s2, 16384, %s33_s19, [#allocation6], %s8432_s30, %s8432_s30, %s8433_s6  }
  0x14   :  { %s8358_s11 = scalar_lea.hbm %s8919_s1, 8192 }
  0x15   :  { %p8359_p8 = scmp.ne.s32.totalorder %s8919_s1, %s8358_s11  ;;  %p8362_p9 = scmp.lt.u32.totalorder %s8358_s11, %s8919_s1 }
  0x17   :  { %p8364_p10 = pnand %p8362_p9, %p8359_p8 }
  0x19   :  { %8367 = shalt.err (!%p8364_p10)
}
  0x1a   :  { %s8368_s16 = scalar_lea.vmem %s8469_s21, 8192  ;;  %p8373_p12 = scmp.lt.s32.totalorder %s8469_s21, %s8469_s21 }
  0x1b   :  { %p8369_p11 = scmp.ne.s32.totalorder %s8469_s21, %s8368_s16  ;;  %p8374_p13 = scmp.lt.s32.totalorder %s8368_s16, %s8368_s16 }
  0x1d   :  { %p8375_p0 = por %p8374_p13, %p8373_p12 }
  0x1f   :  { %p8376_p1 = pnand %p8375_p0, %p8369_p11 }
  0x21   :  { %8379 = shalt.err (!%p8376_p1)
}
  0x22   :  { %26 = dma.hbm_to_vmem [thread:$0]  %s8919_s1, 8192, %s8469_s21, [#allocation4], %s8432_s30, %s8432_s30, %s8433_s6  }
  0x23   :  { %s8434_s18 = smov [#allocation7]   ;;  %s8380_s23 = scalar_lea.hbm %s8921_s3, 90112 }
  0x24   :  { %s44_s19 = sshll.u32 %s8434_s18, 4  ;;  %p8381_p2 = scmp.ne.s32.totalorder %s8921_s3, %s8380_s23  ;;  %s45_s19 = int_to_ptr.vmem [resolvable:$true] %s44_s19 }
  0x25   :  { %p8384_p3 = scmp.lt.u32.totalorder %s8380_s23, %s8921_s3 }
  0x27   :  { %p8386_p4 = pnand %p8384_p3, %p8381_p2 }
  0x29   :  { %8389 = shalt.err (!%p8386_p4)
}
  0x2a   :  { %s8390_s28 = scalar_lea.vmem %s45_s19, 90112  ;;  %p8395_p6 = scmp.lt.s32.totalorder %s45_s19, %s45_s19 }
  0x2b   :  { %p8391_p5 = scmp.ne.s32.totalorder %s45_s19, %s8390_s28  ;;  %p8396_p7 = scmp.lt.s32.totalorder %s8390_s28, %s8390_s28 }
  0x2d   :  { %p8397_p8 = por %p8396_p7, %p8395_p6 }
  0x2f   :  { %p8398_p9 = pnand %p8397_p8, %p8391_p5 }
  0x31   :  { %8401 = shalt.err (!%p8398_p9)
}
  0x32   :  { %s8435_s1 = smov 1408   ;;  %s8436_s21 = smov 88  }
  0x33   :  { %50 = dma.hbm_to_vmem [thread:$0]  %s8921_s3, 90112, %s45_s19, [#allocation6], %s8435_s1, %s8435_s1, %s8436_s21  }
  0x34   :  { %s8437_s6 = smov [#allocation8]   ;;  %s8402_s10 = scalar_lea.hbm %s8922_s4, 180224 }
  0x35   :  { %s56_s7 = sshll.u32 %s8437_s6, 4  ;;  %p8403_p10 = scmp.ne.s32.totalorder %s8922_s4, %s8402_s10  ;;  %s57_s7 = int_to_ptr.vmem [resolvable:$true] %s56_s7 }
  0x36   :  { %p8406_p11 = scmp.lt.u32.totalorder %s8402_s10, %s8922_s4 }
  0x38   :  { %p8408_p12 = pnand %p8406_p11, %p8403_p10 }
  0x3a   :  { %8411 = shalt.err (!%p8408_p12)
}
  0x3b   :  { %s8412_s15 = scalar_lea.vmem %s57_s7, 180224  ;;  %p8417_p0 = scmp.lt.s32.totalorder %s57_s7, %s57_s7 }
  0x3c   :  { %p8413_p13 = scmp.ne.s32.totalorder %s57_s7, %s8412_s15  ;;  %p8418_p1 = scmp.lt.s32.totalorder %s8412_s15, %s8412_s15 }
  0x3e   :  { %p8419_p2 = por %p8418_p1, %p8417_p0 }
  0x40   :  { %p8420_p3 = pnand %p8419_p2, %p8413_p13 }
  0x42   :  { %8423 = shalt.err (!%p8420_p3)
}
  0x43   :  { %62 = dma.hbm_to_vmem [thread:$0]  %s8922_s4, 180224, %s57_s7, [#allocation9], %s8435_s1, %s8435_s1, %s8436_s21  }
  0x44   :  { %8424 = dma.done.wait [#allocation4], 8192  }
  0x45   :  { %8425 = vsyncadd [#allocation4], 4294959104 }
  0x46   :  { %8426 = dma.done.wait [#allocation6], 106496  }
  0x47   :  { %8427 = vsyncadd [#allocation6], 4294860800 }
  0x48   :  { %8428 = dma.done.wait [#allocation9], 180224  }
  0x49   :  { %8429 = vsyncadd [#allocation9], 4294787072  ;;  %v8438_v0 = vmov 0.0   ;;  %v77_v1 = vld [vmem:[#allocation3 + $0x8] sm:$0xff]  ;;  %v331_v3 = vld [vmem:[#allocation5 + $0x18] sm:$0xff]  ;;  %vm3745_vm0 = vcmask 1045504  }
  0x4a   :  { %204 = vmatprep.mubr.f32.mxu0 %v8438_v0  ;;  %5689 = vst [vmem:[%s8923_s5 + $0x108] sm:$0x30] %v8438_v0  ;;  %5690 = vst [vmem:[%s8923_s5 + $0x110] sm:$0x30] %v8438_v0  ;;  %v81_v2 = vld [vmem:[#allocation3 + $0x28] sm:$0xff]  ;;  %v335_v5 = vld [vmem:[#allocation5 + $0x38] sm:$0xff] }
  0x4b   :  { %5691 = vst [vmem:[%s8923_s5 + $0x118] sm:$0x30] %v8438_v0  ;;  %5692 = vst [vmem:[%s8923_s5 + $0x120] sm:$0x30] %v8438_v0  ;;  %v5928_v4 = vpack.c.bf16 %v81_v2, %v77_v1  ;;  %v76_v6 = vld [vmem:[#allocation3] sm:$0xff]  ;;  %v6056_v8 = vpack.c.bf16 %v335_v5, %v331_v3  ;;  %v330_v10 = vld [vmem:[#allocation5 + $0x10] sm:$0xff] }
  0x4c   :  { %5693 = vst [vmem:[%s8923_s5 + $0x128] sm:$0x30] %v8438_v0  ;;  %5694 = vst [vmem:[%s8923_s5 + $0x130] sm:$0x30] %v8438_v0  ;;  %v80_v7 = vld [vmem:[#allocation3 + $0x20] sm:$0xff]  ;;  %v334_v11 = vld [vmem:[#allocation5 + $0x30] sm:$0xff] }
  0x4d   :  { %5695 = vst [vmem:[%s8923_s5 + $0x138] sm:$0x30] %v8438_v0  ;;  %5696 = vst [vmem:[%s8923_s5 + $0x140] sm:$0x30] %v8438_v0  ;;  %v5930_v9 = vpack.c.bf16 %v80_v7, %v76_v6  ;;  %v85_v12 = vld [vmem:[#allocation3 + $0x48] sm:$0xff]  ;;  %5929 = vmatprep.subr.bf16.mxu0 %v5928_v4  ;;  %v6058_v13 = vpack.c.bf16 %v334_v11, %v330_v10  ;;  %v339_v15 = vld [vmem:[#allocation5 + $0x58] sm:$0xff]  ;;  %6057 = vmatprep.subr.bf16.mxu1 %v6056_v8 }
  0x4e   :  { %5697 = vst [vmem:[%s8923_s5 + $0x148] sm:$0x30] %v8438_v0  ;;  %5698 = vst [vmem:[%s8923_s5 + $0x150] sm:$0x30] %v8438_v0  ;;  %v89_v14 = vld [vmem:[#allocation3 + $0x68] sm:$0xff]  ;;  %v343_v16 = vld [vmem:[#allocation5 + $0x78] sm:$0xff] }
  0x4f   :  { %5699 = vst [vmem:[%s8923_s5 + $0x158] sm:$0x30] %v8438_v0  ;;  %5931 = vmatpush1.bf16.msra.mxu0 %v5930_v9  ;;  %v5932_v17 = vpack.c.bf16 %v89_v14, %v85_v12  ;;  %v6060_v18 = vpack.c.bf16 %v343_v16, %v339_v15  ;;  %v84_v19 = vld [vmem:[#allocation3 + $0x40] sm:$0xff]  ;;  %v338_v21 = vld [vmem:[#allocation5 + $0x50] sm:$0xff]  ;;  %6059 = vmatpush1.bf16.msra.mxu1 %v6058_v13  ;;  %v93_v24 = vld [vmem:[#allocation3 + $0x88] sm:$0xff]  ;;  %vm2316_vm1 = vcmask 1041408  }
  0x50   :  { %v88_v20 = vld [vmem:[#allocation3 + $0x60] sm:$0xff]  ;;  %v342_v23 = vld [vmem:[#allocation5 + $0x70] sm:$0xff]  ;;  %v97_v25 = vld [vmem:[#allocation3 + $0xa8] sm:$0xff] }
  0x51   :  { %v5934_v22 = vpack.c.bf16 %v88_v20, %v84_v19  ;;  %5933 = vmatprep.subr.bf16.mxu0 %v5932_v17  ;;  %6061 = vmatprep.subr.bf16.mxu1 %v6060_v18  ;;  %v6062_v26 = vpack.c.bf16 %v342_v23, %v338_v21  ;;  %v5936_v27 = vpack.c.bf16 %v97_v25, %v93_v24  ;;  %v347_v28 = vld [vmem:[#allocation5 + $0x98] sm:$0xff]  ;;  %v92_v30 = vld [vmem:[#allocation3 + $0x80] sm:$0xff]  ;;  %v346_v33 = vld [vmem:[#allocation5 + $0x90] sm:$0xff] }
  0x52   :  { %v351_v29 = vld [vmem:[#allocation5 + $0xb8] sm:$0xff]  ;;  %v96_v32 = vld [vmem:[#allocation3 + $0xa0] sm:$0xff]  ;;  %v350_v34 = vld [vmem:[#allocation5 + $0xb0] sm:$0xff] }
  0x53   :  { %v6064_v31 = vpack.c.bf16 %v351_v29, %v347_v28  ;;  %5935 = vmatpush1.bf16.msra.mxu0 %v5934_v22  ;;  %v5938_v35 = vpack.c.bf16 %v96_v32, %v92_v30  ;;  %v101_v36 = vld [vmem:[#allocation3 + $0xc8] sm:$0xff]  ;;  %v355_v38 = vld [vmem:[#allocation5 + $0xd8] sm:$0xff]  ;;  %6063 = vmatpush1.bf16.msra.mxu1 %v6062_v26  ;;  %v6066_v39 = vpack.c.bf16 %v350_v34, %v346_v33  ;;  %v100_v42 = vld [vmem:[#allocation3 + $0xc0] sm:$0xff] }
  0x54   :  { %v105_v37 = vld [vmem:[#allocation3 + $0xe8] sm:$0xff]  ;;  %5937 = vmatprep.subr.bf16.mxu0 %v5936_v27  ;;  %v359_v41 = vld [vmem:[#allocation5 + $0xf8] sm:$0xff]  ;;  %v104_v43 = vld [vmem:[#allocation3 + $0xe0] sm:$0xff] }
  0x55   :  { %v5940_v40 = vpack.c.bf16 %v105_v37, %v101_v36  ;;  %6065 = vmatprep.subr.bf16.mxu1 %v6064_v31  ;;  %v6068_v44 = vpack.c.bf16 %v359_v41, %v355_v38  ;;  %v354_v45 = vld [vmem:[#allocation5 + $0xd0] sm:$0xff]  ;;  %v109_v47 = vld [vmem:[#allocation3 + $0x108] sm:$0xff]  ;;  %v363_v49 = vld [vmem:[#allocation5 + $0x118] sm:$0xff]  ;;  %v5942_v51 = vpack.c.bf16 %v104_v43, %v100_v42 }
  0x56   :  { %v358_v46 = vld [vmem:[#allocation5 + $0xf0] sm:$0xff]  ;;  %v113_v48 = vld [vmem:[#allocation3 + $0x128] sm:$0xff]  ;;  %v367_v50 = vld [vmem:[#allocation5 + $0x138] sm:$0xff] }
  0x57   :  { %5939 = vmatpush1.bf16.msra.mxu0 %v5938_v35  ;;  %6067 = vmatpush1.bf16.msra.mxu1 %v6066_v39  ;;  %v6070_v52 = vpack.c.bf16 %v358_v46, %v354_v45  ;;  %v5944_v53 = vpack.c.bf16 %v113_v48, %v109_v47  ;;  %v108_v54 = vld [vmem:[#allocation3 + $0x100] sm:$0xff]  ;;  %v362_v56 = vld [vmem:[#allocation5 + $0x110] sm:$0xff]  ;;  %v6072_v57 = vpack.c.bf16 %v367_v50, %v363_v49  ;;  %v117_v59 = vld [vmem:[#allocation3 + $0x148] sm:$0xff] }
  0x58   :  { %5941 = vmatprep.subr.bf16.mxu0 %v5940_v40  ;;  %v112_v55 = vld [vmem:[#allocation3 + $0x120] sm:$0xff]  ;;  %6069 = vmatprep.subr.bf16.mxu1 %v6068_v44  ;;  %v366_v58 = vld [vmem:[#allocation5 + $0x130] sm:$0xff]  ;;  %v121_v60 = vld [vmem:[#allocation3 + $0x168] sm:$0xff] }
  0x59   :  { %v371_v61 = vld [vmem:[#allocation5 + $0x158] sm:$0xff]  ;;  %v5946_v63 = vpack.c.bf16 %v112_v55, %v108_v54  ;;  %v6074_v1 = vpack.c.bf16 %v366_v58, %v362_v56  ;;  %v5948_v2 = vpack.c.bf16 %v121_v60, %v117_v59  ;;  %v116_v3 = vld [vmem:[#allocation3 + $0x140] sm:$0xff]  ;;  %v370_v5 = vld [vmem:[#allocation5 + $0x150] sm:$0xff] }
  0x5a   :  { %v375_v62 = vld [vmem:[#allocation5 + $0x178] sm:$0xff]  ;;  %v120_v4 = vld [vmem:[#allocation3 + $0x160] sm:$0xff]  ;;  %v374_v7 = vld [vmem:[#allocation5 + $0x170] sm:$0xff] }
  0x5b   :  { %5943 = vmatpush1.bf16.msra.mxu0 %v5942_v51  ;;  %6071 = vmatpush1.bf16.msra.mxu1 %v6070_v52  ;;  %v6076_v6 = vpack.c.bf16 %v375_v62, %v371_v61  ;;  %v125_v8 = vld [vmem:[#allocation3 + $0x188] sm:$0xff]  ;;  %v379_v10 = vld [vmem:[#allocation5 + $0x198] sm:$0xff]  ;;  %v5950_v12 = vpack.c.bf16 %v120_v4, %v116_v3  ;;  %v6078_v13 = vpack.c.bf16 %v374_v7, %v370_v5  ;;  %v124_v15 = vld [vmem:[#allocation3 + $0x180] sm:$0xff] }
  0x5c   :  { %5945 = vmatprep.subr.bf16.mxu0 %v5944_v53  ;;  %6073 = vmatprep.subr.bf16.mxu1 %v6072_v57  ;;  %v129_v9 = vld [vmem:[#allocation3 + $0x1a8] sm:$0xff]  ;;  %v383_v11 = vld [vmem:[#allocation5 + $0x1b8] sm:$0xff]  ;;  %v128_v16 = vld [vmem:[#allocation3 + $0x1a0] sm:$0xff] }
  0x5d   :  { %v5952_v14 = vpack.c.bf16 %v129_v9, %v125_v8  ;;  %v378_v17 = vld [vmem:[#allocation5 + $0x190] sm:$0xff]  ;;  %v6080_v18 = vpack.c.bf16 %v383_v11, %v379_v10  ;;  %v133_v20 = vld [vmem:[#allocation3 + $0x1c8] sm:$0xff]  ;;  %v387_v22 = vld [vmem:[#allocation5 + $0x1d8] sm:$0xff]  ;;  %v5954_v24 = vpack.c.bf16 %v128_v16, %v124_v15 }
  0x5e   :  { %v382_v19 = vld [vmem:[#allocation5 + $0x1b0] sm:$0xff]  ;;  %v137_v21 = vld [vmem:[#allocation3 + $0x1e8] sm:$0xff]  ;;  %v391_v23 = vld [vmem:[#allocation5 + $0x1f8] sm:$0xff] }
  0x5f   :  { %5947 = vmatpush1.bf16.msra.mxu0 %v5946_v63  ;;  %6075 = vmatpush1.bf16.msra.mxu1 %v6074_v1  ;;  %v6082_v25 = vpack.c.bf16 %v382_v19, %v378_v17  ;;  %v5956_v26 = vpack.c.bf16 %v137_v21, %v133_v20  ;;  %v132_v27 = vld [vmem:[#allocation3 + $0x1c0] sm:$0xff]  ;;  %v386_v29 = vld [vmem:[#allocation5 + $0x1d0] sm:$0xff]  ;;  %v6084_v30 = vpack.c.bf16 %v391_v23, %v387_v22  ;;  %v79_v32 = vld [vmem:[#allocation3 + $0x18] sm:$0xff] }
  0x60   :  { %5949 = vmatprep.subr.bf16.mxu0 %v5948_v2  ;;  %6077 = vmatprep.subr.bf16.mxu1 %v6076_v6  ;;  %v136_v28 = vld [vmem:[#allocation3 + $0x1e0] sm:$0xff]  ;;  %v390_v31 = vld [vmem:[#allocation5 + $0x1f0] sm:$0xff]  ;;  %v83_v33 = vld [vmem:[#allocation3 + $0x38] sm:$0xff] }
  0x61   :  { %v395_v34 = vld [vmem:[#allocation5 + $0x218] sm:$0xff]  ;;  %v5958_v36 = vpack.c.bf16 %v136_v28, %v132_v27  ;;  %v6086_v37 = vpack.c.bf16 %v390_v31, %v386_v29  ;;  %v5960_v38 = vpack.c.bf16 %v83_v33, %v79_v32  ;;  %v78_v39 = vld [vmem:[#allocation3 + $0x10] sm:$0xff]  ;;  %v8572_v48 = vld [vmem:[%s8918_s0] sm:$0xff] }
  0x62   :  { %v399_v35 = vld [vmem:[#allocation5 + $0x238] sm:$0xff]  ;;  %v82_v40 = vld [vmem:[#allocation3 + $0x30] sm:$0xff]  ;;  %v8579_v21 = vld [vmem:[%s8918_s0] sm:$0x3f] }
  0x63   :  { %5951 = vmatpush1.bf16.msra.mxu0 %v5950_v12  ;;  %6079 = vmatpush1.bf16.msra.mxu1 %v6078_v13  ;;  %v394_v41 = vld [vmem:[#allocation5 + $0x210] sm:$0xff]  ;;  %v6088_v42 = vpack.c.bf16 %v399_v35, %v395_v34  ;;  %v87_v44 = vld [vmem:[#allocation3 + $0x58] sm:$0xff]  ;;  %v5962_v49 = vpack.c.bf16 %v82_v40, %v78_v39 }
  0x64   :  { %5953 = vmatprep.subr.bf16.mxu0 %v5952_v14  ;;  %6081 = vmatprep.subr.bf16.mxu1 %v6080_v18  ;;  %v398_v43 = vld [vmem:[#allocation5 + $0x230] sm:$0xff]  ;;  %v91_v45 = vld [vmem:[#allocation3 + $0x78] sm:$0xff] }
  0x65   :  { %v403_v46 = vld [vmem:[#allocation5 + $0x258] sm:$0xff]  ;;  %v6090_v50 = vpack.c.bf16 %v398_v43, %v394_v41  ;;  %v5964_v51 = vpack.c.bf16 %v91_v45, %v87_v44  ;;  %v86_v52 = vld [vmem:[#allocation3 + $0x50] sm:$0xff]  ;;  %591 = vmatprep.mubr.f32.mxu1 %v8579_v21 }
  0x66   :  { %v407_v47 = vld [vmem:[#allocation5 + $0x278] sm:$0xff]  ;;  %v90_v53 = vld [vmem:[#allocation3 + $0x70] sm:$0xff] }
  0x67   :  { %5955 = vmatpush1.bf16.msra.mxu0 %v5954_v24  ;;  %6083 = vmatpush1.bf16.msra.mxu1 %v6082_v25  ;;  %v402_v54 = vld [vmem:[#allocation5 + $0x250] sm:$0xff]  ;;  %v6092_v55 = vpack.c.bf16 %v407_v47, %v403_v46  ;;  %v95_v57 = vld [vmem:[#allocation3 + $0x98] sm:$0xff]  ;;  %v5966_v61 = vpack.c.bf16 %v90_v53, %v86_v52 }
  0x68   :  { %5957 = vmatprep.subr.bf16.mxu0 %v5956_v26  ;;  %6085 = vmatprep.subr.bf16.mxu1 %v6084_v30  ;;  %v406_v56 = vld [vmem:[#allocation5 + $0x270] sm:$0xff]  ;;  %v99_v58 = vld [vmem:[#allocation3 + $0xb8] sm:$0xff] }
  0x69   :  { %v411_v59 = vld [vmem:[#allocation5 + $0x298] sm:$0xff]  ;;  %v6094_v62 = vpack.c.bf16 %v406_v56, %v402_v54  ;;  %v5968_v63 = vpack.c.bf16 %v99_v58, %v95_v57  ;;  %v94_v1 = vld [vmem:[#allocation3 + $0x90] sm:$0xff] }
  0x6a   :  { %v415_v60 = vld [vmem:[#allocation5 + $0x2b8] sm:$0xff]  ;;  %v98_v2 = vld [vmem:[#allocation3 + $0xb0] sm:$0xff] }
  0x6b   :  { %5959 = vmatpush1.bf16.msra.mxu0 %v5958_v36  ;;  %6087 = vmatpush1.bf16.msra.mxu1 %v6086_v37  ;;  %v410_v3 = vld [vmem:[#allocation5 + $0x290] sm:$0xff]  ;;  %v6096_v4 = vpack.c.bf16 %v415_v60, %v411_v59  ;;  %v103_v6 = vld [vmem:[#allocation3 + $0xd8] sm:$0xff]  ;;  %v5970_v10 = vpack.c.bf16 %v98_v2, %v94_v1 }
  0x6c   :  { %5961 = vmatprep.subr.bf16.mxu0 %v5960_v38  ;;  %6089 = vmatprep.subr.bf16.mxu1 %v6088_v42  ;;  %v414_v5 = vld [vmem:[#allocation5 + $0x2b0] sm:$0xff]  ;;  %v107_v7 = vld [vmem:[#allocation3 + $0xf8] sm:$0xff] }
  0x6d   :  { %v419_v8 = vld [vmem:[#allocation5 + $0x2d8] sm:$0xff]  ;;  %v6098_v11 = vpack.c.bf16 %v414_v5, %v410_v3  ;;  %v102_v12 = vld [vmem:[#allocation3 + $0xd0] sm:$0xff]  ;;  %v333_v5 = vld [vmem:[#allocation5 + $0x28] sm:$0xff] }
  0x6e   :  { %205 = vmatmul.mubr.f32.vlgmr.msra.gmra.mrb[0].mxu0 %v8572_v48  ;;  %v423_v9 = vld [vmem:[#allocation5 + $0x2f8] sm:$0xff]  ;;  %v106_v13 = vld [vmem:[#allocation3 + $0xf0] sm:$0xff] }
  0x6f   :  { %5963 = vmatpush1.bf16.msra.mxu0 %v5962_v49  ;;  %275 = vmatprep.mubr.f32.mxu0 %v8438_v0  ;;  %v5972_v0 = vpack.c.bf16 %v107_v7, %v103_v6  ;;  %v418_v14 = vld [vmem:[#allocation5 + $0x2d0] sm:$0xff]  ;;  %v6100_v15 = vpack.c.bf16 %v423_v9, %v419_v8  ;;  %v111_v17 = vld [vmem:[#allocation3 + $0x118] sm:$0xff]  ;;  %v5974_v22 = vpack.c.bf16 %v106_v13, %v102_v12  ;;  %v328_v9 = vld [vmem:[#allocation5] sm:$0xff] }
  0x70   :  { %6091 = vmatpush1.bf16.msra.mxu1 %v6090_v50  ;;  %5965 = vmatprep.subr.bf16.mxu0 %v5964_v51  ;;  %v422_v16 = vld [vmem:[#allocation5 + $0x2f0] sm:$0xff]  ;;  %v115_v18 = vld [vmem:[#allocation3 + $0x138] sm:$0xff]  ;;  %v8585_v13 = vld [vmem:[%s8918_s0 + $0x2] sm:$0x3f] }
  0x71   :  { %6093 = vmatprep.subr.bf16.mxu1 %v6092_v55  ;;  %v427_v19 = vld [vmem:[#allocation5 + $0x318] sm:$0xff]  ;;  %v6102_v23 = vpack.c.bf16 %v422_v16, %v418_v14  ;;  %v5976_v24 = vpack.c.bf16 %v115_v18, %v111_v17  ;;  %v110_v25 = vld [vmem:[#allocation3 + $0x110] sm:$0xff]  ;;  %v340_v16 = vld [vmem:[#allocation5 + $0x60] sm:$0xff] }
  0x72   :  { %v431_v20 = vld [vmem:[#allocation5 + $0x338] sm:$0xff]  ;;  %v114_v26 = vld [vmem:[#allocation3 + $0x130] sm:$0xff]  ;;  %v345_v17 = vld [vmem:[#allocation5 + $0x88] sm:$0xff] }
  0x73   :  { %5967 = vmatpush1.bf16.msra.mxu0 %v5966_v61  ;;  %v426_v27 = vld [vmem:[#allocation5 + $0x310] sm:$0xff]  ;;  %v6104_v28 = vpack.c.bf16 %v431_v20, %v427_v19  ;;  %v119_v30 = vld [vmem:[#allocation3 + $0x158] sm:$0xff]  ;;  %v5978_v34 = vpack.c.bf16 %v114_v26, %v110_v25  ;;  %v349_v18 = vld [vmem:[#allocation5 + $0xa8] sm:$0xff] }
  0x74   :  { %6095 = vmatpush1.bf16.msra.mxu1 %v6094_v62  ;;  %5969 = vmatprep.subr.bf16.mxu0 %v5968_v63  ;;  %v430_v29 = vld [vmem:[#allocation5 + $0x330] sm:$0xff]  ;;  %v123_v31 = vld [vmem:[#allocation3 + $0x178] sm:$0xff]  ;;  %v6000_v20 = vpack.c.bf16 %v349_v18, %v345_v17  ;;  %v357_v25 = vld [vmem:[#allocation5 + $0xe8] sm:$0xff] }
  0x75   :  { %6097 = vmatprep.subr.bf16.mxu1 %v6096_v4  ;;  %v435_v32 = vld [vmem:[#allocation5 + $0x358] sm:$0xff]  ;;  %v6106_v35 = vpack.c.bf16 %v430_v29, %v426_v27  ;;  %v5980_v36 = vpack.c.bf16 %v123_v31, %v119_v30  ;;  %v118_v37 = vld [vmem:[#allocation3 + $0x150] sm:$0xff]  ;;  %v329_v4 = vld [vmem:[#allocation5 + $0x8] sm:$0xff] }
  0x76   :  { %v439_v33 = vld [vmem:[#allocation5 + $0x378] sm:$0xff]  ;;  %v122_v38 = vld [vmem:[#allocation3 + $0x170] sm:$0xff]  ;;  %v5992_v8 = vpack.c.bf16 %v333_v5, %v329_v4  ;;  %v356_v29 = vld [vmem:[#allocation5 + $0xe0] sm:$0xff] }
  0x77   :  { %5971 = vmatpush1.bf16.msra.mxu0 %v5970_v10  ;;  %v434_v39 = vld [vmem:[#allocation5 + $0x350] sm:$0xff]  ;;  %v6108_v40 = vpack.c.bf16 %v439_v33, %v435_v32  ;;  %v127_v42 = vld [vmem:[#allocation3 + $0x198] sm:$0xff]  ;;  %v5982_v46 = vpack.c.bf16 %v122_v38, %v118_v37  ;;  %v332_v10 = vld [vmem:[#allocation5 + $0x20] sm:$0xff] }
  0x78   :  { %6099 = vmatpush1.bf16.msra.mxu1 %v6098_v11  ;;  %5973 = vmatprep.subr.bf16.mxu0 %v5972_v0  ;;  %v438_v41 = vld [vmem:[#allocation5 + $0x370] sm:$0xff]  ;;  %v131_v43 = vld [vmem:[#allocation3 + $0x1b8] sm:$0xff]  ;;  %v337_v11 = vld [vmem:[#allocation5 + $0x48] sm:$0xff]  ;;  %v5994_v12 = vpack.c.bf16 %v332_v10, %v328_v9 }
  0x79   :  { %6101 = vmatprep.subr.bf16.mxu1 %v6100_v15  ;;  %v443_v44 = vld [vmem:[#allocation5 + $0x398] sm:$0xff]  ;;  %v6110_v47 = vpack.c.bf16 %v438_v41, %v434_v39  ;;  %v5984_v49 = vpack.c.bf16 %v131_v43, %v127_v42  ;;  %v126_v50 = vld [vmem:[#allocation3 + $0x190] sm:$0xff]  ;;  %v341_v0 = vld [vmem:[#allocation5 + $0x68] sm:$0xff] }
  0x7a   :  { %v447_v45 = vld [vmem:[#allocation5 + $0x3b8] sm:$0xff]  ;;  %v130_v51 = vld [vmem:[#allocation3 + $0x1b0] sm:$0xff]  ;;  %v5996_v14 = vpack.c.bf16 %v341_v0, %v337_v11  ;;  %v336_v15 = vld [vmem:[#allocation5 + $0x40] sm:$0xff] }
  0x7b   :  { %5975 = vmatpush1.bf16.msra.mxu0 %v5974_v22  ;;  %v442_v52 = vld [vmem:[#allocation5 + $0x390] sm:$0xff]  ;;  %v6112_v53 = vpack.c.bf16 %v447_v45, %v443_v44  ;;  %v135_v55 = vld [vmem:[#allocation3 + $0x1d8] sm:$0xff]  ;;  %v5986_v59 = vpack.c.bf16 %v130_v51, %v126_v50  ;;  %v5998_v19 = vpack.c.bf16 %v340_v16, %v336_v15  ;;  %v344_v22 = vld [vmem:[#allocation5 + $0x80] sm:$0xff] }
  0x7c   :  { %6103 = vmatpush1.bf16.msra.mxu1 %v6102_v23  ;;  %5977 = vmatprep.subr.bf16.mxu0 %v5976_v24  ;;  %v446_v54 = vld [vmem:[#allocation5 + $0x3b0] sm:$0xff]  ;;  %v139_v56 = vld [vmem:[#allocation3 + $0x1f8] sm:$0xff]  ;;  %v348_v23 = vld [vmem:[#allocation5 + $0xa0] sm:$0xff] }
  0x7d   :  { %6105 = vmatprep.subr.bf16.mxu1 %v6104_v28  ;;  %v451_v57 = vld [vmem:[#allocation5 + $0x3d8] sm:$0xff]  ;;  %v6114_v60 = vpack.c.bf16 %v446_v54, %v442_v52  ;;  %v5988_v61 = vpack.c.bf16 %v139_v56, %v135_v55  ;;  %v134_v62 = vld [vmem:[#allocation3 + $0x1d0] sm:$0xff]  ;;  %v353_v24 = vld [vmem:[#allocation5 + $0xc8] sm:$0xff]  ;;  %v6002_v26 = vpack.c.bf16 %v348_v23, %v344_v22 }
  0x7e   :  { %v455_v58 = vld [vmem:[#allocation5 + $0x3f8] sm:$0xff]  ;;  %v138_v63 = vld [vmem:[#allocation3 + $0x1f0] sm:$0xff]  ;;  %v6004_v27 = vpack.c.bf16 %v357_v25, %v353_v24  ;;  %v352_v28 = vld [vmem:[#allocation5 + $0xc0] sm:$0xff] }
  0x7f   :  { %5979 = vmatpush1.bf16.msra.mxu0 %v5978_v34  ;;  %v450_v1 = vld [vmem:[#allocation5 + $0x3d0] sm:$0xff]  ;;  %v6116_v2 = vpack.c.bf16 %v455_v58, %v451_v57  ;;  %v5990_v6 = vpack.c.bf16 %v138_v63, %v134_v62  ;;  %v361_v30 = vld [vmem:[#allocation5 + $0x108] sm:$0xff]  ;;  %v6006_v31 = vpack.c.bf16 %v356_v29, %v352_v28  ;;  %v360_v33 = vld [vmem:[#allocation5 + $0x100] sm:$0xff] }
  0x80   :  { %6107 = vmatpush1.bf16.msra.mxu1 %v6106_v35  ;;  %5981 = vmatprep.subr.bf16.mxu0 %v5980_v36  ;;  %v454_v3 = vld [vmem:[#allocation5 + $0x3f0] sm:$0xff]  ;;  %v364_v34 = vld [vmem:[#allocation5 + $0x120] sm:$0xff]  ;;  %v369_v35 = vld [vmem:[#allocation5 + $0x148] sm:$0xff] }
  0x81   :  { %6109 = vmatprep.subr.bf16.mxu1 %v6108_v40  ;;  %v6118_v7 = vpack.c.bf16 %v454_v3, %v450_v1  ;;  %v373_v36 = vld [vmem:[#allocation5 + $0x168] sm:$0xff]  ;;  %v368_v38 = vld [vmem:[#allocation5 + $0x140] sm:$0xff] }
  0x82   :  { %v6012_v37 = vpack.c.bf16 %v373_v36, %v369_v35  ;;  %v372_v39 = vld [vmem:[#allocation5 + $0x160] sm:$0xff]  ;;  %v377_v40 = vld [vmem:[#allocation5 + $0x188] sm:$0xff] }
  0x83   :  { %5983 = vmatpush1.bf16.msra.mxu0 %v5982_v46  ;;  %v381_v41 = vld [vmem:[#allocation5 + $0x1a8] sm:$0xff]  ;;  %v6014_v42 = vpack.c.bf16 %v372_v39, %v368_v38  ;;  %v376_v44 = vld [vmem:[#allocation5 + $0x180] sm:$0xff] }
  0x84   :  { %6111 = vmatpush1.bf16.msra.mxu1 %v6110_v47  ;;  %5985 = vmatprep.subr.bf16.mxu0 %v5984_v49  ;;  %v6016_v43 = vpack.c.bf16 %v381_v41, %v377_v40  ;;  %v380_v45 = vld [vmem:[#allocation5 + $0x1a0] sm:$0xff]  ;;  %v385_v46 = vld [vmem:[#allocation5 + $0x1c8] sm:$0xff]  ;;  %v649_v40 = vld [vmem:[#allocation7 + $0x18] sm:$0xff] }
  0x85   :  { %6113 = vmatprep.subr.bf16.mxu1 %v6112_v53  ;;  %v389_v47 = vld [vmem:[#allocation5 + $0x1e8] sm:$0xff]  ;;  %v6018_v49 = vpack.c.bf16 %v380_v45, %v376_v44  ;;  %v384_v51 = vld [vmem:[#allocation5 + $0x1c0] sm:$0xff]  ;;  %v657_v44 = vld [vmem:[#allocation7 + $0x58] sm:$0xff] }
  0x86   :  { %v6020_v50 = vpack.c.bf16 %v389_v47, %v385_v46  ;;  %v388_v52 = vld [vmem:[#allocation5 + $0x1e0] sm:$0xff]  ;;  %v393_v53 = vld [vmem:[#allocation5 + $0x208] sm:$0xff]  ;;  %v648_v47 = vld [vmem:[#allocation7 + $0x10] sm:$0xff] }
  0x87   :  { %5987 = vmatpush1.bf16.msra.mxu0 %v5986_v59  ;;  %v397_v54 = vld [vmem:[#allocation5 + $0x228] sm:$0xff]  ;;  %v6022_v55 = vpack.c.bf16 %v388_v52, %v384_v51  ;;  %v392_v57 = vld [vmem:[#allocation5 + $0x200] sm:$0xff]  ;;  %v680_v52 = vld [vmem:[#allocation7 + $0x110] sm:$0xff] }
  0x88   :  { %6115 = vmatpush1.bf16.msra.mxu1 %v6114_v60  ;;  %5989 = vmatprep.subr.bf16.mxu0 %v5988_v61  ;;  %v6024_v56 = vpack.c.bf16 %v397_v54, %v393_v53  ;;  %v396_v58 = vld [vmem:[#allocation5 + $0x220] sm:$0xff]  ;;  %v401_v59 = vld [vmem:[#allocation5 + $0x248] sm:$0xff] }
  0x89   :  { %6117 = vmatprep.subr.bf16.mxu1 %v6116_v2  ;;  %v405_v60 = vld [vmem:[#allocation5 + $0x268] sm:$0xff]  ;;  %v6026_v61 = vpack.c.bf16 %v396_v58, %v392_v57  ;;  %v400_v63 = vld [vmem:[#allocation5 + $0x240] sm:$0xff] }
  0x8a   :  { %v6028_v62 = vpack.c.bf16 %v405_v60, %v401_v59  ;;  %v404_v1 = vld [vmem:[#allocation5 + $0x260] sm:$0xff]  ;;  %v409_v2 = vld [vmem:[#allocation5 + $0x288] sm:$0xff]  ;;  %v681_v60 = vld [vmem:[#allocation7 + $0x118] sm:$0xff] }
  0x8b   :  { %5991 = vmatpush1.bf16.msra.mxu0 %v5990_v6  ;;  %v413_v3 = vld [vmem:[#allocation5 + $0x2a8] sm:$0xff]  ;;  %v6030_v4 = vpack.c.bf16 %v404_v1, %v400_v63  ;;  %v408_v6 = vld [vmem:[#allocation5 + $0x280] sm:$0xff] }
  0x8c   :  { %6119 = vmatpush1.bf16.msra.mxu1 %v6118_v7  ;;  %5993 = vmatprep.subr.bf16.mxu0 %v5992_v8  ;;  %v6032_v5 = vpack.c.bf16 %v413_v3, %v409_v2  ;;  %v412_v7 = vld [vmem:[#allocation5 + $0x2a0] sm:$0xff]  ;;  %v417_v8 = vld [vmem:[#allocation5 + $0x2c8] sm:$0xff]  ;;  %v693_v2 = vld [vmem:[#allocation7 + $0x178] sm:$0xff] }
  0x8d   :  { %v421_v9 = vld [vmem:[#allocation5 + $0x2e8] sm:$0xff]  ;;  %v6034_v10 = vpack.c.bf16 %v412_v7, %v408_v6  ;;  %v416_v0 = vld [vmem:[#allocation5 + $0x2c0] sm:$0xff]  ;;  %v704_v3 = vld [vmem:[#allocation7 + $0x1d0] sm:$0xff] }
  0x8e   :  { %276 = vmatmul.mubr.f32.vlgmr.msra.gmra.mrb[2].mxu0 %v8572_v48  ;;  %v365_v48 = vld [vmem:[#allocation5 + $0x128] sm:$0xff]  ;;  %v6036_v11 = vpack.c.bf16 %v421_v9, %v417_v8  ;;  %v424_v18 = vld [vmem:[#allocation5 + $0x300] sm:$0xff]  ;;  %v701_v6 = vld [vmem:[#allocation7 + $0x1b8] sm:$0xff] }
  0x8f   :  { %592 = vmatmul.mubr.f32.vlgmr.msra.gmra.mrb[0].mxu1 %v8585_v13  ;;  %5995 = vmatpush1.bf16.msra.mxu0 %v5994_v12  ;;  %v6008_v32 = vpack.c.bf16 %v365_v48, %v361_v30  ;;  %v420_v12 = vld [vmem:[#allocation5 + $0x2e0] sm:$0xff]  ;;  %v429_v15 = vld [vmem:[#allocation5 + $0x328] sm:$0xff]  ;;  %v692_v7 = vld [vmem:[#allocation7 + $0x170] sm:$0xff] }
  0x90   :  { %5997 = vmatprep.subr.bf16.mxu0 %v5996_v14  ;;  %520 = vmatprep.mubr.f32.mxu0 %v8579_v21  ;;  %v6010_v21 = vpack.c.bf16 %v364_v34, %v360_v33  ;;  %v425_v14 = vld [vmem:[#allocation5 + $0x308] sm:$0xff]  ;;  %v6038_v16 = vpack.c.bf16 %v420_v12, %v416_v0  ;;  %v432_v25 = vld [vmem:[#allocation5 + $0x340] sm:$0xff] }
  0x91   :  { %v6040_v17 = vpack.c.bf16 %v429_v15, %v425_v14  ;;  %v437_v22 = vld [vmem:[#allocation5 + $0x368] sm:$0xff]  ;;  %v440_v48 = vld [vmem:[#allocation5 + $0x380] sm:$0xff] }
  0x92   :  { %v445_v28 = vld [vmem:[#allocation5 + $0x3a8] sm:$0xff]  ;;  %v448_v36 = vld [vmem:[#allocation5 + $0x3c0] sm:$0xff] }
  0x93   :  { %5999 = vmatpush1.bf16.msra.mxu0 %v5998_v19  ;;  %v428_v19 = vld [vmem:[#allocation5 + $0x320] sm:$0xff]  ;;  %v453_v33 = vld [vmem:[#allocation5 + $0x3e8] sm:$0xff] }
  0x94   :  { %6001 = vmatprep.subr.bf16.mxu0 %v6000_v20  ;;  %v433_v20 = vld [vmem:[#allocation5 + $0x348] sm:$0xff]  ;;  %v6042_v23 = vpack.c.bf16 %v428_v19, %v424_v18  ;;  %v658_v39 = vld [vmem:[#allocation7 + $0x60] sm:$0xff] }
  0x95   :  { %v6044_v24 = vpack.c.bf16 %v437_v22, %v433_v20  ;;  %v647_v38 = vld [vmem:[#allocation7 + $0x8] sm:$0xff]  ;;  %v682_v54 = vld [vmem:[#allocation7 + $0x120] sm:$0xff]  ;;  %v725_v20 = vld [vmem:[#allocation7 + $0x278] sm:$0xff] }
  0x96   :  { %v6120_v41 = vpack.c.bf16 %v658_v39, %v647_v38  ;;  %v671_v53 = vld [vmem:[#allocation7 + $0xc8] sm:$0xff]  ;;  %v670_v58 = vld [vmem:[#allocation7 + $0xc0] sm:$0xff]  ;;  %v756_v39 = vld [vmem:[#allocation7 + $0x370] sm:$0xff] }
  0x97   :  { %6003 = vmatpush1.bf16.msra.mxu0 %v6002_v26  ;;  %v436_v26 = vld [vmem:[#allocation5 + $0x360] sm:$0xff]  ;;  %v679_v57 = vld [vmem:[#allocation7 + $0x108] sm:$0xff]  ;;  %v6254_v63 = vpack.c.bf16 %v681_v60, %v670_v58 }
  0x98   :  { %6005 = vmatprep.subr.bf16.mxu0 %v6004_v27  ;;  %v441_v27 = vld [vmem:[#allocation5 + $0x388] sm:$0xff]  ;;  %v6046_v29 = vpack.c.bf16 %v436_v26, %v432_v25  ;;  %v726_v15 = vld [vmem:[#allocation7 + $0x280] sm:$0xff]  ;;  %v748_v25 = vld [vmem:[#allocation7 + $0x330] sm:$0xff] }
  0x99   :  { %v6048_v30 = vpack.c.bf16 %v445_v28, %v441_v27  ;;  %v703_v8 = vld [vmem:[#allocation7 + $0x1c8] sm:$0xff]  ;;  %v714_v19 = vld [vmem:[#allocation7 + $0x220] sm:$0xff] }
  0x9a   :  { %v715_v0 = vld [vmem:[#allocation7 + $0x228] sm:$0xff]  ;;  %v6258_v12 = vpack.c.bf16 %v703_v8, %v692_v7  ;;  %v6262_v27 = vpack.c.bf16 %v725_v20, %v714_v19  ;;  %v825_v7 = vld [vmem:[#allocation7 + $0x598] sm:$0xff]  ;;  %v836_v8 = vld [vmem:[#allocation7 + $0x5f0] sm:$0xff] }
  0x9b   :  { %6007 = vmatpush1.bf16.msra.mxu0 %v6006_v31  ;;  %v444_v31 = vld [vmem:[#allocation5 + $0x3a0] sm:$0xff]  ;;  %v6260_v18 = vpack.c.bf16 %v726_v15, %v715_v0  ;;  %v735_v22 = vld [vmem:[#allocation7 + $0x2c8] sm:$0xff]  ;;  %v6280_v15 = vpack.c.bf16 %v836_v8, %v825_v7  ;;  %v932_v8 = vld [vmem:[#allocation7 + $0x8f0] sm:$0xff] }
  0x9c   :  { %6009 = vmatprep.subr.bf16.mxu0 %v6008_v32  ;;  %v449_v32 = vld [vmem:[#allocation5 + $0x3c8] sm:$0xff]  ;;  %v6050_v34 = vpack.c.bf16 %v444_v31, %v440_v48  ;;  %v736_v48 = vld [vmem:[#allocation7 + $0x2d0] sm:$0xff]  ;;  %v822_v0 = vld [vmem:[#allocation7 + $0x580] sm:$0xff] }
  0x9d   :  { %v6052_v35 = vpack.c.bf16 %v453_v33, %v449_v32  ;;  %v747_v32 = vld [vmem:[#allocation7 + $0x328] sm:$0xff]  ;;  %v757_v33 = vld [vmem:[#allocation7 + $0x378] sm:$0xff]  ;;  %v858_v20 = vld [vmem:[#allocation7 + $0x6a0] sm:$0xff] }
  0x9e   :  { %v803_v58 = vld [vmem:[#allocation7 + $0x4e8] sm:$0xff]  ;;  %v946_v7 = vld [vmem:[#allocation7 + $0x960] sm:$0xff] }
  0x9f   :  { %6011 = vmatpush1.bf16.msra.mxu0 %v6010_v21  ;;  %v452_v21 = vld [vmem:[#allocation5 + $0x3e0] sm:$0xff]  ;;  %v847_v19 = vld [vmem:[#allocation7 + $0x648] sm:$0xff] }
  0xa0   :  { %6013 = vmatprep.subr.bf16.mxu0 %v6012_v37  ;;  %v6054_v37 = vpack.c.bf16 %v452_v21, %v448_v36  ;;  %v770_v36 = vld [vmem:[#allocation7 + $0x3e0] sm:$0xff] }
  0xa3   :  { %6015 = vmatpush1.bf16.msra.mxu0 %v6014_v42  ;;  %v660_v42 = vld [vmem:[#allocation7 + $0x70] sm:$0xff] }
  0xa4   :  { %6017 = vmatprep.subr.bf16.mxu0 %v6016_v43  ;;  %v646_v43 = vld [vmem:[#allocation7] sm:$0xff]  ;;  %v6248_v45 = vpack.c.bf16 %v660_v42, %v649_v40  ;;  %v767_v40 = vld [vmem:[#allocation7 + $0x3c8] sm:$0xff] }
  0xa5   :  { %v6122_v46 = vpack.c.bf16 %v657_v44, %v646_v43  ;;  %v769_v43 = vld [vmem:[#allocation7 + $0x3d8] sm:$0xff]  ;;  %v779_v44 = vld [vmem:[#allocation7 + $0x428] sm:$0xff] }
  0xa6   :  { %6249 = vmatprep.subr.bf16.mxu1 %v6248_v45  ;;  %v790_v45 = vld [vmem:[#allocation7 + $0x480] sm:$0xff] }
  0xa7   :  { %6019 = vmatpush1.bf16.msra.mxu0 %v6018_v49  ;;  %v659_v49 = vld [vmem:[#allocation7 + $0x68] sm:$0xff] }
  0xa8   :  { %6021 = vmatprep.subr.bf16.mxu0 %v6020_v50  ;;  %v669_v50 = vld [vmem:[#allocation7 + $0xb8] sm:$0xff]  ;;  %v6250_v51 = vpack.c.bf16 %v659_v49, %v648_v47  ;;  %v792_v47 = vld [vmem:[#allocation7 + $0x490] sm:$0xff]  ;;  %v6142_v49 = vpack.c.bf16 %v767_v40, %v756_v39  ;;  %v879_v39 = vld [vmem:[#allocation7 + $0x748] sm:$0xff] }
  0xa9   :  { %v889_v40 = vld [vmem:[#allocation7 + $0x798] sm:$0xff] }
  0xaa   :  { %6251 = vmatpush1.bf16.msra.mxu1 %v6250_v51  ;;  %v6144_v51 = vpack.c.bf16 %v790_v45, %v779_v44 }
  0xab   :  { %6023 = vmatpush1.bf16.msra.mxu0 %v6022_v55  ;;  %v6252_v55 = vpack.c.bf16 %v682_v54, %v671_v53  ;;  %v789_v53 = vld [vmem:[#allocation7 + $0x478] sm:$0xff]  ;;  %v780_v54 = vld [vmem:[#allocation7 + $0x430] sm:$0xff] }
  0xac   :  { %6025 = vmatprep.subr.bf16.mxu0 %v6024_v56  ;;  %v668_v56 = vld [vmem:[#allocation7 + $0xb0] sm:$0xff] }
  0xad   :  { %v6126_v59 = vpack.c.bf16 %v679_v57, %v668_v56  ;;  %6253 = vmatprep.subr.bf16.mxu1 %v6252_v55  ;;  %v791_v55 = vld [vmem:[#allocation7 + $0x488] sm:$0xff]  ;;  %v801_v56 = vld [vmem:[#allocation7 + $0x4d8] sm:$0xff]  ;;  %v812_v57 = vld [vmem:[#allocation7 + $0x530] sm:$0xff] }
  0xae   :  { %6255 = vmatpush1.bf16.msra.mxu1 %v6254_v63  ;;  %v800_v63 = vld [vmem:[#allocation7 + $0x4d0] sm:$0xff] }
  0xaf   :  { %6027 = vmatpush1.bf16.msra.mxu0 %v6026_v61  ;;  %v691_v61 = vld [vmem:[#allocation7 + $0x168] sm:$0xff] }
  0xb0   :  { %6029 = vmatprep.subr.bf16.mxu0 %v6028_v62  ;;  %v702_v62 = vld [vmem:[#allocation7 + $0x1c0] sm:$0xff] }
  0xb1   :  { %v6128_v1 = vpack.c.bf16 %v702_v62, %v691_v61  ;;  %v6274_v61 = vpack.c.bf16 %v791_v55, %v780_v54  ;;  %v6148_v62 = vpack.c.bf16 %v812_v57, %v801_v56  ;;  %v922_v54 = vld [vmem:[#allocation7 + $0x8a0] sm:$0xff]  ;;  %v924_v55 = vld [vmem:[#allocation7 + $0x8b0] sm:$0xff] }
  0xb3   :  { %6031 = vmatpush1.bf16.msra.mxu0 %v6030_v4  ;;  %v690_v4 = vld [vmem:[#allocation7 + $0x160] sm:$0xff] }
  0xb4   :  { %6033 = vmatprep.subr.bf16.mxu0 %v6032_v5  ;;  %v6256_v5 = vpack.c.bf16 %v704_v3, %v693_v2  ;;  %v6130_v9 = vpack.c.bf16 %v701_v6, %v690_v4  ;;  %v802_v2 = vld [vmem:[#allocation7 + $0x4e0] sm:$0xff]  ;;  %v813_v4 = vld [vmem:[#allocation7 + $0x538] sm:$0xff] }
  0xb5   :  { %v834_v6 = vld [vmem:[#allocation7 + $0x5e0] sm:$0xff] }
  0xb6   :  { %6257 = vmatprep.subr.bf16.mxu1 %v6256_v5  ;;  %v823_v5 = vld [vmem:[#allocation7 + $0x588] sm:$0xff] }
  0xb7   :  { %6035 = vmatpush1.bf16.msra.mxu0 %v6034_v10  ;;  %v713_v10 = vld [vmem:[#allocation7 + $0x218] sm:$0xff]  ;;  %6259 = vmatpush1.bf16.msra.mxu1 %v6258_v12 }
  0xb8   :  { %6037 = vmatprep.subr.bf16.mxu0 %v6036_v11  ;;  %v724_v11 = vld [vmem:[#allocation7 + $0x270] sm:$0xff]  ;;  %6261 = vmatprep.subr.bf16.mxu1 %v6260_v18  ;;  %v833_v12 = vld [vmem:[#allocation7 + $0x5d8] sm:$0xff] }
  0xb9   :  { %v6132_v14 = vpack.c.bf16 %v724_v11, %v713_v10  ;;  %v6278_v10 = vpack.c.bf16 %v813_v4, %v802_v2  ;;  %v6152_v11 = vpack.c.bf16 %v834_v6, %v823_v5  ;;  %v856_v18 = vld [vmem:[#allocation7 + $0x690] sm:$0xff]  ;;  %v935_v5 = vld [vmem:[#allocation7 + $0x908] sm:$0xff] }
  0xba   :  { %v944_v4 = vld [vmem:[#allocation7 + $0x950] sm:$0xff] }
  0xbb   :  { %6039 = vmatpush1.bf16.msra.mxu0 %v6038_v16  ;;  %v712_v16 = vld [vmem:[#allocation7 + $0x210] sm:$0xff]  ;;  %6263 = vmatpush1.bf16.msra.mxu1 %v6262_v27  ;;  %v846_v27 = vld [vmem:[#allocation7 + $0x640] sm:$0xff] }
  0xbc   :  { %6041 = vmatprep.subr.bf16.mxu0 %v6040_v17  ;;  %v723_v17 = vld [vmem:[#allocation7 + $0x268] sm:$0xff] }
  0xbd   :  { %v6134_v26 = vpack.c.bf16 %v723_v17, %v712_v16  ;;  %v835_v16 = vld [vmem:[#allocation7 + $0x5e8] sm:$0xff]  ;;  %v845_v17 = vld [vmem:[#allocation7 + $0x638] sm:$0xff] }
  0xbf   :  { %6043 = vmatpush1.bf16.msra.mxu0 %v6042_v23  ;;  %v746_v23 = vld [vmem:[#allocation7 + $0x320] sm:$0xff] }
  0xc0   :  { %6045 = vmatprep.subr.bf16.mxu0 %v6044_v24  ;;  %v737_v24 = vld [vmem:[#allocation7 + $0x2d8] sm:$0xff]  ;;  %v6136_v28 = vpack.c.bf16 %v746_v23, %v735_v22  ;;  %v6154_v22 = vpack.c.bf16 %v833_v12, %v822_v0  ;;  %v934_v0 = vld [vmem:[#allocation7 + $0x900] sm:$0xff] }
  0xc1   :  { %v6264_v31 = vpack.c.bf16 %v748_v25, %v737_v24  ;;  %v6156_v24 = vpack.c.bf16 %v856_v18, %v845_v17  ;;  %v844_v25 = vld [vmem:[#allocation7 + $0x630] sm:$0xff]  ;;  %v945_v12 = vld [vmem:[#allocation7 + $0x958] sm:$0xff] }
  0xc2   :  { %v957_v17 = vld [vmem:[#allocation7 + $0x9b8] sm:$0xff] }
  0xc3   :  { %6047 = vmatpush1.bf16.msra.mxu0 %v6046_v29  ;;  %v734_v29 = vld [vmem:[#allocation7 + $0x2c0] sm:$0xff]  ;;  %6265 = vmatprep.subr.bf16.mxu1 %v6264_v31  ;;  %v869_v31 = vld [vmem:[#allocation7 + $0x6f8] sm:$0xff] }
  0xc4   :  { %6049 = vmatprep.subr.bf16.mxu0 %v6048_v30  ;;  %v745_v30 = vld [vmem:[#allocation7 + $0x318] sm:$0xff] }
  0xc5   :  { %v6138_v21 = vpack.c.bf16 %v745_v30, %v734_v29  ;;  %v857_v29 = vld [vmem:[#allocation7 + $0x698] sm:$0xff]  ;;  %v867_v30 = vld [vmem:[#allocation7 + $0x6e8] sm:$0xff] }
  0xc7   :  { %6051 = vmatpush1.bf16.msra.mxu0 %v6050_v34  ;;  %v768_v34 = vld [vmem:[#allocation7 + $0x3d0] sm:$0xff] }
  0xc8   :  { %6053 = vmatprep.subr.bf16.mxu0 %v6052_v35  ;;  %v759_v35 = vld [vmem:[#allocation7 + $0x388] sm:$0xff]  ;;  %v6140_v38 = vpack.c.bf16 %v768_v34, %v757_v33  ;;  %v6286_v34 = vpack.c.bf16 %v857_v29, %v846_v27  ;;  %v977_v27 = vld [vmem:[#allocation7 + $0xa58] sm:$0xff]  ;;  %v988_v29 = vld [vmem:[#allocation7 + $0xab0] sm:$0xff] }
  0xc9   :  { %v6268_v42 = vpack.c.bf16 %v770_v36, %v759_v35  ;;  %v866_v36 = vld [vmem:[#allocation7 + $0x6e0] sm:$0xff] }
  0xcb   :  { %6055 = vmatpush1.bf16.msra.mxu0 %v6054_v37  ;;  %v6266_v37 = vpack.c.bf16 %v747_v32, %v736_v48  ;;  %v878_v48 = vld [vmem:[#allocation7 + $0x740] sm:$0xff]  ;;  %v880_v32 = vld [vmem:[#allocation7 + $0x750] sm:$0xff] }
  0xcc   :  { %6121 = vmatprep.subr.bf16.mxu0 %v6120_v41  ;;  %v758_v41 = vld [vmem:[#allocation7 + $0x380] sm:$0xff]  ;;  %v6160_v35 = vpack.c.bf16 %v878_v48, %v867_v30  ;;  %v979_v30 = vld [vmem:[#allocation7 + $0xa68] sm:$0xff] }
  0xcd   :  { %6267 = vmatpush1.bf16.msra.mxu1 %v6266_v37  ;;  %v868_v37 = vld [vmem:[#allocation7 + $0x6f0] sm:$0xff]  ;;  %v990_v48 = vld [vmem:[#allocation7 + $0xac0] sm:$0xff] }
  0xce   :  { %521 = vmatmul.mubr.f32.vlgmr.msra.gmra.mrb[4].mxu0 %v8585_v13  ;;  %v6124_v13 = vpack.c.bf16 %v680_v52, %v669_v50  ;;  %v6270_v50 = vpack.c.bf16 %v769_v43, %v758_v41  ;;  %v778_v52 = vld [vmem:[#allocation7 + $0x420] sm:$0xff]  ;;  %6269 = vmatprep.subr.bf16.mxu1 %v6268_v42  ;;  %v900_v41 = vld [vmem:[#allocation7 + $0x7f0] sm:$0xff]  ;;  %v891_v42 = vld [vmem:[#allocation7 + $0x7a8] sm:$0xff]  ;;  %v6290_v45 = vpack.c.bf16 %v879_v39, %v868_v37 }
  0xcf   :  { %6123 = vmatpush1.bf16.msra.mxu0 %v6122_v46  ;;  %v781_v46 = vld [vmem:[#allocation7 + $0x438] sm:$0xff]  ;;  %v6146_v60 = vpack.c.bf16 %v789_v53, %v778_v52  ;;  %v902_v43 = vld [vmem:[#allocation7 + $0x800] sm:$0xff]  ;;  %v911_v53 = vld [vmem:[#allocation7 + $0x848] sm:$0xff] }
  0xd0   :  { %6125 = vmatprep.subr.bf16.mxu0 %v6124_v13  ;;  %v6272_v13 = vpack.c.bf16 %v792_v47, %v781_v46  ;;  %v6164_v46 = vpack.c.bf16 %v900_v41, %v889_v40  ;;  %v888_v47 = vld [vmem:[#allocation7 + $0x790] sm:$0xff]  ;;  %v901_v52 = vld [vmem:[#allocation7 + $0x7f8] sm:$0xff]  ;;  %v1010_v39 = vld [vmem:[#allocation7 + $0xb60] sm:$0xff] }
  0xd1   :  { %6271 = vmatpush1.bf16.msra.mxu1 %v6270_v50  ;;  %v890_v50 = vld [vmem:[#allocation7 + $0x7a0] sm:$0xff]  ;;  %v1001_v40 = vld [vmem:[#allocation7 + $0xb18] sm:$0xff] }
  0xd2   :  { %6273 = vmatprep.subr.bf16.mxu1 %v6272_v13  ;;  %v913_v13 = vld [vmem:[#allocation7 + $0x858] sm:$0xff]  ;;  %v6294_v57 = vpack.c.bf16 %v901_v52, %v890_v50 }
  0xd3   :  { %6127 = vmatpush1.bf16.msra.mxu0 %v6126_v59  ;;  %v814_v59 = vld [vmem:[#allocation7 + $0x540] sm:$0xff] }
  0xd4   :  { %6129 = vmatprep.subr.bf16.mxu0 %v6128_v1  ;;  %v811_v1 = vld [vmem:[#allocation7 + $0x528] sm:$0xff]  ;;  %v6276_v3 = vpack.c.bf16 %v814_v59, %v803_v58  ;;  %v6168_v58 = vpack.c.bf16 %v922_v54, %v911_v53  ;;  %v910_v59 = vld [vmem:[#allocation7 + $0x840] sm:$0xff] }
  0xd5   :  { %6275 = vmatpush1.bf16.msra.mxu1 %v6274_v61  ;;  %v6296_v61 = vpack.c.bf16 %v924_v55, %v913_v13 }
  0xd6   :  { %6277 = vmatprep.subr.bf16.mxu1 %v6276_v3  ;;  %v933_v3 = vld [vmem:[#allocation7 + $0x8f8] sm:$0xff] }
  0xd7   :  { %6131 = vmatpush1.bf16.msra.mxu0 %v6130_v9  ;;  %v6150_v9 = vpack.c.bf16 %v811_v1, %v800_v63  ;;  %v923_v63 = vld [vmem:[#allocation7 + $0x8a8] sm:$0xff]  ;;  %v6172_v6 = vpack.c.bf16 %v944_v4, %v933_v3 }
  0xd8   :  { %6133 = vmatprep.subr.bf16.mxu0 %v6132_v14  ;;  %v824_v14 = vld [vmem:[#allocation7 + $0x590] sm:$0xff] }
  0xd9   :  { %6279 = vmatpush1.bf16.msra.mxu1 %v6278_v10  ;;  %v6282_v23 = vpack.c.bf16 %v835_v16, %v824_v14  ;;  %v6300_v10 = vpack.c.bf16 %v946_v7, %v935_v5  ;;  %v6302_v14 = vpack.c.bf16 %v945_v12, %v934_v0  ;;  %v966_v16 = vld [vmem:[#allocation7 + $0xa00] sm:$0xff] }
  0xda   :  { %6281 = vmatprep.subr.bf16.mxu1 %v6280_v15  ;;  %v955_v15 = vld [vmem:[#allocation7 + $0x9a8] sm:$0xff]  ;;  %v998_v12 = vld [vmem:[#allocation7 + $0xb00] sm:$0xff] }
  0xdb   :  { %6135 = vmatpush1.bf16.msra.mxu0 %v6134_v26  ;;  %v855_v26 = vld [vmem:[#allocation7 + $0x688] sm:$0xff]  ;;  %v6176_v18 = vpack.c.bf16 %v966_v16, %v955_v15  ;;  %v1000_v15 = vld [vmem:[#allocation7 + $0xb10] sm:$0xff] }
  0xdc   :  { %6137 = vmatprep.subr.bf16.mxu0 %v6136_v28  ;;  %v6284_v28 = vpack.c.bf16 %v858_v20, %v847_v19  ;;  %v6158_v33 = vpack.c.bf16 %v855_v26, %v844_v25  ;;  %v968_v19 = vld [vmem:[#allocation7 + $0xa10] sm:$0xff]  ;;  %v954_v20 = vld [vmem:[#allocation7 + $0x9a0] sm:$0xff]  ;;  %v967_v26 = vld [vmem:[#allocation7 + $0xa08] sm:$0xff] }
  0xdd   :  { %6283 = vmatpush1.bf16.msra.mxu1 %v6282_v23  ;;  %v6304_v23 = vpack.c.bf16 %v968_v19, %v957_v17  ;;  %v956_v25 = vld [vmem:[#allocation7 + $0x9b0] sm:$0xff]  ;;  %v1011_v16 = vld [vmem:[#allocation7 + $0xb68] sm:$0xff]  ;;  %v1021_v17 = vld [vmem:[#allocation7 + $0xbb8] sm:$0xff] }
  0xde   :  { %6285 = vmatprep.subr.bf16.mxu1 %v6284_v28  ;;  %v6306_v28 = vpack.c.bf16 %v967_v26, %v956_v25  ;;  %v1023_v19 = vld [vmem:[#allocation7 + $0xbc8] sm:$0xff] }
  0xdf   :  { %6139 = vmatpush1.bf16.msra.mxu0 %v6138_v21  ;;  %v877_v21 = vld [vmem:[#allocation7 + $0x738] sm:$0xff]  ;;  %v1031_v25 = vld [vmem:[#allocation7 + $0xc08] sm:$0xff] }
  0xe0   :  { %6141 = vmatprep.subr.bf16.mxu0 %v6140_v38  ;;  %v6288_v38 = vpack.c.bf16 %v880_v32, %v869_v31  ;;  %v6162_v44 = vpack.c.bf16 %v877_v21, %v866_v36  ;;  %v6180_v31 = vpack.c.bf16 %v988_v29, %v977_v27  ;;  %v6308_v32 = vpack.c.bf16 %v990_v48, %v979_v30  ;;  %v989_v21 = vld [vmem:[#allocation7 + $0xab8] sm:$0xff]  ;;  %v1022_v27 = vld [vmem:[#allocation7 + $0xbc0] sm:$0xff] }
  0xe1   :  { %6287 = vmatpush1.bf16.msra.mxu1 %v6286_v34  ;;  %v987_v34 = vld [vmem:[#allocation7 + $0xaa8] sm:$0xff] }
  0xe2   :  { %6289 = vmatprep.subr.bf16.mxu1 %v6288_v38  ;;  %v999_v38 = vld [vmem:[#allocation7 + $0xb08] sm:$0xff] }
  0xe3   :  { %6143 = vmatpush1.bf16.msra.mxu0 %v6142_v49  ;;  %v899_v49 = vld [vmem:[#allocation7 + $0x7e8] sm:$0xff]  ;;  %v6184_v41 = vpack.c.bf16 %v1010_v39, %v999_v38  ;;  %v1053_v38 = vld [vmem:[#allocation7 + $0xcb8] sm:$0xff]  ;;  %v1044_v39 = vld [vmem:[#allocation7 + $0xc70] sm:$0xff] }
  0xe4   :  { %6145 = vmatprep.subr.bf16.mxu0 %v6144_v51  ;;  %v6292_v51 = vpack.c.bf16 %v902_v43, %v891_v42  ;;  %v6166_v56 = vpack.c.bf16 %v899_v49, %v888_v47  ;;  %v1012_v42 = vld [vmem:[#allocation7 + $0xb70] sm:$0xff] }
  0xe5   :  { %6291 = vmatpush1.bf16.msra.mxu1 %v6290_v45  ;;  %v6312_v43 = vpack.c.bf16 %v1012_v42, %v1001_v40  ;;  %v1055_v40 = vld [vmem:[#allocation7 + $0xcc8] sm:$0xff]  ;;  %v1076_v42 = vld [vmem:[#allocation7 + $0xd70] sm:$0xff] }
  0xe6   :  { %6293 = vmatprep.subr.bf16.mxu1 %v6292_v51 }
  0xe7   :  { %6147 = vmatpush1.bf16.msra.mxu0 %v6146_v60  ;;  %v921_v60 = vld [vmem:[#allocation7 + $0x898] sm:$0xff] }
  0xe8   :  { %6149 = vmatprep.subr.bf16.mxu0 %v6148_v62  ;;  %v912_v62 = vld [vmem:[#allocation7 + $0x850] sm:$0xff]  ;;  %v6170_v1 = vpack.c.bf16 %v921_v60, %v910_v59 }
  0xe9   :  { %6295 = vmatpush1.bf16.msra.mxu1 %v6294_v57  ;;  %v6298_v2 = vpack.c.bf16 %v923_v63, %v912_v62 }
  0xea   :  { %6297 = vmatprep.subr.bf16.mxu1 %v6296_v61 }
  0xeb   :  { %6151 = vmatpush1.bf16.msra.mxu0 %v6150_v9  ;;  %v943_v9 = vld [vmem:[#allocation7 + $0x948] sm:$0xff] }
  0xec   :  { %6153 = vmatprep.subr.bf16.mxu0 %v6152_v11  ;;  %v6174_v11 = vpack.c.bf16 %v943_v9, %v932_v8 }
  0xed   :  { %6299 = vmatpush1.bf16.msra.mxu1 %v6298_v2 }
  0xee   :  { %6301 = vmatprep.subr.bf16.mxu1 %v6300_v10 }
  0xef   :  { %6155 = vmatpush1.bf16.msra.mxu0 %v6154_v22  ;;  %v965_v22 = vld [vmem:[#allocation7 + $0x9f8] sm:$0xff] }
  0xf0   :  { %6157 = vmatprep.subr.bf16.mxu0 %v6156_v24  ;;  %v6178_v24 = vpack.c.bf16 %v965_v22, %v954_v20  ;;  %v1034_v20 = vld [vmem:[#allocation7 + $0xc20] sm:$0xff] }
  0xf1   :  { %6303 = vmatpush1.bf16.msra.mxu1 %v6302_v14  ;;  %v1009_v14 = vld [vmem:[#allocation7 + $0xb58] sm:$0xff]  ;;  %v6316_v48 = vpack.c.bf16 %v1034_v20, %v1023_v19  ;;  %v1142_v19 = vld [vmem:[#allocation7 + $0xf80] sm:$0xff] }
  0xf2   :  { %6305 = vmatprep.subr.bf16.mxu1 %v6304_v23  ;;  %v6186_v22 = vpack.c.bf16 %v1009_v14, %v998_v12  ;;  %v6314_v23 = vpack.c.bf16 %v1011_v16, %v1000_v15  ;;  %v1119_v12 = vld [vmem:[#allocation7 + $0xec8] sm:$0xff]  ;;  %v1110_v16 = vld [vmem:[#allocation7 + $0xe80] sm:$0xff]  ;;  %v1133_v20 = vld [vmem:[#allocation7 + $0xf38] sm:$0xff] }
  0xf3   :  { %6159 = vmatpush1.bf16.msra.mxu0 %v6158_v33  ;;  %v976_v33 = vld [vmem:[#allocation7 + $0xa50] sm:$0xff] }
  0xf4   :  { %6161 = vmatprep.subr.bf16.mxu0 %v6160_v35  ;;  %v978_v35 = vld [vmem:[#allocation7 + $0xa60] sm:$0xff]  ;;  %v6182_v36 = vpack.c.bf16 %v987_v34, %v976_v33  ;;  %v1045_v33 = vld [vmem:[#allocation7 + $0xc78] sm:$0xff]  ;;  %v1056_v34 = vld [vmem:[#allocation7 + $0xcd0] sm:$0xff] }
  0xf5   :  { %6307 = vmatpush1.bf16.msra.mxu1 %v6306_v28  ;;  %v6310_v37 = vpack.c.bf16 %v989_v21, %v978_v35  ;;  %v1033_v28 = vld [vmem:[#allocation7 + $0xc18] sm:$0xff]  ;;  %v1042_v35 = vld [vmem:[#allocation7 + $0xc60] sm:$0xff] }
  0xf6   :  { %6309 = vmatprep.subr.bf16.mxu1 %v6308_v32  ;;  %v1054_v32 = vld [vmem:[#allocation7 + $0xcc0] sm:$0xff] }
  0xf7   :  { %6163 = vmatpush1.bf16.msra.mxu0 %v6162_v44 }
  0xf8   :  { %6165 = vmatprep.subr.bf16.mxu0 %v6164_v46 }
  0xf9   :  { %6311 = vmatpush1.bf16.msra.mxu1 %v6310_v37  ;;  %v6318_v37 = vpack.c.bf16 %v1033_v28, %v1022_v27  ;;  %v1141_v27 = vld [vmem:[#allocation7 + $0xf78] sm:$0xff] }
  0xfa   :  { %6313 = vmatprep.subr.bf16.mxu1 %v6312_v43 }
  0xfb   :  { %6167 = vmatpush1.bf16.msra.mxu0 %v6166_v56 }
  0xfc   :  { %6169 = vmatprep.subr.bf16.mxu0 %v6168_v58 }
  0xff   :  { %6171 = vmatpush1.bf16.msra.mxu0 %v6170_v1 }
 0x100   :  { %6173 = vmatprep.subr.bf16.mxu0 %v6172_v6 }
 0x103   :  { %6175 = vmatpush1.bf16.msra.mxu0 %v6174_v11 }
 0x104   :  { %6177 = vmatprep.subr.bf16.mxu0 %v6176_v18  ;;  %v1032_v18 = vld [vmem:[#allocation7 + $0xc10] sm:$0xff] }
 0x105   :  { %v6188_v30 = vpack.c.bf16 %v1032_v18, %v1021_v17  ;;  %v1121_v17 = vld [vmem:[#allocation7 + $0xed8] sm:$0xff]  ;;  %v1131_v18 = vld [vmem:[#allocation7 + $0xf28] sm:$0xff] }
 0x106   :  { %v6208_v28 = vpack.c.bf16 %v1142_v19, %v1131_v18  ;;  %v1254_v18 = vld [vmem:[#allocation7 + $0x1300] sm:$0xff] }
 0x107   :  { %6179 = vmatpush1.bf16.msra.mxu0 %v6178_v24  ;;  %v1020_v24 = vld [vmem:[#allocation7 + $0xbb0] sm:$0xff] }
 0x108   :  { %6181 = vmatprep.subr.bf16.mxu0 %v6180_v31  ;;  %v1043_v31 = vld [vmem:[#allocation7 + $0xc68] sm:$0xff]  ;;  %v6190_v21 = vpack.c.bf16 %v1031_v25, %v1020_v24  ;;  %v6334_v24 = vpack.c.bf16 %v1121_v17, %v1110_v16  ;;  %v1130_v25 = vld [vmem:[#allocation7 + $0xf20] sm:$0xff]  ;;  %v1252_v16 = vld [vmem:[#allocation7 + $0x12f0] sm:$0xff] }
 0x109   :  { %v1243_v17 = vld [vmem:[#allocation7 + $0x12a8] sm:$0xff] }
 0x10b   :  { %6183 = vmatpush1.bf16.msra.mxu0 %v6182_v36 }
 0x10c   :  { %6185 = vmatprep.subr.bf16.mxu0 %v6184_v41  ;;  %v1065_v41 = vld [vmem:[#allocation7 + $0xd18] sm:$0xff] }
 0x141   :  { %v206_v44 = vpop.f32.mrb[0].mxu0 }
 0x142   :  { %282 = vst [vmem:[#allocation2] sm:$0x3] %v206_v44  ;;  %v290_v45 = vrot.slane %v206_v44, 6  ;;  %v302_v46 = vrot.slane %v206_v44, 4  ;;  %v314_v47 = vrot.slane %v206_v44, 2  ;;  %v208_v49 = vpop.f32.mrb[1].mxu0  ;;  %v6192_v44 = vpack.c.bf16 %v1054_v32, %v1043_v31 }
 0x143   :  { %283 = vst [vmem:[#allocation2 + $0x8] sm:$0x3] %v208_v49  ;;  %v291_v50 = vrot.slane %v208_v49, 6  ;;  %v303_v51 = vrot.slane %v208_v49, 4  ;;  %v315_v52 = vrot.slane %v208_v49, 2  ;;  %v1153_v31 = vld [vmem:[#allocation7 + $0xfd8] sm:$0xff] }
 0x144   :  { %298 = vst [vmem:[#allocation2] sm:$0x30] %v290_v45  ;;  %310 = vst [vmem:[#allocation2 + $0x20] sm:$0x3] %v302_v46  ;;  %v6320_v45 = vpack.c.bf16 %v1056_v34, %v1045_v33  ;;  %v1067_v46 = vld [vmem:[#allocation7 + $0xd28] sm:$0xff]  ;;  %v1164_v32 = vld [vmem:[#allocation7 + $0x1030] sm:$0xff] }
 0x145   :  { %322 = vst [vmem:[#allocation2 + $0x20] sm:$0x30] %v314_v47  ;;  %299 = vst [vmem:[#allocation2 + $0x8] sm:$0x30] %v291_v50  ;;  %v1078_v47 = vld [vmem:[#allocation7 + $0xd80] sm:$0xff]  ;;  %v6194_v50 = vpack.c.bf16 %v1053_v38, %v1042_v35  ;;  %v1155_v33 = vld [vmem:[#allocation7 + $0xfe8] sm:$0xff]  ;;  %v6210_v35 = vpack.c.bf16 %v1141_v27, %v1130_v25  ;;  %v6212_v38 = vpack.c.bf16 %v1164_v32, %v1153_v31 }
 0x146   :  { %311 = vst [vmem:[#allocation2 + $0x28] sm:$0x3] %v303_v51  ;;  %323 = vst [vmem:[#allocation2 + $0x28] sm:$0x30] %v315_v52  ;;  %v6322_v51 = vpack.c.bf16 %v1055_v40, %v1044_v39  ;;  %v1064_v52 = vld [vmem:[#allocation7 + $0xd10] sm:$0xff]  ;;  %v1166_v34 = vld [vmem:[#allocation7 + $0x1040] sm:$0xff]  ;;  %v6356_v25 = vpack.c.bf16 %v1254_v18, %v1243_v17 }
 0x147   :  { %v6340_v39 = vpack.c.bf16 %v1166_v34, %v1155_v33  ;;  %v1154_v40 = vld [vmem:[#allocation7 + $0xfe0] sm:$0xff]  ;;  %v1276_v31 = vld [vmem:[#allocation7 + $0x13b0] sm:$0xff] }
 0x148   :  { %v1242_v27 = vld [vmem:[#allocation7 + $0x12a0] sm:$0xff] }
 0x149   :  { %v1262_v34 = vld [vmem:[#allocation7 + $0x1340] sm:$0xff] }
 0x161   :  { %v277_v53 = vpop.f32.mrb[2].mxu0 }
 0x162   :  { %284 = vst [vmem:[#allocation2 + $0x10] sm:$0x3] %v277_v53  ;;  %v292_v54 = vrot.slane %v277_v53, 6  ;;  %v304_v13 = vrot.slane %v277_v53, 4  ;;  %v316_v55 = vrot.slane %v277_v53, 2  ;;  %v593_v56 = vpop.f32.mrb[0].mxu1 }
 0x163   :  { %v279_v57 = vpop.f32.mrb[3].mxu0  ;;  %v604_v58 = vrot.slane %v593_v56, 6  ;;  %v616_v59 = vrot.slane %v593_v56, 4  ;;  %v628_v60 = vrot.slane %v593_v56, 2  ;;  %v595_v62 = vpop.f32.mrb[1].mxu1  ;;  %v1075_v53 = vld [vmem:[#allocation7 + $0xd68] sm:$0xff] }
 0x164   :  { %285 = vst [vmem:[#allocation2 + $0x18] sm:$0x3] %v279_v57  ;;  %v293_v61 = vrot.slane %v279_v57, 6  ;;  %300 = vst [vmem:[#allocation2 + $0x10] sm:$0x30] %v292_v54  ;;  %v305_v63 = vrot.slane %v279_v57, 4  ;;  %v6196_v54 = vpack.c.bf16 %v1076_v42, %v1065_v41 }
 0x165   :  { %312 = vst [vmem:[#allocation2 + $0x30] sm:$0x3] %v304_v13  ;;  %324 = vst [vmem:[#allocation2 + $0x30] sm:$0x30] %v316_v55  ;;  %v317_v1 = vrot.slane %v279_v57, 2  ;;  %v605_v2 = vrot.slane %v595_v62, 6  ;;  %v6324_v13 = vpack.c.bf16 %v1078_v47, %v1067_v46 }
 0x166   :  { %v617_v3 = vrot.slane %v595_v62, 4  ;;  %612 = vst [vmem:[#allocation2 + $0x10] sm:$0xc] %v604_v58  ;;  %624 = vst [vmem:[#allocation2 + $0x10] sm:$0xc0] %v616_v59  ;;  %v629_v4 = vrot.slane %v595_v62, 2 }
 0x167   :  { %636 = vst [vmem:[#allocation2 + $0x30] sm:$0xc] %v628_v60  ;;  %301 = vst [vmem:[#allocation2 + $0x18] sm:$0x30] %v293_v61  ;;  %v1066_v55 = vld [vmem:[#allocation7 + $0xd20] sm:$0xff]  ;;  %v1077_v56 = vld [vmem:[#allocation7 + $0xd78] sm:$0xff]  ;;  %v6198_v61 = vpack.c.bf16 %v1075_v53, %v1064_v52 }
 0x168   :  { %313 = vst [vmem:[#allocation2 + $0x38] sm:$0x3] %v305_v63  ;;  %325 = vst [vmem:[#allocation2 + $0x38] sm:$0x30] %v317_v1  ;;  %v1087_v57 = vld [vmem:[#allocation7 + $0xdc8] sm:$0xff]  ;;  %v1098_v58 = vld [vmem:[#allocation7 + $0xe20] sm:$0xff]  ;;  %v6326_v62 = vpack.c.bf16 %v1077_v56, %v1066_v55 }
 0x169   :  { %613 = vst [vmem:[#allocation2 + $0x18] sm:$0xc] %v605_v2  ;;  %625 = vst [vmem:[#allocation2 + $0x18] sm:$0xc0] %v617_v3  ;;  %v1089_v59 = vld [vmem:[#allocation7 + $0xdd8] sm:$0xff]  ;;  %v1100_v60 = vld [vmem:[#allocation7 + $0xe30] sm:$0xff]  ;;  %v6200_v2 = vpack.c.bf16 %v1098_v58, %v1087_v57 }
 0x16a   :  { %637 = vst [vmem:[#allocation2 + $0x38] sm:$0xc] %v629_v4  ;;  %v1086_v63 = vld [vmem:[#allocation7 + $0xdc0] sm:$0xff]  ;;  %v1097_v1 = vld [vmem:[#allocation7 + $0xe18] sm:$0xff]  ;;  %v6328_v3 = vpack.c.bf16 %v1100_v60, %v1089_v59  ;;  %v1088_v4 = vld [vmem:[#allocation7 + $0xdd0] sm:$0xff] }
 0x16b   :  { %v1165_v41 = vld [vmem:[#allocation7 + $0x1038] sm:$0xff]  ;;  %v1175_v42 = vld [vmem:[#allocation7 + $0x1088] sm:$0xff]  ;;  %v1176_v53 = vld [vmem:[#allocation7 + $0x1090] sm:$0xff] }
 0x16c   :  { %v6342_v47 = vpack.c.bf16 %v1165_v41, %v1154_v40  ;;  %v1208_v55 = vld [vmem:[#allocation7 + $0x1190] sm:$0xff]  ;;  %v1199_v56 = vld [vmem:[#allocation7 + $0x1148] sm:$0xff]  ;;  %v1210_v57 = vld [vmem:[#allocation7 + $0x11a0] sm:$0xff] }
 0x16d   :  { %v1196_v60 = vld [vmem:[#allocation7 + $0x1130] sm:$0xff]  ;;  %v1287_v41 = vld [vmem:[#allocation7 + $0x1408] sm:$0xff] }
 0x16e   :  { %v1296_v40 = vld [vmem:[#allocation7 + $0x1450] sm:$0xff] }
 0x170   :  { %v641_v49 = vld [vmem:[#allocation2 + $0x18] sm:$0xff] }
 0x1a1   :  { %v522_v5 = vpop.f32.mrb[4].mxu0 }
 0x1a2   :  { %v602_v6 = vrot.slane %v522_v5, 6  ;;  %v614_v7 = vrot.slane %v522_v5, 4  ;;  %v626_v8 = vrot.slane %v522_v5, 2  ;;  %v524_v9 = vpop.f32.mrb[5].mxu0  ;;  %v1099_v5 = vld [vmem:[#allocation7 + $0xe28] sm:$0xff] }
 0x1a3   :  { %v603_v10 = vrot.slane %v524_v9, 6  ;;  %v615_v11 = vrot.slane %v524_v9, 4  ;;  %v627_v0 = vrot.slane %v524_v9, 2  ;;  %v1122_v9 = vld [vmem:[#allocation7 + $0xee0] sm:$0xff] }
 0x1a4   :  { %610 = vst [vmem:[#allocation2] sm:$0xc] %v602_v6  ;;  %622 = vst [vmem:[#allocation2] sm:$0xc0] %v614_v7  ;;  %v1109_v6 = vld [vmem:[#allocation7 + $0xe78] sm:$0xff]  ;;  %v1120_v7 = vld [vmem:[#allocation7 + $0xed0] sm:$0xff] }
 0x1a5   :  { %634 = vst [vmem:[#allocation2 + $0x20] sm:$0xc] %v626_v8  ;;  %611 = vst [vmem:[#allocation2 + $0x8] sm:$0xc] %v603_v10  ;;  %v1111_v8 = vld [vmem:[#allocation7 + $0xe88] sm:$0xff]  ;;  %v6202_v10 = vpack.c.bf16 %v1097_v1, %v1086_v63  ;;  %v6204_v14 = vpack.c.bf16 %v1120_v7, %v1109_v6  ;;  %v6348_v63 = vpack.c.bf16 %v1210_v57, %v1199_v56  ;;  %v1198_v1 = vld [vmem:[#allocation7 + $0x1140] sm:$0xff] }
 0x1a6   :  { %623 = vst [vmem:[#allocation2 + $0x8] sm:$0xc0] %v615_v11  ;;  %635 = vst [vmem:[#allocation2 + $0x28] sm:$0xc] %v627_v0  ;;  %v6330_v11 = vpack.c.bf16 %v1099_v5, %v1088_v4  ;;  %v1108_v0 = vld [vmem:[#allocation7 + $0xe70] sm:$0xff]  ;;  %v6332_v15 = vpack.c.bf16 %v1122_v9, %v1111_v8  ;;  %v1230_v4 = vld [vmem:[#allocation7 + $0x1240] sm:$0xff] }
 0x1a7   :  { %v1221_v5 = vld [vmem:[#allocation7 + $0x11f8] sm:$0xff]  ;;  %v1232_v6 = vld [vmem:[#allocation7 + $0x1250] sm:$0xff]  ;;  %v1218_v9 = vld [vmem:[#allocation7 + $0x11e0] sm:$0xff] }
 0x1a8   :  { %v1306_v57 = vld [vmem:[#allocation7 + $0x14a0] sm:$0xff] }
 0x1ab   :  { %v638_v29 = vld [vmem:[#allocation2] sm:$0xff] }
 0x1ac   :  { %v642_v43 = vld [vmem:[#allocation2 + $0x20] sm:$0x3f] }
 0x1ad   :  { %v8591_v26 = vld [vmem:[#allocation2 + $0x8] sm:$0xff] }
 0x1ae   :  { %1414 = vmatprep.mubr.f32.mxu0 %v8591_v26  ;;  %1568 = vmatprep.mubr.f32.mxu1 %v8591_v26  ;;  %v643_v36 = vld [vmem:[#allocation2 + $0x28] sm:$0x3f] }
 0x1af   :  { %1415 = vmatmul.mubr.f32.vlgmr.msra.gmra.mrb[6].mxu0 %v638_v29  ;;  %1569 = vmatmul.mubr.f32.vlgmr.msra.gmra.mrb[2].mxu1 %v638_v29 }
 0x1b0   :  { %6187 = vmatpush1.bf16.msra.mxu0 %v6186_v22  ;;  %6315 = vmatpush1.bf16.msra.mxu1 %v6314_v23  ;;  %v1144_v22 = vld [vmem:[#allocation7 + $0xf90] sm:$0xff]  ;;  %v6206_v23 = vpack.c.bf16 %v1119_v12, %v1108_v0  ;;  %v6352_v0 = vpack.c.bf16 %v1232_v6, %v1221_v5 }
 0x1b1   :  { %1420 = vmatprep.mubr.f32.mxu0 %v643_v36  ;;  %1574 = vmatprep.mubr.f32.mxu1 %v643_v36  ;;  %v6336_v29 = vpack.c.bf16 %v1144_v22, %v1133_v20  ;;  %v1220_v12 = vld [vmem:[#allocation7 + $0x11f0] sm:$0xff] }
 0x1b2   :  { %6189 = vmatprep.subr.bf16.mxu0 %v6188_v30  ;;  %6317 = vmatprep.subr.bf16.mxu1 %v6316_v48  ;;  %v1132_v30 = vld [vmem:[#allocation7 + $0xf30] sm:$0xff]  ;;  %v1143_v48 = vld [vmem:[#allocation7 + $0xf88] sm:$0xff] }
 0x1b3   :  { %1421 = vmatmul.mubr.f32.gmra.mrb[8].mxu0 %v642_v43  ;;  %1575 = vmatmul.mubr.f32.gmra.mrb[4].mxu1 %v642_v43  ;;  %v6338_v36 = vpack.c.bf16 %v1143_v48, %v1132_v30  ;;  %v1186_v43 = vld [vmem:[#allocation7 + $0x10e0] sm:$0xff]  ;;  %v1240_v22 = vld [vmem:[#allocation7 + $0x1290] sm:$0xff]  ;;  %v1265_v48 = vld [vmem:[#allocation7 + $0x1358] sm:$0xff] }
 0x1b4   :  { %6191 = vmatpush1.bf16.msra.mxu0 %v6190_v21  ;;  %6319 = vmatpush1.bf16.msra.mxu1 %v6318_v37  ;;  %v1152_v21 = vld [vmem:[#allocation7 + $0xfd0] sm:$0xff]  ;;  %v1163_v37 = vld [vmem:[#allocation7 + $0x1028] sm:$0xff]  ;;  %v1274_v30 = vld [vmem:[#allocation7 + $0x13a0] sm:$0xff] }
 0x1b5   :  { %1491 = vmatprep.mubr.f32.mxu0 %v641_v49  ;;  %1645 = vmatprep.mubr.f32.mxu1 %v641_v49  ;;  %v6214_v46 = vpack.c.bf16 %v1163_v37, %v1152_v21  ;;  %v1174_v49 = vld [vmem:[#allocation7 + $0x1080] sm:$0xff]  ;;  %v6360_v21 = vpack.c.bf16 %v1276_v31, %v1265_v48  ;;  %v1264_v37 = vld [vmem:[#allocation7 + $0x1350] sm:$0xff]  ;;  %v645_v48 = vld [vmem:[#allocation2 + $0x38] sm:$0x3f] }
 0x1b6   :  { %6193 = vmatprep.subr.bf16.mxu0 %v6192_v44  ;;  %6321 = vmatprep.subr.bf16.mxu1 %v6320_v45  ;;  %v1177_v44 = vld [vmem:[#allocation7 + $0x1098] sm:$0xff]  ;;  %v1188_v45 = vld [vmem:[#allocation7 + $0x10f0] sm:$0xff] }
 0x1b7   :  { %v6344_v52 = vpack.c.bf16 %v1188_v45, %v1177_v44  ;;  %v1284_v45 = vld [vmem:[#allocation7 + $0x13f0] sm:$0xff] }
 0x1b8   :  { %6195 = vmatpush1.bf16.msra.mxu0 %v6194_v50  ;;  %6323 = vmatpush1.bf16.msra.mxu1 %v6322_v51  ;;  %v1185_v50 = vld [vmem:[#allocation7 + $0x10d8] sm:$0xff]  ;;  %v6216_v51 = vpack.c.bf16 %v1186_v43, %v1175_v42  ;;  %v1298_v42 = vld [vmem:[#allocation7 + $0x1460] sm:$0xff]  ;;  %v1328_v6 = vld [vmem:[#allocation7 + $0x1550] sm:$0xff] }
 0x1b9   :  { %6197 = vmatprep.subr.bf16.mxu0 %v6196_v54  ;;  %6325 = vmatprep.subr.bf16.mxu1 %v6324_v13  ;;  %v1187_v54 = vld [vmem:[#allocation7 + $0x10e8] sm:$0xff]  ;;  %v1197_v13 = vld [vmem:[#allocation7 + $0x1138] sm:$0xff]  ;;  %v6218_v58 = vpack.c.bf16 %v1185_v50, %v1174_v49  ;;  %v6364_v49 = vpack.c.bf16 %v1298_v42, %v1287_v41  ;;  %v1286_v50 = vld [vmem:[#allocation7 + $0x1400] sm:$0xff] }
 0x1ba   :  { %v6346_v59 = vpack.c.bf16 %v1187_v54, %v1176_v53  ;;  %v1318_v53 = vld [vmem:[#allocation7 + $0x1500] sm:$0xff]  ;;  %v1309_v54 = vld [vmem:[#allocation7 + $0x14b8] sm:$0xff]  ;;  %v708_v41 = vld [vmem:[#allocation7 + $0x1f0] sm:$0xff] }
 0x1bb   :  { %v644_v42 = vld [vmem:[#allocation2 + $0x30] sm:$0x3f] }
 0x1bc   :  { %6199 = vmatpush1.bf16.msra.mxu0 %v6198_v61  ;;  %6327 = vmatpush1.bf16.msra.mxu1 %v6326_v62  ;;  %v1207_v61 = vld [vmem:[#allocation7 + $0x1188] sm:$0xff]  ;;  %v6220_v62 = vpack.c.bf16 %v1208_v55, %v1197_v13  ;;  %v1320_v13 = vld [vmem:[#allocation7 + $0x1510] sm:$0xff] }
 0x1bd   :  { %6201 = vmatprep.subr.bf16.mxu0 %v6200_v2  ;;  %6329 = vmatprep.subr.bf16.mxu1 %v6328_v3  ;;  %v1209_v2 = vld [vmem:[#allocation7 + $0x1198] sm:$0xff]  ;;  %v1219_v3 = vld [vmem:[#allocation7 + $0x11e8] sm:$0xff]  ;;  %v6222_v7 = vpack.c.bf16 %v1207_v61, %v1196_v60  ;;  %v6368_v60 = vpack.c.bf16 %v1320_v13, %v1309_v54  ;;  %v1308_v61 = vld [vmem:[#allocation7 + $0x14b0] sm:$0xff] }
 0x1be   :  { %v6350_v8 = vpack.c.bf16 %v1209_v2, %v1198_v1  ;;  %v1340_v1 = vld [vmem:[#allocation7 + $0x15b0] sm:$0xff]  ;;  %v1331_v2 = vld [vmem:[#allocation7 + $0x1568] sm:$0xff]  ;;  %v730_v13 = vld [vmem:[#allocation7 + $0x2a0] sm:$0xff] }
 0x1bf   :  { %v719_v54 = vld [vmem:[#allocation7 + $0x248] sm:$0xff] }
 0x1c0   :  { %6203 = vmatpush1.bf16.msra.mxu0 %v6202_v10  ;;  %6331 = vmatpush1.bf16.msra.mxu1 %v6330_v11  ;;  %v1229_v10 = vld [vmem:[#allocation7 + $0x1238] sm:$0xff]  ;;  %v6224_v11 = vpack.c.bf16 %v1230_v4, %v1219_v3  ;;  %v1342_v3 = vld [vmem:[#allocation7 + $0x15c0] sm:$0xff] }
 0x1c1   :  { %6205 = vmatprep.subr.bf16.mxu0 %v6204_v14  ;;  %6333 = vmatprep.subr.bf16.mxu1 %v6332_v15  ;;  %v1231_v14 = vld [vmem:[#allocation7 + $0x1248] sm:$0xff]  ;;  %v1241_v15 = vld [vmem:[#allocation7 + $0x1298] sm:$0xff]  ;;  %v6226_v19 = vpack.c.bf16 %v1229_v10, %v1218_v9  ;;  %v6372_v9 = vpack.c.bf16 %v1342_v3, %v1331_v2  ;;  %v1330_v10 = vld [vmem:[#allocation7 + $0x1560] sm:$0xff] }
 0x1c2   :  { %v6354_v20 = vpack.c.bf16 %v1231_v14, %v1220_v12  ;;  %v662_v12 = vld [vmem:[#allocation7 + $0x80] sm:$0xff]  ;;  %v653_v14 = vld [vmem:[#allocation7 + $0x38] sm:$0xff]  ;;  %v752_v3 = vld [vmem:[#allocation7 + $0x350] sm:$0xff] }
 0x1c3   :  { %v741_v2 = vld [vmem:[#allocation7 + $0x2f8] sm:$0xff] }
 0x1c4   :  { %6207 = vmatpush1.bf16.msra.mxu0 %v6206_v23  ;;  %6335 = vmatpush1.bf16.msra.mxu1 %v6334_v24  ;;  %v1251_v23 = vld [vmem:[#allocation7 + $0x12e8] sm:$0xff]  ;;  %v6228_v24 = vpack.c.bf16 %v1252_v16, %v1241_v15  ;;  %v664_v15 = vld [vmem:[#allocation7 + $0x90] sm:$0xff] }
 0x1c5   :  { %6209 = vmatprep.subr.bf16.mxu0 %v6208_v28  ;;  %6337 = vmatprep.subr.bf16.mxu1 %v6336_v29  ;;  %v1253_v28 = vld [vmem:[#allocation7 + $0x12f8] sm:$0xff]  ;;  %v1263_v29 = vld [vmem:[#allocation7 + $0x1348] sm:$0xff]  ;;  %v6230_v32 = vpack.c.bf16 %v1251_v23, %v1240_v22  ;;  %v652_v23 = vld [vmem:[#allocation7 + $0x30] sm:$0xff] }
 0x1c6   :  { %v6358_v33 = vpack.c.bf16 %v1253_v28, %v1242_v27  ;;  %v661_v22 = vld [vmem:[#allocation7 + $0x78] sm:$0xff]  ;;  %v684_v27 = vld [vmem:[#allocation7 + $0x130] sm:$0xff]  ;;  %v675_v28 = vld [vmem:[#allocation7 + $0xe8] sm:$0xff] }
 0x1c8   :  { %6211 = vmatpush1.bf16.msra.mxu0 %v6210_v35  ;;  %6339 = vmatpush1.bf16.msra.mxu1 %v6338_v36  ;;  %v1273_v35 = vld [vmem:[#allocation7 + $0x1398] sm:$0xff]  ;;  %v6232_v36 = vpack.c.bf16 %v1274_v30, %v1263_v29  ;;  %v686_v29 = vld [vmem:[#allocation7 + $0x140] sm:$0xff]  ;;  %v640_v30 = vld [vmem:[#allocation2 + $0x10] sm:$0xff] }
 0x1c9   :  { %6213 = vmatprep.subr.bf16.mxu0 %v6212_v38  ;;  %6341 = vmatprep.subr.bf16.mxu1 %v6340_v39  ;;  %v1275_v38 = vld [vmem:[#allocation7 + $0x13a8] sm:$0xff]  ;;  %v1285_v39 = vld [vmem:[#allocation7 + $0x13f8] sm:$0xff]  ;;  %v6234_v43 = vpack.c.bf16 %v1273_v35, %v1262_v34 }
 0x1ca   :  { %v6362_v44 = vpack.c.bf16 %v1275_v38, %v1264_v37  ;;  %v683_v34 = vld [vmem:[#allocation7 + $0x128] sm:$0xff]  ;;  %v685_v37 = vld [vmem:[#allocation7 + $0x138] sm:$0xff] }
 0x1cb   :  { %v695_v38 = vld [vmem:[#allocation7 + $0x188] sm:$0xff] }
 0x1cc   :  { %6215 = vmatpush1.bf16.msra.mxu0 %v6214_v46  ;;  %6343 = vmatpush1.bf16.msra.mxu1 %v6342_v47  ;;  %v1295_v46 = vld [vmem:[#allocation7 + $0x1448] sm:$0xff]  ;;  %v6236_v47 = vpack.c.bf16 %v1296_v40, %v1285_v39  ;;  %v706_v39 = vld [vmem:[#allocation7 + $0x1e0] sm:$0xff]  ;;  %v697_v40 = vld [vmem:[#allocation7 + $0x198] sm:$0xff] }
 0x1cd   :  { %6217 = vmatprep.subr.bf16.mxu0 %v6216_v51  ;;  %6345 = vmatprep.subr.bf16.mxu1 %v6344_v52  ;;  %v1297_v51 = vld [vmem:[#allocation7 + $0x1458] sm:$0xff]  ;;  %v1307_v52 = vld [vmem:[#allocation7 + $0x14a8] sm:$0xff]  ;;  %v6238_v55 = vpack.c.bf16 %v1295_v46, %v1284_v45  ;;  %v694_v45 = vld [vmem:[#allocation7 + $0x180] sm:$0xff] }
 0x1ce   :  { %v6366_v56 = vpack.c.bf16 %v1297_v51, %v1286_v50  ;;  %v705_v46 = vld [vmem:[#allocation7 + $0x1d8] sm:$0xff]  ;;  %v696_v50 = vld [vmem:[#allocation7 + $0x190] sm:$0xff]  ;;  %v707_v51 = vld [vmem:[#allocation7 + $0x1e8] sm:$0xff] }
 0x1d0   :  { %6219 = vmatpush1.bf16.msra.mxu0 %v6218_v58  ;;  %6347 = vmatpush1.bf16.msra.mxu1 %v6346_v59  ;;  %v1317_v58 = vld [vmem:[#allocation7 + $0x14f8] sm:$0xff]  ;;  %v6240_v59 = vpack.c.bf16 %v1318_v53, %v1307_v52  ;;  %v728_v53 = vld [vmem:[#allocation7 + $0x290] sm:$0xff] }
 0x1d1   :  { %6221 = vmatprep.subr.bf16.mxu0 %v6220_v62  ;;  %6349 = vmatprep.subr.bf16.mxu1 %v6348_v63  ;;  %v1319_v62 = vld [vmem:[#allocation7 + $0x1508] sm:$0xff]  ;;  %v1329_v63 = vld [vmem:[#allocation7 + $0x1558] sm:$0xff]  ;;  %v6242_v4 = vpack.c.bf16 %v1317_v58, %v1306_v57  ;;  %v716_v57 = vld [vmem:[#allocation7 + $0x230] sm:$0xff] }
 0x1d2   :  { %v6370_v5 = vpack.c.bf16 %v1319_v62, %v1308_v61  ;;  %v717_v52 = vld [vmem:[#allocation7 + $0x238] sm:$0xff]  ;;  %v727_v58 = vld [vmem:[#allocation7 + $0x288] sm:$0xff]  ;;  %v718_v61 = vld [vmem:[#allocation7 + $0x240] sm:$0xff] }
 0x1d3   :  { %v729_v62 = vld [vmem:[#allocation7 + $0x298] sm:$0xff] }
 0x1d4   :  { %6223 = vmatpush1.bf16.msra.mxu0 %v6222_v7  ;;  %6351 = vmatpush1.bf16.msra.mxu1 %v6350_v8  ;;  %v1339_v7 = vld [vmem:[#allocation7 + $0x15a8] sm:$0xff]  ;;  %v6244_v8 = vpack.c.bf16 %v1340_v1, %v1329_v63  ;;  %v750_v1 = vld [vmem:[#allocation7 + $0x340] sm:$0xff] }
 0x1d5   :  { %6225 = vmatprep.subr.bf16.mxu0 %v6224_v11  ;;  %6353 = vmatprep.subr.bf16.mxu1 %v6352_v0  ;;  %v1341_v11 = vld [vmem:[#allocation7 + $0x15b8] sm:$0xff]  ;;  %v651_v0 = vld [vmem:[#allocation7 + $0x28] sm:$0xff]  ;;  %v6246_v16 = vpack.c.bf16 %v1339_v7, %v1328_v6 }
 0x1d6   :  { %v6374_v17 = vpack.c.bf16 %v1341_v11, %v1330_v10  ;;  %v6376_v18 = vpack.c.bf16 %v662_v12, %v651_v0  ;;  %v739_v63 = vld [vmem:[#allocation7 + $0x2e8] sm:$0xff]  ;;  %v749_v6 = vld [vmem:[#allocation7 + $0x338] sm:$0xff]  ;;  %v772_v0 = vld [vmem:[#allocation7 + $0x3f0] sm:$0xff] }
 0x1d7   :  { %v6392_v7 = vpack.c.bf16 %v750_v1, %v739_v63  ;;  %v751_v10 = vld [vmem:[#allocation7 + $0x348] sm:$0xff]  ;;  %v761_v11 = vld [vmem:[#allocation7 + $0x398] sm:$0xff] }
 0x1d8   :  { %6227 = vmatpush1.bf16.msra.mxu0 %v6226_v19  ;;  %6355 = vmatpush1.bf16.msra.mxu1 %v6354_v20  ;;  %v6504_v19 = vpack.c.bf16 %v664_v15, %v653_v14  ;;  %v650_v20 = vld [vmem:[#allocation7 + $0x20] sm:$0xff]  ;;  %v763_v12 = vld [vmem:[#allocation7 + $0x3a8] sm:$0xff] }
 0x1d9   :  { %6229 = vmatprep.subr.bf16.mxu0 %v6228_v24  ;;  %6357 = vmatprep.subr.bf16.mxu1 %v6356_v25  ;;  %v663_v24 = vld [vmem:[#allocation7 + $0x88] sm:$0xff]  ;;  %v673_v25 = vld [vmem:[#allocation7 + $0xd8] sm:$0xff]  ;;  %v6378_v31 = vpack.c.bf16 %v661_v22, %v650_v20  ;;  %v774_v14 = vld [vmem:[#allocation7 + $0x400] sm:$0xff] }
 0x1da   :  { %v6380_v35 = vpack.c.bf16 %v684_v27, %v673_v25  ;;  %v6524_v20 = vpack.c.bf16 %v774_v14, %v763_v12  ;;  %v762_v22 = vld [vmem:[#allocation7 + $0x3a0] sm:$0xff]  ;;  %v785_v27 = vld [vmem:[#allocation7 + $0x458] sm:$0xff] }
 0x1db   :  { %v794_v25 = vld [vmem:[#allocation7 + $0x4a0] sm:$0xff]  ;;  %v881_v14 = vld [vmem:[#allocation7 + $0x758] sm:$0xff] }
 0x1dc   :  { %6231 = vmatpush1.bf16.msra.mxu0 %v6230_v32  ;;  %6359 = vmatpush1.bf16.msra.mxu1 %v6358_v33  ;;  %v6506_v32 = vpack.c.bf16 %v663_v24, %v652_v23  ;;  %v672_v33 = vld [vmem:[#allocation7 + $0xd0] sm:$0xff]  ;;  %v773_v23 = vld [vmem:[#allocation7 + $0x3f8] sm:$0xff]  ;;  %v783_v24 = vld [vmem:[#allocation7 + $0x448] sm:$0xff] }
 0x1dd   :  { %6233 = vmatprep.subr.bf16.mxu0 %v6232_v36  ;;  %6361 = vmatprep.subr.bf16.mxu1 %v6360_v21  ;;  %v6508_v36 = vpack.c.bf16 %v686_v29, %v675_v28  ;;  %v674_v21 = vld [vmem:[#allocation7 + $0xe0] sm:$0xff]  ;;  %v796_v28 = vld [vmem:[#allocation7 + $0x4b0] sm:$0xff] }
 0x1de   :  { %v870_v12 = vld [vmem:[#allocation7 + $0x700] sm:$0xff] }
 0x1e0   :  { %6235 = vmatpush1.bf16.msra.mxu0 %v6234_v43  ;;  %6363 = vmatpush1.bf16.msra.mxu1 %v6362_v44  ;;  %v6382_v43 = vpack.c.bf16 %v683_v34, %v672_v33  ;;  %v6510_v44 = vpack.c.bf16 %v685_v37, %v674_v21  ;;  %v6528_v33 = vpack.c.bf16 %v796_v28, %v785_v27  ;;  %v784_v34 = vld [vmem:[#allocation7 + $0x450] sm:$0xff]  ;;  %v807_v37 = vld [vmem:[#allocation7 + $0x508] sm:$0xff] }
 0x1e1   :  { %6237 = vmatprep.subr.bf16.mxu0 %v6236_v47  ;;  %6365 = vmatprep.subr.bf16.mxu1 %v6364_v49  ;;  %v6384_v47 = vpack.c.bf16 %v706_v39, %v695_v38  ;;  %v6512_v49 = vpack.c.bf16 %v708_v41, %v697_v40  ;;  %v816_v21 = vld [vmem:[#allocation7 + $0x550] sm:$0xff]  ;;  %v818_v38 = vld [vmem:[#allocation7 + $0x560] sm:$0xff]  ;;  %v903_v28 = vld [vmem:[#allocation7 + $0x808] sm:$0xff] }
 0x1e2   :  { %v804_v41 = vld [vmem:[#allocation7 + $0x4f0] sm:$0xff] }
 0x1e3   :  { %v892_v27 = vld [vmem:[#allocation7 + $0x7b0] sm:$0xff] }
 0x1e4   :  { %6239 = vmatpush1.bf16.msra.mxu0 %v6238_v55  ;;  %6367 = vmatpush1.bf16.msra.mxu1 %v6366_v56  ;;  %v6386_v55 = vpack.c.bf16 %v705_v46, %v694_v45  ;;  %v6514_v56 = vpack.c.bf16 %v707_v51, %v696_v50  ;;  %v806_v45 = vld [vmem:[#allocation7 + $0x500] sm:$0xff]  ;;  %v817_v46 = vld [vmem:[#allocation7 + $0x558] sm:$0xff]  ;;  %v840_v51 = vld [vmem:[#allocation7 + $0x610] sm:$0xff] }
 0x1e5   :  { %6241 = vmatprep.subr.bf16.mxu0 %v6240_v59  ;;  %6369 = vmatprep.subr.bf16.mxu1 %v6368_v60  ;;  %v6388_v59 = vpack.c.bf16 %v728_v53, %v717_v52  ;;  %v6516_v60 = vpack.c.bf16 %v730_v13, %v719_v54  ;;  %v829_v50 = vld [vmem:[#allocation7 + $0x5b8] sm:$0xff]  ;;  %v6534_v53 = vpack.c.bf16 %v817_v46, %v806_v45  ;;  %v826_v54 = vld [vmem:[#allocation7 + $0x5a0] sm:$0xff]  ;;  %v939_v45 = vld [vmem:[#allocation7 + $0x928] sm:$0xff] }
 0x1e6   :  { %v837_v13 = vld [vmem:[#allocation7 + $0x5f8] sm:$0xff]  ;;  %v950_v46 = vld [vmem:[#allocation7 + $0x980] sm:$0xff] }
 0x1e7   :  { %v6410_v63 = vpack.c.bf16 %v837_v13, %v826_v54  ;;  %v938_v54 = vld [vmem:[#allocation7 + $0x920] sm:$0xff]  ;;  %v949_v13 = vld [vmem:[#allocation7 + $0x978] sm:$0xff] }
 0x1e8   :  { %6243 = vmatpush1.bf16.msra.mxu0 %v6242_v4  ;;  %6371 = vmatpush1.bf16.msra.mxu1 %v6370_v5  ;;  %v6390_v4 = vpack.c.bf16 %v727_v58, %v716_v57  ;;  %v738_v5 = vld [vmem:[#allocation7 + $0x2e0] sm:$0xff]  ;;  %v828_v57 = vld [vmem:[#allocation7 + $0x5b0] sm:$0xff]  ;;  %v839_v58 = vld [vmem:[#allocation7 + $0x608] sm:$0xff] }
 0x1e9   :  { %6245 = vmatprep.subr.bf16.mxu0 %v6244_v8  ;;  %6373 = vmatprep.subr.bf16.mxu1 %v6372_v9  ;;  %v6520_v8 = vpack.c.bf16 %v752_v3, %v741_v2  ;;  %v740_v9 = vld [vmem:[#allocation7 + $0x2f0] sm:$0xff]  ;;  %v6394_v15 = vpack.c.bf16 %v749_v6, %v738_v5  ;;  %v6538_v1 = vpack.c.bf16 %v839_v58, %v828_v57  ;;  %v859_v3 = vld [vmem:[#allocation7 + $0x6a8] sm:$0xff]  ;;  %v850_v5 = vld [vmem:[#allocation7 + $0x660] sm:$0xff] }
 0x1ea   :  { %v848_v2 = vld [vmem:[#allocation7 + $0x650] sm:$0xff]  ;;  %v861_v6 = vld [vmem:[#allocation7 + $0x6b8] sm:$0xff] }
 0x1eb   :  { %v961_v57 = vld [vmem:[#allocation7 + $0x9d8] sm:$0xff]  ;;  %v972_v58 = vld [vmem:[#allocation7 + $0xa30] sm:$0xff] }
 0x1ec   :  { %6247 = vmatpush1.bf16.msra.mxu0 %v6246_v16  ;;  %6375 = vmatpush1.bf16.msra.mxu1 %v6374_v17  ;;  %v6522_v16 = vpack.c.bf16 %v751_v10, %v740_v9  ;;  %v760_v17 = vld [vmem:[#allocation7 + $0x390] sm:$0xff]  ;;  %v873_v9 = vld [vmem:[#allocation7 + $0x718] sm:$0xff] }
 0x1ed   :  { %6377 = vmatprep.subr.bf16.mxu0 %v6376_v18  ;;  %6505 = vmatprep.subr.bf16.mxu1 %v6504_v19  ;;  %v771_v18 = vld [vmem:[#allocation7 + $0x3e8] sm:$0xff]  ;;  %v6396_v19 = vpack.c.bf16 %v772_v0, %v761_v11  ;;  %v884_v10 = vld [vmem:[#allocation7 + $0x770] sm:$0xff]  ;;  %v6414_v11 = vpack.c.bf16 %v859_v3, %v848_v2  ;;  %v6542_v0 = vpack.c.bf16 %v861_v6, %v850_v5  ;;  %v994_v6 = vld [vmem:[#allocation7 + $0xae0] sm:$0xff] }
 0x1ee   :  { %v6398_v29 = vpack.c.bf16 %v771_v18, %v760_v17  ;;  %v872_v17 = vld [vmem:[#allocation7 + $0x710] sm:$0xff]  ;;  %v883_v18 = vld [vmem:[#allocation7 + $0x768] sm:$0xff] }
 0x1ef   :  { %1492 = vmatmul.mubr.f32.vlgmr.msra.gmra.mrb[6].mxu0 %v640_v30  ;;  %1646 = vmatmul.mubr.f32.vlgmr.msra.gmra.mrb[2].mxu1 %v640_v30  ;;  %v6526_v30 = vpack.c.bf16 %v773_v23, %v762_v22  ;;  %v895_v22 = vld [vmem:[#allocation7 + $0x7c8] sm:$0xff]  ;;  %v906_v23 = vld [vmem:[#allocation7 + $0x820] sm:$0xff]  ;;  %v960_v2 = vld [vmem:[#allocation7 + $0x9d0] sm:$0xff] }
 0x1f0   :  { %1497 = vmatprep.mubr.f32.mxu0 %v645_v48  ;;  %1651 = vmatprep.mubr.f32.mxu1 %v645_v48  ;;  %v782_v48 = vld [vmem:[#allocation7 + $0x440] sm:$0xff]  ;;  %v971_v3 = vld [vmem:[#allocation7 + $0xa28] sm:$0xff] }
 0x1f1   :  { %6379 = vmatpush1.bf16.msra.mxu0 %v6378_v31  ;;  %6507 = vmatpush1.bf16.msra.mxu1 %v6506_v32  ;;  %v793_v31 = vld [vmem:[#allocation7 + $0x498] sm:$0xff]  ;;  %v6400_v32 = vpack.c.bf16 %v794_v25, %v783_v24  ;;  %v6418_v24 = vpack.c.bf16 %v881_v14, %v870_v12  ;;  %v6546_v25 = vpack.c.bf16 %v883_v18, %v872_v17  ;;  %v983_v5 = vld [vmem:[#allocation7 + $0xa88] sm:$0xff]  ;;  %v982_v12 = vld [vmem:[#allocation7 + $0xa80] sm:$0xff] }
 0x1f2   :  { %6381 = vmatprep.subr.bf16.mxu0 %v6380_v35  ;;  %6509 = vmatprep.subr.bf16.mxu1 %v6508_v36  ;;  %v795_v35 = vld [vmem:[#allocation7 + $0x4a8] sm:$0xff]  ;;  %v805_v36 = vld [vmem:[#allocation7 + $0x4f8] sm:$0xff]  ;;  %v6402_v39 = vpack.c.bf16 %v793_v31, %v782_v48  ;;  %v894_v48 = vld [vmem:[#allocation7 + $0x7c0] sm:$0xff] }
 0x1f3   :  { %1498 = vmatmul.mubr.f32.gmra.mrb[8].mxu0 %v644_v42  ;;  %1652 = vmatmul.mubr.f32.gmra.mrb[4].mxu1 %v644_v42  ;;  %v6530_v40 = vpack.c.bf16 %v795_v35, %v784_v34  ;;  %v815_v42 = vld [vmem:[#allocation7 + $0x548] sm:$0xff]  ;;  %v905_v31 = vld [vmem:[#allocation7 + $0x818] sm:$0xff]  ;;  %v928_v35 = vld [vmem:[#allocation7 + $0x8d0] sm:$0xff] }
 0x1f4   :  { %1722 = vmatprep.mubr.f32.mxu0 %v8591_v26  ;;  %1876 = vmatprep.mubr.f32.mxu1 %v8591_v26  ;;  %v6518_v26 = vpack.c.bf16 %v729_v62, %v718_v61  ;;  %v6406_v52 = vpack.c.bf16 %v815_v42, %v804_v41  ;;  %v851_v61 = vld [vmem:[#allocation7 + $0x668] sm:$0xff]  ;;  %v862_v62 = vld [vmem:[#allocation7 + $0x6c0] sm:$0xff]  ;;  %v917_v34 = vld [vmem:[#allocation7 + $0x878] sm:$0xff] }
 0x1f5   :  { %6383 = vmatpush1.bf16.msra.mxu0 %v6382_v43  ;;  %6511 = vmatpush1.bf16.msra.mxu1 %v6510_v44  ;;  %v6404_v43 = vpack.c.bf16 %v816_v21, %v805_v36  ;;  %v6532_v44 = vpack.c.bf16 %v818_v38, %v807_v37  ;;  %v6422_v36 = vpack.c.bf16 %v903_v28, %v892_v27  ;;  %v914_v37 = vld [vmem:[#allocation7 + $0x860] sm:$0xff]  ;;  %v925_v38 = vld [vmem:[#allocation7 + $0x8b8] sm:$0xff]  ;;  %v916_v41 = vld [vmem:[#allocation7 + $0x870] sm:$0xff] }
 0x1f6   :  { %6385 = vmatprep.subr.bf16.mxu0 %v6384_v47  ;;  %6513 = vmatprep.subr.bf16.mxu1 %v6512_v49  ;;  %v827_v47 = vld [vmem:[#allocation7 + $0x5a8] sm:$0xff]  ;;  %v838_v49 = vld [vmem:[#allocation7 + $0x600] sm:$0xff]  ;;  %v6550_v21 = vpack.c.bf16 %v905_v31, %v894_v48  ;;  %v993_v14 = vld [vmem:[#allocation7 + $0xad8] sm:$0xff] }
 0x1f7   :  { %v927_v42 = vld [vmem:[#allocation7 + $0x8c8] sm:$0xff]  ;;  %v1005_v17 = vld [vmem:[#allocation7 + $0xb38] sm:$0xff]  ;;  %v1016_v18 = vld [vmem:[#allocation7 + $0xb90] sm:$0xff] }
 0x1f8   :  { %v1004_v27 = vld [vmem:[#allocation7 + $0xb30] sm:$0xff]  ;;  %v1015_v28 = vld [vmem:[#allocation7 + $0xb88] sm:$0xff]  ;;  %v1038_v31 = vld [vmem:[#allocation7 + $0xc40] sm:$0xff] }
 0x1f9   :  { %6387 = vmatpush1.bf16.msra.mxu0 %v6386_v55  ;;  %6515 = vmatpush1.bf16.msra.mxu1 %v6514_v56  ;;  %v6408_v55 = vpack.c.bf16 %v838_v49, %v827_v47  ;;  %v6536_v56 = vpack.c.bf16 %v840_v51, %v829_v50  ;;  %v6426_v47 = vpack.c.bf16 %v925_v38, %v914_v37  ;;  %v936_v50 = vld [vmem:[#allocation7 + $0x910] sm:$0xff]  ;;  %v947_v51 = vld [vmem:[#allocation7 + $0x968] sm:$0xff]  ;;  %v1026_v37 = vld [vmem:[#allocation7 + $0xbe0] sm:$0xff] }
 0x1fa   :  { %6389 = vmatprep.subr.bf16.mxu0 %v6388_v59  ;;  %6517 = vmatprep.subr.bf16.mxu1 %v6516_v60  ;;  %v849_v59 = vld [vmem:[#allocation7 + $0x658] sm:$0xff]  ;;  %v860_v60 = vld [vmem:[#allocation7 + $0x6b0] sm:$0xff]  ;;  %v6554_v49 = vpack.c.bf16 %v927_v42, %v916_v41  ;;  %v1027_v48 = vld [vmem:[#allocation7 + $0xbe8] sm:$0xff] }
 0x1fb   :  { %v1037_v38 = vld [vmem:[#allocation7 + $0xc38] sm:$0xff]  ;;  %v1058_v41 = vld [vmem:[#allocation7 + $0xce0] sm:$0xff] }
 0x1fc   :  { %v1049_v42 = vld [vmem:[#allocation7 + $0xc98] sm:$0xff] }
 0x1fd   :  { %6391 = vmatpush1.bf16.msra.mxu0 %v6390_v4  ;;  %6519 = vmatpush1.bf16.msra.mxu1 %v6518_v26  ;;  %v6412_v4 = vpack.c.bf16 %v860_v60, %v849_v59  ;;  %v6540_v26 = vpack.c.bf16 %v862_v62, %v851_v61  ;;  %v6430_v59 = vpack.c.bf16 %v947_v51, %v936_v50  ;;  %v958_v61 = vld [vmem:[#allocation7 + $0x9c0] sm:$0xff]  ;;  %v969_v62 = vld [vmem:[#allocation7 + $0xa18] sm:$0xff]  ;;  %v1048_v50 = vld [vmem:[#allocation7 + $0xc90] sm:$0xff] }
 0x1fe   :  { %6393 = vmatprep.subr.bf16.mxu0 %v6392_v7  ;;  %6521 = vmatprep.subr.bf16.mxu1 %v6520_v8  ;;  %v871_v7 = vld [vmem:[#allocation7 + $0x708] sm:$0xff]  ;;  %v882_v8 = vld [vmem:[#allocation7 + $0x760] sm:$0xff]  ;;  %v6558_v60 = vpack.c.bf16 %v949_v13, %v938_v54  ;;  %v1069_v54 = vld [vmem:[#allocation7 + $0xd38] sm:$0xff] }
 0x1ff   :  { %v1080_v13 = vld [vmem:[#allocation7 + $0xd90] sm:$0xff] }
 0x201   :  { %6395 = vmatpush1.bf16.msra.mxu0 %v6394_v15  ;;  %6523 = vmatpush1.bf16.msra.mxu1 %v6522_v16  ;;  %v6416_v15 = vpack.c.bf16 %v882_v8, %v871_v7  ;;  %v6544_v16 = vpack.c.bf16 %v884_v10, %v873_v9  ;;  %v6434_v7 = vpack.c.bf16 %v969_v62, %v958_v61  ;;  %v980_v9 = vld [vmem:[#allocation7 + $0xa70] sm:$0xff]  ;;  %v991_v10 = vld [vmem:[#allocation7 + $0xac8] sm:$0xff] }
 0x202   :  { %6397 = vmatprep.subr.bf16.mxu0 %v6396_v19  ;;  %6525 = vmatprep.subr.bf16.mxu1 %v6524_v20  ;;  %v893_v19 = vld [vmem:[#allocation7 + $0x7b8] sm:$0xff]  ;;  %v904_v20 = vld [vmem:[#allocation7 + $0x810] sm:$0xff]  ;;  %v6562_v8 = vpack.c.bf16 %v971_v3, %v960_v2  ;;  %v6452_v61 = vpack.c.bf16 %v1080_v13, %v1069_v54  ;;  %v1179_v54 = vld [vmem:[#allocation7 + $0x10a8] sm:$0xff] }
 0x203   :  { %v1068_v62 = vld [vmem:[#allocation7 + $0xd30] sm:$0xff]  ;;  %v1081_v3 = vld [vmem:[#allocation7 + $0xd98] sm:$0xff]  ;;  %v1190_v13 = vld [vmem:[#allocation7 + $0x1100] sm:$0xff] }
 0x205   :  { %6399 = vmatpush1.bf16.msra.mxu0 %v6398_v29  ;;  %6527 = vmatpush1.bf16.msra.mxu1 %v6526_v30  ;;  %v6420_v29 = vpack.c.bf16 %v904_v20, %v893_v19  ;;  %v6548_v30 = vpack.c.bf16 %v906_v23, %v895_v22  ;;  %v6438_v19 = vpack.c.bf16 %v991_v10, %v980_v9  ;;  %v1090_v10 = vld [vmem:[#allocation7 + $0xde0] sm:$0xff] }
 0x206   :  { %6401 = vmatprep.subr.bf16.mxu0 %v6400_v32  ;;  %6529 = vmatprep.subr.bf16.mxu1 %v6528_v33  ;;  %v915_v32 = vld [vmem:[#allocation7 + $0x868] sm:$0xff]  ;;  %v926_v33 = vld [vmem:[#allocation7 + $0x8c0] sm:$0xff]  ;;  %v6566_v20 = vpack.c.bf16 %v993_v14, %v982_v12  ;;  %v6568_v23 = vpack.c.bf16 %v1016_v18, %v1005_v17 }
 0x207   :  { %v1103_v14 = vld [vmem:[#allocation7 + $0xe48] sm:$0xff]  ;;  %v1126_v18 = vld [vmem:[#allocation7 + $0xf00] sm:$0xff] }
 0x208   :  { %v1115_v17 = vld [vmem:[#allocation7 + $0xea8] sm:$0xff] }
 0x209   :  { %6403 = vmatpush1.bf16.msra.mxu0 %v6402_v39  ;;  %6531 = vmatpush1.bf16.msra.mxu1 %v6530_v40  ;;  %v6424_v39 = vpack.c.bf16 %v926_v33, %v915_v32  ;;  %v6552_v40 = vpack.c.bf16 %v928_v35, %v917_v34  ;;  %v6570_v33 = vpack.c.bf16 %v1015_v28, %v1004_v27  ;;  %v1024_v34 = vld [vmem:[#allocation7 + $0xbd0] sm:$0xff]  ;;  %v1035_v35 = vld [vmem:[#allocation7 + $0xc28] sm:$0xff]  ;;  %v1125_v28 = vld [vmem:[#allocation7 + $0xef8] sm:$0xff] }
 0x20a   :  { %6405 = vmatprep.subr.bf16.mxu0 %v6404_v43  ;;  %6533 = vmatprep.subr.bf16.mxu1 %v6532_v44  ;;  %v937_v43 = vld [vmem:[#allocation7 + $0x918] sm:$0xff]  ;;  %v948_v44 = vld [vmem:[#allocation7 + $0x970] sm:$0xff]  ;;  %v6588_v27 = vpack.c.bf16 %v1126_v18, %v1115_v17 }
 0x20b   :  { %v1225_v17 = vld [vmem:[#allocation7 + $0x1218] sm:$0xff]  ;;  %v1236_v18 = vld [vmem:[#allocation7 + $0x1270] sm:$0xff] }
 0x20d   :  { %6407 = vmatpush1.bf16.msra.mxu0 %v6406_v52  ;;  %6535 = vmatpush1.bf16.msra.mxu1 %v6534_v53  ;;  %v6428_v52 = vpack.c.bf16 %v948_v44, %v937_v43  ;;  %v6556_v53 = vpack.c.bf16 %v950_v46, %v939_v45  ;;  %v1060_v43 = vld [vmem:[#allocation7 + $0xcf0] sm:$0xff]  ;;  %v8601_v44 = vld [vmem:[#allocation2 + $0x28] sm:$0x3f]  ;;  %v6446_v45 = vpack.c.bf16 %v1035_v35, %v1024_v34  ;;  %v1134_v35 = vld [vmem:[#allocation7 + $0xf40] sm:$0xff] }
 0x20e   :  { %6409 = vmatprep.subr.bf16.mxu0 %v6408_v55  ;;  %6537 = vmatprep.subr.bf16.mxu1 %v6536_v56  ;;  %v959_v55 = vld [vmem:[#allocation7 + $0x9c8] sm:$0xff]  ;;  %v970_v56 = vld [vmem:[#allocation7 + $0xa20] sm:$0xff]  ;;  %v6574_v46 = vpack.c.bf16 %v1037_v38, %v1026_v37 }
 0x20f   :  { %v1147_v38 = vld [vmem:[#allocation7 + $0xfa8] sm:$0xff] }
 0x211   :  { %6411 = vmatpush1.bf16.msra.mxu0 %v6410_v63  ;;  %6539 = vmatpush1.bf16.msra.mxu1 %v6538_v1  ;;  %v6432_v63 = vpack.c.bf16 %v970_v56, %v959_v55  ;;  %v6560_v1 = vpack.c.bf16 %v972_v58, %v961_v57  ;;  %v8605_v55 = vld [vmem:[#allocation2 + $0x20] sm:$0x3f]  ;;  %v1071_v56 = vld [vmem:[#allocation7 + $0xd48] sm:$0xff]  ;;  %v8609_v58 = vld [vmem:[#allocation2 + $0x18] sm:$0xff] }
 0x212   :  { %6413 = vmatprep.subr.bf16.mxu0 %v6412_v4  ;;  %6541 = vmatprep.subr.bf16.mxu1 %v6540_v26  ;;  %v981_v4 = vld [vmem:[#allocation7 + $0xa78] sm:$0xff]  ;;  %v992_v26 = vld [vmem:[#allocation7 + $0xad0] sm:$0xff]  ;;  %v1082_v57 = vld [vmem:[#allocation7 + $0xda0] sm:$0xff] }
 0x213   :  { %v6580_v2 = vpack.c.bf16 %v1082_v57, %v1071_v56  ;;  %v1181_v56 = vld [vmem:[#allocation7 + $0x10b8] sm:$0xff]  ;;  %v1192_v57 = vld [vmem:[#allocation7 + $0x1110] sm:$0xff] }
 0x215   :  { %6415 = vmatpush1.bf16.msra.mxu0 %v6414_v11  ;;  %6543 = vmatpush1.bf16.msra.mxu1 %v6542_v0  ;;  %v6436_v11 = vpack.c.bf16 %v992_v26, %v981_v4  ;;  %v6564_v0 = vpack.c.bf16 %v994_v6, %v983_v5  ;;  %v1091_v4 = vld [vmem:[#allocation7 + $0xde8] sm:$0xff]  ;;  %v1102_v26 = vld [vmem:[#allocation7 + $0xe40] sm:$0xff]  ;;  %v1093_v5 = vld [vmem:[#allocation7 + $0xdf8] sm:$0xff] }
 0x216   :  { %6417 = vmatprep.subr.bf16.mxu0 %v6416_v15  ;;  %6545 = vmatprep.subr.bf16.mxu1 %v6544_v16  ;;  %v1003_v15 = vld [vmem:[#allocation7 + $0xb28] sm:$0xff]  ;;  %v1014_v16 = vld [vmem:[#allocation7 + $0xb80] sm:$0xff]  ;;  %v1104_v6 = vld [vmem:[#allocation7 + $0xe50] sm:$0xff]  ;;  %v6456_v9 = vpack.c.bf16 %v1102_v26, %v1091_v4 }
 0x217   :  { %v6440_v22 = vpack.c.bf16 %v1014_v16, %v1003_v15  ;;  %v6584_v12 = vpack.c.bf16 %v1104_v6, %v1093_v5  ;;  %v1113_v15 = vld [vmem:[#allocation7 + $0xe98] sm:$0xff]  ;;  %v1124_v16 = vld [vmem:[#allocation7 + $0xef0] sm:$0xff]  ;;  %v1203_v5 = vld [vmem:[#allocation7 + $0x1168] sm:$0xff] }
 0x218   :  { %v1201_v4 = vld [vmem:[#allocation7 + $0x1158] sm:$0xff]  ;;  %v1212_v26 = vld [vmem:[#allocation7 + $0x11b0] sm:$0xff]  ;;  %v1214_v6 = vld [vmem:[#allocation7 + $0x11c0] sm:$0xff] }
 0x219   :  { %6419 = vmatpush1.bf16.msra.mxu0 %v6418_v24  ;;  %6547 = vmatpush1.bf16.msra.mxu1 %v6546_v25  ;;  %v1002_v24 = vld [vmem:[#allocation7 + $0xb20] sm:$0xff]  ;;  %v1013_v25 = vld [vmem:[#allocation7 + $0xb78] sm:$0xff] }
 0x21a   :  { %6421 = vmatprep.subr.bf16.mxu0 %v6420_v29  ;;  %6549 = vmatprep.subr.bf16.mxu1 %v6548_v30  ;;  %v1025_v29 = vld [vmem:[#allocation7 + $0xbd8] sm:$0xff]  ;;  %v1036_v30 = vld [vmem:[#allocation7 + $0xc30] sm:$0xff]  ;;  %v6442_v32 = vpack.c.bf16 %v1013_v25, %v1002_v24  ;;  %v1123_v24 = vld [vmem:[#allocation7 + $0xee8] sm:$0xff] }
 0x21b   :  { %v1114_v25 = vld [vmem:[#allocation7 + $0xea0] sm:$0xff] }
 0x21d   :  { %6423 = vmatpush1.bf16.msra.mxu0 %v6422_v36  ;;  %6551 = vmatpush1.bf16.msra.mxu1 %v6550_v21  ;;  %v6444_v36 = vpack.c.bf16 %v1036_v30, %v1025_v29  ;;  %v6572_v21 = vpack.c.bf16 %v1038_v31, %v1027_v48  ;;  %v1135_v29 = vld [vmem:[#allocation7 + $0xf48] sm:$0xff]  ;;  %v1146_v30 = vld [vmem:[#allocation7 + $0xfa0] sm:$0xff]  ;;  %v1137_v48 = vld [vmem:[#allocation7 + $0xf58] sm:$0xff] }
 0x21e   :  { %6425 = vmatprep.subr.bf16.mxu0 %v6424_v39  ;;  %6553 = vmatprep.subr.bf16.mxu1 %v6552_v40  ;;  %v1047_v39 = vld [vmem:[#allocation7 + $0xc88] sm:$0xff]  ;;  %v8597_v40 = vld [vmem:[#allocation2] sm:$0xff]  ;;  %v1148_v31 = vld [vmem:[#allocation7 + $0xfb0] sm:$0xff]  ;;  %v6464_v34 = vpack.c.bf16 %v1146_v30, %v1135_v29 }
 0x21f   :  { %v6448_v51 = vpack.c.bf16 %v1058_v41, %v1047_v39  ;;  %v6592_v37 = vpack.c.bf16 %v1148_v31, %v1137_v48  ;;  %v1157_v39 = vld [vmem:[#allocation7 + $0xff8] sm:$0xff]  ;;  %v1168_v41 = vld [vmem:[#allocation7 + $0x1050] sm:$0xff]  ;;  %v1247_v48 = vld [vmem:[#allocation7 + $0x12c8] sm:$0xff] }
 0x220   :  { %v1245_v29 = vld [vmem:[#allocation7 + $0x12b8] sm:$0xff]  ;;  %v1256_v30 = vld [vmem:[#allocation7 + $0x1310] sm:$0xff]  ;;  %v1258_v31 = vld [vmem:[#allocation7 + $0x1320] sm:$0xff] }
 0x221   :  { %6427 = vmatpush1.bf16.msra.mxu0 %v6426_v47  ;;  %6555 = vmatpush1.bf16.msra.mxu1 %v6554_v49  ;;  %v1046_v47 = vld [vmem:[#allocation7 + $0xc80] sm:$0xff]  ;;  %v1057_v49 = vld [vmem:[#allocation7 + $0xcd8] sm:$0xff] }
 0x222   :  { %6429 = vmatprep.subr.bf16.mxu0 %v6428_v52  ;;  %6557 = vmatprep.subr.bf16.mxu1 %v6556_v53  ;;  %v6576_v52 = vpack.c.bf16 %v1060_v43, %v1049_v42  ;;  %v1059_v53 = vld [vmem:[#allocation7 + $0xce8] sm:$0xff]  ;;  %v1170_v43 = vld [vmem:[#allocation7 + $0x1060] sm:$0xff] }
 0x223   :  { %v1159_v42 = vld [vmem:[#allocation7 + $0x1008] sm:$0xff] }
 0x225   :  { %6431 = vmatpush1.bf16.msra.mxu0 %v6430_v59  ;;  %6559 = vmatpush1.bf16.msra.mxu1 %v6558_v60  ;;  %v6450_v59 = vpack.c.bf16 %v1057_v49, %v1046_v47  ;;  %v6578_v60 = vpack.c.bf16 %v1059_v53, %v1048_v50  ;;  %v6468_v47 = vpack.c.bf16 %v1168_v41, %v1157_v39  ;;  %v1156_v49 = vld [vmem:[#allocation7 + $0xff0] sm:$0xff]  ;;  %v1167_v50 = vld [vmem:[#allocation7 + $0x1048] sm:$0xff]  ;;  %v1169_v53 = vld [vmem:[#allocation7 + $0x1058] sm:$0xff] }
 0x226   :  { %6433 = vmatprep.subr.bf16.mxu0 %v6432_v63  ;;  %6561 = vmatprep.subr.bf16.mxu1 %v6560_v1  ;;  %v1079_v63 = vld [vmem:[#allocation7 + $0xd88] sm:$0xff]  ;;  %v1070_v1 = vld [vmem:[#allocation7 + $0xd40] sm:$0xff] }
 0x227   :  { %v1267_v39 = vld [vmem:[#allocation7 + $0x1368] sm:$0xff]  ;;  %v1278_v41 = vld [vmem:[#allocation7 + $0x13c0] sm:$0xff] }
 0x229   :  { %6435 = vmatpush1.bf16.msra.mxu0 %v6434_v7  ;;  %6563 = vmatpush1.bf16.msra.mxu1 %v6562_v8  ;;  %v6454_v7 = vpack.c.bf16 %v1079_v63, %v1068_v62  ;;  %v6582_v8 = vpack.c.bf16 %v1081_v3, %v1070_v1  ;;  %v1178_v62 = vld [vmem:[#allocation7 + $0x10a0] sm:$0xff]  ;;  %v1189_v63 = vld [vmem:[#allocation7 + $0x10f8] sm:$0xff]  ;;  %v1180_v1 = vld [vmem:[#allocation7 + $0x10b0] sm:$0xff] }
 0x22a   :  { %6437 = vmatprep.subr.bf16.mxu0 %v6436_v11  ;;  %6565 = vmatprep.subr.bf16.mxu1 %v6564_v0  ;;  %v1101_v11 = vld [vmem:[#allocation7 + $0xe38] sm:$0xff]  ;;  %v1092_v0 = vld [vmem:[#allocation7 + $0xdf0] sm:$0xff]  ;;  %v1191_v3 = vld [vmem:[#allocation7 + $0x1108] sm:$0xff] }
 0x22d   :  { %6439 = vmatpush1.bf16.msra.mxu0 %v6438_v19  ;;  %6567 = vmatpush1.bf16.msra.mxu1 %v6566_v20  ;;  %v6458_v19 = vpack.c.bf16 %v1101_v11, %v1090_v10  ;;  %v6586_v20 = vpack.c.bf16 %v1103_v14, %v1092_v0  ;;  %v1200_v10 = vld [vmem:[#allocation7 + $0x1150] sm:$0xff]  ;;  %v1211_v11 = vld [vmem:[#allocation7 + $0x11a8] sm:$0xff]  ;;  %v1202_v0 = vld [vmem:[#allocation7 + $0x1160] sm:$0xff] }
 0x22e   :  { %6441 = vmatprep.subr.bf16.mxu0 %v6440_v22  ;;  %6569 = vmatprep.subr.bf16.mxu1 %v6568_v23  ;;  %v6460_v22 = vpack.c.bf16 %v1124_v16, %v1113_v15  ;;  %v1112_v23 = vld [vmem:[#allocation7 + $0xe90] sm:$0xff]  ;;  %v1213_v14 = vld [vmem:[#allocation7 + $0x11b8] sm:$0xff]  ;;  %v1223_v15 = vld [vmem:[#allocation7 + $0x1208] sm:$0xff] }
 0x22f   :  { %v1234_v16 = vld [vmem:[#allocation7 + $0x1260] sm:$0xff] }
 0x230   :  { %1723 = vmatmul.mubr.f32.vlgmr.msra.gmra.mrb[10].mxu0 %v8597_v40  ;;  %1877 = vmatmul.mubr.f32.vlgmr.msra.gmra.mrb[6].mxu1 %v8597_v40 }
 0x231   :  { %1728 = vmatprep.mubr.f32.mxu0 %v8601_v44  ;;  %6443 = vmatpush1.bf16.msra.mxu0 %v6442_v32  ;;  %v6462_v32 = vpack.c.bf16 %v1123_v24, %v1112_v23  ;;  %v1222_v23 = vld [vmem:[#allocation7 + $0x1200] sm:$0xff]  ;;  %v1233_v24 = vld [vmem:[#allocation7 + $0x1258] sm:$0xff] }
 0x232   :  { %1882 = vmatprep.mubr.f32.mxu1 %v8601_v44  ;;  %6571 = vmatpush1.bf16.msra.mxu1 %v6570_v33  ;;  %v6590_v33 = vpack.c.bf16 %v1125_v28, %v1114_v25  ;;  %v1224_v25 = vld [vmem:[#allocation7 + $0x1210] sm:$0xff]  ;;  %v1235_v28 = vld [vmem:[#allocation7 + $0x1268] sm:$0xff] }
 0x233   :  { %6445 = vmatprep.subr.bf16.mxu0 %v6444_v36  ;;  %6573 = vmatprep.subr.bf16.mxu1 %v6572_v21  ;;  %v1145_v36 = vld [vmem:[#allocation7 + $0xf98] sm:$0xff]  ;;  %v1136_v21 = vld [vmem:[#allocation7 + $0xf50] sm:$0xff] }
 0x234   :  { %1729 = vmatmul.mubr.f32.gmra.mrb[12].mxu0 %v8605_v55  ;;  %1883 = vmatmul.mubr.f32.gmra.mrb[8].mxu1 %v8605_v55 }
 0x235   :  { %6447 = vmatpush1.bf16.msra.mxu0 %v6446_v45  ;;  %1799 = vmatprep.mubr.f32.mxu0 %v8609_v58  ;;  %v6466_v45 = vpack.c.bf16 %v1145_v36, %v1134_v35  ;;  %v1244_v35 = vld [vmem:[#allocation7 + $0x12b0] sm:$0xff]  ;;  %v1255_v36 = vld [vmem:[#allocation7 + $0x1308] sm:$0xff] }
 0x236   :  { %6575 = vmatpush1.bf16.msra.mxu1 %v6574_v46  ;;  %1953 = vmatprep.mubr.f32.mxu1 %v8609_v58  ;;  %v6594_v46 = vpack.c.bf16 %v1147_v38, %v1136_v21  ;;  %v1246_v21 = vld [vmem:[#allocation7 + $0x12c0] sm:$0xff]  ;;  %v1257_v38 = vld [vmem:[#allocation7 + $0x1318] sm:$0xff] }
 0x237   :  { %6449 = vmatprep.subr.bf16.mxu0 %v6448_v51  ;;  %6577 = vmatprep.subr.bf16.mxu1 %v6576_v52  ;;  %v1158_v51 = vld [vmem:[#allocation7 + $0x1000] sm:$0xff]  ;;  %v6596_v52 = vpack.c.bf16 %v1170_v43, %v1159_v42  ;;  %v1269_v42 = vld [vmem:[#allocation7 + $0x1378] sm:$0xff]  ;;  %v1280_v43 = vld [vmem:[#allocation7 + $0x13d0] sm:$0xff] }
 0x239   :  { %6451 = vmatpush1.bf16.msra.mxu0 %v6450_v59  ;;  %v6470_v59 = vpack.c.bf16 %v1167_v50, %v1156_v49  ;;  %v1266_v49 = vld [vmem:[#allocation7 + $0x1360] sm:$0xff]  ;;  %v1277_v50 = vld [vmem:[#allocation7 + $0x13b8] sm:$0xff] }
 0x23a   :  { %6579 = vmatpush1.bf16.msra.mxu1 %v6578_v60  ;;  %6453 = vmatprep.subr.bf16.mxu0 %v6452_v61  ;;  %v6598_v60 = vpack.c.bf16 %v1169_v53, %v1158_v51  ;;  %v6472_v61 = vpack.c.bf16 %v1190_v13, %v1179_v54  ;;  %v1268_v51 = vld [vmem:[#allocation7 + $0x1370] sm:$0xff]  ;;  %v1279_v53 = vld [vmem:[#allocation7 + $0x13c8] sm:$0xff]  ;;  %v1289_v54 = vld [vmem:[#allocation7 + $0x1418] sm:$0xff] }
 0x23b   :  { %6581 = vmatprep.subr.bf16.mxu1 %v6580_v2  ;;  %v6600_v2 = vpack.c.bf16 %v1192_v57, %v1181_v56  ;;  %v1300_v13 = vld [vmem:[#allocation7 + $0x1470] sm:$0xff]  ;;  %v1291_v56 = vld [vmem:[#allocation7 + $0x1428] sm:$0xff]  ;;  %v1302_v57 = vld [vmem:[#allocation7 + $0x1480] sm:$0xff] }
 0x23d   :  { %6455 = vmatpush1.bf16.msra.mxu0 %v6454_v7  ;;  %v6474_v7 = vpack.c.bf16 %v1189_v63, %v1178_v62  ;;  %v1288_v62 = vld [vmem:[#allocation7 + $0x1410] sm:$0xff]  ;;  %v1299_v63 = vld [vmem:[#allocation7 + $0x1468] sm:$0xff] }
 0x23e   :  { %6583 = vmatpush1.bf16.msra.mxu1 %v6582_v8  ;;  %6457 = vmatprep.subr.bf16.mxu0 %v6456_v9  ;;  %v6602_v8 = vpack.c.bf16 %v1191_v3, %v1180_v1  ;;  %v6476_v9 = vpack.c.bf16 %v1212_v26, %v1201_v4  ;;  %v1290_v1 = vld [vmem:[#allocation7 + $0x1420] sm:$0xff]  ;;  %v1301_v3 = vld [vmem:[#allocation7 + $0x1478] sm:$0xff]  ;;  %v1311_v4 = vld [vmem:[#allocation7 + $0x14c8] sm:$0xff] }
 0x23f   :  { %6585 = vmatprep.subr.bf16.mxu1 %v6584_v12  ;;  %v6604_v12 = vpack.c.bf16 %v1214_v6, %v1203_v5  ;;  %v1322_v26 = vld [vmem:[#allocation7 + $0x1520] sm:$0xff]  ;;  %v1313_v5 = vld [vmem:[#allocation7 + $0x14d8] sm:$0xff]  ;;  %v1324_v6 = vld [vmem:[#allocation7 + $0x1530] sm:$0xff] }
 0x241   :  { %6459 = vmatpush1.bf16.msra.mxu0 %v6458_v19  ;;  %v6478_v19 = vpack.c.bf16 %v1211_v11, %v1200_v10  ;;  %v1310_v10 = vld [vmem:[#allocation7 + $0x14c0] sm:$0xff]  ;;  %v1321_v11 = vld [vmem:[#allocation7 + $0x1518] sm:$0xff] }
 0x242   :  { %6587 = vmatpush1.bf16.msra.mxu1 %v6586_v20  ;;  %6461 = vmatprep.subr.bf16.mxu0 %v6460_v22  ;;  %v6606_v20 = vpack.c.bf16 %v1213_v14, %v1202_v0  ;;  %v6480_v22 = vpack.c.bf16 %v1234_v16, %v1223_v15  ;;  %v1312_v0 = vld [vmem:[#allocation7 + $0x14d0] sm:$0xff]  ;;  %v1323_v14 = vld [vmem:[#allocation7 + $0x1528] sm:$0xff]  ;;  %v1333_v15 = vld [vmem:[#allocation7 + $0x1578] sm:$0xff] }
 0x243   :  { %6589 = vmatprep.subr.bf16.mxu1 %v6588_v27  ;;  %v6608_v27 = vpack.c.bf16 %v1236_v18, %v1225_v17  ;;  %v1344_v16 = vld [vmem:[#allocation7 + $0x15d0] sm:$0xff]  ;;  %v1335_v17 = vld [vmem:[#allocation7 + $0x1588] sm:$0xff]  ;;  %v1346_v18 = vld [vmem:[#allocation7 + $0x15e0] sm:$0xff] }
 0x245   :  { %6463 = vmatpush1.bf16.msra.mxu0 %v6462_v32  ;;  %v6482_v32 = vpack.c.bf16 %v1233_v24, %v1222_v23  ;;  %v1332_v23 = vld [vmem:[#allocation7 + $0x1570] sm:$0xff]  ;;  %v1343_v24 = vld [vmem:[#allocation7 + $0x15c8] sm:$0xff] }
 0x246   :  { %6591 = vmatpush1.bf16.msra.mxu1 %v6590_v33  ;;  %6465 = vmatprep.subr.bf16.mxu0 %v6464_v34  ;;  %v6610_v33 = vpack.c.bf16 %v1235_v28, %v1224_v25  ;;  %v6484_v34 = vpack.c.bf16 %v1256_v30, %v1245_v29  ;;  %v1334_v25 = vld [vmem:[#allocation7 + $0x1580] sm:$0xff]  ;;  %v1345_v28 = vld [vmem:[#allocation7 + $0x15d8] sm:$0xff]  ;;  %v655_v29 = vld [vmem:[#allocation7 + $0x48] sm:$0xff] }
 0x247   :  { %6593 = vmatprep.subr.bf16.mxu1 %v6592_v37  ;;  %v6612_v37 = vpack.c.bf16 %v1258_v31, %v1247_v48  ;;  %v666_v30 = vld [vmem:[#allocation7 + $0xa0] sm:$0xff]  ;;  %v832_v48 = vld [vmem:[#allocation7 + $0x5d0] sm:$0xff]  ;;  %v843_v31 = vld [vmem:[#allocation7 + $0x628] sm:$0xff] }
 0x249   :  { %6467 = vmatpush1.bf16.msra.mxu0 %v6466_v45  ;;  %v6486_v45 = vpack.c.bf16 %v1255_v36, %v1244_v35  ;;  %v6760_v35 = vpack.c.bf16 %v843_v31, %v832_v48  ;;  %v654_v36 = vld [vmem:[#allocation7 + $0x40] sm:$0xff]  ;;  %v755_v31 = vld [vmem:[#allocation7 + $0x368] sm:$0xff] }
 0x24a   :  { %6595 = vmatpush1.bf16.msra.mxu1 %v6594_v46  ;;  %6469 = vmatprep.subr.bf16.mxu0 %v6468_v47  ;;  %v6614_v46 = vpack.c.bf16 %v1257_v38, %v1246_v21  ;;  %v6488_v47 = vpack.c.bf16 %v1278_v41, %v1267_v39  ;;  %v665_v21 = vld [vmem:[#allocation7 + $0x98] sm:$0xff]  ;;  %v667_v38 = vld [vmem:[#allocation7 + $0xa8] sm:$0xff]  ;;  %v688_v41 = vld [vmem:[#allocation7 + $0x150] sm:$0xff] }
 0x24b   :  { %6597 = vmatprep.subr.bf16.mxu1 %v6596_v52  ;;  %v6616_v52 = vpack.c.bf16 %v1280_v43, %v1269_v42  ;;  %v677_v39 = vld [vmem:[#allocation7 + $0xf8] sm:$0xff]  ;;  %v854_v42 = vld [vmem:[#allocation7 + $0x680] sm:$0xff] }
 0x24c   :  { %v865_v43 = vld [vmem:[#allocation7 + $0x6d8] sm:$0xff] }
 0x24d   :  { %6471 = vmatpush1.bf16.msra.mxu0 %v6470_v59  ;;  %v6490_v59 = vpack.c.bf16 %v1277_v50, %v1266_v49  ;;  %v676_v49 = vld [vmem:[#allocation7 + $0xf0] sm:$0xff]  ;;  %v687_v50 = vld [vmem:[#allocation7 + $0x148] sm:$0xff] }
 0x24e   :  { %6599 = vmatpush1.bf16.msra.mxu1 %v6598_v60  ;;  %6473 = vmatprep.subr.bf16.mxu0 %v6472_v61  ;;  %v6618_v60 = vpack.c.bf16 %v1279_v53, %v1268_v51  ;;  %v6492_v61 = vpack.c.bf16 %v1300_v13, %v1289_v54  ;;  %v678_v51 = vld [vmem:[#allocation7 + $0x100] sm:$0xff]  ;;  %v6764_v53 = vpack.c.bf16 %v865_v43, %v854_v42  ;;  %v689_v54 = vld [vmem:[#allocation7 + $0x158] sm:$0xff]  ;;  %v699_v13 = vld [vmem:[#allocation7 + $0x1a8] sm:$0xff] }
 0x24f   :  { %6601 = vmatprep.subr.bf16.mxu1 %v6600_v2  ;;  %v6620_v2 = vpack.c.bf16 %v1302_v57, %v1291_v56  ;;  %v710_v56 = vld [vmem:[#allocation7 + $0x200] sm:$0xff]  ;;  %v8617_v57 = vld [vmem:[#allocation2 + $0x38] sm:$0x3f] }
 0x250   :  { %v777_v43 = vld [vmem:[#allocation7 + $0x418] sm:$0xff] }
 0x251   :  { %6475 = vmatpush1.bf16.msra.mxu0 %v6474_v7  ;;  %v6494_v7 = vpack.c.bf16 %v1299_v63, %v1288_v62  ;;  %v6766_v62 = vpack.c.bf16 %v689_v54, %v678_v51  ;;  %v6640_v63 = vpack.c.bf16 %v710_v56, %v699_v13  ;;  %v786_v54 = vld [vmem:[#allocation7 + $0x460] sm:$0xff]  ;;  %v797_v13 = vld [vmem:[#allocation7 + $0x4b8] sm:$0xff]  ;;  %v788_v56 = vld [vmem:[#allocation7 + $0x470] sm:$0xff] }
 0x252   :  { %6603 = vmatpush1.bf16.msra.mxu1 %v6602_v8  ;;  %6477 = vmatprep.subr.bf16.mxu0 %v6476_v9  ;;  %v6622_v8 = vpack.c.bf16 %v1301_v3, %v1290_v1  ;;  %v6496_v9 = vpack.c.bf16 %v1322_v26, %v1311_v4  ;;  %v698_v1 = vld [vmem:[#allocation7 + $0x1a0] sm:$0xff]  ;;  %v700_v3 = vld [vmem:[#allocation7 + $0x1b0] sm:$0xff] }
 0x253   :  { %6605 = vmatprep.subr.bf16.mxu1 %v6604_v12  ;;  %v6624_v12 = vpack.c.bf16 %v1324_v6, %v1313_v5  ;;  %v8621_v4 = vld [vmem:[#allocation2 + $0x30] sm:$0x3f]  ;;  %v711_v5 = vld [vmem:[#allocation7 + $0x208] sm:$0xff]  ;;  %v721_v6 = vld [vmem:[#allocation7 + $0x258] sm:$0xff] }
 0x255   :  { %6479 = vmatpush1.bf16.msra.mxu0 %v6478_v19  ;;  %v6498_v19 = vpack.c.bf16 %v1321_v11, %v1310_v10  ;;  %v909_v10 = vld [vmem:[#allocation7 + $0x838] sm:$0xff] }
 0x256   :  { %6607 = vmatpush1.bf16.msra.mxu1 %v6606_v20  ;;  %6481 = vmatprep.subr.bf16.mxu0 %v6480_v22  ;;  %v6626_v20 = vpack.c.bf16 %v1323_v14, %v1312_v0  ;;  %v6500_v22 = vpack.c.bf16 %v1344_v16, %v1333_v15  ;;  %v6770_v0 = vpack.c.bf16 %v711_v5, %v700_v3  ;;  %v720_v14 = vld [vmem:[#allocation7 + $0x250] sm:$0xff]  ;;  %v731_v15 = vld [vmem:[#allocation7 + $0x2a8] sm:$0xff]  ;;  %v722_v16 = vld [vmem:[#allocation7 + $0x260] sm:$0xff] }
 0x257   :  { %6609 = vmatprep.subr.bf16.mxu1 %v6608_v27  ;;  %v6628_v27 = vpack.c.bf16 %v1346_v18, %v1335_v17  ;;  %v733_v18 = vld [vmem:[#allocation7 + $0x2b8] sm:$0xff]  ;;  %v808_v5 = vld [vmem:[#allocation7 + $0x510] sm:$0xff] }
 0x259   :  { %6483 = vmatpush1.bf16.msra.mxu0 %v6482_v32  ;;  %v6502_v32 = vpack.c.bf16 %v1343_v24, %v1332_v23  ;;  %v931_v23 = vld [vmem:[#allocation7 + $0x8e8] sm:$0xff]  ;;  %v6646_v24 = vpack.c.bf16 %v731_v15, %v720_v14 }
 0x25a   :  { %6611 = vmatpush1.bf16.msra.mxu1 %v6610_v33  ;;  %6485 = vmatprep.subr.bf16.mxu0 %v6484_v34  ;;  %v6630_v33 = vpack.c.bf16 %v1345_v28, %v1334_v25  ;;  %v6632_v34 = vpack.c.bf16 %v666_v30, %v655_v29  ;;  %v6774_v25 = vpack.c.bf16 %v733_v18, %v722_v16  ;;  %v742_v28 = vld [vmem:[#allocation7 + $0x300] sm:$0xff]  ;;  %v753_v29 = vld [vmem:[#allocation7 + $0x358] sm:$0xff]  ;;  %v744_v30 = vld [vmem:[#allocation7 + $0x310] sm:$0xff] }
 0x25b   :  { %6613 = vmatprep.subr.bf16.mxu1 %v6612_v37  ;;  %v656_v37 = vld [vmem:[#allocation7 + $0x50] sm:$0xff]  ;;  %v841_v18 = vld [vmem:[#allocation7 + $0x618] sm:$0xff] }
 0x25d   :  { %6487 = vmatpush1.bf16.msra.mxu0 %v6486_v45  ;;  %v6634_v45 = vpack.c.bf16 %v665_v21, %v654_v36  ;;  %v6650_v36 = vpack.c.bf16 %v753_v29, %v742_v28  ;;  %v6778_v21 = vpack.c.bf16 %v755_v31, %v744_v30  ;;  %v852_v30 = vld [vmem:[#allocation7 + $0x670] sm:$0xff] }
 0x25e   :  { %6615 = vmatpush1.bf16.msra.mxu1 %v6614_v46  ;;  %6489 = vmatprep.subr.bf16.mxu0 %v6488_v47  ;;  %v6762_v46 = vpack.c.bf16 %v667_v38, %v656_v37  ;;  %v6636_v47 = vpack.c.bf16 %v688_v41, %v677_v39  ;;  %v764_v38 = vld [vmem:[#allocation7 + $0x3b0] sm:$0xff]  ;;  %v775_v39 = vld [vmem:[#allocation7 + $0x408] sm:$0xff]  ;;  %v766_v41 = vld [vmem:[#allocation7 + $0x3c0] sm:$0xff] }
 0x25f   :  { %6617 = vmatprep.subr.bf16.mxu1 %v6616_v52  ;;  %v8613_v52 = vld [vmem:[#allocation2 + $0x10] sm:$0xff]  ;;  %v6782_v51 = vpack.c.bf16 %v777_v43, %v766_v41  ;;  %v874_v41 = vld [vmem:[#allocation7 + $0x720] sm:$0xff] }
 0x260   :  { %v1052_v43 = vld [vmem:[#allocation7 + $0xcb0] sm:$0xff] }
 0x261   :  { %6491 = vmatpush1.bf16.msra.mxu0 %v6490_v59  ;;  %v876_v59 = vld [vmem:[#allocation7 + $0x730] sm:$0xff] }
 0x262   :  { %6619 = vmatpush1.bf16.msra.mxu1 %v6618_v60  ;;  %6493 = vmatprep.subr.bf16.mxu0 %v6492_v61  ;;  %v887_v60 = vld [vmem:[#allocation7 + $0x788] sm:$0xff]  ;;  %v6638_v61 = vpack.c.bf16 %v687_v50, %v676_v49  ;;  %v6654_v50 = vpack.c.bf16 %v775_v39, %v764_v38 }
 0x263   :  { %6621 = vmatprep.subr.bf16.mxu1 %v6620_v2  ;;  %v709_v2 = vld [vmem:[#allocation7 + $0x1f8] sm:$0xff]  ;;  %v6768_v26 = vpack.c.bf16 %v887_v60, %v876_v59  ;;  %v975_v49 = vld [vmem:[#allocation7 + $0xa48] sm:$0xff] }
 0x264   :  { %v6642_v11 = vpack.c.bf16 %v709_v2, %v698_v1  ;;  %v799_v60 = vld [vmem:[#allocation7 + $0x4c8] sm:$0xff]  ;;  %v997_v1 = vld [vmem:[#allocation7 + $0xaf8] sm:$0xff]  ;;  %v6658_v2 = vpack.c.bf16 %v797_v13, %v786_v54  ;;  %v896_v13 = vld [vmem:[#allocation7 + $0x7d0] sm:$0xff] }
 0x265   :  { %6495 = vmatpush1.bf16.msra.mxu0 %v6494_v7  ;;  %v732_v7 = vld [vmem:[#allocation7 + $0x2b0] sm:$0xff]  ;;  %v6786_v3 = vpack.c.bf16 %v799_v60, %v788_v56  ;;  %v907_v56 = vld [vmem:[#allocation7 + $0x828] sm:$0xff] }
 0x266   :  { %6623 = vmatpush1.bf16.msra.mxu1 %v6622_v8  ;;  %6497 = vmatprep.subr.bf16.mxu0 %v6496_v9  ;;  %v8328_v8 = vld [vmem:[#allocation2 + $0x8] sm:$0xff]  ;;  %v898_v9 = vld [vmem:[#allocation7 + $0x7e0] sm:$0xff] }
 0x267   :  { %6625 = vmatprep.subr.bf16.mxu1 %v6624_v12  ;;  %v6644_v12 = vpack.c.bf16 %v732_v7, %v721_v6  ;;  %v6772_v17 = vpack.c.bf16 %v909_v10, %v898_v9  ;;  %v819_v6 = vld [vmem:[#allocation7 + $0x568] sm:$0xff]  ;;  %v810_v7 = vld [vmem:[#allocation7 + $0x520] sm:$0xff]  ;;  %v821_v9 = vld [vmem:[#allocation7 + $0x578] sm:$0xff] }
 0x268   :  { %v831_v10 = vld [vmem:[#allocation7 + $0x5c8] sm:$0xff]  ;;  %v6662_v14 = vpack.c.bf16 %v819_v6, %v808_v5  ;;  %v6790_v15 = vpack.c.bf16 %v821_v9, %v810_v7  ;;  %v929_v5 = vld [vmem:[#allocation7 + $0x8d8] sm:$0xff]  ;;  %v1096_v6 = vld [vmem:[#allocation7 + $0xe10] sm:$0xff] }
 0x269   :  { %6499 = vmatpush1.bf16.msra.mxu0 %v6498_v19  ;;  %v743_v19 = vld [vmem:[#allocation7 + $0x308] sm:$0xff]  ;;  %v941_v9 = vld [vmem:[#allocation7 + $0x938] sm:$0xff] }
 0x26a   :  { %6627 = vmatpush1.bf16.msra.mxu1 %v6626_v20  ;;  %6501 = vmatprep.subr.bf16.mxu0 %v6500_v22  ;;  %v754_v20 = vld [vmem:[#allocation7 + $0x360] sm:$0xff]  ;;  %v920_v22 = vld [vmem:[#allocation7 + $0x890] sm:$0xff] }
 0x26b   :  { %6629 = vmatprep.subr.bf16.mxu1 %v6628_v27  ;;  %v6648_v27 = vpack.c.bf16 %v754_v20, %v743_v19  ;;  %v6776_v48 = vpack.c.bf16 %v931_v23, %v920_v22  ;;  %v1008_v20 = vld [vmem:[#allocation7 + $0xb50] sm:$0xff]  ;;  %v1019_v22 = vld [vmem:[#allocation7 + $0xba8] sm:$0xff]  ;;  %v853_v23 = vld [vmem:[#allocation7 + $0x678] sm:$0xff] }
 0x26c   :  { %v6794_v29 = vpack.c.bf16 %v1019_v22, %v1008_v20  ;;  %v1129_v20 = vld [vmem:[#allocation7 + $0xf18] sm:$0xff]  ;;  %v963_v22 = vld [vmem:[#allocation7 + $0x9e8] sm:$0xff] }
 0x26d   :  { %6503 = vmatpush1.bf16.msra.mxu0 %v6502_v32  ;;  %v765_v32 = vld [vmem:[#allocation7 + $0x3b8] sm:$0xff] }
 0x26e   :  { %6631 = vmatpush1.bf16.msra.mxu1 %v6630_v33  ;;  %6633 = vmatprep.subr.bf16.mxu0 %v6632_v34  ;;  %v776_v33 = vld [vmem:[#allocation7 + $0x410] sm:$0xff]  ;;  %v942_v34 = vld [vmem:[#allocation7 + $0x940] sm:$0xff] }
 0x26f   :  { %6761 = vmatprep.subr.bf16.mxu1 %v6760_v35  ;;  %v953_v35 = vld [vmem:[#allocation7 + $0x998] sm:$0xff]  ;;  %v6652_v37 = vpack.c.bf16 %v776_v33, %v765_v32  ;;  %v1030_v33 = vld [vmem:[#allocation7 + $0xc00] sm:$0xff] }
 0x270   :  { %1800 = vmatmul.mubr.f32.vlgmr.msra.gmra.mrb[10].mxu0 %v8613_v52  ;;  %v6780_v42 = vpack.c.bf16 %v953_v35, %v942_v34  ;;  %v1041_v34 = vld [vmem:[#allocation7 + $0xc58] sm:$0xff]  ;;  %v875_v35 = vld [vmem:[#allocation7 + $0x728] sm:$0xff] }
 0x271   :  { %1954 = vmatmul.mubr.f32.vlgmr.msra.gmra.mrb[6].mxu1 %v8613_v52  ;;  %1805 = vmatprep.mubr.f32.mxu0 %v8617_v57  ;;  %v6798_v39 = vpack.c.bf16 %v1041_v34, %v1030_v33  ;;  %v1151_v33 = vld [vmem:[#allocation7 + $0xfc8] sm:$0xff]  ;;  %v985_v34 = vld [vmem:[#allocation7 + $0xa98] sm:$0xff] }
 0x272   :  { %1959 = vmatprep.mubr.f32.mxu1 %v8617_v57  ;;  %6635 = vmatpush1.bf16.msra.mxu0 %v6634_v45  ;;  %v787_v45 = vld [vmem:[#allocation7 + $0x468] sm:$0xff] }
 0x273   :  { %6763 = vmatpush3.bf16.msra.mxu1 %v6762_v46  ;;  %6637 = vmatprep.subr.bf16.mxu0 %v6636_v47  ;;  %v798_v46 = vld [vmem:[#allocation7 + $0x4c0] sm:$0xff]  ;;  %v964_v47 = vld [vmem:[#allocation7 + $0x9f0] sm:$0xff] }
 0x274   :  { %1806 = vmatmul.mubr.f32.gmra.mrb[12].mxu0 %v8621_v4  ;;  %6765 = vmatprep.subr.bf16.mxu1 %v6764_v53  ;;  %v6656_v53 = vpack.c.bf16 %v798_v46, %v787_v45  ;;  %v6784_v59 = vpack.c.bf16 %v975_v49, %v964_v47  ;;  %v1063_v47 = vld [vmem:[#allocation7 + $0xd08] sm:$0xff]  ;;  %v897_v49 = vld [vmem:[#allocation7 + $0x7d8] sm:$0xff] }
 0x275   :  { %1960 = vmatmul.mubr.f32.gmra.mrb[8].mxu1 %v8621_v4  ;;  %2030 = vmatprep.mubr.f32.mxu0 %v8328_v8 }
 0x276   :  { %6639 = vmatpush1.bf16.msra.mxu0 %v6638_v61  ;;  %2184 = vmatprep.mubr.f32.mxu1 %v8328_v8  ;;  %v809_v61 = vld [vmem:[#allocation7 + $0x518] sm:$0xff] }
 0x277   :  { %6767 = vmatpush3.bf16.msra.mxu1 %v6766_v62  ;;  %6641 = vmatprep.subr.bf16.mxu0 %v6640_v63  ;;  %v820_v62 = vld [vmem:[#allocation7 + $0x570] sm:$0xff]  ;;  %v986_v63 = vld [vmem:[#allocation7 + $0xaa0] sm:$0xff] }
 0x278   :  { %6769 = vmatprep.subr.bf16.mxu1 %v6768_v26  ;;  %v6660_v26 = vpack.c.bf16 %v820_v62, %v809_v61  ;;  %v6788_v8 = vpack.c.bf16 %v997_v1, %v986_v63  ;;  %v1085_v61 = vld [vmem:[#allocation7 + $0xdb8] sm:$0xff]  ;;  %v919_v62 = vld [vmem:[#allocation7 + $0x888] sm:$0xff]  ;;  %v930_v63 = vld [vmem:[#allocation7 + $0x8e0] sm:$0xff] }
 0x279   :  { %v1272_v1 = vld [vmem:[#allocation7 + $0x1390] sm:$0xff] }
 0x27a   :  { %6643 = vmatpush1.bf16.msra.mxu0 %v6642_v11  ;;  %v842_v11 = vld [vmem:[#allocation7 + $0x620] sm:$0xff] }
 0x27b   :  { %6771 = vmatpush3.bf16.msra.mxu1 %v6770_v0  ;;  %6645 = vmatprep.subr.bf16.mxu0 %v6644_v12  ;;  %v1184_v0 = vld [vmem:[#allocation7 + $0x10d0] sm:$0xff]  ;;  %v1195_v12 = vld [vmem:[#allocation7 + $0x1128] sm:$0xff]  ;;  %v6664_v16 = vpack.c.bf16 %v842_v11, %v831_v10  ;;  %v1294_v11 = vld [vmem:[#allocation7 + $0x1440] sm:$0xff] }
 0x27c   :  { %6773 = vmatprep.subr.bf16.mxu1 %v6772_v17  ;;  %v830_v17 = vld [vmem:[#allocation7 + $0x5c0] sm:$0xff]  ;;  %v6792_v19 = vpack.c.bf16 %v1195_v12, %v1184_v0  ;;  %v952_v10 = vld [vmem:[#allocation7 + $0x990] sm:$0xff]  ;;  %v1305_v0 = vld [vmem:[#allocation7 + $0x1498] sm:$0xff] }
 0x27d   :  { %v6666_v28 = vpack.c.bf16 %v841_v18, %v830_v17  ;;  %v951_v17 = vld [vmem:[#allocation7 + $0x988] sm:$0xff]  ;;  %v1118_v18 = vld [vmem:[#allocation7 + $0xec0] sm:$0xff] }
 0x27e   :  { %6647 = vmatpush1.bf16.msra.mxu0 %v6646_v24  ;;  %v864_v24 = vld [vmem:[#allocation7 + $0x6d0] sm:$0xff] }
 0x27f   :  { %6775 = vmatpush3.bf16.msra.mxu1 %v6774_v25  ;;  %6649 = vmatprep.subr.bf16.mxu0 %v6648_v27  ;;  %v1206_v25 = vld [vmem:[#allocation7 + $0x1180] sm:$0xff]  ;;  %v1217_v27 = vld [vmem:[#allocation7 + $0x11d8] sm:$0xff]  ;;  %v6668_v31 = vpack.c.bf16 %v864_v24, %v853_v23  ;;  %v1316_v24 = vld [vmem:[#allocation7 + $0x14f0] sm:$0xff] }
 0x280   :  { %6777 = vmatprep.subr.bf16.mxu1 %v6776_v48  ;;  %v863_v48 = vld [vmem:[#allocation7 + $0x6c8] sm:$0xff]  ;;  %v6796_v32 = vpack.c.bf16 %v1217_v27, %v1206_v25  ;;  %v974_v23 = vld [vmem:[#allocation7 + $0xa40] sm:$0xff] }
 0x281   :  { %v6670_v38 = vpack.c.bf16 %v863_v48, %v852_v30  ;;  %v1327_v25 = vld [vmem:[#allocation7 + $0x1548] sm:$0xff]  ;;  %v962_v30 = vld [vmem:[#allocation7 + $0x9e0] sm:$0xff]  ;;  %v973_v48 = vld [vmem:[#allocation7 + $0xa38] sm:$0xff] }
 0x282   :  { %6651 = vmatpush1.bf16.msra.mxu0 %v6650_v36  ;;  %v886_v36 = vld [vmem:[#allocation7 + $0x780] sm:$0xff] }
 0x283   :  { %6779 = vmatpush3.bf16.msra.mxu1 %v6778_v21  ;;  %6653 = vmatprep.subr.bf16.mxu0 %v6652_v37  ;;  %v1228_v21 = vld [vmem:[#allocation7 + $0x1230] sm:$0xff]  ;;  %v1239_v37 = vld [vmem:[#allocation7 + $0x1288] sm:$0xff]  ;;  %v6672_v45 = vpack.c.bf16 %v886_v36, %v875_v35  ;;  %v1338_v36 = vld [vmem:[#allocation7 + $0x15a0] sm:$0xff] }
 0x284   :  { %6781 = vmatprep.subr.bf16.mxu1 %v6780_v42  ;;  %v885_v42 = vld [vmem:[#allocation7 + $0x778] sm:$0xff]  ;;  %v6800_v46 = vpack.c.bf16 %v1239_v37, %v1228_v21  ;;  %v996_v35 = vld [vmem:[#allocation7 + $0xaf0] sm:$0xff]  ;;  %v6690_v37 = vpack.c.bf16 %v973_v48, %v962_v30 }
 0x285   :  { %v1349_v21 = vld [vmem:[#allocation7 + $0x15f8] sm:$0xff] }
 0x286   :  { %6655 = vmatpush1.bf16.msra.mxu0 %v6654_v50  ;;  %v908_v50 = vld [vmem:[#allocation7 + $0x830] sm:$0xff]  ;;  %v8332_v30 = vld [vmem:[#allocation2 + $0x18] sm:$0xff] }
 0x287   :  { %6783 = vmatpush3.bf16.msra.mxu1 %v6782_v51  ;;  %6657 = vmatprep.subr.bf16.mxu0 %v6656_v53  ;;  %v1250_v51 = vld [vmem:[#allocation7 + $0x12e0] sm:$0xff]  ;;  %v1261_v53 = vld [vmem:[#allocation7 + $0x1338] sm:$0xff]  ;;  %v6676_v54 = vpack.c.bf16 %v908_v50, %v897_v49  ;;  %v2330_v50 = vld [vmem:[#allocation8 + $0x8] sm:$0xff] }
 0x288   :  { %6785 = vmatprep.subr.bf16.mxu1 %v6784_v59  ;;  %v1074_v59 = vld [vmem:[#allocation7 + $0xd60] sm:$0xff]  ;;  %v6804_v60 = vpack.c.bf16 %v1261_v53, %v1250_v51  ;;  %v2396_v48 = vld [vmem:[#allocation8 + $0x218] sm:$0xff] }
 0x289   :  { %v1018_v49 = vld [vmem:[#allocation7 + $0xba0] sm:$0xff] }
 0x28a   :  { %6659 = vmatpush1.bf16.msra.mxu0 %v6658_v2  ;;  %v1283_v2 = vld [vmem:[#allocation7 + $0x13e8] sm:$0xff]  ;;  %v2341_v51 = vld [vmem:[#allocation8 + $0x60] sm:$0xff] }
 0x28b   :  { %6787 = vmatpush3.bf16.msra.mxu1 %v6786_v3  ;;  %6661 = vmatprep.subr.bf16.mxu0 %v6660_v26  ;;  %v6806_v3 = vpack.c.bf16 %v1085_v61, %v1074_v59  ;;  %v6680_v26 = vpack.c.bf16 %v930_v63, %v919_v62  ;;  %v6808_v7 = vpack.c.bf16 %v1283_v2, %v1272_v1  ;;  %v2329_v59 = vld [vmem:[#allocation8] sm:$0xff]  ;;  %v1029_v61 = vld [vmem:[#allocation7 + $0xbf8] sm:$0xff]  ;;  %v1040_v62 = vld [vmem:[#allocation7 + $0xc50] sm:$0xff] }
 0x28c   :  { %6789 = vmatprep.subr.bf16.mxu1 %v6788_v8  ;;  %v1107_v8 = vld [vmem:[#allocation7 + $0xe68] sm:$0xff]  ;;  %v2352_v63 = vld [vmem:[#allocation8 + $0xb8] sm:$0xff]  ;;  %v2363_v1 = vld [vmem:[#allocation8 + $0x110] sm:$0xff] }
 0x28e   :  { %6663 = vmatpush1.bf16.msra.mxu0 %v6662_v14  ;;  %v6810_v14 = vpack.c.bf16 %v1107_v8, %v1096_v6  ;;  %v1039_v6 = vld [vmem:[#allocation7 + $0xc48] sm:$0xff]  ;;  %v8329_v8 = vld [vmem:[#allocation2] sm:$0xff] }
 0x28f   :  { %6791 = vmatpush3.bf16.msra.mxu1 %v6790_v15  ;;  %6665 = vmatprep.subr.bf16.mxu0 %v6664_v16  ;;  %v6684_v15 = vpack.c.bf16 %v952_v10, %v941_v9  ;;  %v940_v16 = vld [vmem:[#allocation7 + $0x930] sm:$0xff]  ;;  %v6828_v9 = vpack.c.bf16 %v2363_v1, %v2352_v63  ;;  %v2362_v10 = vld [vmem:[#allocation8 + $0x108] sm:$0xff] }
 0x290   :  { %6793 = vmatprep.subr.bf16.mxu1 %v6792_v19  ;;  %v6812_v19 = vpack.c.bf16 %v1305_v0, %v1294_v11  ;;  %v6686_v27 = vpack.c.bf16 %v951_v17, %v940_v16  ;;  %v1051_v11 = vld [vmem:[#allocation7 + $0xca8] sm:$0xff]  ;;  %v1062_v0 = vld [vmem:[#allocation7 + $0xd00] sm:$0xff]  ;;  %v2439_v63 = vld [vmem:[#allocation8 + $0x370] sm:$0xff] }
 0x291   :  { %v2374_v16 = vld [vmem:[#allocation8 + $0x168] sm:$0xff]  ;;  %v2385_v17 = vld [vmem:[#allocation8 + $0x1c0] sm:$0xff] }
 0x292   :  { %2185 = vmatmul.mubr.f32.vlgmr.msra.gmra.mrb[10].mxu1 %v8597_v40  ;;  %6667 = vmatpush1.bf16.msra.mxu0 %v6666_v28  ;;  %v6674_v40 = vpack.c.bf16 %v885_v42, %v874_v41  ;;  %v6814_v28 = vpack.c.bf16 %v1129_v20, %v1118_v18  ;;  %v984_v41 = vld [vmem:[#allocation7 + $0xa90] sm:$0xff]  ;;  %v995_v42 = vld [vmem:[#allocation7 + $0xae8] sm:$0xff]  ;;  %v6704_v20 = vpack.c.bf16 %v1062_v0, %v1051_v11  ;;  %v1138_v0 = vld [vmem:[#allocation7 + $0xf60] sm:$0xff] }
 0x293   :  { %2189 = vmatprep.mubr.f32.mxu1 %v8601_v44  ;;  %6795 = vmatpush3.bf16.msra.mxu1 %v6794_v29  ;;  %v6802_v44 = vpack.c.bf16 %v1063_v47, %v1052_v43  ;;  %v6688_v29 = vpack.c.bf16 %v974_v23, %v963_v22  ;;  %v1162_v43 = vld [vmem:[#allocation7 + $0x1020] sm:$0xff]  ;;  %v1007_v47 = vld [vmem:[#allocation7 + $0xb48] sm:$0xff]  ;;  %v6694_v53 = vpack.c.bf16 %v995_v42, %v984_v41  ;;  %v1061_v23 = vld [vmem:[#allocation7 + $0xcf8] sm:$0xff] }
 0x294   :  { %6669 = vmatprep.subr.bf16.mxu0 %v6668_v31  ;;  %6797 = vmatprep.subr.bf16.mxu1 %v6796_v32  ;;  %v1140_v31 = vld [vmem:[#allocation7 + $0xf70] sm:$0xff]  ;;  %v6816_v32 = vpack.c.bf16 %v1327_v25, %v1316_v24  ;;  %v1050_v22 = vld [vmem:[#allocation7 + $0xca0] sm:$0xff]  ;;  %v2418_v41 = vld [vmem:[#allocation8 + $0x2c8] sm:$0xff] }
 0x295   :  { %v2373_v24 = vld [vmem:[#allocation8 + $0x160] sm:$0xff] }
 0x296   :  { %2190 = vmatmul.mubr.f32.gmra.mrb[12].mxu1 %v8605_v55  ;;  %6671 = vmatpush1.bf16.msra.mxu0 %v6670_v38  ;;  %v6678_v55 = vpack.c.bf16 %v907_v56, %v896_v13  ;;  %v6818_v38 = vpack.c.bf16 %v1151_v33, %v1140_v31  ;;  %v1006_v13 = vld [vmem:[#allocation7 + $0xb40] sm:$0xff]  ;;  %v1017_v56 = vld [vmem:[#allocation7 + $0xb98] sm:$0xff]  ;;  %v2407_v31 = vld [vmem:[#allocation8 + $0x270] sm:$0xff] }
 0x297   :  { %6799 = vmatpush3.bf16.msra.mxu1 %v6798_v39  ;;  %2259 = vmatprep.mubr.f32.mxu1 %v8609_v58  ;;  %v918_v58 = vld [vmem:[#allocation7 + $0x880] sm:$0xff]  ;;  %v6692_v39 = vpack.c.bf16 %v996_v35, %v985_v34  ;;  %v6698_v2 = vpack.c.bf16 %v1017_v56, %v1006_v13  ;;  %v1072_v35 = vld [vmem:[#allocation7 + $0xd50] sm:$0xff] }
 0x298   :  { %6673 = vmatprep.subr.bf16.mxu0 %v6672_v45  ;;  %6801 = vmatprep.subr.bf16.mxu1 %v6800_v46  ;;  %v6682_v12 = vpack.c.bf16 %v929_v5, %v918_v58  ;;  %v6820_v45 = vpack.c.bf16 %v1349_v21, %v1338_v36  ;;  %v1173_v46 = vld [vmem:[#allocation7 + $0x1078] sm:$0xff]  ;;  %v6700_v58 = vpack.c.bf16 %v1040_v62, %v1029_v61  ;;  %v1028_v5 = vld [vmem:[#allocation7 + $0xbf0] sm:$0xff]  ;;  %v8331_v25 = vld [vmem:[#allocation2 + $0x20] sm:$0x3f] }
 0x299   :  { %v6702_v18 = vpack.c.bf16 %v1039_v6, %v1028_v5  ;;  %v1083_v36 = vld [vmem:[#allocation7 + $0xda8] sm:$0xff]  ;;  %v2395_v21 = vld [vmem:[#allocation8 + $0x210] sm:$0xff]  ;;  %v2429_v42 = vld [vmem:[#allocation8 + $0x320] sm:$0xff] }
 0x29a   :  { %6675 = vmatpush1.bf16.msra.mxu0 %v6674_v40  ;;  %v6822_v40 = vpack.c.bf16 %v1173_v46, %v1162_v43  ;;  %v6710_v43 = vpack.c.bf16 %v1083_v36, %v1072_v35  ;;  %v2451_v13 = vld [vmem:[#allocation8 + $0x3d0] sm:$0xff]  ;;  %v1127_v62 = vld [vmem:[#allocation7 + $0xf08] sm:$0xff]  ;;  %v2473_v6 = vld [vmem:[#allocation8 + $0x480] sm:$0xff] }
 0x29b   :  { %6803 = vmatpush3.bf16.msra.mxu1 %v6802_v44  ;;  %6677 = vmatprep.subr.bf16.mxu0 %v6676_v54  ;;  %v6696_v44 = vpack.c.bf16 %v1018_v49, %v1007_v47  ;;  %v6824_v54 = vpack.c.bf16 %v2341_v51, %v2330_v50  ;;  %v1094_v47 = vld [vmem:[#allocation7 + $0xe00] sm:$0xff]  ;;  %v1105_v49 = vld [vmem:[#allocation7 + $0xe58] sm:$0xff]  ;;  %v6840_v51 = vpack.c.bf16 %v2429_v42, %v2418_v41  ;;  %v1116_v61 = vld [vmem:[#allocation7 + $0xeb0] sm:$0xff] }
 0x29c   :  { %6805 = vmatprep.subr.bf16.mxu1 %v6804_v60  ;;  %v2340_v60 = vld [vmem:[#allocation8 + $0x58] sm:$0xff]  ;;  %v2417_v50 = vld [vmem:[#allocation8 + $0x2c0] sm:$0xff]  ;;  %v6714_v56 = vpack.c.bf16 %v1105_v49, %v1094_v47  ;;  %v2462_v5 = vld [vmem:[#allocation8 + $0x428] sm:$0xff] }
 0x29d   :  { %v1194_v35 = vld [vmem:[#allocation7 + $0x1120] sm:$0xff]  ;;  %v2506_v36 = vld [vmem:[#allocation8 + $0x588] sm:$0xff]  ;;  %v1193_v41 = vld [vmem:[#allocation7 + $0x1118] sm:$0xff] }
 0x29e   :  { %6679 = vmatpush1.bf16.msra.mxu0 %v6678_v55  ;;  %v2293_v55 = vld [vmem:[#allocation2 + $0x8] sm:$0xfc]  ;;  %v2505_v42 = vld [vmem:[#allocation8 + $0x580] sm:$0xff]  ;;  %v1216_v47 = vld [vmem:[#allocation7 + $0x11d0] sm:$0xff] }
 0x29f   :  { %6807 = vmatpush3.bf16.msra.mxu1 %v6806_v3  ;;  %6681 = vmatprep.subr.bf16.mxu0 %v6680_v26  ;;  %v2297_v3 = vld [vmem:[#allocation2 + $0x28] sm:$0x3f]  ;;  %v6826_v26 = vpack.c.bf16 %v2340_v60, %v2329_v59  ;;  %v2528_v49 = vld [vmem:[#allocation8 + $0x638] sm:$0xff] }
 0x2a0   :  { %6809 = vmatprep.subr.bf16.mxu1 %v6808_v7  ;;  %v2351_v7 = vld [vmem:[#allocation8 + $0xb0] sm:$0xff] }
 0x2a2   :  { %6683 = vmatpush1.bf16.msra.mxu0 %v6682_v12  ;;  %v8330_v12 = vld [vmem:[#allocation2 + $0x28] sm:$0x3f] }
 0x2a3   :  { %6811 = vmatpush3.bf16.msra.mxu1 %v6810_v14  ;;  %6685 = vmatprep.subr.bf16.mxu0 %v6684_v15  ;;  %v3749_v14 = vrot.slane %v2293_v55, 2  ;;  %v8630_v15 = vrot.slane %v2297_v3, 2  ;;  %v1139_v55 = vld [vmem:[#allocation7 + $0xf68] sm:$0xff]  ;;  %v1150_v3 = vld [vmem:[#allocation7 + $0xfc0] sm:$0xff] }
 0x2a4   :  { %6813 = vmatprep.subr.bf16.mxu1 %v6812_v19  ;;  %v6830_v19 = vpack.c.bf16 %v2362_v10, %v2351_v7  ;;  %v6720_v11 = vpack.c.bf16 %v1150_v3, %v1139_v55  ;;  %v1226_v3 = vld [vmem:[#allocation7 + $0x1220] sm:$0xff] }
 0x2a6   :  { %6687 = vmatpush1.bf16.msra.mxu0 %v6686_v27  ;;  %v2384_v27 = vld [vmem:[#allocation8 + $0x1b8] sm:$0xff] }
 0x2a7   :  { %6815 = vmatpush3.bf16.msra.mxu1 %v6814_v28  ;;  %6689 = vmatprep.subr.bf16.mxu0 %v6688_v29  ;;  %v1073_v28 = vld [vmem:[#allocation7 + $0xd58] sm:$0xff]  ;;  %v1084_v29 = vld [vmem:[#allocation7 + $0xdb0] sm:$0xff]  ;;  %v6834_v33 = vpack.c.bf16 %v2384_v27, %v2373_v24 }
 0x2a8   :  { %6817 = vmatprep.subr.bf16.mxu1 %v6816_v32  ;;  %v6706_v32 = vpack.c.bf16 %v1061_v23, %v1050_v22  ;;  %v6708_v34 = vpack.c.bf16 %v1084_v29, %v1073_v28  ;;  %v2484_v23 = vld [vmem:[#allocation8 + $0x4d8] sm:$0xff]  ;;  %v2495_v24 = vld [vmem:[#allocation8 + $0x530] sm:$0xff] }
 0x2aa   :  { %6691 = vmatpush1.bf16.msra.mxu0 %v6690_v37  ;;  %v2406_v37 = vld [vmem:[#allocation8 + $0x268] sm:$0xff] }
 0x2ab   :  { %6819 = vmatpush3.bf16.msra.mxu1 %v6818_v38  ;;  %6693 = vmatprep.subr.bf16.mxu0 %v6692_v39  ;;  %v1095_v38 = vld [vmem:[#allocation7 + $0xe08] sm:$0xff]  ;;  %v1106_v39 = vld [vmem:[#allocation7 + $0xe60] sm:$0xff] }
 0x2ac   :  { %6821 = vmatprep.subr.bf16.mxu1 %v6820_v45  ;;  %v6838_v45 = vpack.c.bf16 %v2406_v37, %v2395_v21  ;;  %v6712_v46 = vpack.c.bf16 %v1106_v39, %v1095_v38  ;;  %v2517_v21 = vld [vmem:[#allocation8 + $0x5e0] sm:$0xff] }
 0x2ad   :  { %v1182_v39 = vld [vmem:[#allocation7 + $0x10c0] sm:$0xff] }
 0x2ae   :  { %6695 = vmatpush1.bf16.msra.mxu0 %v6694_v53  ;;  %v2428_v53 = vld [vmem:[#allocation8 + $0x318] sm:$0xff] }
 0x2af   :  { %6823 = vmatpush3.bf16.msra.mxu1 %v6822_v40  ;;  %6697 = vmatprep.subr.bf16.mxu0 %v6696_v44  ;;  %v1117_v40 = vld [vmem:[#allocation7 + $0xeb8] sm:$0xff]  ;;  %v1128_v44 = vld [vmem:[#allocation7 + $0xf10] sm:$0xff]  ;;  %v6842_v59 = vpack.c.bf16 %v2428_v53, %v2417_v50 }
 0x2b0   :  { %6825 = vmatprep.subr.bf16.mxu1 %v6824_v54  ;;  %v2440_v54 = vld [vmem:[#allocation8 + $0x378] sm:$0xff]  ;;  %v6716_v60 = vpack.c.bf16 %v1128_v44, %v1117_v40  ;;  %v2539_v50 = vld [vmem:[#allocation8 + $0x690] sm:$0xff] }
 0x2b1   :  { %2031 = vmatmul.mubr.f32.vlgmr.msra.gmra.mrb[14].mxu0 %v8329_v8  ;;  %v6844_v1 = vpack.c.bf16 %v2451_v13, %v2440_v54  ;;  %v1204_v44 = vld [vmem:[#allocation7 + $0x1170] sm:$0xff]  ;;  %v1215_v54 = vld [vmem:[#allocation7 + $0x11c8] sm:$0xff] }
 0x2b2   :  { %2260 = vmatmul.mubr.f32.vlgmr.msra.gmra.mrb[14].mxu1 %v8613_v52  ;;  %2036 = vmatprep.mubr.f32.mxu0 %v8330_v12  ;;  %v6832_v52 = vpack.c.bf16 %v2385_v17, %v2374_v16  ;;  %v1149_v12 = vld [vmem:[#allocation7 + $0xfb8] sm:$0xff]  ;;  %v6848_v16 = vpack.c.bf16 %v2473_v6, %v2462_v5  ;;  %v2527_v13 = vld [vmem:[#allocation8 + $0x630] sm:$0xff] }
 0x2b3   :  { %6699 = vmatpush1.bf16.msra.mxu0 %v6698_v2  ;;  %2264 = vmatprep.mubr.f32.mxu1 %v8617_v57  ;;  %v8636_v57 = vsel %vm3745_vm0, %v3749_v14, %v8630_v15  ;;  %v2450_v2 = vld [vmem:[#allocation8 + $0x3c8] sm:$0xff]  ;;  %v2461_v14 = vld [vmem:[#allocation8 + $0x420] sm:$0xff]  ;;  %v2472_v17 = vld [vmem:[#allocation8 + $0x478] sm:$0xff]  ;;  %v6722_v27 = vpack.c.bf16 %v1149_v12, %v1138_v0 }
 0x2b4   :  { %6827 = vmatpush1.bf16.msra.mxu1 %v6826_v26  ;;  %6701 = vmatprep.subr.bf16.mxu0 %v6700_v58  ;;  %v6846_v10 = vpack.c.bf16 %v2450_v2, %v2439_v63  ;;  %v6850_v28 = vpack.c.bf16 %v2472_v17, %v2461_v14  ;;  %v2561_v63 = vld [vmem:[#allocation8 + $0x740] sm:$0xff]  ;;  %v2560_v6 = vld [vmem:[#allocation8 + $0x738] sm:$0xff]  ;;  %v1248_v14 = vld [vmem:[#allocation7 + $0x12d0] sm:$0xff] }
 0x2b5   :  { %2037 = vmatmul.mubr.f32.gmra.mrb[16].mxu0 %v8331_v25  ;;  %6829 = vmatprep.subr.bf16.mxu1 %v6828_v9  ;;  %v6718_v9 = vpack.c.bf16 %v1127_v62, %v1116_v61  ;;  %v1238_v61 = vld [vmem:[#allocation7 + $0x1280] sm:$0xff]  ;;  %v2550_v62 = vld [vmem:[#allocation8 + $0x6e8] sm:$0xff]  ;;  %v2571_v17 = vld [vmem:[#allocation8 + $0x790] sm:$0xff] }
 0x2b6   :  { %2265 = vmatmul.mubr.f32.gmra.mrb[16].mxu1 %v8621_v4  ;;  %2107 = vmatprep.mubr.f32.mxu0 %v8332_v30  ;;  %v6836_v4 = vpack.c.bf16 %v2407_v31, %v2396_v48  ;;  %v1160_v30 = vld [vmem:[#allocation7 + $0x1010] sm:$0xff]  ;;  %v1171_v48 = vld [vmem:[#allocation7 + $0x1068] sm:$0xff]  ;;  %v6864_v5 = vpack.c.bf16 %v2561_v63, %v2550_v62 }
 0x2b7   :  { %6703 = vmatpush1.bf16.msra.mxu0 %v6702_v18  ;;  %3850 = vmatprep.mubr.f32.mxu1 %v8636_v57  ;;  %v1161_v18 = vld [vmem:[#allocation7 + $0x1018] sm:$0xff]  ;;  %v2483_v31 = vld [vmem:[#allocation8 + $0x4d0] sm:$0xff] }
 0x2b8   :  { %6831 = vmatpush1.bf16.msra.mxu1 %v6830_v19  ;;  %6705 = vmatprep.subr.bf16.mxu0 %v6704_v20  ;;  %v1172_v19 = vld [vmem:[#allocation7 + $0x1070] sm:$0xff] }
 0x2b9   :  { %6833 = vmatprep.subr.bf16.mxu1 %v6832_v52  ;;  %v6724_v29 = vpack.c.bf16 %v1172_v19, %v1161_v18  ;;  %v2582_v19 = vld [vmem:[#allocation8 + $0x7e8] sm:$0xff] }
 0x2bb   :  { %6707 = vmatpush1.bf16.msra.mxu0 %v6706_v32  ;;  %v6852_v32 = vpack.c.bf16 %v2495_v24, %v2484_v23  ;;  %v2594_v23 = vld [vmem:[#allocation8 + $0x848] sm:$0xff]  ;;  %v2605_v24 = vld [vmem:[#allocation8 + $0x8a0] sm:$0xff] }
 0x2bc   :  { %6835 = vmatpush1.bf16.msra.mxu1 %v6834_v33  ;;  %6709 = vmatprep.subr.bf16.mxu0 %v6708_v34  ;;  %v2494_v33 = vld [vmem:[#allocation8 + $0x528] sm:$0xff] }
 0x2bd   :  { %6837 = vmatprep.subr.bf16.mxu1 %v6836_v4  ;;  %v1183_v34 = vld [vmem:[#allocation7 + $0x10c8] sm:$0xff]  ;;  %v6726_v4 = vpack.c.bf16 %v1171_v48, %v1160_v30  ;;  %v6854_v37 = vpack.c.bf16 %v2494_v33, %v2483_v31  ;;  %v2593_v30 = vld [vmem:[#allocation8 + $0x840] sm:$0xff]  ;;  %v6872_v48 = vpack.c.bf16 %v2605_v24, %v2594_v23  ;;  %v2604_v31 = vld [vmem:[#allocation8 + $0x898] sm:$0xff] }
 0x2be   :  { %v6728_v38 = vpack.c.bf16 %v1194_v35, %v1183_v34  ;;  %v1304_v33 = vld [vmem:[#allocation7 + $0x1490] sm:$0xff]  ;;  %v2616_v34 = vld [vmem:[#allocation8 + $0x8f8] sm:$0xff] }
 0x2bf   :  { %6711 = vmatpush1.bf16.msra.mxu0 %v6710_v43  ;;  %v6856_v43 = vpack.c.bf16 %v2517_v21, %v2506_v36  ;;  %v2627_v35 = vld [vmem:[#allocation8 + $0x950] sm:$0xff]  ;;  %v6874_v21 = vpack.c.bf16 %v2604_v31, %v2593_v30  ;;  %v2704_v23 = vld [vmem:[#allocation8 + $0xbb8] sm:$0xff] }
 0x2c0   :  { %6839 = vmatpush1.bf16.msra.mxu1 %v6838_v45  ;;  %6713 = vmatprep.subr.bf16.mxu0 %v6712_v46  ;;  %v2516_v45 = vld [vmem:[#allocation8 + $0x5d8] sm:$0xff]  ;;  %v2715_v24 = vld [vmem:[#allocation8 + $0xc10] sm:$0xff] }
 0x2c1   :  { %6841 = vmatprep.subr.bf16.mxu1 %v6840_v51  ;;  %v1205_v46 = vld [vmem:[#allocation7 + $0x1178] sm:$0xff]  ;;  %v6730_v51 = vpack.c.bf16 %v1193_v41, %v1182_v39  ;;  %v6858_v53 = vpack.c.bf16 %v2516_v45, %v2505_v42  ;;  %v2615_v39 = vld [vmem:[#allocation8 + $0x8f0] sm:$0xff]  ;;  %v6876_v41 = vpack.c.bf16 %v2627_v35, %v2616_v34  ;;  %v2626_v42 = vld [vmem:[#allocation8 + $0x948] sm:$0xff] }
 0x2c2   :  { %v1493_v26 = vpop.f32.mrb[6].mxu0  ;;  %v1647_v58 = vpop.f32.mrb[2].mxu1  ;;  %v6732_v40 = vpack.c.bf16 %v1216_v47, %v1205_v46  ;;  %v1326_v45 = vld [vmem:[#allocation7 + $0x1540] sm:$0xff]  ;;  %v2638_v46 = vld [vmem:[#allocation8 + $0x9a8] sm:$0xff]  ;;  %v2703_v31 = vld [vmem:[#allocation8 + $0xbb0] sm:$0xff] }
 0x2c3   :  { %6715 = vmatpush1.bf16.msra.mxu0 %v6714_v56  ;;  %2270 = vst [vmem:[%s8923_s5] sm:$0xff] %v1493_v26  ;;  %2272 = vst [vmem:[%s8923_s5 + $0x10] sm:$0xff] %v1647_v58  ;;  %v1495_v7 = vpop.f32.mrb[7].mxu0  ;;  %v1649_v8 = vpop.f32.mrb[3].mxu1  ;;  %v6860_v56 = vpack.c.bf16 %v2539_v50, %v2528_v49  ;;  %v1237_v26 = vld [vmem:[#allocation7 + $0x1278] sm:$0xff]  ;;  %v2549_v58 = vld [vmem:[#allocation8 + $0x6e0] sm:$0xff]  ;;  %v6878_v50 = vpack.c.bf16 %v2626_v42, %v2615_v39 }
 0x2c4   :  { %6843 = vmatpush1.bf16.msra.mxu1 %v6842_v59  ;;  %2271 = vst [vmem:[%s8923_s5 + $0x8] sm:$0xff] %v1495_v7  ;;  %2273 = vst [vmem:[%s8923_s5 + $0x18] sm:$0xff] %v1649_v8  ;;  %6717 = vmatprep.subr.bf16.mxu0 %v6716_v60  ;;  %v2538_v59 = vld [vmem:[#allocation8 + $0x688] sm:$0xff]  ;;  %v1249_v7 = vld [vmem:[#allocation7 + $0x12d8] sm:$0xff]  ;;  %v6866_v0 = vpack.c.bf16 %v2560_v6, %v2549_v58 }
 0x2c5   :  { %6845 = vmatprep.subr.bf16.mxu1 %v6844_v1  ;;  %v1227_v60 = vld [vmem:[#allocation7 + $0x1228] sm:$0xff]  ;;  %v6734_v1 = vpack.c.bf16 %v1215_v54, %v1204_v44  ;;  %v6862_v2 = vpack.c.bf16 %v2538_v59, %v2527_v13  ;;  %v1260_v8 = vld [vmem:[#allocation7 + $0x1330] sm:$0xff]  ;;  %v2649_v47 = vld [vmem:[#allocation8 + $0xa00] sm:$0xff] }
 0x2c6   :  { %v1499_v20 = vpop.f32.mrb[8].mxu0  ;;  %v1653_v22 = vpop.f32.mrb[4].mxu1  ;;  %v6736_v55 = vpack.c.bf16 %v1238_v61, %v1227_v60  ;;  %v6740_v12 = vpack.c.bf16 %v1260_v8, %v1249_v7  ;;  %v2637_v44 = vld [vmem:[#allocation8 + $0x9a0] sm:$0xff]  ;;  %v6880_v54 = vpack.c.bf16 %v2649_v47, %v2638_v46  ;;  %v2648_v13 = vld [vmem:[#allocation8 + $0x9f8] sm:$0xff]  ;;  %v1348_v59 = vld [vmem:[#allocation7 + $0x15f0] sm:$0xff] }
 0x2c7   :  { %6719 = vmatpush1.bf16.msra.mxu0 %v6718_v9  ;;  %2281 = vst [vmem:[%s8923_s5 + $0x58] sm:$0x3f] %v1499_v20  ;;  %2283 = vst [vmem:[%s8923_s5 + $0x68] sm:$0x3f] %v1653_v22  ;;  %v1501_v25 = vpop.f32.mrb[9].mxu0  ;;  %v1655_v52 = vpop.f32.mrb[5].mxu1  ;;  %v6882_v63 = vpack.c.bf16 %v2648_v13, %v2637_v44 }
 0x2c8   :  { %6847 = vmatpush1.bf16.msra.mxu1 %v6846_v10  ;;  %2282 = vst [vmem:[%s8923_s5 + $0x60] sm:$0x3f] %v1501_v25  ;;  %2284 = vst [vmem:[%s8923_s5 + $0x70] sm:$0x3f] %v1655_v52  ;;  %6721 = vmatprep.subr.bf16.mxu0 %v6720_v11  ;;  %v2572_v9 = vld [vmem:[#allocation8 + $0x798] sm:$0xff]  ;;  %v2583_v10 = vld [vmem:[#allocation8 + $0x7f0] sm:$0xff]  ;;  %v6738_v11 = vpack.c.bf16 %v1237_v26, %v1226_v3  ;;  %v6870_v52 = vpack.c.bf16 %v2582_v19, %v2571_v17 }
 0x2c9   :  { %6849 = vmatprep.subr.bf16.mxu1 %v6848_v16  ;;  %v1259_v16 = vld [vmem:[#allocation7 + $0x1328] sm:$0xff]  ;;  %v6868_v18 = vpack.c.bf16 %v2583_v10, %v2572_v9  ;;  %v1282_v22 = vld [vmem:[#allocation7 + $0x13e0] sm:$0xff]  ;;  %v2660_v60 = vld [vmem:[#allocation8 + $0xa58] sm:$0xff] }
 0x2ca   :  { %v1271_v20 = vld [vmem:[#allocation7 + $0x1388] sm:$0xff]  ;;  %v6742_v25 = vpack.c.bf16 %v1259_v16, %v1248_v14  ;;  %v2671_v61 = vld [vmem:[#allocation8 + $0xab0] sm:$0xff]  ;;  %v2693_v8 = vld [vmem:[#allocation8 + $0xb60] sm:$0xff] }
 0x2cb   :  { %6723 = vmatpush1.bf16.msra.mxu0 %v6722_v27  ;;  %v6744_v27 = vpack.c.bf16 %v1282_v22, %v1271_v20  ;;  %v2659_v3 = vld [vmem:[#allocation8 + $0xa50] sm:$0xff]  ;;  %v6884_v26 = vpack.c.bf16 %v2671_v61, %v2660_v60  ;;  %v2670_v58 = vld [vmem:[#allocation8 + $0xaa8] sm:$0xff]  ;;  %v2292_v10 = vld [vmem:[#allocation2] sm:$0xfc] }
 0x2cc   :  { %6851 = vmatpush1.bf16.msra.mxu1 %v6850_v28  ;;  %6725 = vmatprep.subr.bf16.mxu0 %v6724_v29  ;;  %v1270_v28 = vld [vmem:[#allocation7 + $0x1380] sm:$0xff]  ;;  %v1281_v29 = vld [vmem:[#allocation7 + $0x13d8] sm:$0xff]  ;;  %v2343_v6 = vld [vmem:[#allocation8 + $0x70] sm:$0xff]  ;;  %v3746_v19 = vrot.slane %v2292_v10, 2 }
 0x2cd   :  { %6853 = vmatprep.subr.bf16.mxu1 %v6852_v32  ;;  %v1293_v32 = vld [vmem:[#allocation7 + $0x1438] sm:$0xff]  ;;  %v6746_v36 = vpack.c.bf16 %v1281_v29, %v1270_v28  ;;  %v2682_v7 = vld [vmem:[#allocation8 + $0xb08] sm:$0xff]  ;;  %v2681_v16 = vld [vmem:[#allocation8 + $0xb00] sm:$0xff] }
 0x2ce   :  { %v6888_v14 = vpack.c.bf16 %v2693_v8, %v2682_v7  ;;  %v2692_v17 = vld [vmem:[#allocation8 + $0xb58] sm:$0xff]  ;;  %v2342_v22 = vld [vmem:[#allocation8 + $0x68] sm:$0xff]  ;;  %v8333_v34 = vld [vmem:[#allocation2 + $0x10] sm:$0xff] }
 0x2cf   :  { %6727 = vmatpush1.bf16.msra.mxu0 %v6726_v4  ;;  %v6748_v4 = vpack.c.bf16 %v1304_v33, %v1293_v32  ;;  %v2295_v28 = vld [vmem:[#allocation2 + $0x18] sm:$0xfc]  ;;  %v2714_v32 = vld [vmem:[#allocation8 + $0xc08] sm:$0xff]  ;;  %v2353_v33 = vld [vmem:[#allocation8 + $0xc0] sm:$0xff] }
 0x2d0   :  { %6855 = vmatpush1.bf16.msra.mxu1 %v6854_v37  ;;  %6729 = vmatprep.subr.bf16.mxu0 %v6728_v38  ;;  %v1292_v37 = vld [vmem:[#allocation7 + $0x1430] sm:$0xff]  ;;  %v1303_v38 = vld [vmem:[#allocation7 + $0x1488] sm:$0xff]  ;;  %v2299_v29 = vld [vmem:[#allocation2 + $0x38] sm:$0x3f]  ;;  %v3755_v39 = vrot.slane %v2295_v28, 2 }
 0x2d1   :  { %6857 = vmatprep.subr.bf16.mxu1 %v6856_v43  ;;  %v1315_v43 = vld [vmem:[#allocation7 + $0x14e8] sm:$0xff]  ;;  %v6750_v49 = vpack.c.bf16 %v1303_v38, %v1292_v37  ;;  %v2737_v37 = vld [vmem:[#allocation8 + $0xcc0] sm:$0xff]  ;;  %v8334_v38 = vld [vmem:[#allocation2 + $0x38] sm:$0x3f] }
 0x2d2   :  { %v2376_v42 = vld [vmem:[#allocation8 + $0x178] sm:$0xff]  ;;  %v2386_v44 = vld [vmem:[#allocation8 + $0x1c8] sm:$0xff]  ;;  %v2759_v13 = vld [vmem:[#allocation8 + $0xd70] sm:$0xff] }
 0x2d3   :  { %6731 = vmatpush1.bf16.msra.mxu0 %v6730_v51  ;;  %v6752_v51 = vpack.c.bf16 %v1326_v45, %v1315_v43  ;;  %v2387_v43 = vld [vmem:[#allocation8 + $0x1d0] sm:$0xff]  ;;  %v6894_v45 = vpack.c.bf16 %v2714_v32, %v2703_v31  ;;  %v2409_v60 = vld [vmem:[#allocation8 + $0x280] sm:$0xff]  ;;  %v2464_v32 = vld [vmem:[#allocation8 + $0x438] sm:$0xff] }
 0x2d4   :  { %6859 = vmatpush1.bf16.msra.mxu1 %v6858_v53  ;;  %6733 = vmatprep.subr.bf16.mxu0 %v6732_v40  ;;  %v1314_v53 = vld [vmem:[#allocation7 + $0x14e0] sm:$0xff]  ;;  %v1325_v40 = vld [vmem:[#allocation7 + $0x1538] sm:$0xff]  ;;  %v2431_v7 = vld [vmem:[#allocation8 + $0x330] sm:$0xff] }
 0x2d5   :  { %6861 = vmatprep.subr.bf16.mxu1 %v6860_v56  ;;  %v1337_v56 = vld [vmem:[#allocation7 + $0x1598] sm:$0xff]  ;;  %v6754_v62 = vpack.c.bf16 %v1325_v40, %v1314_v53  ;;  %v8335_v53 = vld [vmem:[#allocation2 + $0x30] sm:$0x3f]  ;;  %v7088_v40 = vpack.c.bf16 %v2387_v43, %v2376_v42  ;;  %v2441_v28 = vld [vmem:[#allocation8 + $0x380] sm:$0xff] }
 0x2d6   :  { %v2825_v31 = vld [vmem:[#allocation8 + $0xf80] sm:$0xff]  ;;  %v2474_v42 = vld [vmem:[#allocation8 + $0x488] sm:$0xff]  ;;  %v2836_v43 = vld [vmem:[#allocation8 + $0xfd8] sm:$0xff] }
 0x2d7   :  { %6735 = vmatpush1.bf16.msra.mxu0 %v6734_v1  ;;  %v6756_v1 = vpack.c.bf16 %v1348_v59, %v1337_v56  ;;  %v2398_v59 = vld [vmem:[#allocation8 + $0x228] sm:$0xff] }
 0x2d8   :  { %6863 = vmatpush1.bf16.msra.mxu1 %v6862_v2  ;;  %6737 = vmatprep.subr.bf16.mxu0 %v6736_v55  ;;  %v1336_v2 = vld [vmem:[#allocation7 + $0x1590] sm:$0xff]  ;;  %v1347_v55 = vld [vmem:[#allocation7 + $0x15e8] sm:$0xff] }
 0x2d9   :  { %6865 = vmatprep.subr.bf16.mxu1 %v6864_v5  ;;  %v2332_v5 = vld [vmem:[#allocation8 + $0x18] sm:$0xff]  ;;  %v6758_v9 = vpack.c.bf16 %v1347_v55, %v1336_v2  ;;  %v2758_v2 = vld [vmem:[#allocation8 + $0xd68] sm:$0xff]  ;;  %v2397_v55 = vld [vmem:[#allocation8 + $0x220] sm:$0xff] }
 0x2db   :  { %6739 = vmatpush1.bf16.msra.mxu0 %v6738_v11  ;;  %v2296_v11 = vld [vmem:[#allocation2 + $0x20] sm:$0x3f] }
 0x2dc   :  { %6867 = vmatpush1.bf16.msra.mxu1 %v6866_v0  ;;  %6741 = vmatprep.subr.bf16.mxu0 %v6740_v12  ;;  %v6886_v0 = vpack.c.bf16 %v2670_v58, %v2659_v3  ;;  %v7080_v12 = vpack.c.bf16 %v2343_v6, %v2332_v5  ;;  %v8663_v20 = vrot.slane %v2296_v11, 2  ;;  %v7092_v3 = vpack.c.bf16 %v2409_v60, %v2398_v59  ;;  %v2770_v58 = vld [vmem:[#allocation8 + $0xdc8] sm:$0xff]  ;;  %v2781_v5 = vld [vmem:[#allocation8 + $0xe20] sm:$0xff]  ;;  %v2420_v6 = vld [vmem:[#allocation8 + $0x2d8] sm:$0xff] }
 0x2dd   :  { %6869 = vmatprep.subr.bf16.mxu1 %v6868_v18  ;;  %v2331_v18 = vld [vmem:[#allocation8 + $0x10] sm:$0xff]  ;;  %v6904_v10 = vpack.c.bf16 %v2781_v5, %v2770_v58  ;;  %v2769_v11 = vld [vmem:[#allocation8 + $0xdc0] sm:$0xff]  ;;  %v2858_v59 = vld [vmem:[#allocation8 + $0x1088] sm:$0xff] }
 0x2de   :  { %v7082_v30 = vpack.c.bf16 %v2342_v22, %v2331_v18  ;;  %v8667_v35 = vsel %vm3745_vm0, %v3746_v19, %v8663_v20  ;;  %v2803_v18 = vld [vmem:[#allocation8 + $0xed0] sm:$0xff]  ;;  %v2442_v19 = vld [vmem:[#allocation8 + $0x388] sm:$0xff]  ;;  %v2453_v22 = vld [vmem:[#allocation8 + $0x3e0] sm:$0xff] }
 0x2df   :  { %6743 = vmatpush1.bf16.msra.mxu0 %v6742_v25  ;;  %v2354_v25 = vld [vmem:[#allocation8 + $0xc8] sm:$0xff]  ;;  %v2869_v60 = vld [vmem:[#allocation8 + $0x10e0] sm:$0xff] }
 0x2e0   :  { %6871 = vmatpush1.bf16.msra.mxu1 %v6870_v52  ;;  %6745 = vmatprep.subr.bf16.mxu0 %v6744_v27  ;;  %v2365_v52 = vld [vmem:[#allocation8 + $0x120] sm:$0xff]  ;;  %v6890_v27 = vpack.c.bf16 %v2692_v17, %v2681_v16  ;;  %v2430_v16 = vld [vmem:[#allocation8 + $0x328] sm:$0xff]  ;;  %v2792_v17 = vld [vmem:[#allocation8 + $0xe78] sm:$0xff] }
 0x2e1   :  { %6873 = vmatprep.subr.bf16.mxu1 %v6872_v48  ;;  %v6892_v48 = vpack.c.bf16 %v2715_v24, %v2704_v23  ;;  %v2518_v5 = vld [vmem:[#allocation8 + $0x5e8] sm:$0xff] }
 0x2e3   :  { %6747 = vmatpush1.bf16.msra.mxu0 %v6746_v36  ;;  %v7084_v36 = vpack.c.bf16 %v2365_v52, %v2354_v25  ;;  %v6908_v25 = vpack.c.bf16 %v2803_v18, %v2792_v17  ;;  %v2791_v52 = vld [vmem:[#allocation8 + $0xe70] sm:$0xff]  ;;  %v2540_v18 = vld [vmem:[#allocation8 + $0x698] sm:$0xff] }
 0x2e4   :  { %6875 = vmatpush1.bf16.msra.mxu1 %v6874_v21  ;;  %6749 = vmatprep.subr.bf16.mxu0 %v6748_v4  ;;  %v2364_v21 = vld [vmem:[#allocation8 + $0x118] sm:$0xff]  ;;  %v2726_v4 = vld [vmem:[#allocation8 + $0xc68] sm:$0xff] }
 0x2e5   :  { %6877 = vmatprep.subr.bf16.mxu1 %v6876_v41  ;;  %v8670_v41 = vrot.slane %v2299_v29, 2  ;;  %v7086_v46 = vpack.c.bf16 %v2364_v21, %v2353_v33  ;;  %v6896_v47 = vpack.c.bf16 %v2737_v37, %v2726_v4  ;;  %v7100_v29 = vpack.c.bf16 %v2453_v22, %v2442_v19  ;;  %v2475_v33 = vld [vmem:[#allocation8 + $0x490] sm:$0xff]  ;;  %v2813_v4 = vld [vmem:[#allocation8 + $0xf20] sm:$0xff]  ;;  %v2824_v37 = vld [vmem:[#allocation8 + $0xf78] sm:$0xff] }
 0x2e6   :  { %v2902_v19 = vld [vmem:[#allocation8 + $0x11e8] sm:$0xff]  ;;  %v2913_v22 = vld [vmem:[#allocation8 + $0x1240] sm:$0xff] }
 0x2e7   :  { %6751 = vmatpush1.bf16.msra.mxu0 %v6750_v49  ;;  %v2725_v49 = vld [vmem:[#allocation8 + $0xc60] sm:$0xff]  ;;  %v8676_v56 = vsel %vm3745_vm0, %v3755_v39, %v8670_v41  ;;  %v7104_v39 = vpack.c.bf16 %v2475_v33, %v2464_v32  ;;  %v2924_v32 = vld [vmem:[#allocation8 + $0x1298] sm:$0xff]  ;;  %v2935_v33 = vld [vmem:[#allocation8 + $0x12f0] sm:$0xff] }
 0x2e8   :  { %6879 = vmatpush1.bf16.msra.mxu1 %v6878_v50  ;;  %6753 = vmatprep.subr.bf16.mxu0 %v6752_v51  ;;  %v2736_v50 = vld [vmem:[#allocation8 + $0xcb8] sm:$0xff]  ;;  %v2375_v51 = vld [vmem:[#allocation8 + $0x170] sm:$0xff] }
 0x2e9   :  { %6881 = vmatprep.subr.bf16.mxu1 %v6880_v54  ;;  %v2748_v54 = vld [vmem:[#allocation8 + $0xd18] sm:$0xff]  ;;  %v6898_v61 = vpack.c.bf16 %v2736_v50, %v2725_v49  ;;  %v6914_v49 = vpack.c.bf16 %v2824_v37, %v2813_v4  ;;  %v6932_v37 = vpack.c.bf16 %v2935_v33, %v2924_v32  ;;  %v3022_v32 = vld [vmem:[#allocation8 + $0x15a8] sm:$0xff]  ;;  %v2661_v33 = vld [vmem:[#allocation8 + $0xa60] sm:$0xff] }
 0x2eb   :  { %6755 = vmatpush1.bf16.msra.mxu0 %v6754_v62  ;;  %v7090_v62 = vpack.c.bf16 %v2386_v44, %v2375_v51  ;;  %v2485_v44 = vld [vmem:[#allocation8 + $0x4e0] sm:$0xff] }
 0x2ec   :  { %6883 = vmatpush1.bf16.msra.mxu1 %v6882_v63  ;;  %6757 = vmatprep.subr.bf16.mxu0 %v6756_v1  ;;  %v6900_v63 = vpack.c.bf16 %v2759_v13, %v2748_v54  ;;  %v2747_v1 = vld [vmem:[#allocation8 + $0xd10] sm:$0xff]  ;;  %v2496_v13 = vld [vmem:[#allocation8 + $0x538] sm:$0xff] }
 0x2ed   :  { %6885 = vmatprep.subr.bf16.mxu1 %v6884_v26  ;;  %v2408_v26 = vld [vmem:[#allocation8 + $0x278] sm:$0xff]  ;;  %v6902_v8 = vpack.c.bf16 %v2758_v2, %v2747_v1  ;;  %v7110_v1 = vpack.c.bf16 %v2496_v13, %v2485_v44  ;;  %v6920_v2 = vpack.c.bf16 %v2869_v60, %v2858_v59  ;;  %v2945_v44 = vld [vmem:[#allocation8 + $0x1340] sm:$0xff]  ;;  %v2595_v13 = vld [vmem:[#allocation8 + $0x850] sm:$0xff] }
 0x2ee   :  { %v2606_v60 = vld [vmem:[#allocation8 + $0x8a8] sm:$0xff] }
 0x2ef   :  { %6759 = vmatpush1.bf16.msra.mxu0 %v6758_v9  ;;  %v7094_v9 = vpack.c.bf16 %v2408_v26, %v2397_v55  ;;  %v2857_v55 = vld [vmem:[#allocation8 + $0x1080] sm:$0xff]  ;;  %v2507_v26 = vld [vmem:[#allocation8 + $0x590] sm:$0xff] }
 0x2f0   :  { %6887 = vmatpush1.bf16.msra.mxu1 %v6886_v0  ;;  %7081 = vmatprep.subr.bf16.mxu0 %v7080_v12  ;;  %v2780_v0 = vld [vmem:[#allocation8 + $0xe18] sm:$0xff]  ;;  %v2419_v12 = vld [vmem:[#allocation8 + $0x2d0] sm:$0xff] }
 0x2f1   :  { %6889 = vmatprep.subr.bf16.mxu1 %v6888_v14  ;;  %v7096_v14 = vpack.c.bf16 %v2431_v7, %v2420_v6  ;;  %v6906_v23 = vpack.c.bf16 %v2780_v0, %v2769_v11  ;;  %v7098_v24 = vpack.c.bf16 %v2430_v16, %v2419_v12  ;;  %v2880_v6 = vld [vmem:[#allocation8 + $0x1138] sm:$0xff]  ;;  %v2891_v7 = vld [vmem:[#allocation8 + $0x1190] sm:$0xff]  ;;  %v7114_v11 = vpack.c.bf16 %v2518_v5, %v2507_v26  ;;  %v2529_v16 = vld [vmem:[#allocation8 + $0x640] sm:$0xff] }
 0x2f2   :  { %2108 = vmatmul.mubr.f32.vlgmr.msra.gmra.mrb[14].mxu0 %v8333_v34  ;;  %v6924_v0 = vpack.c.bf16 %v2891_v7, %v2880_v6  ;;  %v2879_v12 = vld [vmem:[#allocation8 + $0x1130] sm:$0xff]  ;;  %v2617_v5 = vld [vmem:[#allocation8 + $0x900] sm:$0xff]  ;;  %v2628_v7 = vld [vmem:[#allocation8 + $0x958] sm:$0xff] }
 0x2f3   :  { %3851 = vmatmul.mubr.f32.vlgmr.msra.gmra.mrb[18].mxu1 %v8667_v35  ;;  %2113 = vmatprep.mubr.f32.mxu0 %v8334_v38  ;;  %v2463_v38 = vld [vmem:[#allocation8 + $0x430] sm:$0xff] }
 0x2f4   :  { %3856 = vmatprep.mubr.f32.mxu1 %v8630_v15  ;;  %6891 = vmatpush1.bf16.msra.mxu1 %v6890_v27  ;;  %v2802_v27 = vld [vmem:[#allocation8 + $0xec8] sm:$0xff]  ;;  %v7106_v50 = vpack.c.bf16 %v2474_v42, %v2463_v38  ;;  %v2923_v38 = vld [vmem:[#allocation8 + $0x1290] sm:$0xff]  ;;  %v2573_v42 = vld [vmem:[#allocation8 + $0x7a0] sm:$0xff] }
 0x2f5   :  { %7083 = vmatpush1.bf16.msra.mxu0 %v7082_v30  ;;  %6893 = vmatprep.subr.bf16.mxu1 %v6892_v48  ;;  %v2452_v30 = vld [vmem:[#allocation8 + $0x3d8] sm:$0xff]  ;;  %v2814_v48 = vld [vmem:[#allocation8 + $0xf28] sm:$0xff]  ;;  %v6910_v34 = vpack.c.bf16 %v2802_v27, %v2791_v52  ;;  %v7118_v52 = vpack.c.bf16 %v2540_v18, %v2529_v16  ;;  %v6928_v27 = vpack.c.bf16 %v2913_v22, %v2902_v19  ;;  %v2967_v26 = vld [vmem:[#allocation8 + $0x13f0] sm:$0xff] }
 0x2f6   :  { %2114 = vmatmul.mubr.f32.gmra.mrb[16].mxu0 %v8335_v53  ;;  %7085 = vmatprep.subr.bf16.mxu0 %v7084_v36  ;;  %v7102_v36 = vpack.c.bf16 %v2452_v30, %v2441_v28  ;;  %v6912_v21 = vpack.c.bf16 %v2825_v31, %v2814_v48  ;;  %v2835_v53 = vld [vmem:[#allocation8 + $0xfd0] sm:$0xff]  ;;  %v2901_v28 = vld [vmem:[#allocation8 + $0x11e0] sm:$0xff]  ;;  %v2562_v31 = vld [vmem:[#allocation8 + $0x748] sm:$0xff] }
 0x2f7   :  { %3857 = vmatmul.mubr.f32.gmra.mrb[20].mxu1 %v8663_v20  ;;  %4158 = vmatprep.mubr.f32.mxu0 %v8636_v57  ;;  %v2551_v30 = vld [vmem:[#allocation8 + $0x6f0] sm:$0xff]  ;;  %v2989_v16 = vld [vmem:[#allocation8 + $0x14a0] sm:$0xff]  ;;  %v2650_v22 = vld [vmem:[#allocation8 + $0xa08] sm:$0xff] }
 0x2f8   :  { %6895 = vmatpush1.bf16.msra.mxu1 %v6894_v45  ;;  %3927 = vmatprep.mubr.f32.mxu1 %v8676_v56  ;;  %v2847_v45 = vld [vmem:[#allocation8 + $0x1030] sm:$0xff]  ;;  %v7122_v4 = vpack.c.bf16 %v2562_v31, %v2551_v30 }
 0x2f9   :  { %7087 = vmatpush1.bf16.msra.mxu0 %v7086_v46  ;;  %6897 = vmatprep.subr.bf16.mxu1 %v6896_v47  ;;  %v2486_v46 = vld [vmem:[#allocation8 + $0x4e8] sm:$0xff]  ;;  %v2497_v47 = vld [vmem:[#allocation8 + $0x540] sm:$0xff]  ;;  %v6916_v51 = vpack.c.bf16 %v2847_v45, %v2836_v43  ;;  %v2584_v45 = vld [vmem:[#allocation8 + $0x7f8] sm:$0xff] }
 0x2fa   :  { %7089 = vmatprep.subr.bf16.mxu0 %v7088_v40  ;;  %v2846_v40 = vld [vmem:[#allocation8 + $0x1028] sm:$0xff]  ;;  %v7108_v54 = vpack.c.bf16 %v2497_v47, %v2486_v46  ;;  %v2957_v47 = vld [vmem:[#allocation8 + $0x13a0] sm:$0xff]  ;;  %v2639_v18 = vld [vmem:[#allocation8 + $0x9b0] sm:$0xff] }
 0x2fb   :  { %v2946_v46 = vld [vmem:[#allocation8 + $0x1348] sm:$0xff]  ;;  %v7138_v30 = vpack.c.bf16 %v2650_v22, %v2639_v18  ;;  %v3011_v31 = vld [vmem:[#allocation8 + $0x1550] sm:$0xff]  ;;  %v3077_v18 = vld [vmem:[#allocation8 + $0x1760] sm:$0xff] }
 0x2fc   :  { %6899 = vmatpush1.bf16.msra.mxu1 %v6898_v61  ;;  %v2508_v61 = vld [vmem:[#allocation8 + $0x598] sm:$0xff]  ;;  %v2727_v22 = vld [vmem:[#allocation8 + $0xc70] sm:$0xff] }
 0x2fd   :  { %7091 = vmatpush1.bf16.msra.mxu0 %v7090_v62  ;;  %6901 = vmatprep.subr.bf16.mxu1 %v6900_v63  ;;  %v2519_v62 = vld [vmem:[#allocation8 + $0x5f0] sm:$0xff]  ;;  %v6918_v63 = vpack.c.bf16 %v2846_v40, %v2835_v53  ;;  %v7126_v53 = vpack.c.bf16 %v2584_v45, %v2573_v42  ;;  %v6936_v40 = vpack.c.bf16 %v2957_v47, %v2946_v46 }
 0x2fe   :  { %7093 = vmatprep.subr.bf16.mxu0 %v7092_v3  ;;  %v2868_v3 = vld [vmem:[#allocation8 + $0x10d8] sm:$0xff]  ;;  %v7112_v58 = vpack.c.bf16 %v2519_v62, %v2508_v61  ;;  %v2979_v62 = vld [vmem:[#allocation8 + $0x1450] sm:$0xff] }
 0x2ff   :  { %v2968_v61 = vld [vmem:[#allocation8 + $0x13f8] sm:$0xff]  ;;  %v2695_v42 = vld [vmem:[#allocation8 + $0xb70] sm:$0xff] }
 0x300   :  { %6903 = vmatpush1.bf16.msra.mxu1 %v6902_v8  ;;  %v2530_v8 = vld [vmem:[#allocation8 + $0x648] sm:$0xff] }
 0x301   :  { %7095 = vmatpush1.bf16.msra.mxu0 %v7094_v9  ;;  %6905 = vmatprep.subr.bf16.mxu1 %v6904_v10  ;;  %v2541_v9 = vld [vmem:[#allocation8 + $0x6a0] sm:$0xff]  ;;  %v6922_v10 = vpack.c.bf16 %v2868_v3, %v2857_v55  ;;  %v7130_v55 = vpack.c.bf16 %v2606_v60, %v2595_v13  ;;  %v6940_v3 = vpack.c.bf16 %v2979_v62, %v2968_v61  ;;  %v2694_v13 = vld [vmem:[#allocation8 + $0xb68] sm:$0xff]  ;;  %v3067_v60 = vld [vmem:[#allocation8 + $0x1710] sm:$0xff] }
 0x302   :  { %7097 = vmatprep.subr.bf16.mxu0 %v7096_v14  ;;  %v2890_v14 = vld [vmem:[#allocation8 + $0x1188] sm:$0xff]  ;;  %v7116_v17 = vpack.c.bf16 %v2541_v9, %v2530_v8  ;;  %v3001_v9 = vld [vmem:[#allocation8 + $0x1500] sm:$0xff] }
 0x303   :  { %v2990_v8 = vld [vmem:[#allocation8 + $0x14a8] sm:$0xff]  ;;  %v2717_v62 = vld [vmem:[#allocation8 + $0xc20] sm:$0xff] }
 0x304   :  { %6907 = vmatpush1.bf16.msra.mxu1 %v6906_v23  ;;  %v2552_v23 = vld [vmem:[#allocation8 + $0x6f8] sm:$0xff]  ;;  %v2706_v61 = vld [vmem:[#allocation8 + $0xbc8] sm:$0xff] }
 0x305   :  { %7099 = vmatpush1.bf16.msra.mxu0 %v7098_v24  ;;  %6909 = vmatprep.subr.bf16.mxu1 %v6908_v25  ;;  %v2563_v24 = vld [vmem:[#allocation8 + $0x750] sm:$0xff]  ;;  %v6926_v25 = vpack.c.bf16 %v2890_v14, %v2879_v12  ;;  %v7134_v12 = vpack.c.bf16 %v2628_v7, %v2617_v5  ;;  %v6944_v14 = vpack.c.bf16 %v3001_v9, %v2990_v8  ;;  %v2705_v5 = vld [vmem:[#allocation8 + $0xbc0] sm:$0xff]  ;;  %v2716_v9 = vld [vmem:[#allocation8 + $0xc18] sm:$0xff] }
 0x306   :  { %7101 = vmatprep.subr.bf16.mxu0 %v7100_v29  ;;  %v2912_v29 = vld [vmem:[#allocation8 + $0x1238] sm:$0xff]  ;;  %v7120_v48 = vpack.c.bf16 %v2563_v24, %v2552_v23  ;;  %v3023_v24 = vld [vmem:[#allocation8 + $0x15b0] sm:$0xff] }
 0x307   :  { %v3012_v23 = vld [vmem:[#allocation8 + $0x1558] sm:$0xff] }
 0x308   :  { %6911 = vmatpush1.bf16.msra.mxu1 %v6910_v34  ;;  %v2574_v34 = vld [vmem:[#allocation8 + $0x7a8] sm:$0xff] }
 0x309   :  { %7103 = vmatpush1.bf16.msra.mxu0 %v7102_v36  ;;  %6913 = vmatprep.subr.bf16.mxu1 %v6912_v21  ;;  %v2585_v36 = vld [vmem:[#allocation8 + $0x800] sm:$0xff]  ;;  %v6930_v21 = vpack.c.bf16 %v2912_v29, %v2901_v28  ;;  %v2301_v28 = vld [vmem:[#allocation2 + $0x8] sm:$0xff] }
 0x30a   :  { %7105 = vmatprep.subr.bf16.mxu0 %v7104_v39  ;;  %v2934_v39 = vld [vmem:[#allocation8 + $0x12e8] sm:$0xff]  ;;  %v7124_v43 = vpack.c.bf16 %v2585_v36, %v2574_v34  ;;  %v2294_v34 = vld [vmem:[#allocation2 + $0x10] sm:$0xfc]  ;;  %v2318_v45 = vrot.slane %v2301_v28, 6 }
 0x30b   :  { %v2305_v29 = vld [vmem:[#allocation2 + $0x28] sm:$0xf] }
 0x30c   :  { %6915 = vmatpush1.bf16.msra.mxu1 %v6914_v49  ;;  %v2596_v49 = vld [vmem:[#allocation8 + $0x858] sm:$0xff]  ;;  %v2323_v46 = vrot.slane %v2305_v29, 6  ;;  %v3761_v7 = vrot.slane %v2318_v45, 2  ;;  %v2750_v28 = vld [vmem:[#allocation8 + $0xd28] sm:$0xff]  ;;  %v2761_v29 = vld [vmem:[#allocation8 + $0xd80] sm:$0xff] }
 0x30d   :  { %7107 = vmatpush1.bf16.msra.mxu0 %v7106_v50  ;;  %6917 = vmatprep.subr.bf16.mxu1 %v6916_v51  ;;  %v2607_v50 = vld [vmem:[#allocation8 + $0x8b0] sm:$0xff]  ;;  %v6934_v51 = vpack.c.bf16 %v2934_v39, %v2923_v38  ;;  %v2684_v39 = vld [vmem:[#allocation8 + $0xb18] sm:$0xff] }
 0x30e   :  { %7109 = vmatprep.subr.bf16.mxu0 %v7108_v54  ;;  %v2956_v54 = vld [vmem:[#allocation8 + $0x1398] sm:$0xff]  ;;  %v7128_v59 = vpack.c.bf16 %v2607_v50, %v2596_v49  ;;  %v2298_v38 = vld [vmem:[#allocation2 + $0x30] sm:$0x3f]  ;;  %v3752_v50 = vrot.slane %v2294_v34, 2  ;;  %v2749_v34 = vld [vmem:[#allocation8 + $0xd20] sm:$0xff] }
 0x310   :  { %6919 = vmatpush1.bf16.msra.mxu1 %v6918_v63  ;;  %v2618_v63 = vld [vmem:[#allocation8 + $0x908] sm:$0xff] }
 0x311   :  { %7111 = vmatpush1.bf16.msra.mxu0 %v7110_v1  ;;  %6921 = vmatprep.subr.bf16.mxu1 %v6920_v2  ;;  %v2629_v1 = vld [vmem:[#allocation8 + $0x960] sm:$0xff]  ;;  %v6938_v2 = vpack.c.bf16 %v2956_v54, %v2945_v44  ;;  %v3044_v44 = vld [vmem:[#allocation8 + $0x1658] sm:$0xff]  ;;  %v2683_v54 = vld [vmem:[#allocation8 + $0xb10] sm:$0xff] }
 0x312   :  { %7113 = vmatprep.subr.bf16.mxu0 %v7112_v58  ;;  %v2978_v58 = vld [vmem:[#allocation8 + $0x1448] sm:$0xff]  ;;  %v7132_v6 = vpack.c.bf16 %v2629_v1, %v2618_v63  ;;  %v2324_v63 = vsel %vm2316_vm1, %v2318_v45, %v2323_v46  ;;  %v3121_v46 = vld [vmem:[#allocation8 + $0x18c0] sm:$0xff] }
 0x313   :  { %v8688_v8 = vrot.slane %v2324_v63, 2  ;;  %v3154_v63 = vld [vmem:[#allocation8 + $0x19c8] sm:$0xff] }
 0x314   :  { %6923 = vmatpush1.bf16.msra.mxu1 %v6922_v10  ;;  %v2640_v10 = vld [vmem:[#allocation8 + $0x9b8] sm:$0xff] }
 0x315   :  { %7115 = vmatpush1.bf16.msra.mxu0 %v7114_v11  ;;  %6925 = vmatprep.subr.bf16.mxu1 %v6924_v0  ;;  %v2651_v11 = vld [vmem:[#allocation8 + $0xa10] sm:$0xff]  ;;  %v6942_v0 = vpack.c.bf16 %v2978_v58, %v2967_v26  ;;  %v3066_v58 = vld [vmem:[#allocation8 + $0x1708] sm:$0xff] }
 0x316   :  { %7117 = vmatprep.subr.bf16.mxu0 %v7116_v17  ;;  %v3000_v17 = vld [vmem:[#allocation8 + $0x14f8] sm:$0xff]  ;;  %v7136_v19 = vpack.c.bf16 %v2651_v11, %v2640_v10  ;;  %v3055_v26 = vld [vmem:[#allocation8 + $0x16b0] sm:$0xff]  ;;  %v3078_v10 = vld [vmem:[#allocation8 + $0x1768] sm:$0xff] }
 0x317   :  { %v3089_v11 = vld [vmem:[#allocation8 + $0x17c0] sm:$0xff] }
 0x318   :  { %6927 = vmatpush1.bf16.msra.mxu1 %v6926_v25  ;;  %v2662_v25 = vld [vmem:[#allocation8 + $0xa68] sm:$0xff] }
 0x319   :  { %7119 = vmatpush1.bf16.msra.mxu0 %v7118_v52  ;;  %6929 = vmatprep.subr.bf16.mxu1 %v6928_v27  ;;  %v2673_v52 = vld [vmem:[#allocation8 + $0xac0] sm:$0xff]  ;;  %v6946_v27 = vpack.c.bf16 %v3000_v17, %v2989_v16  ;;  %v7150_v16 = vpack.c.bf16 %v2716_v9, %v2705_v5  ;;  %v6960_v17 = vpack.c.bf16 %v3089_v11, %v3078_v10  ;;  %v2816_v9 = vld [vmem:[#allocation8 + $0xf38] sm:$0xff]  ;;  %v2827_v10 = vld [vmem:[#allocation8 + $0xf90] sm:$0xff] }
 0x31a   :  { %7121 = vmatprep.subr.bf16.mxu0 %v7120_v48  ;;  %v6948_v48 = vpack.c.bf16 %v3023_v24, %v3012_v23  ;;  %v7140_v36 = vpack.c.bf16 %v2673_v52, %v2662_v25  ;;  %v8696_v23 = vsel %vm3745_vm0, %v3761_v7, %v8688_v8  ;;  %v2738_v25 = vld [vmem:[#allocation8 + $0xcc8] sm:$0xff]  ;;  %v3100_v52 = vld [vmem:[#allocation8 + $0x1818] sm:$0xff]  ;;  %v3177_v5 = vld [vmem:[#allocation8 + $0x1a80] sm:$0xff] }
 0x31c   :  { %6931 = vmatpush1.bf16.msra.mxu1 %v6930_v21  ;;  %v2672_v21 = vld [vmem:[#allocation8 + $0xab8] sm:$0xff] }
 0x31d   :  { %7123 = vmatpush1.bf16.msra.mxu0 %v7122_v4  ;;  %6933 = vmatprep.subr.bf16.mxu1 %v6932_v37  ;;  %v3034_v4 = vld [vmem:[#allocation8 + $0x1608] sm:$0xff]  ;;  %v3045_v37 = vld [vmem:[#allocation8 + $0x1660] sm:$0xff]  ;;  %v7142_v47 = vpack.c.bf16 %v2672_v21, %v2661_v33  ;;  %v2760_v21 = vld [vmem:[#allocation8 + $0xd78] sm:$0xff] }
 0x31e   :  { %7125 = vmatprep.subr.bf16.mxu0 %v7124_v43  ;;  %v6950_v43 = vpack.c.bf16 %v3022_v32, %v3011_v31  ;;  %v6952_v49 = vpack.c.bf16 %v3045_v37, %v3034_v4  ;;  %v3099_v32 = vld [vmem:[#allocation8 + $0x1810] sm:$0xff]  ;;  %v3110_v33 = vld [vmem:[#allocation8 + $0x1868] sm:$0xff]  ;;  %v3133_v37 = vld [vmem:[#allocation8 + $0x1920] sm:$0xff] }
 0x31f   :  { %v3122_v4 = vld [vmem:[#allocation8 + $0x18c8] sm:$0xff] }
 0x320   :  { %6935 = vmatpush1.bf16.msra.mxu1 %v6934_v51  ;;  %v8680_v51 = vrot.slane %v2298_v38, 2  ;;  %v2772_v38 = vld [vmem:[#allocation8 + $0xdd8] sm:$0xff]  ;;  %v6968_v45 = vpack.c.bf16 %v3133_v37, %v3122_v4 }
 0x321   :  { %7127 = vmatpush1.bf16.msra.mxu0 %v7126_v53  ;;  %6937 = vmatprep.subr.bf16.mxu1 %v6936_v40  ;;  %v7144_v53 = vpack.c.bf16 %v2695_v42, %v2684_v39  ;;  %v3033_v40 = vld [vmem:[#allocation8 + $0x1600] sm:$0xff]  ;;  %v2783_v39 = vld [vmem:[#allocation8 + $0xe30] sm:$0xff]  ;;  %v6966_v42 = vpack.c.bf16 %v3110_v33, %v3099_v32  ;;  %v2848_v37 = vld [vmem:[#allocation8 + $0x1038] sm:$0xff] }
 0x322   :  { %7129 = vmatprep.subr.bf16.mxu0 %v7128_v59  ;;  %v3056_v59 = vld [vmem:[#allocation8 + $0x16b8] sm:$0xff]  ;;  %v6954_v1 = vpack.c.bf16 %v3044_v44, %v3033_v40  ;;  %v3155_v44 = vld [vmem:[#allocation8 + $0x19d0] sm:$0xff] }
 0x323   :  { %v3144_v40 = vld [vmem:[#allocation8 + $0x1978] sm:$0xff] }
 0x324   :  { %6939 = vmatpush1.bf16.msra.mxu1 %v6938_v2  ;;  %v8685_v2 = vsel %vm3745_vm0, %v3752_v50, %v8680_v51  ;;  %v7160_v50 = vpack.c.bf16 %v2783_v39, %v2772_v38  ;;  %v3210_v38 = vld [vmem:[#allocation8 + $0x1b88] sm:$0xff]  ;;  %v3221_v39 = vld [vmem:[#allocation8 + $0x1be0] sm:$0xff] }
 0x325   :  { %7131 = vmatpush1.bf16.msra.mxu0 %v7130_v55  ;;  %6941 = vmatprep.subr.bf16.mxu1 %v6940_v3  ;;  %v7146_v55 = vpack.c.bf16 %v2694_v13, %v2683_v54  ;;  %v6956_v3 = vpack.c.bf16 %v3067_v60, %v3056_v59  ;;  %v2794_v54 = vld [vmem:[#allocation8 + $0xe88] sm:$0xff]  ;;  %v2805_v13 = vld [vmem:[#allocation8 + $0xee0] sm:$0xff] }
 0x326   :  { %7133 = vmatprep.subr.bf16.mxu0 %v7132_v6  ;;  %v7148_v6 = vpack.c.bf16 %v2717_v62, %v2706_v61  ;;  %v6972_v61 = vpack.c.bf16 %v3155_v44, %v3144_v40  ;;  %v3143_v62 = vld [vmem:[#allocation8 + $0x1970] sm:$0xff]  ;;  %v2870_v44 = vld [vmem:[#allocation8 + $0x10e8] sm:$0xff] }
 0x328   :  { %6943 = vmatpush1.bf16.msra.mxu1 %v6942_v0  ;;  %v2728_v0 = vld [vmem:[#allocation8 + $0xc78] sm:$0xff] }
 0x329   :  { %7135 = vmatpush1.bf16.msra.mxu0 %v7134_v12  ;;  %6945 = vmatprep.subr.bf16.mxu1 %v6944_v14  ;;  %v2739_v12 = vld [vmem:[#allocation8 + $0xcd0] sm:$0xff]  ;;  %v6958_v14 = vpack.c.bf16 %v3066_v58, %v3055_v26  ;;  %v2804_v26 = vld [vmem:[#allocation8 + $0xed8] sm:$0xff]  ;;  %v3166_v58 = vld [vmem:[#allocation8 + $0x1a28] sm:$0xff] }
 0x32a   :  { %7137 = vmatprep.subr.bf16.mxu0 %v7136_v19  ;;  %v3088_v19 = vld [vmem:[#allocation8 + $0x17b8] sm:$0xff]  ;;  %v7152_v24 = vpack.c.bf16 %v2739_v12, %v2728_v0  ;;  %v6974_v0 = vpack.c.bf16 %v3154_v63, %v3143_v62 }
 0x32c   :  { %6947 = vmatpush1.bf16.msra.mxu1 %v6946_v27  ;;  %v3111_v27 = vld [vmem:[#allocation8 + $0x1870] sm:$0xff] }
 0x32d   :  { %7139 = vmatpush1.bf16.msra.mxu0 %v7138_v30  ;;  %6949 = vmatprep.subr.bf16.mxu1 %v6948_v48  ;;  %v6962_v30 = vpack.c.bf16 %v3088_v19, %v3077_v18  ;;  %v7154_v48 = vpack.c.bf16 %v2738_v25, %v2727_v22  ;;  %v6964_v31 = vpack.c.bf16 %v3111_v27, %v3100_v52  ;;  %v2815_v18 = vld [vmem:[#allocation8 + $0xf30] sm:$0xff]  ;;  %v3188_v25 = vld [vmem:[#allocation8 + $0x1ad8] sm:$0xff] }
 0x32e   :  { %7141 = vmatprep.subr.bf16.mxu0 %v7140_v36  ;;  %v7156_v36 = vpack.c.bf16 %v2761_v29, %v2750_v28  ;;  %v7168_v22 = vpack.c.bf16 %v2827_v10, %v2816_v9  ;;  %v3199_v52 = vld [vmem:[#allocation8 + $0x1b30] sm:$0xff]  ;;  %v2838_v29 = vld [vmem:[#allocation8 + $0xfe8] sm:$0xff] }
 0x32f   :  { %v6980_v33 = vpack.c.bf16 %v3199_v52, %v3188_v25  ;;  %v2915_v9 = vld [vmem:[#allocation8 + $0x1250] sm:$0xff]  ;;  %v2937_v25 = vld [vmem:[#allocation8 + $0x1300] sm:$0xff] }
 0x330   :  { %6951 = vmatpush1.bf16.msra.mxu1 %v6950_v43  ;;  %v7158_v43 = vpack.c.bf16 %v2760_v21, %v2749_v34  ;;  %v3187_v34 = vld [vmem:[#allocation8 + $0x1ad0] sm:$0xff]  ;;  %v2837_v21 = vld [vmem:[#allocation8 + $0xfe0] sm:$0xff] }
 0x331   :  { %7143 = vmatpush1.bf16.msra.mxu0 %v7142_v47  ;;  %6953 = vmatprep.subr.bf16.mxu1 %v6952_v49  ;;  %v3132_v47 = vld [vmem:[#allocation8 + $0x1918] sm:$0xff]  ;;  %v2771_v49 = vld [vmem:[#allocation8 + $0xdd0] sm:$0xff] }
 0x332   :  { %7145 = vmatprep.subr.bf16.mxu0 %v7144_v53  ;;  %v2782_v53 = vld [vmem:[#allocation8 + $0xe28] sm:$0xff]  ;;  %v6970_v59 = vpack.c.bf16 %v3132_v47, %v3121_v46  ;;  %v7174_v46 = vpack.c.bf16 %v2848_v37, %v2837_v21  ;;  %v6984_v47 = vpack.c.bf16 %v3221_v39, %v3210_v38  ;;  %v2959_v21 = vld [vmem:[#allocation8 + $0x13b0] sm:$0xff]  ;;  %v3297_v39 = vld [vmem:[#allocation8 + $0x1e40] sm:$0xff] }
 0x333   :  { %3928 = vmatmul.mubr.f32.vlgmr.msra.gmra.mrb[18].mxu1 %v8685_v2  ;;  %v7162_v60 = vpack.c.bf16 %v2782_v53, %v2771_v49  ;;  %v3209_v49 = vld [vmem:[#allocation8 + $0x1b80] sm:$0xff]  ;;  %v2859_v53 = vld [vmem:[#allocation8 + $0x1090] sm:$0xff] }
 0x334   :  { %4159 = vmatmul.mubr.f32.vlgmr.msra.gmra.mrb[18].mxu0 %v8667_v35  ;;  %3933 = vmatprep.mubr.f32.mxu1 %v8670_v41  ;;  %v7178_v62 = vpack.c.bf16 %v2870_v44, %v2859_v53  ;;  %v2981_v53 = vld [vmem:[#allocation8 + $0x1460] sm:$0xff] }
 0x335   :  { %6955 = vmatpush1.bf16.msra.mxu1 %v6954_v1  ;;  %4164 = vmatprep.mubr.f32.mxu0 %v8630_v15  ;;  %v2793_v1 = vld [vmem:[#allocation8 + $0xe80] sm:$0xff] }
 0x336   :  { %7147 = vmatpush1.bf16.msra.mxu0 %v7146_v55  ;;  %6957 = vmatprep.subr.bf16.mxu1 %v6956_v3  ;;  %v7164_v3 = vpack.c.bf16 %v2805_v13, %v2794_v54  ;;  %v7166_v12 = vpack.c.bf16 %v2804_v26, %v2793_v1  ;;  %v3232_v54 = vld [vmem:[#allocation8 + $0x1c38] sm:$0xff]  ;;  %v3243_v13 = vld [vmem:[#allocation8 + $0x1c90] sm:$0xff] }
 0x337   :  { %3934 = vmatmul.mubr.f32.gmra.mrb[20].mxu1 %v8680_v51  ;;  %7149 = vmatprep.subr.bf16.mxu0 %v7148_v6  ;;  %v6988_v63 = vpack.c.bf16 %v3243_v13, %v3232_v54  ;;  %v3231_v1 = vld [vmem:[#allocation8 + $0x1c30] sm:$0xff] }
 0x338   :  { %4165 = vmatmul.mubr.f32.gmra.mrb[20].mxu0 %v8663_v20  ;;  %4004 = vmatprep.mubr.f32.mxu1 %v8696_v23  ;;  %v3319_v13 = vld [vmem:[#allocation8 + $0x1ef0] sm:$0xff] }
 0x339   :  { %6959 = vmatpush1.bf16.msra.mxu1 %v6958_v14  ;;  %4235 = vmatprep.mubr.f32.mxu0 %v8676_v56  ;;  %v6976_v14 = vpack.c.bf16 %v3177_v5, %v3166_v58  ;;  %v2892_v58 = vld [vmem:[#allocation8 + $0x1198] sm:$0xff]  ;;  %v3254_v5 = vld [vmem:[#allocation8 + $0x1ce8] sm:$0xff] }
 0x33a   :  { %7151 = vmatpush1.bf16.msra.mxu0 %v7150_v16  ;;  %6961 = vmatprep.subr.bf16.mxu1 %v6960_v17  ;;  %v3165_v16 = vld [vmem:[#allocation8 + $0x1a20] sm:$0xff]  ;;  %v3176_v17 = vld [vmem:[#allocation8 + $0x1a78] sm:$0xff] }
 0x33b   :  { %7153 = vmatprep.subr.bf16.mxu0 %v7152_v24  ;;  %v2826_v24 = vld [vmem:[#allocation8 + $0xf88] sm:$0xff] }
 0x33c   :  { %v7170_v32 = vpack.c.bf16 %v2826_v24, %v2815_v18  ;;  %v2914_v18 = vld [vmem:[#allocation8 + $0x1248] sm:$0xff] }
 0x33d   :  { %6963 = vmatpush1.bf16.msra.mxu1 %v6962_v30  ;;  %v2849_v30 = vld [vmem:[#allocation8 + $0x1040] sm:$0xff]  ;;  %v2926_v24 = vld [vmem:[#allocation8 + $0x12a8] sm:$0xff] }
 0x33e   :  { %7155 = vmatpush1.bf16.msra.mxu0 %v7154_v48  ;;  %6965 = vmatprep.subr.bf16.mxu1 %v6964_v31  ;;  %v6978_v31 = vpack.c.bf16 %v3176_v17, %v3165_v16  ;;  %v7172_v4 = vpack.c.bf16 %v2849_v30, %v2838_v29  ;;  %v2903_v16 = vld [vmem:[#allocation8 + $0x11f0] sm:$0xff]  ;;  %v3286_v30 = vld [vmem:[#allocation8 + $0x1de8] sm:$0xff] }
 0x33f   :  { %7157 = vmatprep.subr.bf16.mxu0 %v7156_v36  ;;  %v3198_v36 = vld [vmem:[#allocation8 + $0x1b28] sm:$0xff]  ;;  %v3275_v29 = vld [vmem:[#allocation8 + $0x1d90] sm:$0xff] }
 0x341   :  { %6967 = vmatpush1.bf16.msra.mxu1 %v6966_v42  ;;  %v2860_v42 = vld [vmem:[#allocation8 + $0x1098] sm:$0xff] }
 0x342   :  { %7159 = vmatpush1.bf16.msra.mxu0 %v7158_v43  ;;  %6969 = vmatprep.subr.bf16.mxu1 %v6968_v45  ;;  %v2871_v43 = vld [vmem:[#allocation8 + $0x10f0] sm:$0xff]  ;;  %v6982_v45 = vpack.c.bf16 %v3198_v36, %v3187_v34  ;;  %v3309_v34 = vld [vmem:[#allocation8 + $0x1ea0] sm:$0xff]  ;;  %v2948_v36 = vld [vmem:[#allocation8 + $0x1358] sm:$0xff] }
 0x343   :  { %7161 = vmatprep.subr.bf16.mxu0 %v7160_v50  ;;  %v1801_v55 = vpop.f32.mrb[10].mxu0  ;;  %v3220_v50 = vld [vmem:[#allocation8 + $0x1bd8] sm:$0xff]  ;;  %v7176_v40 = vpack.c.bf16 %v2871_v43, %v2860_v42  ;;  %v2947_v43 = vld [vmem:[#allocation8 + $0x1350] sm:$0xff] }
 0x344   :  { %2274 = vst [vmem:[%s8923_s5 + $0x20] sm:$0xff] %v1801_v55  ;;  %v1955_v6 = vpop.f32.mrb[6].mxu1  ;;  %v1803_v7 = vpop.f32.mrb[11].mxu0  ;;  %v3242_v55 = vld [vmem:[#allocation8 + $0x1c88] sm:$0xff]  ;;  %v3308_v42 = vld [vmem:[#allocation8 + $0x1e98] sm:$0xff] }
 0x345   :  { %6971 = vmatpush1.bf16.msra.mxu1 %v6970_v59  ;;  %2276 = vst [vmem:[%s8923_s5 + $0x30] sm:$0xff] %v1955_v6  ;;  %2275 = vst [vmem:[%s8923_s5 + $0x28] sm:$0xff] %v1803_v7  ;;  %v1957_v11 = vpop.f32.mrb[7].mxu1  ;;  %v2882_v59 = vld [vmem:[#allocation8 + $0x1148] sm:$0xff]  ;;  %v3265_v6 = vld [vmem:[#allocation8 + $0x1d40] sm:$0xff]  ;;  %v6990_v10 = vpack.c.bf16 %v3242_v55, %v3231_v1 }
 0x346   :  { %7163 = vmatpush1.bf16.msra.mxu0 %v7162_v60  ;;  %2277 = vst [vmem:[%s8923_s5 + $0x38] sm:$0xff] %v1957_v11  ;;  %6973 = vmatprep.subr.bf16.mxu1 %v6972_v61  ;;  %v2893_v60 = vld [vmem:[#allocation8 + $0x11a0] sm:$0xff]  ;;  %v6986_v61 = vpack.c.bf16 %v3220_v50, %v3209_v49  ;;  %v2904_v7 = vld [vmem:[#allocation8 + $0x11f8] sm:$0xff]  ;;  %v3331_v49 = vld [vmem:[#allocation8 + $0x1f50] sm:$0xff] }
 0x347   :  { %7165 = vmatprep.subr.bf16.mxu0 %v7164_v3  ;;  %v1807_v19 = vpop.f32.mrb[12].mxu0  ;;  %v2881_v3 = vld [vmem:[#allocation8 + $0x1140] sm:$0xff]  ;;  %v7180_v26 = vpack.c.bf16 %v2893_v60, %v2882_v59  ;;  %v7184_v17 = vpack.c.bf16 %v2915_v9, %v2904_v7  ;;  %v2970_v50 = vld [vmem:[#allocation8 + $0x1408] sm:$0xff]  ;;  %v2992_v55 = vld [vmem:[#allocation8 + $0x14b8] sm:$0xff] }
 0x348   :  { %2285 = vst [vmem:[%s8923_s5 + $0x78] sm:$0x3f] %v1807_v19  ;;  %v1961_v27 = vpop.f32.mrb[8].mxu1  ;;  %v1809_v28 = vpop.f32.mrb[13].mxu0  ;;  %v7182_v11 = vpack.c.bf16 %v2892_v58, %v2881_v3  ;;  %v3276_v19 = vld [vmem:[#allocation8 + $0x1d98] sm:$0xff]  ;;  %v3330_v59 = vld [vmem:[#allocation8 + $0x1f48] sm:$0xff] }
 0x349   :  { %6975 = vmatpush1.bf16.msra.mxu1 %v6974_v0  ;;  %2287 = vst [vmem:[%s8923_s5 + $0x88] sm:$0x3f] %v1961_v27  ;;  %2286 = vst [vmem:[%s8923_s5 + $0x80] sm:$0x3f] %v1809_v28  ;;  %v1963_v48 = vpop.f32.mrb[9].mxu1  ;;  %v6992_v0 = vpack.c.bf16 %v3265_v6, %v3254_v5  ;;  %v7186_v27 = vpack.c.bf16 %v2914_v18, %v2903_v16  ;;  %v2969_v60 = vld [vmem:[#allocation8 + $0x1400] sm:$0xff]  ;;  %v7006_v58 = vpack.c.bf16 %v3330_v59, %v3319_v13 }
 0x34a   :  { %7167 = vmatpush1.bf16.msra.mxu0 %v7166_v12  ;;  %2288 = vst [vmem:[%s8923_s5 + $0x90] sm:$0x3f] %v1963_v48  ;;  %6977 = vmatprep.subr.bf16.mxu1 %v6976_v14  ;;  %v3253_v12 = vld [vmem:[#allocation8 + $0x1ce0] sm:$0xff]  ;;  %v3264_v14 = vld [vmem:[#allocation8 + $0x1d38] sm:$0xff]  ;;  %v3003_v3 = vld [vmem:[#allocation8 + $0x1510] sm:$0xff] }
 0x34b   :  { %7169 = vmatprep.subr.bf16.mxu0 %v7168_v22  ;;  %v3287_v22 = vld [vmem:[#allocation8 + $0x1df0] sm:$0xff]  ;;  %v6994_v52 = vpack.c.bf16 %v3264_v14, %v3253_v12  ;;  %v2925_v48 = vld [vmem:[#allocation8 + $0x12a0] sm:$0xff]  ;;  %v7200_v16 = vpack.c.bf16 %v3003_v3, %v2992_v55  ;;  %v3364_v18 = vld [vmem:[#allocation8 + $0x2058] sm:$0xff] }
 0x34c   :  { %v6996_v28 = vpack.c.bf16 %v3287_v22, %v3276_v19  ;;  %v3353_v1 = vld [vmem:[#allocation8 + $0x2000] sm:$0xff]  ;;  %v2991_v12 = vld [vmem:[#allocation8 + $0x14b0] sm:$0xff]  ;;  %v3014_v22 = vld [vmem:[#allocation8 + $0x1568] sm:$0xff] }
 0x34d   :  { %6979 = vmatpush1.bf16.msra.mxu1 %v6978_v31  ;;  %v7188_v31 = vpack.c.bf16 %v2937_v25, %v2926_v24  ;;  %v2300_v5 = vld [vmem:[#allocation2] sm:$0xff]  ;;  %v3375_v19 = vld [vmem:[#allocation8 + $0x20b0] sm:$0xff]  ;;  %v3396_v59 = vld [vmem:[#allocation8 + $0x2158] sm:$0xff] }
 0x34e   :  { %7171 = vmatpush1.bf16.msra.mxu0 %v7170_v32  ;;  %6981 = vmatprep.subr.bf16.mxu1 %v6980_v33  ;;  %v2936_v32 = vld [vmem:[#allocation8 + $0x12f8] sm:$0xff]  ;;  %v3298_v33 = vld [vmem:[#allocation8 + $0x1e48] sm:$0xff]  ;;  %v2304_v6 = vld [vmem:[#allocation2 + $0x20] sm:$0xf]  ;;  %v2317_v25 = vrot.slane %v2300_v5, 6 }
 0x34f   :  { %7173 = vmatprep.subr.bf16.mxu0 %v7172_v4  ;;  %v6998_v4 = vpack.c.bf16 %v3286_v30, %v3275_v29  ;;  %v7190_v37 = vpack.c.bf16 %v2936_v32, %v2925_v48  ;;  %v7000_v38 = vpack.c.bf16 %v3309_v34, %v3298_v33  ;;  %v3025_v24 = vld [vmem:[#allocation8 + $0x15c0] sm:$0xff]  ;;  %v2303_v29 = vld [vmem:[#allocation2 + $0x18] sm:$0xff]  ;;  %v7012_v32 = vpack.c.bf16 %v3375_v19, %v3364_v18  ;;  %v3363_v33 = vld [vmem:[#allocation8 + $0x2050] sm:$0xff] }
 0x350   :  { %v2307_v30 = vld [vmem:[#allocation2 + $0x38] sm:$0xf]  ;;  %v3374_v34 = vld [vmem:[#allocation8 + $0x20a8] sm:$0xff]  ;;  %v3385_v13 = vld [vmem:[#allocation8 + $0x2100] sm:$0xff] }
 0x351   :  { %6983 = vmatpush1.bf16.msra.mxu1 %v6982_v45  ;;  %v7192_v45 = vpack.c.bf16 %v2959_v21, %v2948_v36  ;;  %v3013_v36 = vld [vmem:[#allocation8 + $0x1560] sm:$0xff]  ;;  %v3080_v19 = vld [vmem:[#allocation8 + $0x1778] sm:$0xff] }
 0x352   :  { %7175 = vmatpush1.bf16.msra.mxu0 %v7174_v46  ;;  %6985 = vmatprep.subr.bf16.mxu1 %v6984_v47  ;;  %v2958_v46 = vld [vmem:[#allocation8 + $0x13a8] sm:$0xff]  ;;  %v3320_v47 = vld [vmem:[#allocation8 + $0x1ef8] sm:$0xff]  ;;  %v3069_v55 = vld [vmem:[#allocation8 + $0x1720] sm:$0xff] }
 0x353   :  { %7177 = vmatprep.subr.bf16.mxu0 %v7176_v40  ;;  %v7002_v40 = vpack.c.bf16 %v3308_v42, %v3297_v39  ;;  %v7194_v44 = vpack.c.bf16 %v2958_v46, %v2947_v43  ;;  %v7004_v54 = vpack.c.bf16 %v3331_v49, %v3320_v47  ;;  %v3397_v39 = vld [vmem:[#allocation8 + $0x2160] sm:$0xff]  ;;  %v3036_v43 = vld [vmem:[#allocation8 + $0x1618] sm:$0xff]  ;;  %v7014_v46 = vpack.c.bf16 %v3374_v34, %v3363_v33  ;;  %v3463_v33 = vld [vmem:[#allocation8 + $0x2370] sm:$0xff] }
 0x354   :  { %v2320_v47 = vrot.slane %v2303_v29, 6  ;;  %v2327_v49 = vrot.slane %v2307_v30, 6  ;;  %v3441_v18 = vld [vmem:[#allocation8 + $0x22c0] sm:$0xff]  ;;  %v3079_v29 = vld [vmem:[#allocation8 + $0x1770] sm:$0xff]  ;;  %v3102_v34 = vld [vmem:[#allocation8 + $0x1828] sm:$0xff] }
 0x355   :  { %6987 = vmatpush1.bf16.msra.mxu1 %v6986_v61  ;;  %v7196_v61 = vpack.c.bf16 %v2981_v53, %v2970_v50 }
 0x356   :  { %7179 = vmatpush1.bf16.msra.mxu0 %v7178_v62  ;;  %6989 = vmatprep.subr.bf16.mxu1 %v6988_v63  ;;  %v2980_v62 = vld [vmem:[#allocation8 + $0x1458] sm:$0xff]  ;;  %v3342_v63 = vld [vmem:[#allocation8 + $0x1fa8] sm:$0xff]  ;;  %v2328_v3 = vsel %vm2316_vm1, %v2320_v47, %v2327_v49  ;;  %v3485_v49 = vld [vmem:[#allocation8 + $0x2420] sm:$0xff] }
 0x357   :  { %7181 = vmatprep.subr.bf16.mxu0 %v7180_v26  ;;  %v7198_v9 = vpack.c.bf16 %v2980_v62, %v2969_v60  ;;  %v3035_v60 = vld [vmem:[#allocation8 + $0x1610] sm:$0xff]  ;;  %v3408_v62 = vld [vmem:[#allocation8 + $0x21b8] sm:$0xff] }
 0x359   :  { %6991 = vmatpush1.bf16.msra.mxu1 %v6990_v10  ;;  %v7008_v10 = vpack.c.bf16 %v3353_v1, %v3342_v63  ;;  %v3419_v63 = vld [vmem:[#allocation8 + $0x2210] sm:$0xff]  ;;  %v3058_v1 = vld [vmem:[#allocation8 + $0x16c8] sm:$0xff] }
 0x35a   :  { %7183 = vmatpush1.bf16.msra.mxu0 %v7182_v11  ;;  %6993 = vmatprep.subr.bf16.mxu1 %v6992_v0  ;;  %v3341_v11 = vld [vmem:[#allocation8 + $0x1fa0] sm:$0xff]  ;;  %v3352_v0 = vld [vmem:[#allocation8 + $0x1ff8] sm:$0xff] }
 0x35b   :  { %7185 = vmatprep.subr.bf16.mxu0 %v7184_v17  ;;  %v3002_v17 = vld [vmem:[#allocation8 + $0x1508] sm:$0xff] }
 0x35d   :  { %6995 = vmatpush1.bf16.msra.mxu1 %v6994_v52  ;;  %v2321_v52 = vrot.slane %v2304_v6, 6  ;;  %v7020_v6 = vpack.c.bf16 %v3419_v63, %v3408_v62  ;;  %v3134_v63 = vld [vmem:[#allocation8 + $0x1928] sm:$0xff] }
 0x35e   :  { %7187 = vmatpush1.bf16.msra.mxu0 %v7186_v27  ;;  %6997 = vmatprep.subr.bf16.mxu1 %v6996_v28  ;;  %v7010_v28 = vpack.c.bf16 %v3352_v0, %v3341_v11  ;;  %v7212_v11 = vpack.c.bf16 %v3069_v55, %v3058_v1  ;;  %v3767_v0 = vrot.slane %v2320_v47, 2  ;;  %v3474_v47 = vld [vmem:[#allocation8 + $0x23c8] sm:$0xff]  ;;  %v3496_v1 = vld [vmem:[#allocation8 + $0x2478] sm:$0xff]  ;;  %v3507_v55 = vld [vmem:[#allocation8 + $0x24d0] sm:$0xff] }
 0x35f   :  { %7189 = vmatprep.subr.bf16.mxu0 %v7188_v31  ;;  %v7202_v31 = vpack.c.bf16 %v3002_v17, %v2991_v12  ;;  %v2322_v42 = vsel %vm2316_vm1, %v2317_v25, %v2321_v52  ;;  %v8738_v12 = vrot.slane %v2328_v3, 2  ;;  %v3430_v17 = vld [vmem:[#allocation8 + $0x2268] sm:$0xff] }
 0x360   :  { %v7024_v52 = vpack.c.bf16 %v3441_v18, %v3430_v17  ;;  %v3146_v3 = vld [vmem:[#allocation8 + $0x1988] sm:$0xff]  ;;  %v3529_v18 = vld [vmem:[#allocation8 + $0x2580] sm:$0xff] }
 0x361   :  { %6999 = vmatpush1.bf16.msra.mxu1 %v6998_v4  ;;  %v7204_v4 = vpack.c.bf16 %v3025_v24, %v3014_v22  ;;  %v3091_v22 = vld [vmem:[#allocation8 + $0x17d0] sm:$0xff]  ;;  %v8746_v30 = vsel %vm3745_vm0, %v3767_v0, %v8738_v12  ;;  %v3518_v17 = vld [vmem:[#allocation8 + $0x2528] sm:$0xff] }
 0x362   :  { %7191 = vmatpush1.bf16.msra.mxu0 %v7190_v37  ;;  %7001 = vmatprep.subr.bf16.mxu1 %v7000_v38  ;;  %v3024_v37 = vld [vmem:[#allocation8 + $0x15b8] sm:$0xff]  ;;  %v3386_v38 = vld [vmem:[#allocation8 + $0x2108] sm:$0xff] }
 0x363   :  { %7193 = vmatprep.subr.bf16.mxu0 %v7192_v45  ;;  %v3047_v45 = vld [vmem:[#allocation8 + $0x1670] sm:$0xff]  ;;  %v7206_v50 = vpack.c.bf16 %v3024_v37, %v3013_v36  ;;  %v7016_v53 = vpack.c.bf16 %v3397_v39, %v3386_v38  ;;  %v3113_v36 = vld [vmem:[#allocation8 + $0x1880] sm:$0xff] }
 0x364   :  { %v3451_v39 = vld [vmem:[#allocation8 + $0x2310] sm:$0xff] }
 0x365   :  { %7003 = vmatpush1.bf16.msra.mxu1 %v7002_v40  ;;  %v5732_v26 = vpop.f32.mrb[10].mxu1  ;;  %v3758_v40 = vrot.slane %v2317_v25, 2 }
 0x366   :  { %7195 = vmatpush1.bf16.msra.mxu0 %v7194_v44  ;;  %v5733_v7 = vpop.f32.mrb[11].mxu1  ;;  %7005 = vmatprep.subr.bf16.mxu1 %v7004_v54  ;;  %v8730_v44 = vrot.slane %v2322_v42, 2  ;;  %v7208_v54 = vpack.c.bf16 %v3047_v45, %v3036_v43  ;;  %v3462_v42 = vld [vmem:[#allocation8 + $0x2368] sm:$0xff]  ;;  %v3101_v43 = vld [vmem:[#allocation8 + $0x1820] sm:$0xff]  ;;  %v7220_v45 = vpack.c.bf16 %v3113_v36, %v3102_v34  ;;  %v3540_v36 = vld [vmem:[#allocation8 + $0x25d8] sm:$0xff] }
 0x367   :  { %v8725_v14 = vadd.f32 %v5733_v7, %v5732_v26  ;;  %7197 = vmatprep.subr.bf16.mxu0 %v7196_v61  ;;  %v3046_v61 = vld [vmem:[#allocation8 + $0x1668] sm:$0xff]  ;;  %v7018_v26 = vpack.c.bf16 %v3396_v59, %v3385_v13  ;;  %v3407_v7 = vld [vmem:[#allocation8 + $0x21b0] sm:$0xff]  ;;  %v7032_v13 = vpack.c.bf16 %v3485_v49, %v3474_v47  ;;  %v3473_v59 = vld [vmem:[#allocation8 + $0x23c0] sm:$0xff] }
 0x368   :  { %v7210_v5 = vpack.c.bf16 %v3046_v61, %v3035_v60  ;;  %v3484_v60 = vld [vmem:[#allocation8 + $0x2418] sm:$0xff]  ;;  %v3123_v61 = vld [vmem:[#allocation8 + $0x18d0] sm:$0xff]  ;;  %v3178_v34 = vld [vmem:[#allocation8 + $0x1a88] sm:$0xff] }
 0x369   :  { %7007 = vmatpush1.bf16.msra.mxu1 %v7006_v58  ;;  %v5735_v27 = vpop.f32.mrb[12].mxu1  ;;  %v8735_v58 = vsel %vm3745_vm0, %v3758_v40, %v8730_v44  ;;  %v7030_v40 = vpack.c.bf16 %v3462_v42, %v3451_v39  ;;  %v3190_v39 = vld [vmem:[#allocation8 + $0x1ae8] sm:$0xff]  ;;  %v3201_v42 = vld [vmem:[#allocation8 + $0x1b40] sm:$0xff] }
 0x36a   :  { %7199 = vmatpush1.bf16.msra.mxu0 %v7198_v9  ;;  %v5736_v48 = vpop.f32.mrb[13].mxu1  ;;  %7009 = vmatprep.subr.bf16.mxu1 %v7008_v10  ;;  %v3418_v9 = vld [vmem:[#allocation8 + $0x2208] sm:$0xff]  ;;  %v3057_v10 = vld [vmem:[#allocation8 + $0x16c0] sm:$0xff] }
 0x36b   :  { %v8727_v21 = vadd.f32 %v5736_v48, %v5735_v27  ;;  %7201 = vmatprep.subr.bf16.mxu0 %v7200_v16  ;;  %v3068_v16 = vld [vmem:[#allocation8 + $0x1718] sm:$0xff]  ;;  %v7022_v24 = vpack.c.bf16 %v3418_v9, %v3407_v7  ;;  %v3429_v27 = vld [vmem:[#allocation8 + $0x2260] sm:$0xff]  ;;  %v7216_v48 = vpack.c.bf16 %v3091_v22, %v3080_v19  ;;  %v7036_v7 = vpack.c.bf16 %v3507_v55, %v3496_v1  ;;  %v3495_v9 = vld [vmem:[#allocation8 + $0x2470] sm:$0xff] }
 0x36c   :  { %v7214_v25 = vpack.c.bf16 %v3068_v16, %v3057_v10  ;;  %v3506_v10 = vld [vmem:[#allocation8 + $0x24c8] sm:$0xff]  ;;  %v3156_v16 = vld [vmem:[#allocation8 + $0x19d8] sm:$0xff] }
 0x36d   :  { %7011 = vmatpush1.bf16.msra.mxu1 %v7010_v28  ;;  %v3440_v28 = vld [vmem:[#allocation8 + $0x22b8] sm:$0xff] }
 0x36e   :  { %7203 = vmatpush1.bf16.msra.mxu0 %v7202_v31  ;;  %7013 = vmatprep.subr.bf16.mxu1 %v7012_v32  ;;  %v3090_v31 = vld [vmem:[#allocation8 + $0x17c8] sm:$0xff]  ;;  %v3452_v32 = vld [vmem:[#allocation8 + $0x2318] sm:$0xff] }
 0x36f   :  { %7205 = vmatprep.subr.bf16.mxu0 %v7204_v4  ;;  %v7026_v4 = vpack.c.bf16 %v3440_v28, %v3429_v27  ;;  %v7218_v37 = vpack.c.bf16 %v3090_v31, %v3079_v29  ;;  %v7028_v38 = vpack.c.bf16 %v3463_v33, %v3452_v32  ;;  %v3168_v22 = vld [vmem:[#allocation8 + $0x1a38] sm:$0xff]  ;;  %v7040_v29 = vpack.c.bf16 %v3529_v18, %v3518_v17  ;;  %v3167_v32 = vld [vmem:[#allocation8 + $0x1a30] sm:$0xff] }
 0x370   :  { %v3528_v31 = vld [vmem:[#allocation8 + $0x2578] sm:$0xff]  ;;  %v7234_v47 = vpack.c.bf16 %v3178_v34, %v3167_v32  ;;  %v3583_v18 = vld [vmem:[#allocation8 + $0x2730] sm:$0xff] }
 0x371   :  { %7015 = vmatpush1.bf16.msra.mxu1 %v7014_v46  ;;  %v3112_v46 = vld [vmem:[#allocation8 + $0x1878] sm:$0xff] }
 0x372   :  { %7207 = vmatpush1.bf16.msra.mxu0 %v7206_v50  ;;  %7017 = vmatprep.subr.bf16.mxu1 %v7016_v53  ;;  %v3124_v50 = vld [vmem:[#allocation8 + $0x18d8] sm:$0xff]  ;;  %v3135_v53 = vld [vmem:[#allocation8 + $0x1930] sm:$0xff] }
 0x373   :  { %7209 = vmatprep.subr.bf16.mxu0 %v7208_v54  ;;  %v7222_v54 = vpack.c.bf16 %v3112_v46, %v3101_v43  ;;  %v7224_v62 = vpack.c.bf16 %v3135_v53, %v3124_v50  ;;  %v3539_v50 = vld [vmem:[#allocation8 + $0x25d0] sm:$0xff]  ;;  %v3550_v53 = vld [vmem:[#allocation8 + $0x2628] sm:$0xff]  ;;  %v3616_v34 = vld [vmem:[#allocation8 + $0x2838] sm:$0xff] }
 0x374   :  { %4005 = vmatmul.mubr.f32.vlgmr.msra.gmra.mrb[18].mxu1 %v8735_v58 }
 0x375   :  { %4236 = vmatmul.mubr.f32.vlgmr.msra.gmra.mrb[18].mxu0 %v8685_v2  ;;  %4010 = vmatprep.mubr.f32.mxu1 %v8688_v8 }
 0x376   :  { %7019 = vmatpush1.bf16.msra.mxu1 %v7018_v26  ;;  %4241 = vmatprep.mubr.f32.mxu0 %v8670_v41  ;;  %v3157_v26 = vld [vmem:[#allocation8 + $0x19e0] sm:$0xff] }
 0x377   :  { %7211 = vmatpush1.bf16.msra.mxu0 %v7210_v5  ;;  %7021 = vmatprep.subr.bf16.mxu1 %v7020_v6  ;;  %v7034_v5 = vpack.c.bf16 %v3484_v60, %v3473_v59  ;;  %v7226_v6 = vpack.c.bf16 %v3134_v63, %v3123_v61  ;;  %v7228_v0 = vpack.c.bf16 %v3157_v26, %v3146_v3  ;;  %v3573_v59 = vld [vmem:[#allocation8 + $0x26e0] sm:$0xff]  ;;  %v3212_v61 = vld [vmem:[#allocation8 + $0x1b98] sm:$0xff] }
 0x378   :  { %4011 = vmatmul.mubr.f32.gmra.mrb[20].mxu1 %v8730_v44  ;;  %7213 = vmatprep.subr.bf16.mxu0 %v7212_v11  ;;  %v3145_v11 = vld [vmem:[#allocation8 + $0x1980] sm:$0xff]  ;;  %v7046_v63 = vpack.c.bf16 %v3550_v53, %v3539_v50  ;;  %v3572_v26 = vld [vmem:[#allocation8 + $0x26d8] sm:$0xff]  ;;  %v3638_v50 = vld [vmem:[#allocation8 + $0x28e8] sm:$0xff] }
 0x379   :  { %4242 = vmatmul.mubr.f32.gmra.mrb[20].mxu0 %v8680_v51  ;;  %4081 = vmatprep.mubr.f32.mxu1 %v8746_v30  ;;  %v7230_v28 = vpack.c.bf16 %v3156_v16, %v3145_v11  ;;  %v3561_v3 = vld [vmem:[#allocation8 + $0x2680] sm:$0xff] }
 0x37a   :  { %7023 = vmatpush1.bf16.msra.mxu1 %v7022_v24  ;;  %4312 = vmatprep.mubr.f32.mxu0 %v8696_v23  ;;  %v3179_v24 = vld [vmem:[#allocation8 + $0x1a90] sm:$0xff]  ;;  %v3245_v11 = vld [vmem:[#allocation8 + $0x1ca0] sm:$0xff] }
 0x37b   :  { %7215 = vmatpush1.bf16.msra.mxu0 %v7214_v25  ;;  %7025 = vmatprep.subr.bf16.mxu1 %v7024_v52  ;;  %v7038_v52 = vpack.c.bf16 %v3506_v10, %v3495_v9  ;;  %v7232_v33 = vpack.c.bf16 %v3179_v24, %v3168_v22  ;;  %v3584_v9 = vld [vmem:[#allocation8 + $0x2738] sm:$0xff]  ;;  %v3234_v10 = vld [vmem:[#allocation8 + $0x1c48] sm:$0xff]  ;;  %v3233_v22 = vld [vmem:[#allocation8 + $0x1c40] sm:$0xff] }
 0x37c   :  { %7217 = vmatprep.subr.bf16.mxu0 %v7216_v48  ;;  %v3517_v48 = vld [vmem:[#allocation8 + $0x2520] sm:$0xff]  ;;  %v7244_v24 = vpack.c.bf16 %v3245_v11, %v3234_v10 }
 0x37d   :  { %v3277_v53 = vld [vmem:[#allocation8 + $0x1da0] sm:$0xff] }
 0x37e   :  { %7027 = vmatpush1.bf16.msra.mxu1 %v7026_v4  ;;  %v3551_v4 = vld [vmem:[#allocation8 + $0x2630] sm:$0xff] }
 0x37f   :  { %7219 = vmatpush1.bf16.msra.mxu0 %v7218_v37  ;;  %7029 = vmatprep.subr.bf16.mxu1 %v7028_v38  ;;  %v7044_v49 = vpack.c.bf16 %v3551_v4, %v3540_v36  ;;  %v3255_v36 = vld [vmem:[#allocation8 + $0x1cf0] sm:$0xff] }
 0x380   :  { %7221 = vmatprep.subr.bf16.mxu0 %v7220_v45  ;;  %v7042_v45 = vpack.c.bf16 %v3528_v31, %v3517_v48 }
 0x382   :  { %7031 = vmatpush1.bf16.msra.mxu1 %v7030_v40  ;;  %v3189_v40 = vld [vmem:[#allocation8 + $0x1ae0] sm:$0xff] }
 0x383   :  { %7223 = vmatpush1.bf16.msra.mxu0 %v7222_v54  ;;  %7033 = vmatprep.subr.bf16.mxu1 %v7032_v13  ;;  %v3200_v54 = vld [vmem:[#allocation8 + $0x1b38] sm:$0xff]  ;;  %v3562_v13 = vld [vmem:[#allocation8 + $0x2688] sm:$0xff] }
 0x384   :  { %7225 = vmatprep.subr.bf16.mxu0 %v7224_v62  ;;  %v3223_v62 = vld [vmem:[#allocation8 + $0x1bf0] sm:$0xff]  ;;  %v7238_v1 = vpack.c.bf16 %v3200_v54, %v3189_v40  ;;  %v7048_v55 = vpack.c.bf16 %v3573_v59, %v3562_v13  ;;  %v3650_v54 = vld [vmem:[#allocation8 + $0x2948] sm:$0xff]  ;;  %v3661_v13 = vld [vmem:[#allocation8 + $0x29a0] sm:$0xff] }
 0x385   :  { %v5770_v19 = vpop.f32.mrb[14].mxu1  ;;  %v3300_v59 = vld [vmem:[#allocation8 + $0x1e58] sm:$0xff] }
 0x386   :  { %7035 = vmatpush1.bf16.msra.mxu1 %v7034_v5  ;;  %v5771_v25 = vpop.f32.mrb[15].mxu1  ;;  %v3211_v5 = vld [vmem:[#allocation8 + $0x1b90] sm:$0xff] }
 0x387   :  { %7227 = vmatpush1.bf16.msra.mxu0 %v7226_v6  ;;  %v5772_v27 = vadd.f32 %v5771_v25, %v5770_v19  ;;  %7037 = vmatprep.subr.bf16.mxu1 %v7036_v7  ;;  %v7240_v6 = vpack.c.bf16 %v3223_v62, %v3212_v61  ;;  %v3222_v7 = vld [vmem:[#allocation8 + $0x1be8] sm:$0xff]  ;;  %v3244_v25 = vld [vmem:[#allocation8 + $0x1c98] sm:$0xff] }
 0x388   :  { %7229 = vmatprep.subr.bf16.mxu0 %v7228_v0  ;;  %v7050_v0 = vpack.c.bf16 %v3572_v26, %v3561_v3  ;;  %v7242_v16 = vpack.c.bf16 %v3222_v7, %v3211_v5  ;;  %v3594_v19 = vld [vmem:[#allocation8 + $0x2788] sm:$0xff]  ;;  %v7246_v31 = vpack.c.bf16 %v3244_v25, %v3233_v22  ;;  %v3299_v3 = vld [vmem:[#allocation8 + $0x1e50] sm:$0xff]  ;;  %v3332_v22 = vld [vmem:[#allocation8 + $0x1f58] sm:$0xff] }
 0x389   :  { %v2262_v37 = vadd.f32 %v5772_v27, %v8725_v14  ;;  %v5773_v38 = vpop.f32.mrb[16].mxu1  ;;  %v7236_v14 = vpack.c.bf16 %v3201_v42, %v3190_v39  ;;  %v3617_v27 = vld [vmem:[#allocation8 + $0x2840] sm:$0xff]  ;;  %v7054_v48 = vpack.c.bf16 %v3594_v19, %v3583_v18  ;;  %v3639_v39 = vld [vmem:[#allocation8 + $0x28f0] sm:$0xff]  ;;  %v3278_v42 = vld [vmem:[#allocation8 + $0x1da8] sm:$0xff] }
 0x38a   :  { %7039 = vmatpush1.bf16.msra.mxu1 %v7038_v52  ;;  %v5774_v43 = vpop.f32.mrb[17].mxu1  ;;  %v3606_v52 = vld [vmem:[#allocation8 + $0x27e8] sm:$0xff]  ;;  %v3683_v7 = vld [vmem:[#allocation8 + $0x2a50] sm:$0xff]  ;;  %v3321_v18 = vld [vmem:[#allocation8 + $0x1f00] sm:$0xff] }
 0x38b   :  { %2280 = vst [vmem:[%s8923_s5 + $0x50] sm:$0xff] %v2262_v37  ;;  %7231 = vmatpush1.bf16.msra.mxu0 %v7230_v28  ;;  %v5775_v46 = vadd.f32 %v5774_v43, %v5773_v38  ;;  %7041 = vmatprep.subr.bf16.mxu1 %v7040_v29  ;;  %v3256_v28 = vld [vmem:[#allocation8 + $0x1cf8] sm:$0xff]  ;;  %v3267_v29 = vld [vmem:[#allocation8 + $0x1d50] sm:$0xff]  ;;  %v7056_v32 = vpack.c.bf16 %v3617_v27, %v3606_v52  ;;  %v3266_v37 = vld [vmem:[#allocation8 + $0x1d48] sm:$0xff] }
 0x38c   :  { %7233 = vmatprep.subr.bf16.mxu0 %v7232_v33  ;;  %v3605_v33 = vld [vmem:[#allocation8 + $0x27e0] sm:$0xff]  ;;  %v7248_v4 = vpack.c.bf16 %v3267_v29, %v3256_v28  ;;  %v3628_v38 = vld [vmem:[#allocation8 + $0x2898] sm:$0xff]  ;;  %v3310_v5 = vld [vmem:[#allocation8 + $0x1ea8] sm:$0xff] }
 0x38d   :  { %v2267_v60 = vadd.f32 %v5775_v46, %v8727_v21  ;;  %v3595_v21 = vld [vmem:[#allocation8 + $0x2790] sm:$0xff]  ;;  %v3289_v43 = vld [vmem:[#allocation8 + $0x1e00] sm:$0xff]  ;;  %v7250_v46 = vpack.c.bf16 %v3266_v37, %v3255_v36  ;;  %v7258_v11 = vpack.c.bf16 %v3310_v5, %v3299_v3  ;;  %v3344_v52 = vld [vmem:[#allocation8 + $0x1fb8] sm:$0xff] }
 0x38e   :  { %7043 = vmatpush1.bf16.msra.mxu1 %v7042_v45  ;;  %v7052_v17 = vpack.c.bf16 %v3595_v21, %v3584_v9  ;;  %v7058_v45 = vpack.c.bf16 %v3616_v34, %v3605_v33  ;;  %v7252_v40 = vpack.c.bf16 %v3289_v43, %v3278_v42  ;;  %v3322_v9 = vld [vmem:[#allocation8 + $0x1f08] sm:$0xff]  ;;  %v3333_v21 = vld [vmem:[#allocation8 + $0x1f60] sm:$0xff]  ;;  %v3355_v27 = vld [vmem:[#allocation8 + $0x2010] sm:$0xff] }
 0x38f   :  { %2291 = vst [vmem:[%s8923_s5 + $0xa8] sm:$0x3f] %v2267_v60  ;;  %7235 = vmatpush1.bf16.msra.mxu0 %v7234_v47  ;;  %7045 = vmatprep.subr.bf16.mxu1 %v7044_v49  ;;  %v7060_v47 = vpack.c.bf16 %v3639_v39, %v3628_v38  ;;  %v3627_v49 = vld [vmem:[#allocation8 + $0x2890] sm:$0xff]  ;;  %v7260_v19 = vpack.c.bf16 %v3333_v21, %v3322_v9  ;;  %v3705_v25 = vld [vmem:[#allocation8 + $0x2b00] sm:$0xff]  ;;  %v3704_v34 = vld [vmem:[#allocation8 + $0x2af8] sm:$0xff] }
 0x390   :  { %7237 = vmatprep.subr.bf16.mxu0 %v7236_v14  ;;  %v3288_v14 = vld [vmem:[#allocation8 + $0x1df8] sm:$0xff]  ;;  %v3311_v60 = vld [vmem:[#allocation8 + $0x1eb0] sm:$0xff]  ;;  %v7062_v61 = vpack.c.bf16 %v3638_v50, %v3627_v49  ;;  %v3693_v33 = vld [vmem:[#allocation8 + $0x2aa0] sm:$0xff] }
 0x391   :  { %v7254_v62 = vpack.c.bf16 %v3288_v14, %v3277_v53  ;;  %v7256_v26 = vpack.c.bf16 %v3311_v60, %v3300_v59  ;;  %v2302_v29 = vld [vmem:[#allocation2 + $0x10] sm:$0xff]  ;;  %v3354_v37 = vld [vmem:[#allocation8 + $0x2008] sm:$0xff]  ;;  %v3716_v38 = vld [vmem:[#allocation8 + $0x2b58] sm:$0xff] }
 0x392   :  { %7047 = vmatpush1.bf16.msra.mxu1 %v7046_v63  ;;  %v7064_v63 = vpack.c.bf16 %v3661_v13, %v3650_v54  ;;  %v3343_v36 = vld [vmem:[#allocation8 + $0x1fb0] sm:$0xff]  ;;  %v3366_v42 = vld [vmem:[#allocation8 + $0x2068] sm:$0xff]  ;;  %v3377_v43 = vld [vmem:[#allocation8 + $0x20c0] sm:$0xff] }
 0x393   :  { %7239 = vmatpush1.bf16.msra.mxu0 %v7238_v1  ;;  %7049 = vmatprep.subr.bf16.mxu1 %v7048_v55  ;;  %v3649_v1 = vld [vmem:[#allocation8 + $0x2940] sm:$0xff]  ;;  %v3660_v55 = vld [vmem:[#allocation8 + $0x2998] sm:$0xff]  ;;  %v3727_v39 = vld [vmem:[#allocation8 + $0x2bb0] sm:$0xff]  ;;  %v7266_v49 = vpack.c.bf16 %v3354_v37, %v3343_v36  ;;  %v7268_v54 = vpack.c.bf16 %v3377_v43, %v3366_v42 }
 0x394   :  { %7241 = vmatprep.subr.bf16.mxu0 %v7240_v6  ;;  %v3672_v6 = vld [vmem:[#allocation8 + $0x29f8] sm:$0xff]  ;;  %v7066_v10 = vpack.c.bf16 %v3660_v55, %v3649_v1  ;;  %v7076_v50 = vpack.c.bf16 %v3727_v39, %v3716_v38  ;;  %v3715_v53 = vld [vmem:[#allocation8 + $0x2b50] sm:$0xff]  ;;  %v3365_v14 = vld [vmem:[#allocation8 + $0x2060] sm:$0xff] }
 0x395   :  { %v3376_v13 = vld [vmem:[#allocation8 + $0x20b8] sm:$0xff]  ;;  %v2334_v59 = vld [vmem:[#allocation8 + $0x28] sm:$0xff]  ;;  %v2345_v60 = vld [vmem:[#allocation8 + $0x80] sm:$0xff] }
 0x396   :  { %7051 = vmatpush1.bf16.msra.mxu1 %v7050_v0  ;;  %v7068_v0 = vpack.c.bf16 %v3683_v7, %v3672_v6  ;;  %v7270_v55 = vpack.c.bf16 %v3376_v13, %v3365_v14  ;;  %v7336_v3 = vpack.c.bf16 %v2345_v60, %v2334_v59  ;;  %v3387_v7 = vld [vmem:[#allocation8 + $0x2110] sm:$0xff]  ;;  %v3398_v9 = vld [vmem:[#allocation8 + $0x2168] sm:$0xff]  ;;  %v2333_v21 = vld [vmem:[#allocation8 + $0x20] sm:$0xff] }
 0x397   :  { %7243 = vmatpush1.bf16.msra.mxu0 %v7242_v16  ;;  %7053 = vmatprep.subr.bf16.mxu1 %v7052_v17  ;;  %v3671_v16 = vld [vmem:[#allocation8 + $0x29f0] sm:$0xff]  ;;  %v3682_v17 = vld [vmem:[#allocation8 + $0x2a48] sm:$0xff]  ;;  %v2377_v39 = vld [vmem:[#allocation8 + $0x180] sm:$0xff] }
 0x398   :  { %7245 = vmatprep.subr.bf16.mxu0 %v7244_v24  ;;  %v3694_v24 = vld [vmem:[#allocation8 + $0x2aa8] sm:$0xff]  ;;  %v7070_v28 = vpack.c.bf16 %v3682_v17, %v3671_v16  ;;  %v2356_v16 = vld [vmem:[#allocation8 + $0xd8] sm:$0xff]  ;;  %v2367_v17 = vld [vmem:[#allocation8 + $0x130] sm:$0xff] }
 0x399   :  { %v3431_v37 = vld [vmem:[#allocation8 + $0x2270] sm:$0xff]  ;;  %v3442_v38 = vld [vmem:[#allocation8 + $0x22c8] sm:$0xff]  ;;  %v2388_v43 = vld [vmem:[#allocation8 + $0x1d8] sm:$0xff] }
 0x39a   :  { %7055 = vmatpush1.bf16.msra.mxu1 %v7054_v48  ;;  %v2306_v48 = vld [vmem:[#allocation2 + $0x30] sm:$0xf]  ;;  %v3453_v14 = vld [vmem:[#allocation8 + $0x2320] sm:$0xff]  ;;  %v2410_v60 = vld [vmem:[#allocation8 + $0x288] sm:$0xff] }
 0x39b   :  { %7247 = vmatpush1.bf16.msra.mxu0 %v7246_v31  ;;  %7057 = vmatprep.subr.bf16.mxu1 %v7056_v32  ;;  %v7262_v31 = vpack.c.bf16 %v3332_v22, %v3321_v18  ;;  %v7072_v32 = vpack.c.bf16 %v3705_v25, %v3694_v24  ;;  %v7274_v18 = vpack.c.bf16 %v3398_v9, %v3387_v7  ;;  %v3409_v25 = vld [vmem:[#allocation8 + $0x21c0] sm:$0xff]  ;;  %v2399_v13 = vld [vmem:[#allocation8 + $0x230] sm:$0xff]  ;;  %v3486_v7 = vld [vmem:[#allocation8 + $0x2428] sm:$0xff] }
 0x39c   :  { %7249 = vmatprep.subr.bf16.mxu0 %v7248_v4  ;;  %v7264_v4 = vpack.c.bf16 %v3355_v27, %v3344_v52  ;;  %v3420_v52 = vld [vmem:[#allocation8 + $0x2218] sm:$0xff]  ;;  %v2355_v27 = vld [vmem:[#allocation8 + $0xd0] sm:$0xff]  ;;  %v2421_v9 = vld [vmem:[#allocation8 + $0x2e0] sm:$0xff] }
 0x39e   :  { %7059 = vmatpush1.bf16.msra.mxu1 %v7058_v45  ;;  %v2319_v45 = vrot.slane %v2302_v29, 6  ;;  %v2366_v29 = vld [vmem:[#allocation8 + $0x128] sm:$0xff] }
 0x39f   :  { %7251 = vmatpush1.bf16.msra.mxu0 %v7250_v46  ;;  %7061 = vmatprep.subr.bf16.mxu1 %v7060_v47  ;;  %v2325_v46 = vrot.slane %v2306_v48, 6  ;;  %v7074_v47 = vpack.c.bf16 %v3704_v34, %v3693_v33  ;;  %v3432_v48 = vld [vmem:[#allocation8 + $0x2278] sm:$0xff]  ;;  %v2389_v33 = vld [vmem:[#allocation8 + $0x1e0] sm:$0xff]  ;;  %v7278_v34 = vpack.c.bf16 %v3420_v52, %v3409_v25  ;;  %v7342_v36 = vpack.c.bf16 %v2366_v29, %v2355_v27  ;;  %v2443_v27 = vld [vmem:[#allocation8 + $0x390] sm:$0xff] }
 0x3a0   :  { %7253 = vmatprep.subr.bf16.mxu0 %v7252_v40  ;;  %v3726_v40 = vld [vmem:[#allocation8 + $0x2ba8] sm:$0xff]  ;;  %v3497_v25 = vld [vmem:[#allocation8 + $0x2480] sm:$0xff]  ;;  %v3508_v52 = vld [vmem:[#allocation8 + $0x24d8] sm:$0xff] }
 0x3a1   :  { %v7078_v1 = vpack.c.bf16 %v3726_v40, %v3715_v53  ;;  %v7346_v53 = vpack.c.bf16 %v2388_v43, %v2377_v39  ;;  %v3519_v39 = vld [vmem:[#allocation8 + $0x2530] sm:$0xff]  ;;  %v2465_v43 = vld [vmem:[#allocation8 + $0x440] sm:$0xff] }
 0x3a2   :  { %7063 = vmatpush1.bf16.msra.mxu1 %v7062_v61  ;;  %v2326_v61 = vsel %vm2316_vm1, %v2319_v45, %v2325_v46  ;;  %v3465_v46 = vld [vmem:[#allocation8 + $0x2380] sm:$0xff] }
 0x3a3   :  { %7255 = vmatpush1.bf16.msra.mxu0 %v7254_v62  ;;  %7065 = vmatprep.subr.bf16.mxu1 %v7064_v63  ;;  %v3388_v62 = vld [vmem:[#allocation8 + $0x2118] sm:$0xff]  ;;  %v3399_v63 = vld [vmem:[#allocation8 + $0x2170] sm:$0xff]  ;;  %v8760_v5 = vrot.slane %v2326_v61, 2 }
 0x3a4   :  { %7257 = vmatprep.subr.bf16.mxu0 %v7256_v26  ;;  %v3764_v26 = vrot.slane %v2319_v45, 2  ;;  %v7272_v6 = vpack.c.bf16 %v3399_v63, %v3388_v62  ;;  %v3454_v45 = vld [vmem:[#allocation8 + $0x2328] sm:$0xff]  ;;  %v3476_v61 = vld [vmem:[#allocation8 + $0x23d8] sm:$0xff]  ;;  %v3487_v62 = vld [vmem:[#allocation8 + $0x2430] sm:$0xff] }
 0x3a5   :  { %v7284_v40 = vpack.c.bf16 %v3465_v46, %v3454_v45  ;;  %v2422_v63 = vld [vmem:[#allocation8 + $0x2e8] sm:$0xff] }
 0x3a6   :  { %7067 = vmatpush1.bf16.msra.mxu1 %v7066_v10  ;;  %v2344_v10 = vld [vmem:[#allocation8 + $0x78] sm:$0xff] }
 0x3a7   :  { %7259 = vmatpush1.bf16.msra.mxu0 %v7258_v11  ;;  %7069 = vmatprep.subr.bf16.mxu1 %v7068_v0  ;;  %v3410_v11 = vld [vmem:[#allocation8 + $0x21c8] sm:$0xff]  ;;  %v3421_v0 = vld [vmem:[#allocation8 + $0x2220] sm:$0xff]  ;;  %v7338_v22 = vpack.c.bf16 %v2344_v10, %v2333_v21  ;;  %v2432_v10 = vld [vmem:[#allocation8 + $0x338] sm:$0xff] }
 0x3a8   :  { %7261 = vmatprep.subr.bf16.mxu0 %v7260_v19  ;;  %v8764_v19 = vsel %vm3745_vm0, %v3764_v26, %v8760_v5  ;;  %v7276_v24 = vpack.c.bf16 %v3421_v0, %v3410_v11  ;;  %v7288_v26 = vpack.c.bf16 %v3487_v62, %v3476_v61  ;;  %v3498_v11 = vld [vmem:[#allocation8 + $0x2488] sm:$0xff]  ;;  %v3509_v0 = vld [vmem:[#allocation8 + $0x24e0] sm:$0xff]  ;;  %v3552_v61 = vld [vmem:[#allocation8 + $0x2638] sm:$0xff] }
 0x3a9   :  { %v2487_v62 = vld [vmem:[#allocation8 + $0x4f0] sm:$0xff] }
 0x3aa   :  { %7071 = vmatpush1.bf16.msra.mxu1 %v7070_v28  ;;  %v7340_v28 = vpack.c.bf16 %v2367_v17, %v2356_v16  ;;  %v2444_v16 = vld [vmem:[#allocation8 + $0x398] sm:$0xff]  ;;  %v2455_v17 = vld [vmem:[#allocation8 + $0x3f0] sm:$0xff] }
 0x3ab   :  { %7263 = vmatpush1.bf16.msra.mxu0 %v7262_v31  ;;  %7073 = vmatprep.subr.bf16.mxu1 %v7072_v32  ;;  %v3443_v31 = vld [vmem:[#allocation8 + $0x22d0] sm:$0xff]  ;;  %v2378_v32 = vld [vmem:[#allocation8 + $0x188] sm:$0xff]  ;;  %v7356_v29 = vpack.c.bf16 %v2455_v17, %v2444_v16  ;;  %v2520_v17 = vld [vmem:[#allocation8 + $0x5f8] sm:$0xff] }
 0x3ac   :  { %7265 = vmatprep.subr.bf16.mxu0 %v7264_v4  ;;  %v7280_v4 = vpack.c.bf16 %v3443_v31, %v3432_v48  ;;  %v7344_v42 = vpack.c.bf16 %v2389_v33, %v2378_v32  ;;  %v2454_v48 = vld [vmem:[#allocation8 + $0x3e8] sm:$0xff]  ;;  %v3520_v31 = vld [vmem:[#allocation8 + $0x2538] sm:$0xff]  ;;  %v3531_v32 = vld [vmem:[#allocation8 + $0x2590] sm:$0xff] }
 0x3ae   :  { %7075 = vmatpush1.bf16.msra.mxu1 %v7074_v47  ;;  %v2400_v47 = vld [vmem:[#allocation8 + $0x238] sm:$0xff] }
 0x3af   :  { %7267 = vmatpush1.bf16.msra.mxu0 %v7266_v49  ;;  %7077 = vmatprep.subr.bf16.mxu1 %v7076_v50  ;;  %v2411_v49 = vld [vmem:[#allocation8 + $0x290] sm:$0xff]  ;;  %v7282_v50 = vpack.c.bf16 %v3442_v38, %v3431_v37  ;;  %v7358_v37 = vpack.c.bf16 %v2454_v48, %v2443_v27  ;;  %v7296_v38 = vpack.c.bf16 %v3531_v32, %v3520_v31  ;;  %v3596_v48 = vld [vmem:[#allocation8 + $0x2798] sm:$0xff] }
 0x3b0   :  { %7269 = vmatprep.subr.bf16.mxu0 %v7268_v54  ;;  %v3464_v54 = vld [vmem:[#allocation8 + $0x2378] sm:$0xff]  ;;  %v7348_v59 = vpack.c.bf16 %v2411_v49, %v2400_v47  ;;  %v3542_v49 = vld [vmem:[#allocation8 + $0x25e8] sm:$0xff]  ;;  %v2531_v31 = vld [vmem:[#allocation8 + $0x650] sm:$0xff] }
 0x3b1   :  { %v2476_v47 = vld [vmem:[#allocation8 + $0x498] sm:$0xff] }
 0x3b2   :  { %7079 = vmatpush1.bf16.msra.mxu1 %v7078_v1  ;;  %v2433_v1 = vld [vmem:[#allocation8 + $0x340] sm:$0xff] }
 0x3b3   :  { %7271 = vmatpush1.bf16.msra.mxu0 %v7270_v55  ;;  %7337 = vmatprep.subr.bf16.mxu1 %v7336_v3  ;;  %v7286_v55 = vpack.c.bf16 %v3464_v54, %v3453_v14  ;;  %v7350_v3 = vpack.c.bf16 %v2410_v60, %v2399_v13  ;;  %v7352_v21 = vpack.c.bf16 %v2433_v1, %v2422_v63  ;;  %v2499_v14 = vld [vmem:[#allocation8 + $0x550] sm:$0xff]  ;;  %v3541_v60 = vld [vmem:[#allocation8 + $0x25e0] sm:$0xff]  ;;  %v2498_v1 = vld [vmem:[#allocation8 + $0x548] sm:$0xff] }
 0x3b4   :  { %7273 = vmatprep.subr.bf16.mxu0 %v7272_v6  ;;  %v3475_v6 = vld [vmem:[#allocation8 + $0x23d0] sm:$0xff]  ;;  %v7362_v13 = vpack.c.bf16 %v2476_v47, %v2465_v43 }
 0x3b5   :  { %4082 = vmatmul.mubr.f32.vlgmr.msra.gmra.mrb[18].mxu1 %v8764_v19  ;;  %v3607_v43 = vld [vmem:[#allocation8 + $0x27f0] sm:$0xff] }
 0x3b6   :  { %4313 = vmatmul.mubr.f32.vlgmr.msra.gmra.mrb[18].mxu0 %v8735_v58  ;;  %4087 = vmatprep.mubr.f32.mxu1 %v8738_v12 }
 0x3b7   :  { %4318 = vmatprep.mubr.f32.mxu0 %v8688_v8  ;;  %7275 = vmatpush1.bf16.msra.mxu0 %v7274_v18  ;;  %v7290_v18 = vpack.c.bf16 %v3486_v7, %v3475_v6  ;;  %v2521_v6 = vld [vmem:[#allocation8 + $0x600] sm:$0xff]  ;;  %v7302_v7 = vpack.c.bf16 %v3552_v61, %v3541_v60  ;;  %v3640_v61 = vld [vmem:[#allocation8 + $0x28f8] sm:$0xff] }
 0x3b8   :  { %7339 = vmatpush1.bf16.msra.mxu1 %v7338_v22  ;;  %7277 = vmatprep.subr.bf16.mxu0 %v7276_v24  ;;  %v7354_v22 = vpack.c.bf16 %v2432_v10, %v2421_v9  ;;  %v7292_v24 = vpack.c.bf16 %v3509_v0, %v3498_v11  ;;  %v7366_v9 = vpack.c.bf16 %v2498_v1, %v2487_v62  ;;  %v3563_v10 = vld [vmem:[#allocation8 + $0x2690] sm:$0xff]  ;;  %v3574_v11 = vld [vmem:[#allocation8 + $0x26e8] sm:$0xff]  ;;  %v2509_v0 = vld [vmem:[#allocation8 + $0x5a0] sm:$0xff] }
 0x3b9   :  { %4088 = vmatmul.mubr.f32.gmra.mrb[20].mxu1 %v8760_v5  ;;  %7341 = vmatprep.subr.bf16.mxu1 %v7340_v28  ;;  %v7370_v27 = vpack.c.bf16 %v2520_v17, %v2509_v0  ;;  %v3629_v60 = vld [vmem:[#allocation8 + $0x28a0] sm:$0xff]  ;;  %v2575_v62 = vld [vmem:[#allocation8 + $0x7b0] sm:$0xff]  ;;  %v2586_v1 = vld [vmem:[#allocation8 + $0x808] sm:$0xff] }
 0x3ba   :  { %4319 = vmatmul.mubr.f32.gmra.mrb[20].mxu0 %v8730_v44  ;;  %4466 = vmatprep.mubr.f32.mxu1 %v8636_v57  ;;  %v2597_v0 = vld [vmem:[#allocation8 + $0x860] sm:$0xff]  ;;  %v2608_v17 = vld [vmem:[#allocation8 + $0x8b8] sm:$0xff] }
 0x3bb   :  { %7279 = vmatpush1.bf16.msra.mxu0 %v7278_v34  ;;  %4389 = vmatprep.mubr.f32.mxu0 %v8746_v30  ;;  %v2466_v34 = vld [vmem:[#allocation8 + $0x448] sm:$0xff] }
 0x3bc   :  { %7343 = vmatpush1.bf16.msra.mxu1 %v7342_v36  ;;  %7281 = vmatprep.subr.bf16.mxu0 %v7280_v4  ;;  %v2477_v36 = vld [vmem:[#allocation8 + $0x4a0] sm:$0xff]  ;;  %v7294_v4 = vpack.c.bf16 %v3508_v52, %v3497_v25  ;;  %v2543_v25 = vld [vmem:[#allocation8 + $0x6b0] sm:$0xff]  ;;  %v7306_v52 = vpack.c.bf16 %v3574_v11, %v3563_v10  ;;  %v3662_v11 = vld [vmem:[#allocation8 + $0x29a8] sm:$0xff] }
 0x3bd   :  { %7345 = vmatprep.subr.bf16.mxu1 %v7344_v42  ;;  %v3530_v42 = vld [vmem:[#allocation8 + $0x2588] sm:$0xff]  ;;  %v7360_v46 = vpack.c.bf16 %v2477_v36, %v2466_v34  ;;  %v3608_v34 = vld [vmem:[#allocation8 + $0x27f8] sm:$0xff]  ;;  %v3619_v36 = vld [vmem:[#allocation8 + $0x2850] sm:$0xff] }
 0x3be   :  { %v7298_v54 = vpack.c.bf16 %v3530_v42, %v3519_v39  ;;  %v7312_v42 = vpack.c.bf16 %v3619_v36, %v3608_v34  ;;  %v3651_v10 = vld [vmem:[#allocation8 + $0x2950] sm:$0xff]  ;;  %v3696_v34 = vld [vmem:[#allocation8 + $0x2ab8] sm:$0xff] }
 0x3bf   :  { %7283 = vmatpush1.bf16.msra.mxu0 %v7282_v50  ;;  %v3553_v50 = vld [vmem:[#allocation8 + $0x2640] sm:$0xff]  ;;  %v3707_v36 = vld [vmem:[#allocation8 + $0x2b10] sm:$0xff] }
 0x3c0   :  { %7347 = vmatpush1.bf16.msra.mxu1 %v7346_v53  ;;  %7285 = vmatprep.subr.bf16.mxu0 %v7284_v40  ;;  %v2488_v40 = vld [vmem:[#allocation8 + $0x4f8] sm:$0xff] }
 0x3c1   :  { %7349 = vmatprep.subr.bf16.mxu1 %v7348_v59  ;;  %v7300_v59 = vpack.c.bf16 %v3553_v50, %v3542_v49  ;;  %v7364_v63 = vpack.c.bf16 %v2499_v14, %v2488_v40  ;;  %v2564_v49 = vld [vmem:[#allocation8 + $0x758] sm:$0xff]  ;;  %v3630_v50 = vld [vmem:[#allocation8 + $0x28a8] sm:$0xff]  ;;  %v2587_v14 = vld [vmem:[#allocation8 + $0x810] sm:$0xff] }
 0x3c2   :  { %v2576_v40 = vld [vmem:[#allocation8 + $0x7b8] sm:$0xff] }
 0x3c3   :  { %7287 = vmatpush1.bf16.msra.mxu0 %v7286_v55  ;;  %v3564_v55 = vld [vmem:[#allocation8 + $0x2698] sm:$0xff] }
 0x3c4   :  { %7351 = vmatpush1.bf16.msra.mxu1 %v7350_v3  ;;  %7289 = vmatprep.subr.bf16.mxu0 %v7288_v26  ;;  %v3575_v3 = vld [vmem:[#allocation8 + $0x26f0] sm:$0xff]  ;;  %v2510_v26 = vld [vmem:[#allocation8 + $0x5a8] sm:$0xff] }
 0x3c5   :  { %7353 = vmatprep.subr.bf16.mxu1 %v7352_v21  ;;  %v2109_v28 = vpop.f32.mrb[14].mxu0  ;;  %v7304_v21 = vpack.c.bf16 %v3575_v3, %v3564_v55  ;;  %v7368_v16 = vpack.c.bf16 %v2521_v6, %v2510_v26  ;;  %v3652_v55 = vld [vmem:[#allocation8 + $0x2958] sm:$0xff]  ;;  %v3663_v3 = vld [vmem:[#allocation8 + $0x29b0] sm:$0xff]  ;;  %v2598_v26 = vld [vmem:[#allocation8 + $0x868] sm:$0xff] }
 0x3c6   :  { %2278 = vst [vmem:[%s8923_s5 + $0x40] sm:$0xff] %v2109_v28  ;;  %v2111_v33 = vpop.f32.mrb[15].mxu0  ;;  %v2609_v6 = vld [vmem:[#allocation8 + $0x8c0] sm:$0xff] }
 0x3c7   :  { %7291 = vmatpush1.bf16.msra.mxu0 %v7290_v18  ;;  %2279 = vst [vmem:[%s8923_s5 + $0x48] sm:$0xff] %v2111_v33  ;;  %v3586_v18 = vld [vmem:[#allocation8 + $0x2748] sm:$0xff] }
 0x3c8   :  { %7355 = vmatpush1.bf16.msra.mxu1 %v7354_v22  ;;  %7293 = vmatprep.subr.bf16.mxu0 %v7292_v24  ;;  %v3597_v22 = vld [vmem:[#allocation8 + $0x27a0] sm:$0xff]  ;;  %v2532_v24 = vld [vmem:[#allocation8 + $0x658] sm:$0xff]  ;;  %v2542_v33 = vld [vmem:[#allocation8 + $0x6a8] sm:$0xff] }
 0x3c9   :  { %7357 = vmatprep.subr.bf16.mxu1 %v7356_v29  ;;  %v2115_v45 = vpop.f32.mrb[16].mxu0  ;;  %v7308_v28 = vpack.c.bf16 %v3597_v22, %v3586_v18  ;;  %v3585_v29 = vld [vmem:[#allocation8 + $0x2740] sm:$0xff]  ;;  %v7372_v32 = vpack.c.bf16 %v2543_v25, %v2532_v24  ;;  %v7374_v39 = vpack.c.bf16 %v2542_v33, %v2531_v31  ;;  %v3674_v18 = vld [vmem:[#allocation8 + $0x2a08] sm:$0xff]  ;;  %v2620_v24 = vld [vmem:[#allocation8 + $0x918] sm:$0xff] }
 0x3ca   :  { %2289 = vst [vmem:[%s8923_s5 + $0x98] sm:$0x3f] %v2115_v45  ;;  %v2117_v53 = vpop.f32.mrb[17].mxu0  ;;  %v3618_v45 = vld [vmem:[#allocation8 + $0x2848] sm:$0xff]  ;;  %v3685_v22 = vld [vmem:[#allocation8 + $0x2a60] sm:$0xff]  ;;  %v2631_v25 = vld [vmem:[#allocation8 + $0x970] sm:$0xff] }
 0x3cb   :  { %7295 = vmatpush1.bf16.msra.mxu0 %v7294_v4  ;;  %2290 = vst [vmem:[%s8923_s5 + $0xa0] sm:$0x3f] %v2117_v53  ;;  %v2554_v4 = vld [vmem:[#allocation8 + $0x708] sm:$0xff]  ;;  %v3641_v53 = vld [vmem:[#allocation8 + $0x2900] sm:$0xff]  ;;  %v2619_v31 = vld [vmem:[#allocation8 + $0x910] sm:$0xff] }
 0x3cc   :  { %7359 = vmatpush1.bf16.msra.mxu1 %v7358_v37  ;;  %7297 = vmatprep.subr.bf16.mxu0 %v7296_v38  ;;  %v2565_v37 = vld [vmem:[#allocation8 + $0x760] sm:$0xff]  ;;  %v7310_v38 = vpack.c.bf16 %v3596_v48, %v3585_v29  ;;  %v3684_v48 = vld [vmem:[#allocation8 + $0x2a58] sm:$0xff]  ;;  %v2630_v33 = vld [vmem:[#allocation8 + $0x968] sm:$0xff] }
 0x3cd   :  { %7361 = vmatprep.subr.bf16.mxu1 %v7360_v46  ;;  %v2553_v46 = vld [vmem:[#allocation8 + $0x700] sm:$0xff]  ;;  %v7376_v47 = vpack.c.bf16 %v2565_v37, %v2554_v4  ;;  %v2642_v4 = vld [vmem:[#allocation8 + $0x9c8] sm:$0xff] }
 0x3ce   :  { %v3673_v29 = vld [vmem:[#allocation8 + $0x2a00] sm:$0xff] }
 0x3cf   :  { %7299 = vmatpush1.bf16.msra.mxu0 %v7298_v54  ;;  %v7314_v54 = vpack.c.bf16 %v3618_v45, %v3607_v43  ;;  %v2653_v37 = vld [vmem:[#allocation8 + $0xa20] sm:$0xff]  ;;  %v3695_v43 = vld [vmem:[#allocation8 + $0x2ab0] sm:$0xff]  ;;  %v3706_v45 = vld [vmem:[#allocation8 + $0x2b08] sm:$0xff] }
 0x3d0   :  { %7363 = vmatpush1.bf16.msra.mxu1 %v7362_v13  ;;  %7301 = vmatprep.subr.bf16.mxu0 %v7300_v59  ;;  %v7378_v13 = vpack.c.bf16 %v2564_v49, %v2553_v46  ;;  %v7316_v59 = vpack.c.bf16 %v3641_v53, %v3630_v50  ;;  %v2641_v46 = vld [vmem:[#allocation8 + $0x9c0] sm:$0xff]  ;;  %v2652_v49 = vld [vmem:[#allocation8 + $0xa18] sm:$0xff]  ;;  %v3718_v50 = vld [vmem:[#allocation8 + $0x2b68] sm:$0xff] }
 0x3d1   :  { %7365 = vmatprep.subr.bf16.mxu1 %v7364_v63  ;;  %v7380_v63 = vpack.c.bf16 %v2587_v14, %v2576_v40  ;;  %v3729_v53 = vld [vmem:[#allocation8 + $0x2bc0] sm:$0xff]  ;;  %v2664_v40 = vld [vmem:[#allocation8 + $0xa78] sm:$0xff]  ;;  %v2675_v14 = vld [vmem:[#allocation8 + $0xad0] sm:$0xff] }
 0x3d3   :  { %7303 = vmatpush1.bf16.msra.mxu0 %v7302_v7  ;;  %v7318_v7 = vpack.c.bf16 %v3640_v61, %v3629_v60  ;;  %v3717_v60 = vld [vmem:[#allocation8 + $0x2b60] sm:$0xff]  ;;  %v3728_v61 = vld [vmem:[#allocation8 + $0x2bb8] sm:$0xff] }
 0x3d4   :  { %7367 = vmatpush1.bf16.msra.mxu1 %v7366_v9  ;;  %7305 = vmatprep.subr.bf16.mxu0 %v7304_v21  ;;  %v7382_v9 = vpack.c.bf16 %v2586_v1, %v2575_v62  ;;  %v7320_v21 = vpack.c.bf16 %v3663_v3, %v3652_v55  ;;  %v2663_v62 = vld [vmem:[#allocation8 + $0xa70] sm:$0xff]  ;;  %v2674_v1 = vld [vmem:[#allocation8 + $0xac8] sm:$0xff]  ;;  %v2336_v55 = vld [vmem:[#allocation8 + $0x38] sm:$0xff] }
 0x3d5   :  { %7369 = vmatprep.subr.bf16.mxu1 %v7368_v16  ;;  %v7384_v16 = vpack.c.bf16 %v2609_v6, %v2598_v26  ;;  %v2347_v3 = vld [vmem:[#allocation8 + $0x90] sm:$0xff]  ;;  %v2686_v26 = vld [vmem:[#allocation8 + $0xb28] sm:$0xff]  ;;  %v2697_v6 = vld [vmem:[#allocation8 + $0xb80] sm:$0xff] }
 0x3d7   :  { %7307 = vmatpush1.bf16.msra.mxu0 %v7306_v52  ;;  %v7322_v52 = vpack.c.bf16 %v3662_v11, %v3651_v10  ;;  %v7400_v10 = vpack.c.bf16 %v2697_v6, %v2686_v26  ;;  %v2685_v11 = vld [vmem:[#allocation8 + $0xb20] sm:$0xff]  ;;  %v2424_v26 = vld [vmem:[#allocation8 + $0x2f8] sm:$0xff]  ;;  %v2435_v6 = vld [vmem:[#allocation8 + $0x350] sm:$0xff] }
 0x3d8   :  { %7371 = vmatpush1.bf16.msra.mxu1 %v7370_v27  ;;  %7309 = vmatprep.subr.bf16.mxu0 %v7308_v28  ;;  %v7386_v27 = vpack.c.bf16 %v2608_v17, %v2597_v0  ;;  %v7324_v28 = vpack.c.bf16 %v3685_v22, %v3674_v18  ;;  %v2696_v0 = vld [vmem:[#allocation8 + $0xb78] sm:$0xff]  ;;  %v2346_v17 = vld [vmem:[#allocation8 + $0x88] sm:$0xff]  ;;  %v2719_v22 = vld [vmem:[#allocation8 + $0xc30] sm:$0xff] }
 0x3d9   :  { %7373 = vmatprep.subr.bf16.mxu1 %v7372_v32  ;;  %v7388_v32 = vpack.c.bf16 %v2631_v25, %v2620_v24  ;;  %v2708_v18 = vld [vmem:[#allocation8 + $0xbd8] sm:$0xff]  ;;  %v2358_v24 = vld [vmem:[#allocation8 + $0xe8] sm:$0xff]  ;;  %v2369_v25 = vld [vmem:[#allocation8 + $0x140] sm:$0xff] }
 0x3db   :  { %7311 = vmatpush1.bf16.msra.mxu0 %v7310_v38  ;;  %v7326_v38 = vpack.c.bf16 %v3684_v48, %v3673_v29  ;;  %v2707_v29 = vld [vmem:[#allocation8 + $0xbd0] sm:$0xff]  ;;  %v2718_v48 = vld [vmem:[#allocation8 + $0xc28] sm:$0xff] }
 0x3dc   :  { %7375 = vmatpush1.bf16.msra.mxu1 %v7374_v39  ;;  %7313 = vmatprep.subr.bf16.mxu0 %v7312_v42  ;;  %v7390_v39 = vpack.c.bf16 %v2630_v33, %v2619_v31  ;;  %v7328_v42 = vpack.c.bf16 %v3707_v36, %v3696_v34  ;;  %v2357_v31 = vld [vmem:[#allocation8 + $0xe0] sm:$0xff]  ;;  %v2368_v33 = vld [vmem:[#allocation8 + $0x138] sm:$0xff]  ;;  %v2730_v34 = vld [vmem:[#allocation8 + $0xc88] sm:$0xff] }
 0x3dd   :  { %7377 = vmatprep.subr.bf16.mxu1 %v7376_v47  ;;  %v7392_v47 = vpack.c.bf16 %v2653_v37, %v2642_v4  ;;  %v2741_v36 = vld [vmem:[#allocation8 + $0xce0] sm:$0xff]  ;;  %v2380_v4 = vld [vmem:[#allocation8 + $0x198] sm:$0xff]  ;;  %v2391_v37 = vld [vmem:[#allocation8 + $0x1f0] sm:$0xff] }
 0x3df   :  { %7315 = vmatpush1.bf16.msra.mxu0 %v7314_v54  ;;  %v7330_v54 = vpack.c.bf16 %v3706_v45, %v3695_v43  ;;  %v2729_v43 = vld [vmem:[#allocation8 + $0xc80] sm:$0xff]  ;;  %v2740_v45 = vld [vmem:[#allocation8 + $0xcd8] sm:$0xff] }
 0x3e0   :  { %7379 = vmatpush1.bf16.msra.mxu1 %v7378_v13  ;;  %7317 = vmatprep.subr.bf16.mxu0 %v7316_v59  ;;  %v7394_v13 = vpack.c.bf16 %v2652_v49, %v2641_v46  ;;  %v7332_v59 = vpack.c.bf16 %v3729_v53, %v3718_v50  ;;  %v2379_v46 = vld [vmem:[#allocation8 + $0x190] sm:$0xff]  ;;  %v2390_v49 = vld [vmem:[#allocation8 + $0x1e8] sm:$0xff]  ;;  %v2752_v50 = vld [vmem:[#allocation8 + $0xd38] sm:$0xff] }
 0x3e1   :  { %7381 = vmatprep.subr.bf16.mxu1 %v7380_v63  ;;  %v7396_v63 = vpack.c.bf16 %v2675_v14, %v2664_v40  ;;  %v2763_v53 = vld [vmem:[#allocation8 + $0xd90] sm:$0xff]  ;;  %v2402_v40 = vld [vmem:[#allocation8 + $0x248] sm:$0xff]  ;;  %v2413_v14 = vld [vmem:[#allocation8 + $0x2a0] sm:$0xff] }
 0x3e3   :  { %7319 = vmatpush1.bf16.msra.mxu0 %v7318_v7  ;;  %v7334_v7 = vpack.c.bf16 %v3728_v61, %v3717_v60  ;;  %v2751_v60 = vld [vmem:[#allocation8 + $0xd30] sm:$0xff]  ;;  %v2762_v61 = vld [vmem:[#allocation8 + $0xd88] sm:$0xff] }
 0x3e4   :  { %7383 = vmatpush1.bf16.msra.mxu1 %v7382_v9  ;;  %7321 = vmatprep.subr.bf16.mxu0 %v7320_v21  ;;  %v7398_v9 = vpack.c.bf16 %v2674_v1, %v2663_v62  ;;  %v7592_v21 = vpack.c.bf16 %v2347_v3, %v2336_v55  ;;  %v2401_v62 = vld [vmem:[#allocation8 + $0x240] sm:$0xff]  ;;  %v2412_v1 = vld [vmem:[#allocation8 + $0x298] sm:$0xff]  ;;  %v2774_v55 = vld [vmem:[#allocation8 + $0xde8] sm:$0xff] }
 0x3e5   :  { %7385 = vmatprep.subr.bf16.mxu1 %v7384_v16  ;;  %v2335_v16 = vld [vmem:[#allocation8 + $0x30] sm:$0xff]  ;;  %v2785_v3 = vld [vmem:[#allocation8 + $0xe40] sm:$0xff] }
 0x3e7   :  { %7323 = vmatpush1.bf16.msra.mxu0 %v7322_v52  ;;  %v7402_v52 = vpack.c.bf16 %v2696_v0, %v2685_v11  ;;  %v2784_v11 = vld [vmem:[#allocation8 + $0xe38] sm:$0xff]  ;;  %v2423_v0 = vld [vmem:[#allocation8 + $0x2f0] sm:$0xff] }
 0x3e8   :  { %7387 = vmatpush1.bf16.msra.mxu1 %v7386_v27  ;;  %7325 = vmatprep.subr.bf16.mxu0 %v7324_v28  ;;  %v7594_v27 = vpack.c.bf16 %v2346_v17, %v2335_v16  ;;  %v7404_v28 = vpack.c.bf16 %v2719_v22, %v2708_v18  ;;  %v7608_v16 = vpack.c.bf16 %v2435_v6, %v2424_v26  ;;  %v2434_v17 = vld [vmem:[#allocation8 + $0x348] sm:$0xff]  ;;  %v2796_v18 = vld [vmem:[#allocation8 + $0xe98] sm:$0xff]  ;;  %v2807_v22 = vld [vmem:[#allocation8 + $0xef0] sm:$0xff] }
 0x3e9   :  { %7389 = vmatprep.subr.bf16.mxu1 %v7388_v32  ;;  %v7596_v32 = vpack.c.bf16 %v2369_v25, %v2358_v24  ;;  %v2446_v24 = vld [vmem:[#allocation8 + $0x3a8] sm:$0xff]  ;;  %v2457_v25 = vld [vmem:[#allocation8 + $0x400] sm:$0xff]  ;;  %v2512_v26 = vld [vmem:[#allocation8 + $0x5b8] sm:$0xff] }
 0x3ea   :  { %v2523_v6 = vld [vmem:[#allocation8 + $0x610] sm:$0xff] }
 0x3eb   :  { %7327 = vmatpush1.bf16.msra.mxu0 %v7326_v38  ;;  %v7406_v38 = vpack.c.bf16 %v2718_v48, %v2707_v29  ;;  %v2795_v29 = vld [vmem:[#allocation8 + $0xe90] sm:$0xff]  ;;  %v2806_v48 = vld [vmem:[#allocation8 + $0xee8] sm:$0xff] }
 0x3ec   :  { %7391 = vmatpush1.bf16.msra.mxu1 %v7390_v39  ;;  %7329 = vmatprep.subr.bf16.mxu0 %v7328_v42  ;;  %v7598_v39 = vpack.c.bf16 %v2368_v33, %v2357_v31  ;;  %v7408_v42 = vpack.c.bf16 %v2741_v36, %v2730_v34  ;;  %v2445_v31 = vld [vmem:[#allocation8 + $0x3a0] sm:$0xff]  ;;  %v2456_v33 = vld [vmem:[#allocation8 + $0x3f8] sm:$0xff]  ;;  %v2818_v34 = vld [vmem:[#allocation8 + $0xf48] sm:$0xff] }
 0x3ed   :  { %7393 = vmatprep.subr.bf16.mxu1 %v7392_v47  ;;  %v7600_v47 = vpack.c.bf16 %v2391_v37, %v2380_v4  ;;  %v2829_v36 = vld [vmem:[#allocation8 + $0xfa0] sm:$0xff]  ;;  %v2468_v4 = vld [vmem:[#allocation8 + $0x458] sm:$0xff]  ;;  %v2479_v37 = vld [vmem:[#allocation8 + $0x4b0] sm:$0xff] }
 0x3ef   :  { %7331 = vmatpush1.bf16.msra.mxu0 %v7330_v54  ;;  %v7410_v54 = vpack.c.bf16 %v2740_v45, %v2729_v43  ;;  %v2817_v43 = vld [vmem:[#allocation8 + $0xf40] sm:$0xff]  ;;  %v2828_v45 = vld [vmem:[#allocation8 + $0xf98] sm:$0xff] }
 0x3f0   :  { %7395 = vmatpush1.bf16.msra.mxu1 %v7394_v13  ;;  %7333 = vmatprep.subr.bf16.mxu0 %v7332_v59  ;;  %v7602_v13 = vpack.c.bf16 %v2390_v49, %v2379_v46  ;;  %v7412_v59 = vpack.c.bf16 %v2763_v53, %v2752_v50  ;;  %v2467_v46 = vld [vmem:[#allocation8 + $0x450] sm:$0xff]  ;;  %v2478_v49 = vld [vmem:[#allocation8 + $0x4a8] sm:$0xff]  ;;  %v2840_v50 = vld [vmem:[#allocation8 + $0xff8] sm:$0xff] }
 0x3f1   :  { %7397 = vmatprep.subr.bf16.mxu1 %v7396_v63  ;;  %v7604_v63 = vpack.c.bf16 %v2413_v14, %v2402_v40  ;;  %v2851_v53 = vld [vmem:[#allocation8 + $0x1050] sm:$0xff]  ;;  %v2490_v40 = vld [vmem:[#allocation8 + $0x508] sm:$0xff]  ;;  %v2501_v14 = vld [vmem:[#allocation8 + $0x560] sm:$0xff] }
 0x3f3   :  { %7335 = vmatpush1.bf16.msra.mxu0 %v7334_v7  ;;  %v7414_v7 = vpack.c.bf16 %v2762_v61, %v2751_v60  ;;  %v2839_v60 = vld [vmem:[#allocation8 + $0xff0] sm:$0xff]  ;;  %v2850_v61 = vld [vmem:[#allocation8 + $0x1048] sm:$0xff] }
 0x3f4   :  { %7399 = vmatpush1.bf16.msra.mxu1 %v7398_v9  ;;  %7593 = vmatprep.subr.bf16.mxu0 %v7592_v21  ;;  %v7606_v9 = vpack.c.bf16 %v2412_v1, %v2401_v62  ;;  %v7416_v21 = vpack.c.bf16 %v2785_v3, %v2774_v55  ;;  %v2489_v62 = vld [vmem:[#allocation8 + $0x500] sm:$0xff]  ;;  %v2500_v1 = vld [vmem:[#allocation8 + $0x558] sm:$0xff]  ;;  %v2862_v55 = vld [vmem:[#allocation8 + $0x10a8] sm:$0xff] }
 0x3f5   :  { %7401 = vmatprep.subr.bf16.mxu1 %v7400_v10  ;;  %v2773_v10 = vld [vmem:[#allocation8 + $0xde0] sm:$0xff] }
 0x3f6   :  { %4390 = vmatmul.mubr.f32.vlgmr.msra.gmra.mrb[18].mxu0 %v8764_v19  ;;  %v2873_v3 = vld [vmem:[#allocation8 + $0x1100] sm:$0xff] }
 0x3f7   :  { %4467 = vmatmul.mubr.f32.vlgmr.msra.gmra.mrb[22].mxu1 %v8667_v35  ;;  %4395 = vmatprep.mubr.f32.mxu0 %v8738_v12 }
 0x3f8   :  { %4472 = vmatprep.mubr.f32.mxu1 %v8630_v15  ;;  %7403 = vmatpush1.bf16.msra.mxu1 %v7402_v52  ;;  %v7418_v52 = vpack.c.bf16 %v2784_v11, %v2773_v10  ;;  %v2861_v10 = vld [vmem:[#allocation8 + $0x10a0] sm:$0xff]  ;;  %v2872_v11 = vld [vmem:[#allocation8 + $0x10f8] sm:$0xff] }
 0x3f9   :  { %7595 = vmatpush1.bf16.msra.mxu0 %v7594_v27  ;;  %7405 = vmatprep.subr.bf16.mxu1 %v7404_v28  ;;  %v7610_v27 = vpack.c.bf16 %v2434_v17, %v2423_v0  ;;  %v7420_v28 = vpack.c.bf16 %v2807_v22, %v2796_v18  ;;  %v2511_v0 = vld [vmem:[#allocation8 + $0x5b0] sm:$0xff]  ;;  %v2522_v17 = vld [vmem:[#allocation8 + $0x608] sm:$0xff]  ;;  %v2884_v18 = vld [vmem:[#allocation8 + $0x1158] sm:$0xff] }
 0x3fa   :  { %4396 = vmatmul.mubr.f32.gmra.mrb[20].mxu0 %v8760_v5  ;;  %7597 = vmatprep.subr.bf16.mxu0 %v7596_v32  ;;  %v7612_v32 = vpack.c.bf16 %v2457_v25, %v2446_v24  ;;  %v2895_v22 = vld [vmem:[#allocation8 + $0x11b0] sm:$0xff]  ;;  %v2534_v24 = vld [vmem:[#allocation8 + $0x668] sm:$0xff]  ;;  %v2545_v25 = vld [vmem:[#allocation8 + $0x6c0] sm:$0xff] }
 0x3fb   :  { %4473 = vmatmul.mubr.f32.gmra.mrb[24].mxu1 %v8663_v20  ;;  %4774 = vmatprep.mubr.f32.mxu0 %v8636_v57 }
 0x3fc   :  { %7407 = vmatpush1.bf16.msra.mxu1 %v7406_v38  ;;  %4543 = vmatprep.mubr.f32.mxu1 %v8676_v56  ;;  %v7422_v38 = vpack.c.bf16 %v2806_v48, %v2795_v29  ;;  %v2883_v29 = vld [vmem:[#allocation8 + $0x1150] sm:$0xff]  ;;  %v2894_v48 = vld [vmem:[#allocation8 + $0x11a8] sm:$0xff] }
 0x3fd   :  { %7599 = vmatpush1.bf16.msra.mxu0 %v7598_v39  ;;  %7409 = vmatprep.subr.bf16.mxu1 %v7408_v42  ;;  %v7614_v39 = vpack.c.bf16 %v2456_v33, %v2445_v31  ;;  %v7424_v42 = vpack.c.bf16 %v2829_v36, %v2818_v34  ;;  %v2533_v31 = vld [vmem:[#allocation8 + $0x660] sm:$0xff]  ;;  %v2544_v33 = vld [vmem:[#allocation8 + $0x6b8] sm:$0xff]  ;;  %v2906_v34 = vld [vmem:[#allocation8 + $0x1208] sm:$0xff] }
 0x3fe   :  { %7601 = vmatprep.subr.bf16.mxu0 %v7600_v47  ;;  %v7616_v47 = vpack.c.bf16 %v2479_v37, %v2468_v4  ;;  %v2917_v36 = vld [vmem:[#allocation8 + $0x1260] sm:$0xff]  ;;  %v2556_v4 = vld [vmem:[#allocation8 + $0x718] sm:$0xff]  ;;  %v2567_v37 = vld [vmem:[#allocation8 + $0x770] sm:$0xff] }
 0x400   :  { %7411 = vmatpush1.bf16.msra.mxu1 %v7410_v54  ;;  %v7426_v54 = vpack.c.bf16 %v2828_v45, %v2817_v43  ;;  %v2905_v43 = vld [vmem:[#allocation8 + $0x1200] sm:$0xff]  ;;  %v2916_v45 = vld [vmem:[#allocation8 + $0x1258] sm:$0xff] }
 0x401   :  { %7603 = vmatpush1.bf16.msra.mxu0 %v7602_v13  ;;  %7413 = vmatprep.subr.bf16.mxu1 %v7412_v59  ;;  %v7618_v13 = vpack.c.bf16 %v2478_v49, %v2467_v46  ;;  %v7428_v59 = vpack.c.bf16 %v2851_v53, %v2840_v50  ;;  %v2555_v46 = vld [vmem:[#allocation8 + $0x710] sm:$0xff]  ;;  %v2566_v49 = vld [vmem:[#allocation8 + $0x768] sm:$0xff]  ;;  %v2928_v50 = vld [vmem:[#allocation8 + $0x12b8] sm:$0xff] }
 0x402   :  { %7605 = vmatprep.subr.bf16.mxu0 %v7604_v63  ;;  %v7620_v63 = vpack.c.bf16 %v2501_v14, %v2490_v40  ;;  %v2939_v53 = vld [vmem:[#allocation8 + $0x1310] sm:$0xff]  ;;  %v2578_v40 = vld [vmem:[#allocation8 + $0x7c8] sm:$0xff]  ;;  %v2589_v14 = vld [vmem:[#allocation8 + $0x820] sm:$0xff] }
 0x404   :  { %7415 = vmatpush1.bf16.msra.mxu1 %v7414_v7  ;;  %v7430_v7 = vpack.c.bf16 %v2850_v61, %v2839_v60  ;;  %v2927_v60 = vld [vmem:[#allocation8 + $0x12b0] sm:$0xff]  ;;  %v2938_v61 = vld [vmem:[#allocation8 + $0x1308] sm:$0xff] }
 0x405   :  { %7607 = vmatpush1.bf16.msra.mxu0 %v7606_v9  ;;  %7417 = vmatprep.subr.bf16.mxu1 %v7416_v21  ;;  %v7622_v9 = vpack.c.bf16 %v2500_v1, %v2489_v62  ;;  %v7432_v21 = vpack.c.bf16 %v2873_v3, %v2862_v55  ;;  %v2577_v62 = vld [vmem:[#allocation8 + $0x7c0] sm:$0xff]  ;;  %v2588_v1 = vld [vmem:[#allocation8 + $0x818] sm:$0xff]  ;;  %v2950_v55 = vld [vmem:[#allocation8 + $0x1368] sm:$0xff] }
 0x406   :  { %7609 = vmatprep.subr.bf16.mxu0 %v7608_v16  ;;  %v7624_v16 = vpack.c.bf16 %v2523_v6, %v2512_v26  ;;  %v2961_v3 = vld [vmem:[#allocation8 + $0x13c0] sm:$0xff]  ;;  %v2600_v26 = vld [vmem:[#allocation8 + $0x878] sm:$0xff]  ;;  %v2611_v6 = vld [vmem:[#allocation8 + $0x8d0] sm:$0xff] }
 0x408   :  { %7419 = vmatpush1.bf16.msra.mxu1 %v7418_v52  ;;  %v7434_v52 = vpack.c.bf16 %v2872_v11, %v2861_v10  ;;  %v2949_v10 = vld [vmem:[#allocation8 + $0x1360] sm:$0xff]  ;;  %v2960_v11 = vld [vmem:[#allocation8 + $0x13b8] sm:$0xff] }
 0x409   :  { %7611 = vmatpush1.bf16.msra.mxu0 %v7610_v27  ;;  %7421 = vmatprep.subr.bf16.mxu1 %v7420_v28  ;;  %v7626_v27 = vpack.c.bf16 %v2522_v17, %v2511_v0  ;;  %v7436_v28 = vpack.c.bf16 %v2895_v22, %v2884_v18  ;;  %v2599_v0 = vld [vmem:[#allocation8 + $0x870] sm:$0xff]  ;;  %v2610_v17 = vld [vmem:[#allocation8 + $0x8c8] sm:$0xff]  ;;  %v2972_v18 = vld [vmem:[#allocation8 + $0x1418] sm:$0xff] }
 0x40a   :  { %7613 = vmatprep.subr.bf16.mxu0 %v7612_v32  ;;  %v7628_v32 = vpack.c.bf16 %v2545_v25, %v2534_v24  ;;  %v2983_v22 = vld [vmem:[#allocation8 + $0x1470] sm:$0xff]  ;;  %v2622_v24 = vld [vmem:[#allocation8 + $0x928] sm:$0xff]  ;;  %v2633_v25 = vld [vmem:[#allocation8 + $0x980] sm:$0xff] }
 0x40c   :  { %7423 = vmatpush1.bf16.msra.mxu1 %v7422_v38  ;;  %v7438_v38 = vpack.c.bf16 %v2894_v48, %v2883_v29  ;;  %v2971_v29 = vld [vmem:[#allocation8 + $0x1410] sm:$0xff]  ;;  %v2982_v48 = vld [vmem:[#allocation8 + $0x1468] sm:$0xff] }
 0x40d   :  { %7615 = vmatpush1.bf16.msra.mxu0 %v7614_v39  ;;  %7425 = vmatprep.subr.bf16.mxu1 %v7424_v42  ;;  %v7630_v39 = vpack.c.bf16 %v2544_v33, %v2533_v31  ;;  %v7440_v42 = vpack.c.bf16 %v2917_v36, %v2906_v34  ;;  %v2621_v31 = vld [vmem:[#allocation8 + $0x920] sm:$0xff]  ;;  %v2632_v33 = vld [vmem:[#allocation8 + $0x978] sm:$0xff]  ;;  %v2994_v34 = vld [vmem:[#allocation8 + $0x14c8] sm:$0xff] }
 0x40e   :  { %7617 = vmatprep.subr.bf16.mxu0 %v7616_v47  ;;  %v7632_v47 = vpack.c.bf16 %v2567_v37, %v2556_v4  ;;  %v3005_v36 = vld [vmem:[#allocation8 + $0x1520] sm:$0xff]  ;;  %v2644_v4 = vld [vmem:[#allocation8 + $0x9d8] sm:$0xff]  ;;  %v2655_v37 = vld [vmem:[#allocation8 + $0xa30] sm:$0xff] }
 0x410   :  { %7427 = vmatpush1.bf16.msra.mxu1 %v7426_v54  ;;  %v7442_v54 = vpack.c.bf16 %v2916_v45, %v2905_v43  ;;  %v2993_v43 = vld [vmem:[#allocation8 + $0x14c0] sm:$0xff]  ;;  %v3004_v45 = vld [vmem:[#allocation8 + $0x1518] sm:$0xff] }
 0x411   :  { %7619 = vmatpush1.bf16.msra.mxu0 %v7618_v13  ;;  %7429 = vmatprep.subr.bf16.mxu1 %v7428_v59  ;;  %v7634_v13 = vpack.c.bf16 %v2566_v49, %v2555_v46  ;;  %v7444_v59 = vpack.c.bf16 %v2939_v53, %v2928_v50  ;;  %v2643_v46 = vld [vmem:[#allocation8 + $0x9d0] sm:$0xff]  ;;  %v2654_v49 = vld [vmem:[#allocation8 + $0xa28] sm:$0xff]  ;;  %v3016_v50 = vld [vmem:[#allocation8 + $0x1578] sm:$0xff] }
 0x412   :  { %7621 = vmatprep.subr.bf16.mxu0 %v7620_v63  ;;  %v7636_v63 = vpack.c.bf16 %v2589_v14, %v2578_v40  ;;  %v3027_v53 = vld [vmem:[#allocation8 + $0x15d0] sm:$0xff]  ;;  %v2666_v40 = vld [vmem:[#allocation8 + $0xa88] sm:$0xff]  ;;  %v2677_v14 = vld [vmem:[#allocation8 + $0xae0] sm:$0xff] }
 0x414   :  { %7431 = vmatpush1.bf16.msra.mxu1 %v7430_v7  ;;  %v7446_v7 = vpack.c.bf16 %v2938_v61, %v2927_v60  ;;  %v3015_v60 = vld [vmem:[#allocation8 + $0x1570] sm:$0xff]  ;;  %v3026_v61 = vld [vmem:[#allocation8 + $0x15c8] sm:$0xff] }
 0x415   :  { %7623 = vmatpush1.bf16.msra.mxu0 %v7622_v9  ;;  %7433 = vmatprep.subr.bf16.mxu1 %v7432_v21  ;;  %v7638_v9 = vpack.c.bf16 %v2588_v1, %v2577_v62  ;;  %v7448_v21 = vpack.c.bf16 %v2961_v3, %v2950_v55  ;;  %v2665_v62 = vld [vmem:[#allocation8 + $0xa80] sm:$0xff]  ;;  %v2676_v1 = vld [vmem:[#allocation8 + $0xad8] sm:$0xff]  ;;  %v3038_v55 = vld [vmem:[#allocation8 + $0x1628] sm:$0xff] }
 0x416   :  { %7625 = vmatprep.subr.bf16.mxu0 %v7624_v16  ;;  %v7640_v16 = vpack.c.bf16 %v2611_v6, %v2600_v26  ;;  %v3049_v3 = vld [vmem:[#allocation8 + $0x1680] sm:$0xff]  ;;  %v2688_v26 = vld [vmem:[#allocation8 + $0xb38] sm:$0xff]  ;;  %v2699_v6 = vld [vmem:[#allocation8 + $0xb90] sm:$0xff] }
 0x418   :  { %7435 = vmatpush1.bf16.msra.mxu1 %v7434_v52  ;;  %v7450_v52 = vpack.c.bf16 %v2960_v11, %v2949_v10  ;;  %v7656_v10 = vpack.c.bf16 %v2699_v6, %v2688_v26  ;;  %v3037_v11 = vld [vmem:[#allocation8 + $0x1620] sm:$0xff]  ;;  %v2776_v26 = vld [vmem:[#allocation8 + $0xdf8] sm:$0xff]  ;;  %v2787_v6 = vld [vmem:[#allocation8 + $0xe50] sm:$0xff] }
 0x419   :  { %7627 = vmatpush1.bf16.msra.mxu0 %v7626_v27  ;;  %7437 = vmatprep.subr.bf16.mxu1 %v7436_v28  ;;  %v7642_v27 = vpack.c.bf16 %v2610_v17, %v2599_v0  ;;  %v7452_v28 = vpack.c.bf16 %v2983_v22, %v2972_v18  ;;  %v3048_v0 = vld [vmem:[#allocation8 + $0x1678] sm:$0xff]  ;;  %v2698_v17 = vld [vmem:[#allocation8 + $0xb88] sm:$0xff]  ;;  %v3071_v22 = vld [vmem:[#allocation8 + $0x1730] sm:$0xff] }
 0x41a   :  { %7629 = vmatprep.subr.bf16.mxu0 %v7628_v32  ;;  %v7644_v32 = vpack.c.bf16 %v2633_v25, %v2622_v24  ;;  %v3060_v18 = vld [vmem:[#allocation8 + $0x16d8] sm:$0xff]  ;;  %v2710_v24 = vld [vmem:[#allocation8 + $0xbe8] sm:$0xff]  ;;  %v2721_v25 = vld [vmem:[#allocation8 + $0xc40] sm:$0xff] }
 0x41c   :  { %7439 = vmatpush1.bf16.msra.mxu1 %v7438_v38  ;;  %v7454_v38 = vpack.c.bf16 %v2982_v48, %v2971_v29  ;;  %v3059_v29 = vld [vmem:[#allocation8 + $0x16d0] sm:$0xff]  ;;  %v3070_v48 = vld [vmem:[#allocation8 + $0x1728] sm:$0xff] }
 0x41d   :  { %7631 = vmatpush1.bf16.msra.mxu0 %v7630_v39  ;;  %7441 = vmatprep.subr.bf16.mxu1 %v7440_v42  ;;  %v7646_v39 = vpack.c.bf16 %v2632_v33, %v2621_v31  ;;  %v7456_v42 = vpack.c.bf16 %v3005_v36, %v2994_v34  ;;  %v2709_v31 = vld [vmem:[#allocation8 + $0xbe0] sm:$0xff]  ;;  %v2720_v33 = vld [vmem:[#allocation8 + $0xc38] sm:$0xff]  ;;  %v3082_v34 = vld [vmem:[#allocation8 + $0x1788] sm:$0xff] }
 0x41e   :  { %7633 = vmatprep.subr.bf16.mxu0 %v7632_v47  ;;  %v7648_v47 = vpack.c.bf16 %v2655_v37, %v2644_v4  ;;  %v3093_v36 = vld [vmem:[#allocation8 + $0x17e0] sm:$0xff]  ;;  %v2732_v4 = vld [vmem:[#allocation8 + $0xc98] sm:$0xff]  ;;  %v2743_v37 = vld [vmem:[#allocation8 + $0xcf0] sm:$0xff] }
 0x420   :  { %7443 = vmatpush1.bf16.msra.mxu1 %v7442_v54  ;;  %v7458_v54 = vpack.c.bf16 %v3004_v45, %v2993_v43  ;;  %v3081_v43 = vld [vmem:[#allocation8 + $0x1780] sm:$0xff]  ;;  %v3092_v45 = vld [vmem:[#allocation8 + $0x17d8] sm:$0xff] }
 0x421   :  { %7635 = vmatpush1.bf16.msra.mxu0 %v7634_v13  ;;  %7445 = vmatprep.subr.bf16.mxu1 %v7444_v59  ;;  %v7650_v13 = vpack.c.bf16 %v2654_v49, %v2643_v46  ;;  %v7460_v59 = vpack.c.bf16 %v3027_v53, %v3016_v50  ;;  %v2731_v46 = vld [vmem:[#allocation8 + $0xc90] sm:$0xff]  ;;  %v2742_v49 = vld [vmem:[#allocation8 + $0xce8] sm:$0xff]  ;;  %v3104_v50 = vld [vmem:[#allocation8 + $0x1838] sm:$0xff] }
 0x422   :  { %7637 = vmatprep.subr.bf16.mxu0 %v7636_v63  ;;  %v7652_v63 = vpack.c.bf16 %v2677_v14, %v2666_v40  ;;  %v3115_v53 = vld [vmem:[#allocation8 + $0x1890] sm:$0xff]  ;;  %v2754_v40 = vld [vmem:[#allocation8 + $0xd48] sm:$0xff]  ;;  %v2765_v14 = vld [vmem:[#allocation8 + $0xda0] sm:$0xff] }
 0x424   :  { %7447 = vmatpush1.bf16.msra.mxu1 %v7446_v7  ;;  %v7462_v7 = vpack.c.bf16 %v3026_v61, %v3015_v60  ;;  %v3103_v60 = vld [vmem:[#allocation8 + $0x1830] sm:$0xff]  ;;  %v3114_v61 = vld [vmem:[#allocation8 + $0x1888] sm:$0xff] }
 0x425   :  { %7639 = vmatpush1.bf16.msra.mxu0 %v7638_v9  ;;  %7449 = vmatprep.subr.bf16.mxu1 %v7448_v21  ;;  %v7654_v9 = vpack.c.bf16 %v2676_v1, %v2665_v62  ;;  %v7464_v21 = vpack.c.bf16 %v3049_v3, %v3038_v55  ;;  %v2753_v62 = vld [vmem:[#allocation8 + $0xd40] sm:$0xff]  ;;  %v2764_v1 = vld [vmem:[#allocation8 + $0xd98] sm:$0xff]  ;;  %v3126_v55 = vld [vmem:[#allocation8 + $0x18e8] sm:$0xff] }
 0x426   :  { %7641 = vmatprep.subr.bf16.mxu0 %v7640_v16  ;;  %v2687_v16 = vld [vmem:[#allocation8 + $0xb30] sm:$0xff]  ;;  %v3137_v3 = vld [vmem:[#allocation8 + $0x1940] sm:$0xff] }
 0x428   :  { %7451 = vmatpush1.bf16.msra.mxu1 %v7450_v52  ;;  %v7466_v52 = vpack.c.bf16 %v3048_v0, %v3037_v11  ;;  %v3136_v11 = vld [vmem:[#allocation8 + $0x1938] sm:$0xff]  ;;  %v2775_v0 = vld [vmem:[#allocation8 + $0xdf0] sm:$0xff] }
 0x429   :  { %7643 = vmatpush1.bf16.msra.mxu0 %v7642_v27  ;;  %7453 = vmatprep.subr.bf16.mxu1 %v7452_v28  ;;  %v7658_v27 = vpack.c.bf16 %v2698_v17, %v2687_v16  ;;  %v7468_v28 = vpack.c.bf16 %v3071_v22, %v3060_v18  ;;  %v7672_v16 = vpack.c.bf16 %v2787_v6, %v2776_v26  ;;  %v2786_v17 = vld [vmem:[#allocation8 + $0xe48] sm:$0xff]  ;;  %v3148_v18 = vld [vmem:[#allocation8 + $0x1998] sm:$0xff]  ;;  %v3159_v22 = vld [vmem:[#allocation8 + $0x19f0] sm:$0xff] }
 0x42a   :  { %7645 = vmatprep.subr.bf16.mxu0 %v7644_v32  ;;  %v7660_v32 = vpack.c.bf16 %v2721_v25, %v2710_v24  ;;  %v2798_v24 = vld [vmem:[#allocation8 + $0xea8] sm:$0xff]  ;;  %v2809_v25 = vld [vmem:[#allocation8 + $0xf00] sm:$0xff]  ;;  %v2864_v26 = vld [vmem:[#allocation8 + $0x10b8] sm:$0xff] }
 0x42b   :  { %v2875_v6 = vld [vmem:[#allocation8 + $0x1110] sm:$0xff] }
 0x42c   :  { %7455 = vmatpush1.bf16.msra.mxu1 %v7454_v38  ;;  %v7470_v38 = vpack.c.bf16 %v3070_v48, %v3059_v29  ;;  %v3147_v29 = vld [vmem:[#allocation8 + $0x1990] sm:$0xff]  ;;  %v3158_v48 = vld [vmem:[#allocation8 + $0x19e8] sm:$0xff] }
 0x42d   :  { %7647 = vmatpush1.bf16.msra.mxu0 %v7646_v39  ;;  %7457 = vmatprep.subr.bf16.mxu1 %v7456_v42  ;;  %v7662_v39 = vpack.c.bf16 %v2720_v33, %v2709_v31  ;;  %v7472_v42 = vpack.c.bf16 %v3093_v36, %v3082_v34  ;;  %v2797_v31 = vld [vmem:[#allocation8 + $0xea0] sm:$0xff]  ;;  %v2808_v33 = vld [vmem:[#allocation8 + $0xef8] sm:$0xff]  ;;  %v3170_v34 = vld [vmem:[#allocation8 + $0x1a48] sm:$0xff] }
 0x42e   :  { %7649 = vmatprep.subr.bf16.mxu0 %v7648_v47  ;;  %v7664_v47 = vpack.c.bf16 %v2743_v37, %v2732_v4  ;;  %v3181_v36 = vld [vmem:[#allocation8 + $0x1aa0] sm:$0xff]  ;;  %v2820_v4 = vld [vmem:[#allocation8 + $0xf58] sm:$0xff]  ;;  %v2831_v37 = vld [vmem:[#allocation8 + $0xfb0] sm:$0xff] }
 0x430   :  { %7459 = vmatpush1.bf16.msra.mxu1 %v7458_v54  ;;  %v7474_v54 = vpack.c.bf16 %v3092_v45, %v3081_v43  ;;  %v3169_v43 = vld [vmem:[#allocation8 + $0x1a40] sm:$0xff]  ;;  %v3180_v45 = vld [vmem:[#allocation8 + $0x1a98] sm:$0xff] }
 0x431   :  { %7651 = vmatpush1.bf16.msra.mxu0 %v7650_v13  ;;  %7461 = vmatprep.subr.bf16.mxu1 %v7460_v59  ;;  %v7666_v13 = vpack.c.bf16 %v2742_v49, %v2731_v46  ;;  %v7476_v59 = vpack.c.bf16 %v3115_v53, %v3104_v50  ;;  %v2819_v46 = vld [vmem:[#allocation8 + $0xf50] sm:$0xff]  ;;  %v2830_v49 = vld [vmem:[#allocation8 + $0xfa8] sm:$0xff]  ;;  %v3192_v50 = vld [vmem:[#allocation8 + $0x1af8] sm:$0xff] }
 0x432   :  { %7653 = vmatprep.subr.bf16.mxu0 %v7652_v63  ;;  %v7668_v63 = vpack.c.bf16 %v2765_v14, %v2754_v40  ;;  %v3203_v53 = vld [vmem:[#allocation8 + $0x1b50] sm:$0xff]  ;;  %v2842_v40 = vld [vmem:[#allocation8 + $0x1008] sm:$0xff]  ;;  %v2853_v14 = vld [vmem:[#allocation8 + $0x1060] sm:$0xff] }
 0x434   :  { %7463 = vmatpush1.bf16.msra.mxu1 %v7462_v7  ;;  %v7478_v7 = vpack.c.bf16 %v3114_v61, %v3103_v60  ;;  %v3191_v60 = vld [vmem:[#allocation8 + $0x1af0] sm:$0xff]  ;;  %v3202_v61 = vld [vmem:[#allocation8 + $0x1b48] sm:$0xff] }
 0x435   :  { %7655 = vmatpush1.bf16.msra.mxu0 %v7654_v9  ;;  %7465 = vmatprep.subr.bf16.mxu1 %v7464_v21  ;;  %v7670_v9 = vpack.c.bf16 %v2764_v1, %v2753_v62  ;;  %v7480_v21 = vpack.c.bf16 %v3137_v3, %v3126_v55  ;;  %v2841_v62 = vld [vmem:[#allocation8 + $0x1000] sm:$0xff]  ;;  %v2852_v1 = vld [vmem:[#allocation8 + $0x1058] sm:$0xff]  ;;  %v3214_v55 = vld [vmem:[#allocation8 + $0x1ba8] sm:$0xff] }
 0x436   :  { %7657 = vmatprep.subr.bf16.mxu0 %v7656_v10  ;;  %v3125_v10 = vld [vmem:[#allocation8 + $0x18e0] sm:$0xff] }
 0x437   :  { %4544 = vmatmul.mubr.f32.vlgmr.msra.gmra.mrb[22].mxu1 %v8685_v2  ;;  %v3225_v3 = vld [vmem:[#allocation8 + $0x1c00] sm:$0xff] }
 0x438   :  { %4775 = vmatmul.mubr.f32.vlgmr.msra.gmra.mrb[22].mxu0 %v8667_v35  ;;  %4549 = vmatprep.mubr.f32.mxu1 %v8670_v41 }
 0x439   :  { %7467 = vmatpush1.bf16.msra.mxu1 %v7466_v52  ;;  %4780 = vmatprep.mubr.f32.mxu0 %v8630_v15  ;;  %v7482_v52 = vpack.c.bf16 %v3136_v11, %v3125_v10  ;;  %v3213_v10 = vld [vmem:[#allocation8 + $0x1ba0] sm:$0xff]  ;;  %v3224_v11 = vld [vmem:[#allocation8 + $0x1bf8] sm:$0xff] }
 0x43a   :  { %7659 = vmatpush1.bf16.msra.mxu0 %v7658_v27  ;;  %7469 = vmatprep.subr.bf16.mxu1 %v7468_v28  ;;  %v7674_v27 = vpack.c.bf16 %v2786_v17, %v2775_v0  ;;  %v7484_v28 = vpack.c.bf16 %v3159_v22, %v3148_v18  ;;  %v2863_v0 = vld [vmem:[#allocation8 + $0x10b0] sm:$0xff]  ;;  %v2874_v17 = vld [vmem:[#allocation8 + $0x1108] sm:$0xff]  ;;  %v3236_v18 = vld [vmem:[#allocation8 + $0x1c58] sm:$0xff] }
 0x43b   :  { %4550 = vmatmul.mubr.f32.gmra.mrb[24].mxu1 %v8680_v51  ;;  %7661 = vmatprep.subr.bf16.mxu0 %v7660_v32  ;;  %v7676_v32 = vpack.c.bf16 %v2809_v25, %v2798_v24  ;;  %v3247_v22 = vld [vmem:[#allocation8 + $0x1cb0] sm:$0xff]  ;;  %v2886_v24 = vld [vmem:[#allocation8 + $0x1168] sm:$0xff]  ;;  %v2897_v25 = vld [vmem:[#allocation8 + $0x11c0] sm:$0xff] }
 0x43c   :  { %4781 = vmatmul.mubr.f32.gmra.mrb[24].mxu0 %v8663_v20  ;;  %4620 = vmatprep.mubr.f32.mxu1 %v8696_v23 }
 0x43d   :  { %7471 = vmatpush1.bf16.msra.mxu1 %v7470_v38  ;;  %4851 = vmatprep.mubr.f32.mxu0 %v8676_v56  ;;  %v7486_v38 = vpack.c.bf16 %v3158_v48, %v3147_v29  ;;  %v3235_v29 = vld [vmem:[#allocation8 + $0x1c50] sm:$0xff]  ;;  %v3246_v48 = vld [vmem:[#allocation8 + $0x1ca8] sm:$0xff] }
 0x43e   :  { %7663 = vmatpush1.bf16.msra.mxu0 %v7662_v39  ;;  %7473 = vmatprep.subr.bf16.mxu1 %v7472_v42  ;;  %v7678_v39 = vpack.c.bf16 %v2808_v33, %v2797_v31  ;;  %v7488_v42 = vpack.c.bf16 %v3181_v36, %v3170_v34  ;;  %v2885_v31 = vld [vmem:[#allocation8 + $0x1160] sm:$0xff]  ;;  %v2896_v33 = vld [vmem:[#allocation8 + $0x11b8] sm:$0xff]  ;;  %v3258_v34 = vld [vmem:[#allocation8 + $0x1d08] sm:$0xff] }
 0x43f   :  { %7665 = vmatprep.subr.bf16.mxu0 %v7664_v47  ;;  %v7680_v47 = vpack.c.bf16 %v2831_v37, %v2820_v4  ;;  %v3269_v36 = vld [vmem:[#allocation8 + $0x1d60] sm:$0xff]  ;;  %v2908_v4 = vld [vmem:[#allocation8 + $0x1218] sm:$0xff]  ;;  %v2919_v37 = vld [vmem:[#allocation8 + $0x1270] sm:$0xff] }
 0x441   :  { %7475 = vmatpush1.bf16.msra.mxu1 %v7474_v54  ;;  %v7490_v54 = vpack.c.bf16 %v3180_v45, %v3169_v43  ;;  %v3257_v43 = vld [vmem:[#allocation8 + $0x1d00] sm:$0xff]  ;;  %v3268_v45 = vld [vmem:[#allocation8 + $0x1d58] sm:$0xff] }
 0x442   :  { %7667 = vmatpush1.bf16.msra.mxu0 %v7666_v13  ;;  %7477 = vmatprep.subr.bf16.mxu1 %v7476_v59  ;;  %v7682_v13 = vpack.c.bf16 %v2830_v49, %v2819_v46  ;;  %v7492_v59 = vpack.c.bf16 %v3203_v53, %v3192_v50  ;;  %v2907_v46 = vld [vmem:[#allocation8 + $0x1210] sm:$0xff]  ;;  %v2918_v49 = vld [vmem:[#allocation8 + $0x1268] sm:$0xff]  ;;  %v3280_v50 = vld [vmem:[#allocation8 + $0x1db8] sm:$0xff] }
 0x443   :  { %7669 = vmatprep.subr.bf16.mxu0 %v7668_v63  ;;  %v7684_v63 = vpack.c.bf16 %v2853_v14, %v2842_v40  ;;  %v3291_v53 = vld [vmem:[#allocation8 + $0x1e10] sm:$0xff]  ;;  %v2930_v40 = vld [vmem:[#allocation8 + $0x12c8] sm:$0xff]  ;;  %v2941_v14 = vld [vmem:[#allocation8 + $0x1320] sm:$0xff] }
 0x445   :  { %7479 = vmatpush1.bf16.msra.mxu1 %v7478_v7  ;;  %v7494_v7 = vpack.c.bf16 %v3202_v61, %v3191_v60  ;;  %v3279_v60 = vld [vmem:[#allocation8 + $0x1db0] sm:$0xff]  ;;  %v3290_v61 = vld [vmem:[#allocation8 + $0x1e08] sm:$0xff] }
 0x446   :  { %7671 = vmatpush1.bf16.msra.mxu0 %v7670_v9  ;;  %7481 = vmatprep.subr.bf16.mxu1 %v7480_v21  ;;  %v7686_v9 = vpack.c.bf16 %v2852_v1, %v2841_v62  ;;  %v7496_v21 = vpack.c.bf16 %v3225_v3, %v3214_v55  ;;  %v2929_v62 = vld [vmem:[#allocation8 + $0x12c0] sm:$0xff]  ;;  %v2940_v1 = vld [vmem:[#allocation8 + $0x1318] sm:$0xff]  ;;  %v3302_v55 = vld [vmem:[#allocation8 + $0x1e68] sm:$0xff] }
 0x447   :  { %7673 = vmatprep.subr.bf16.mxu0 %v7672_v16  ;;  %v7688_v16 = vpack.c.bf16 %v2875_v6, %v2864_v26  ;;  %v3313_v3 = vld [vmem:[#allocation8 + $0x1ec0] sm:$0xff]  ;;  %v2952_v26 = vld [vmem:[#allocation8 + $0x1378] sm:$0xff]  ;;  %v2963_v6 = vld [vmem:[#allocation8 + $0x13d0] sm:$0xff] }
 0x449   :  { %7483 = vmatpush1.bf16.msra.mxu1 %v7482_v52  ;;  %v7498_v52 = vpack.c.bf16 %v3224_v11, %v3213_v10  ;;  %v3301_v10 = vld [vmem:[#allocation8 + $0x1e60] sm:$0xff]  ;;  %v3312_v11 = vld [vmem:[#allocation8 + $0x1eb8] sm:$0xff] }
 0x44a   :  { %7675 = vmatpush1.bf16.msra.mxu0 %v7674_v27  ;;  %7485 = vmatprep.subr.bf16.mxu1 %v7484_v28  ;;  %v7690_v27 = vpack.c.bf16 %v2874_v17, %v2863_v0  ;;  %v7500_v28 = vpack.c.bf16 %v3247_v22, %v3236_v18  ;;  %v2951_v0 = vld [vmem:[#allocation8 + $0x1370] sm:$0xff]  ;;  %v2962_v17 = vld [vmem:[#allocation8 + $0x13c8] sm:$0xff]  ;;  %v3324_v18 = vld [vmem:[#allocation8 + $0x1f18] sm:$0xff] }
 0x44b   :  { %7677 = vmatprep.subr.bf16.mxu0 %v7676_v32  ;;  %v7692_v32 = vpack.c.bf16 %v2897_v25, %v2886_v24  ;;  %v3335_v22 = vld [vmem:[#allocation8 + $0x1f70] sm:$0xff]  ;;  %v2974_v24 = vld [vmem:[#allocation8 + $0x1428] sm:$0xff]  ;;  %v2985_v25 = vld [vmem:[#allocation8 + $0x1480] sm:$0xff] }
 0x44d   :  { %7487 = vmatpush1.bf16.msra.mxu1 %v7486_v38  ;;  %v7502_v38 = vpack.c.bf16 %v3246_v48, %v3235_v29  ;;  %v3323_v29 = vld [vmem:[#allocation8 + $0x1f10] sm:$0xff]  ;;  %v3334_v48 = vld [vmem:[#allocation8 + $0x1f68] sm:$0xff] }
 0x44e   :  { %7679 = vmatpush1.bf16.msra.mxu0 %v7678_v39  ;;  %7489 = vmatprep.subr.bf16.mxu1 %v7488_v42  ;;  %v7694_v39 = vpack.c.bf16 %v2896_v33, %v2885_v31  ;;  %v7504_v42 = vpack.c.bf16 %v3269_v36, %v3258_v34  ;;  %v2973_v31 = vld [vmem:[#allocation8 + $0x1420] sm:$0xff]  ;;  %v2984_v33 = vld [vmem:[#allocation8 + $0x1478] sm:$0xff]  ;;  %v3346_v34 = vld [vmem:[#allocation8 + $0x1fc8] sm:$0xff] }
 0x44f   :  { %7681 = vmatprep.subr.bf16.mxu0 %v7680_v47  ;;  %v7696_v47 = vpack.c.bf16 %v2919_v37, %v2908_v4  ;;  %v3357_v36 = vld [vmem:[#allocation8 + $0x2020] sm:$0xff]  ;;  %v2996_v4 = vld [vmem:[#allocation8 + $0x14d8] sm:$0xff]  ;;  %v3007_v37 = vld [vmem:[#allocation8 + $0x1530] sm:$0xff] }
 0x451   :  { %7491 = vmatpush1.bf16.msra.mxu1 %v7490_v54  ;;  %v7506_v54 = vpack.c.bf16 %v3268_v45, %v3257_v43  ;;  %v3345_v43 = vld [vmem:[#allocation8 + $0x1fc0] sm:$0xff]  ;;  %v3356_v45 = vld [vmem:[#allocation8 + $0x2018] sm:$0xff] }
 0x452   :  { %7683 = vmatpush1.bf16.msra.mxu0 %v7682_v13  ;;  %7493 = vmatprep.subr.bf16.mxu1 %v7492_v59  ;;  %v7698_v13 = vpack.c.bf16 %v2918_v49, %v2907_v46  ;;  %v7508_v59 = vpack.c.bf16 %v3291_v53, %v3280_v50  ;;  %v2995_v46 = vld [vmem:[#allocation8 + $0x14d0] sm:$0xff]  ;;  %v3006_v49 = vld [vmem:[#allocation8 + $0x1528] sm:$0xff]  ;;  %v3368_v50 = vld [vmem:[#allocation8 + $0x2078] sm:$0xff] }
 0x453   :  { %7685 = vmatprep.subr.bf16.mxu0 %v7684_v63  ;;  %v7700_v63 = vpack.c.bf16 %v2941_v14, %v2930_v40  ;;  %v3379_v53 = vld [vmem:[#allocation8 + $0x20d0] sm:$0xff]  ;;  %v3018_v40 = vld [vmem:[#allocation8 + $0x1588] sm:$0xff]  ;;  %v3029_v14 = vld [vmem:[#allocation8 + $0x15e0] sm:$0xff] }
 0x455   :  { %7495 = vmatpush1.bf16.msra.mxu1 %v7494_v7  ;;  %v7510_v7 = vpack.c.bf16 %v3290_v61, %v3279_v60  ;;  %v3367_v60 = vld [vmem:[#allocation8 + $0x2070] sm:$0xff]  ;;  %v3378_v61 = vld [vmem:[#allocation8 + $0x20c8] sm:$0xff] }
 0x456   :  { %7687 = vmatpush1.bf16.msra.mxu0 %v7686_v9  ;;  %7497 = vmatprep.subr.bf16.mxu1 %v7496_v21  ;;  %v7702_v9 = vpack.c.bf16 %v2940_v1, %v2929_v62  ;;  %v7512_v21 = vpack.c.bf16 %v3313_v3, %v3302_v55  ;;  %v3017_v62 = vld [vmem:[#allocation8 + $0x1580] sm:$0xff]  ;;  %v3028_v1 = vld [vmem:[#allocation8 + $0x15d8] sm:$0xff]  ;;  %v3390_v55 = vld [vmem:[#allocation8 + $0x2128] sm:$0xff] }
 0x457   :  { %7689 = vmatprep.subr.bf16.mxu0 %v7688_v16  ;;  %v7704_v16 = vpack.c.bf16 %v2963_v6, %v2952_v26  ;;  %v3401_v3 = vld [vmem:[#allocation8 + $0x2180] sm:$0xff]  ;;  %v3040_v26 = vld [vmem:[#allocation8 + $0x1638] sm:$0xff]  ;;  %v3051_v6 = vld [vmem:[#allocation8 + $0x1690] sm:$0xff] }
 0x459   :  { %7499 = vmatpush1.bf16.msra.mxu1 %v7498_v52  ;;  %v7514_v52 = vpack.c.bf16 %v3312_v11, %v3301_v10  ;;  %v7720_v10 = vpack.c.bf16 %v3051_v6, %v3040_v26  ;;  %v3389_v11 = vld [vmem:[#allocation8 + $0x2120] sm:$0xff]  ;;  %v3128_v26 = vld [vmem:[#allocation8 + $0x18f8] sm:$0xff]  ;;  %v3139_v6 = vld [vmem:[#allocation8 + $0x1950] sm:$0xff] }
 0x45a   :  { %7691 = vmatpush1.bf16.msra.mxu0 %v7690_v27  ;;  %7501 = vmatprep.subr.bf16.mxu1 %v7500_v28  ;;  %v7706_v27 = vpack.c.bf16 %v2962_v17, %v2951_v0  ;;  %v7516_v28 = vpack.c.bf16 %v3335_v22, %v3324_v18  ;;  %v3400_v0 = vld [vmem:[#allocation8 + $0x2178] sm:$0xff]  ;;  %v3050_v17 = vld [vmem:[#allocation8 + $0x1688] sm:$0xff]  ;;  %v3423_v22 = vld [vmem:[#allocation8 + $0x2230] sm:$0xff] }
 0x45b   :  { %7693 = vmatprep.subr.bf16.mxu0 %v7692_v32  ;;  %v7708_v32 = vpack.c.bf16 %v2985_v25, %v2974_v24  ;;  %v3412_v18 = vld [vmem:[#allocation8 + $0x21d8] sm:$0xff]  ;;  %v3062_v24 = vld [vmem:[#allocation8 + $0x16e8] sm:$0xff]  ;;  %v3073_v25 = vld [vmem:[#allocation8 + $0x1740] sm:$0xff] }
 0x45d   :  { %7503 = vmatpush1.bf16.msra.mxu1 %v7502_v38  ;;  %v7518_v38 = vpack.c.bf16 %v3334_v48, %v3323_v29  ;;  %v3411_v29 = vld [vmem:[#allocation8 + $0x21d0] sm:$0xff]  ;;  %v3422_v48 = vld [vmem:[#allocation8 + $0x2228] sm:$0xff] }
 0x45e   :  { %7695 = vmatpush1.bf16.msra.mxu0 %v7694_v39  ;;  %7505 = vmatprep.subr.bf16.mxu1 %v7504_v42  ;;  %v7710_v39 = vpack.c.bf16 %v2984_v33, %v2973_v31  ;;  %v7520_v42 = vpack.c.bf16 %v3357_v36, %v3346_v34  ;;  %v3061_v31 = vld [vmem:[#allocation8 + $0x16e0] sm:$0xff]  ;;  %v3072_v33 = vld [vmem:[#allocation8 + $0x1738] sm:$0xff]  ;;  %v3434_v34 = vld [vmem:[#allocation8 + $0x2288] sm:$0xff] }
 0x45f   :  { %7697 = vmatprep.subr.bf16.mxu0 %v7696_v47  ;;  %v7712_v47 = vpack.c.bf16 %v3007_v37, %v2996_v4  ;;  %v3445_v36 = vld [vmem:[#allocation8 + $0x22e0] sm:$0xff]  ;;  %v3084_v4 = vld [vmem:[#allocation8 + $0x1798] sm:$0xff]  ;;  %v3095_v37 = vld [vmem:[#allocation8 + $0x17f0] sm:$0xff] }
 0x461   :  { %7507 = vmatpush1.bf16.msra.mxu1 %v7506_v54  ;;  %v7522_v54 = vpack.c.bf16 %v3356_v45, %v3345_v43  ;;  %v3433_v43 = vld [vmem:[#allocation8 + $0x2280] sm:$0xff]  ;;  %v3444_v45 = vld [vmem:[#allocation8 + $0x22d8] sm:$0xff] }
 0x462   :  { %7699 = vmatpush1.bf16.msra.mxu0 %v7698_v13  ;;  %7509 = vmatprep.subr.bf16.mxu1 %v7508_v59  ;;  %v7714_v13 = vpack.c.bf16 %v3006_v49, %v2995_v46  ;;  %v7524_v59 = vpack.c.bf16 %v3379_v53, %v3368_v50  ;;  %v3083_v46 = vld [vmem:[#allocation8 + $0x1790] sm:$0xff]  ;;  %v3094_v49 = vld [vmem:[#allocation8 + $0x17e8] sm:$0xff]  ;;  %v3456_v50 = vld [vmem:[#allocation8 + $0x2338] sm:$0xff] }
 0x463   :  { %7701 = vmatprep.subr.bf16.mxu0 %v7700_v63  ;;  %v7716_v63 = vpack.c.bf16 %v3029_v14, %v3018_v40  ;;  %v3467_v53 = vld [vmem:[#allocation8 + $0x2390] sm:$0xff]  ;;  %v3106_v40 = vld [vmem:[#allocation8 + $0x1848] sm:$0xff]  ;;  %v3117_v14 = vld [vmem:[#allocation8 + $0x18a0] sm:$0xff] }
 0x465   :  { %7511 = vmatpush1.bf16.msra.mxu1 %v7510_v7  ;;  %v7526_v7 = vpack.c.bf16 %v3378_v61, %v3367_v60  ;;  %v3455_v60 = vld [vmem:[#allocation8 + $0x2330] sm:$0xff]  ;;  %v3466_v61 = vld [vmem:[#allocation8 + $0x2388] sm:$0xff] }
 0x466   :  { %7703 = vmatpush1.bf16.msra.mxu0 %v7702_v9  ;;  %7513 = vmatprep.subr.bf16.mxu1 %v7512_v21  ;;  %v7718_v9 = vpack.c.bf16 %v3028_v1, %v3017_v62  ;;  %v7528_v21 = vpack.c.bf16 %v3401_v3, %v3390_v55  ;;  %v3105_v62 = vld [vmem:[#allocation8 + $0x1840] sm:$0xff]  ;;  %v3116_v1 = vld [vmem:[#allocation8 + $0x1898] sm:$0xff]  ;;  %v3478_v55 = vld [vmem:[#allocation8 + $0x23e8] sm:$0xff] }
 0x467   :  { %7705 = vmatprep.subr.bf16.mxu0 %v7704_v16  ;;  %v3039_v16 = vld [vmem:[#allocation8 + $0x1630] sm:$0xff]  ;;  %v3489_v3 = vld [vmem:[#allocation8 + $0x2440] sm:$0xff] }
 0x469   :  { %7515 = vmatpush1.bf16.msra.mxu1 %v7514_v52  ;;  %v7530_v52 = vpack.c.bf16 %v3400_v0, %v3389_v11  ;;  %v3488_v11 = vld [vmem:[#allocation8 + $0x2438] sm:$0xff]  ;;  %v3127_v0 = vld [vmem:[#allocation8 + $0x18f0] sm:$0xff] }
 0x46a   :  { %7707 = vmatpush1.bf16.msra.mxu0 %v7706_v27  ;;  %7517 = vmatprep.subr.bf16.mxu1 %v7516_v28  ;;  %v7722_v27 = vpack.c.bf16 %v3050_v17, %v3039_v16  ;;  %v7532_v28 = vpack.c.bf16 %v3423_v22, %v3412_v18  ;;  %v7736_v16 = vpack.c.bf16 %v3139_v6, %v3128_v26  ;;  %v3138_v17 = vld [vmem:[#allocation8 + $0x1948] sm:$0xff]  ;;  %v3500_v18 = vld [vmem:[#allocation8 + $0x2498] sm:$0xff]  ;;  %v3511_v22 = vld [vmem:[#allocation8 + $0x24f0] sm:$0xff] }
 0x46b   :  { %7709 = vmatprep.subr.bf16.mxu0 %v7708_v32  ;;  %v7724_v32 = vpack.c.bf16 %v3073_v25, %v3062_v24  ;;  %v3150_v24 = vld [vmem:[#allocation8 + $0x19a8] sm:$0xff]  ;;  %v3161_v25 = vld [vmem:[#allocation8 + $0x1a00] sm:$0xff]  ;;  %v3204_v6 = vld [vmem:[#allocation8 + $0x1b58] sm:$0xff] }
 0x46d   :  { %7519 = vmatpush1.bf16.msra.mxu1 %v7518_v38  ;;  %v7534_v38 = vpack.c.bf16 %v3422_v48, %v3411_v29  ;;  %v3499_v29 = vld [vmem:[#allocation8 + $0x2490] sm:$0xff]  ;;  %v3510_v48 = vld [vmem:[#allocation8 + $0x24e8] sm:$0xff] }
 0x46e   :  { %7711 = vmatpush1.bf16.msra.mxu0 %v7710_v39  ;;  %7521 = vmatprep.subr.bf16.mxu1 %v7520_v42  ;;  %v7726_v39 = vpack.c.bf16 %v3072_v33, %v3061_v31  ;;  %v7536_v42 = vpack.c.bf16 %v3445_v36, %v3434_v34  ;;  %v3149_v31 = vld [vmem:[#allocation8 + $0x19a0] sm:$0xff]  ;;  %v7740_v33 = vpack.c.bf16 %v3161_v25, %v3150_v24  ;;  %v3160_v34 = vld [vmem:[#allocation8 + $0x19f8] sm:$0xff]  ;;  %v3522_v36 = vld [vmem:[#allocation8 + $0x2548] sm:$0xff] }
 0x46f   :  { %7713 = vmatprep.subr.bf16.mxu0 %v7712_v47  ;;  %v7728_v47 = vpack.c.bf16 %v3095_v37, %v3084_v4  ;;  %v3533_v4 = vld [vmem:[#allocation8 + $0x25a0] sm:$0xff]  ;;  %v3226_v25 = vld [vmem:[#allocation8 + $0x1c08] sm:$0xff] }
 0x471   :  { %7523 = vmatpush1.bf16.msra.mxu1 %v7522_v54  ;;  %v7538_v54 = vpack.c.bf16 %v3444_v45, %v3433_v43  ;;  %v7742_v43 = vpack.c.bf16 %v3160_v34, %v3149_v31  ;;  %v7552_v45 = vpack.c.bf16 %v3533_v4, %v3522_v36  ;;  %v3598_v34 = vld [vmem:[#allocation8 + $0x27a8] sm:$0xff]  ;;  %v3237_v36 = vld [vmem:[#allocation8 + $0x1c60] sm:$0xff] }
 0x472   :  { %7715 = vmatpush1.bf16.msra.mxu0 %v7714_v13  ;;  %7525 = vmatprep.subr.bf16.mxu1 %v7524_v59  ;;  %v7730_v13 = vpack.c.bf16 %v3094_v49, %v3083_v46  ;;  %v7540_v59 = vpack.c.bf16 %v3467_v53, %v3456_v50  ;;  %v3521_v46 = vld [vmem:[#allocation8 + $0x2540] sm:$0xff]  ;;  %v3171_v49 = vld [vmem:[#allocation8 + $0x1a50] sm:$0xff] }
 0x473   :  { %7717 = vmatprep.subr.bf16.mxu0 %v7716_v63  ;;  %v7732_v63 = vpack.c.bf16 %v3117_v14, %v3106_v40  ;;  %v3182_v40 = vld [vmem:[#allocation8 + $0x1aa8] sm:$0xff]  ;;  %v3544_v14 = vld [vmem:[#allocation8 + $0x25f8] sm:$0xff] }
 0x475   :  { %7527 = vmatpush1.bf16.msra.mxu1 %v7526_v7  ;;  %v7542_v7 = vpack.c.bf16 %v3466_v61, %v3455_v60  ;;  %v3205_v60 = vld [vmem:[#allocation8 + $0x1b60] sm:$0xff] }
 0x476   :  { %7719 = vmatpush1.bf16.msra.mxu0 %v7718_v9  ;;  %7529 = vmatprep.subr.bf16.mxu1 %v7528_v21  ;;  %v7734_v9 = vpack.c.bf16 %v3116_v1, %v3105_v62  ;;  %v7544_v21 = vpack.c.bf16 %v3489_v3, %v3478_v55  ;;  %v7746_v62 = vpack.c.bf16 %v3182_v40, %v3171_v49  ;;  %v3543_v1 = vld [vmem:[#allocation8 + $0x25f0] sm:$0xff]  ;;  %v3554_v55 = vld [vmem:[#allocation8 + $0x2648] sm:$0xff]  ;;  %v3193_v3 = vld [vmem:[#allocation8 + $0x1b00] sm:$0xff] }
 0x477   :  { %7721 = vmatprep.subr.bf16.mxu0 %v7720_v10  ;;  %v3477_v10 = vld [vmem:[#allocation8 + $0x23e0] sm:$0xff] }
 0x478   :  { %4621 = vmatmul.mubr.f32.vlgmr.msra.gmra.mrb[22].mxu1 %v8735_v58  ;;  %v3609_v49 = vld [vmem:[#allocation8 + $0x2800] sm:$0xff] }
 0x479   :  { %4852 = vmatmul.mubr.f32.vlgmr.msra.gmra.mrb[22].mxu0 %v8685_v2  ;;  %4626 = vmatprep.mubr.f32.mxu1 %v8688_v8 }
 0x47a   :  { %7531 = vmatpush1.bf16.msra.mxu1 %v7530_v52  ;;  %4857 = vmatprep.mubr.f32.mxu0 %v8670_v41  ;;  %v7546_v52 = vpack.c.bf16 %v3488_v11, %v3477_v10  ;;  %v3227_v10 = vld [vmem:[#allocation8 + $0x1c10] sm:$0xff]  ;;  %v7558_v11 = vpack.c.bf16 %v3554_v55, %v3543_v1  ;;  %v3642_v55 = vld [vmem:[#allocation8 + $0x2908] sm:$0xff] }
 0x47b   :  { %7723 = vmatpush1.bf16.msra.mxu0 %v7722_v27  ;;  %7533 = vmatprep.subr.bf16.mxu1 %v7532_v28  ;;  %v7738_v27 = vpack.c.bf16 %v3138_v17, %v3127_v0  ;;  %v7548_v28 = vpack.c.bf16 %v3511_v22, %v3500_v18  ;;  %v7750_v0 = vpack.c.bf16 %v3204_v6, %v3193_v3  ;;  %v3565_v17 = vld [vmem:[#allocation8 + $0x26a0] sm:$0xff]  ;;  %v3576_v18 = vld [vmem:[#allocation8 + $0x26f8] sm:$0xff]  ;;  %v3215_v22 = vld [vmem:[#allocation8 + $0x1bb0] sm:$0xff] }
 0x47c   :  { %4627 = vmatmul.mubr.f32.gmra.mrb[24].mxu1 %v8730_v44  ;;  %7725 = vmatprep.subr.bf16.mxu0 %v7724_v32  ;;  %v7754_v31 = vpack.c.bf16 %v3226_v25, %v3215_v22  ;;  %v3631_v1 = vld [vmem:[#allocation8 + $0x28b0] sm:$0xff]  ;;  %v3281_v3 = vld [vmem:[#allocation8 + $0x1dc0] sm:$0xff]  ;;  %v3292_v6 = vld [vmem:[#allocation8 + $0x1e18] sm:$0xff] }
 0x47d   :  { %4858 = vmatmul.mubr.f32.gmra.mrb[24].mxu0 %v8680_v51  ;;  %4697 = vmatprep.mubr.f32.mxu1 %v8746_v30  ;;  %v3303_v22 = vld [vmem:[#allocation8 + $0x1e70] sm:$0xff]  ;;  %v3314_v25 = vld [vmem:[#allocation8 + $0x1ec8] sm:$0xff] }
 0x47e   :  { %7535 = vmatpush1.bf16.msra.mxu1 %v7534_v38  ;;  %4928 = vmatprep.mubr.f32.mxu0 %v8696_v23  ;;  %v3172_v38 = vld [vmem:[#allocation8 + $0x1a58] sm:$0xff] }
 0x47f   :  { %7727 = vmatpush1.bf16.msra.mxu0 %v7726_v39  ;;  %7537 = vmatprep.subr.bf16.mxu1 %v7536_v42  ;;  %v3183_v39 = vld [vmem:[#allocation8 + $0x1ab0] sm:$0xff]  ;;  %v7550_v42 = vpack.c.bf16 %v3510_v48, %v3499_v29  ;;  %v3249_v29 = vld [vmem:[#allocation8 + $0x1cc0] sm:$0xff]  ;;  %v7562_v48 = vpack.c.bf16 %v3576_v18, %v3565_v17  ;;  %v3664_v18 = vld [vmem:[#allocation8 + $0x29b8] sm:$0xff] }
 0x480   :  { %7729 = vmatprep.subr.bf16.mxu0 %v7728_v47  ;;  %v3532_v47 = vld [vmem:[#allocation8 + $0x2598] sm:$0xff]  ;;  %v7744_v53 = vpack.c.bf16 %v3183_v39, %v3172_v38  ;;  %v3610_v38 = vld [vmem:[#allocation8 + $0x2808] sm:$0xff]  ;;  %v3621_v39 = vld [vmem:[#allocation8 + $0x2860] sm:$0xff] }
 0x481   :  { %v7554_v61 = vpack.c.bf16 %v3532_v47, %v3521_v46  ;;  %v7568_v47 = vpack.c.bf16 %v3621_v39, %v3610_v38  ;;  %v3653_v17 = vld [vmem:[#allocation8 + $0x2960] sm:$0xff]  ;;  %v3698_v38 = vld [vmem:[#allocation8 + $0x2ac8] sm:$0xff] }
 0x482   :  { %7539 = vmatpush1.bf16.msra.mxu1 %v7538_v54  ;;  %v3555_v54 = vld [vmem:[#allocation8 + $0x2650] sm:$0xff]  ;;  %v3709_v39 = vld [vmem:[#allocation8 + $0x2b20] sm:$0xff] }
 0x483   :  { %7731 = vmatpush1.bf16.msra.mxu0 %v7730_v13  ;;  %7541 = vmatprep.subr.bf16.mxu1 %v7540_v59  ;;  %v3194_v59 = vld [vmem:[#allocation8 + $0x1b08] sm:$0xff] }
 0x484   :  { %7733 = vmatprep.subr.bf16.mxu0 %v7732_v63  ;;  %v7556_v63 = vpack.c.bf16 %v3555_v54, %v3544_v14  ;;  %v7748_v26 = vpack.c.bf16 %v3205_v60, %v3194_v59  ;;  %v3270_v14 = vld [vmem:[#allocation8 + $0x1d68] sm:$0xff]  ;;  %v3632_v54 = vld [vmem:[#allocation8 + $0x28b8] sm:$0xff]  ;;  %v3293_v60 = vld [vmem:[#allocation8 + $0x1e20] sm:$0xff] }
 0x485   :  { %v3282_v59 = vld [vmem:[#allocation8 + $0x1dc8] sm:$0xff] }
 0x486   :  { %7543 = vmatpush1.bf16.msra.mxu1 %v7542_v7  ;;  %v3566_v7 = vld [vmem:[#allocation8 + $0x26a8] sm:$0xff] }
 0x487   :  { %7735 = vmatpush1.bf16.msra.mxu0 %v7734_v9  ;;  %7545 = vmatprep.subr.bf16.mxu1 %v7544_v21  ;;  %v3577_v9 = vld [vmem:[#allocation8 + $0x2700] sm:$0xff]  ;;  %v3216_v21 = vld [vmem:[#allocation8 + $0x1bb8] sm:$0xff] }
 0x488   :  { %7737 = vmatprep.subr.bf16.mxu0 %v7736_v16  ;;  %v4083_v32 = vpop.f32.mrb[18].mxu1  ;;  %v7560_v16 = vpack.c.bf16 %v3577_v9, %v3566_v7  ;;  %v7752_v24 = vpack.c.bf16 %v3227_v10, %v3216_v21  ;;  %v3654_v7 = vld [vmem:[#allocation8 + $0x2968] sm:$0xff]  ;;  %v3665_v9 = vld [vmem:[#allocation8 + $0x29c0] sm:$0xff]  ;;  %v3304_v21 = vld [vmem:[#allocation8 + $0x1e78] sm:$0xff] }
 0x489   :  { %5667 = vst [vmem:[%s8923_s5 + $0xb0] sm:$0xff] %v4083_v32  ;;  %v4085_v37 = vpop.f32.mrb[19].mxu1  ;;  %v3315_v10 = vld [vmem:[#allocation8 + $0x1ed0] sm:$0xff] }
 0x48a   :  { %7547 = vmatpush1.bf16.msra.mxu1 %v7546_v52  ;;  %5668 = vst [vmem:[%s8923_s5 + $0xb8] sm:$0xff] %v4085_v37  ;;  %v3588_v52 = vld [vmem:[#allocation8 + $0x2758] sm:$0xff] }
 0x48b   :  { %7739 = vmatpush1.bf16.msra.mxu0 %v7738_v27  ;;  %7549 = vmatprep.subr.bf16.mxu1 %v7548_v28  ;;  %v3599_v27 = vld [vmem:[#allocation8 + $0x27b0] sm:$0xff]  ;;  %v3238_v28 = vld [vmem:[#allocation8 + $0x1c68] sm:$0xff]  ;;  %v3248_v37 = vld [vmem:[#allocation8 + $0x1cb8] sm:$0xff] }
 0x48c   :  { %7741 = vmatprep.subr.bf16.mxu0 %v7740_v33  ;;  %v4089_v50 = vpop.f32.mrb[20].mxu1  ;;  %v7564_v32 = vpack.c.bf16 %v3599_v27, %v3588_v52  ;;  %v3587_v33 = vld [vmem:[#allocation8 + $0x2750] sm:$0xff]  ;;  %v7756_v4 = vpack.c.bf16 %v3249_v29, %v3238_v28  ;;  %v7758_v46 = vpack.c.bf16 %v3248_v37, %v3237_v36  ;;  %v3676_v52 = vld [vmem:[#allocation8 + $0x2a18] sm:$0xff]  ;;  %v3326_v28 = vld [vmem:[#allocation8 + $0x1f28] sm:$0xff] }
 0x48d   :  { %5678 = vst [vmem:[%s8923_s5 + $0x108] sm:$0xf] %v4089_v50  ;;  %v4091_v13 = vpop.f32.mrb[21].mxu1  ;;  %v3620_v50 = vld [vmem:[#allocation8 + $0x2858] sm:$0xff]  ;;  %v3687_v27 = vld [vmem:[#allocation8 + $0x2a70] sm:$0xff]  ;;  %v3337_v29 = vld [vmem:[#allocation8 + $0x1f80] sm:$0xff] }
 0x48e   :  { %7551 = vmatpush1.bf16.msra.mxu1 %v7550_v42  ;;  %5679 = vst [vmem:[%s8923_s5 + $0x110] sm:$0xf] %v4091_v13  ;;  %v3260_v42 = vld [vmem:[#allocation8 + $0x1d18] sm:$0xff]  ;;  %v3643_v13 = vld [vmem:[#allocation8 + $0x2910] sm:$0xff]  ;;  %v3325_v36 = vld [vmem:[#allocation8 + $0x1f20] sm:$0xff] }
 0x48f   :  { %7743 = vmatpush1.bf16.msra.mxu0 %v7742_v43  ;;  %7553 = vmatprep.subr.bf16.mxu1 %v7552_v45  ;;  %v3271_v43 = vld [vmem:[#allocation8 + $0x1d70] sm:$0xff]  ;;  %v7566_v45 = vpack.c.bf16 %v3598_v34, %v3587_v33  ;;  %v3686_v34 = vld [vmem:[#allocation8 + $0x2a68] sm:$0xff]  ;;  %v3336_v37 = vld [vmem:[#allocation8 + $0x1f78] sm:$0xff] }
 0x490   :  { %7745 = vmatprep.subr.bf16.mxu0 %v7744_v53  ;;  %v3259_v53 = vld [vmem:[#allocation8 + $0x1d10] sm:$0xff]  ;;  %v7760_v40 = vpack.c.bf16 %v3271_v43, %v3260_v42  ;;  %v3348_v42 = vld [vmem:[#allocation8 + $0x1fd8] sm:$0xff] }
 0x491   :  { %v3675_v33 = vld [vmem:[#allocation8 + $0x2a10] sm:$0xff] }
 0x492   :  { %7555 = vmatpush1.bf16.msra.mxu1 %v7554_v61  ;;  %v7570_v61 = vpack.c.bf16 %v3620_v50, %v3609_v49  ;;  %v3359_v43 = vld [vmem:[#allocation8 + $0x2030] sm:$0xff]  ;;  %v3697_v49 = vld [vmem:[#allocation8 + $0x2ac0] sm:$0xff]  ;;  %v3708_v50 = vld [vmem:[#allocation8 + $0x2b18] sm:$0xff] }
 0x493   :  { %7747 = vmatpush1.bf16.msra.mxu0 %v7746_v62  ;;  %7557 = vmatprep.subr.bf16.mxu1 %v7556_v63  ;;  %v7762_v62 = vpack.c.bf16 %v3270_v14, %v3259_v53  ;;  %v7572_v63 = vpack.c.bf16 %v3643_v13, %v3632_v54  ;;  %v3347_v53 = vld [vmem:[#allocation8 + $0x1fd0] sm:$0xff]  ;;  %v3358_v14 = vld [vmem:[#allocation8 + $0x2028] sm:$0xff]  ;;  %v3720_v54 = vld [vmem:[#allocation8 + $0x2b78] sm:$0xff] }
 0x494   :  { %7749 = vmatprep.subr.bf16.mxu0 %v7748_v26  ;;  %v7764_v26 = vpack.c.bf16 %v3293_v60, %v3282_v59  ;;  %v3731_v13 = vld [vmem:[#allocation8 + $0x2bd0] sm:$0xff]  ;;  %v3370_v59 = vld [vmem:[#allocation8 + $0x2088] sm:$0xff]  ;;  %v3381_v60 = vld [vmem:[#allocation8 + $0x20e0] sm:$0xff] }
 0x496   :  { %7559 = vmatpush1.bf16.msra.mxu1 %v7558_v11  ;;  %v7574_v11 = vpack.c.bf16 %v3642_v55, %v3631_v1  ;;  %v3719_v1 = vld [vmem:[#allocation8 + $0x2b70] sm:$0xff]  ;;  %v3730_v55 = vld [vmem:[#allocation8 + $0x2bc8] sm:$0xff] }
 0x497   :  { %7751 = vmatpush1.bf16.msra.mxu0 %v7750_v0  ;;  %7561 = vmatprep.subr.bf16.mxu1 %v7560_v16  ;;  %v7766_v0 = vpack.c.bf16 %v3292_v6, %v3281_v3  ;;  %v7576_v16 = vpack.c.bf16 %v3665_v9, %v3654_v7  ;;  %v3369_v3 = vld [vmem:[#allocation8 + $0x2080] sm:$0xff]  ;;  %v3380_v6 = vld [vmem:[#allocation8 + $0x20d8] sm:$0xff]  ;;  %v2338_v7 = vld [vmem:[#allocation8 + $0x48] sm:$0xff] }
 0x498   :  { %7753 = vmatprep.subr.bf16.mxu0 %v7752_v24  ;;  %v7768_v24 = vpack.c.bf16 %v3315_v10, %v3304_v21  ;;  %v2349_v9 = vld [vmem:[#allocation8 + $0xa0] sm:$0xff]  ;;  %v3392_v21 = vld [vmem:[#allocation8 + $0x2138] sm:$0xff]  ;;  %v3403_v10 = vld [vmem:[#allocation8 + $0x2190] sm:$0xff] }
 0x49a   :  { %7563 = vmatpush1.bf16.msra.mxu1 %v7562_v48  ;;  %v7578_v48 = vpack.c.bf16 %v3664_v18, %v3653_v17  ;;  %v7784_v17 = vpack.c.bf16 %v3403_v10, %v3392_v21  ;;  %v3391_v18 = vld [vmem:[#allocation8 + $0x2130] sm:$0xff]  ;;  %v2426_v21 = vld [vmem:[#allocation8 + $0x308] sm:$0xff]  ;;  %v2437_v10 = vld [vmem:[#allocation8 + $0x360] sm:$0xff] }
 0x49b   :  { %7755 = vmatpush1.bf16.msra.mxu0 %v7754_v31  ;;  %7565 = vmatprep.subr.bf16.mxu1 %v7564_v32  ;;  %v7770_v31 = vpack.c.bf16 %v3314_v25, %v3303_v22  ;;  %v7580_v32 = vpack.c.bf16 %v3687_v27, %v3676_v52  ;;  %v3402_v22 = vld [vmem:[#allocation8 + $0x2188] sm:$0xff]  ;;  %v2348_v25 = vld [vmem:[#allocation8 + $0x98] sm:$0xff]  ;;  %v3425_v27 = vld [vmem:[#allocation8 + $0x2240] sm:$0xff] }
 0x49c   :  { %7757 = vmatprep.subr.bf16.mxu0 %v7756_v4  ;;  %v7772_v4 = vpack.c.bf16 %v3337_v29, %v3326_v28  ;;  %v3414_v52 = vld [vmem:[#allocation8 + $0x21e8] sm:$0xff]  ;;  %v2360_v28 = vld [vmem:[#allocation8 + $0xf8] sm:$0xff]  ;;  %v2371_v29 = vld [vmem:[#allocation8 + $0x150] sm:$0xff] }
 0x49e   :  { %7567 = vmatpush1.bf16.msra.mxu1 %v7566_v45  ;;  %v7582_v45 = vpack.c.bf16 %v3686_v34, %v3675_v33  ;;  %v3413_v33 = vld [vmem:[#allocation8 + $0x21e0] sm:$0xff]  ;;  %v3424_v34 = vld [vmem:[#allocation8 + $0x2238] sm:$0xff] }
 0x49f   :  { %7759 = vmatpush1.bf16.msra.mxu0 %v7758_v46  ;;  %7569 = vmatprep.subr.bf16.mxu1 %v7568_v47  ;;  %v7774_v46 = vpack.c.bf16 %v3336_v37, %v3325_v36  ;;  %v7584_v47 = vpack.c.bf16 %v3709_v39, %v3698_v38  ;;  %v2359_v36 = vld [vmem:[#allocation8 + $0xf0] sm:$0xff]  ;;  %v2370_v37 = vld [vmem:[#allocation8 + $0x148] sm:$0xff]  ;;  %v3436_v38 = vld [vmem:[#allocation8 + $0x2298] sm:$0xff] }
 0x4a0   :  { %7761 = vmatprep.subr.bf16.mxu0 %v7760_v40  ;;  %v7776_v40 = vpack.c.bf16 %v3359_v43, %v3348_v42  ;;  %v3447_v39 = vld [vmem:[#allocation8 + $0x22f0] sm:$0xff]  ;;  %v2382_v42 = vld [vmem:[#allocation8 + $0x1a8] sm:$0xff]  ;;  %v2393_v43 = vld [vmem:[#allocation8 + $0x200] sm:$0xff] }
 0x4a2   :  { %7571 = vmatpush1.bf16.msra.mxu1 %v7570_v61  ;;  %v7586_v61 = vpack.c.bf16 %v3708_v50, %v3697_v49  ;;  %v3435_v49 = vld [vmem:[#allocation8 + $0x2290] sm:$0xff]  ;;  %v3446_v50 = vld [vmem:[#allocation8 + $0x22e8] sm:$0xff] }
 0x4a3   :  { %7763 = vmatpush1.bf16.msra.mxu0 %v7762_v62  ;;  %7573 = vmatprep.subr.bf16.mxu1 %v7572_v63  ;;  %v7778_v62 = vpack.c.bf16 %v3358_v14, %v3347_v53  ;;  %v7588_v63 = vpack.c.bf16 %v3731_v13, %v3720_v54  ;;  %v2381_v53 = vld [vmem:[#allocation8 + $0x1a0] sm:$0xff]  ;;  %v2392_v14 = vld [vmem:[#allocation8 + $0x1f8] sm:$0xff]  ;;  %v3458_v54 = vld [vmem:[#allocation8 + $0x2348] sm:$0xff] }
 0x4a4   :  { %7765 = vmatprep.subr.bf16.mxu0 %v7764_v26  ;;  %v7780_v26 = vpack.c.bf16 %v3381_v60, %v3370_v59  ;;  %v3469_v13 = vld [vmem:[#allocation8 + $0x23a0] sm:$0xff]  ;;  %v2404_v59 = vld [vmem:[#allocation8 + $0x258] sm:$0xff]  ;;  %v2415_v60 = vld [vmem:[#allocation8 + $0x2b0] sm:$0xff] }
 0x4a6   :  { %7575 = vmatpush1.bf16.msra.mxu1 %v7574_v11  ;;  %v7590_v11 = vpack.c.bf16 %v3730_v55, %v3719_v1  ;;  %v3457_v1 = vld [vmem:[#allocation8 + $0x2340] sm:$0xff]  ;;  %v3468_v55 = vld [vmem:[#allocation8 + $0x2398] sm:$0xff] }
 0x4a7   :  { %7767 = vmatpush1.bf16.msra.mxu0 %v7766_v0  ;;  %7577 = vmatprep.subr.bf16.mxu1 %v7576_v16  ;;  %v7782_v0 = vpack.c.bf16 %v3380_v6, %v3369_v3  ;;  %v7848_v16 = vpack.c.bf16 %v2349_v9, %v2338_v7  ;;  %v2403_v3 = vld [vmem:[#allocation8 + $0x250] sm:$0xff]  ;;  %v2414_v6 = vld [vmem:[#allocation8 + $0x2a8] sm:$0xff]  ;;  %v3480_v7 = vld [vmem:[#allocation8 + $0x23f8] sm:$0xff] }
 0x4a8   :  { %7769 = vmatprep.subr.bf16.mxu0 %v7768_v24  ;;  %v2337_v24 = vld [vmem:[#allocation8 + $0x40] sm:$0xff]  ;;  %v3491_v9 = vld [vmem:[#allocation8 + $0x2450] sm:$0xff] }
 0x4aa   :  { %7579 = vmatpush1.bf16.msra.mxu1 %v7578_v48  ;;  %v7786_v48 = vpack.c.bf16 %v3402_v22, %v3391_v18  ;;  %v3490_v18 = vld [vmem:[#allocation8 + $0x2448] sm:$0xff]  ;;  %v2425_v22 = vld [vmem:[#allocation8 + $0x300] sm:$0xff] }
 0x4ab   :  { %7771 = vmatpush1.bf16.msra.mxu0 %v7770_v31  ;;  %7581 = vmatprep.subr.bf16.mxu1 %v7580_v32  ;;  %v7850_v31 = vpack.c.bf16 %v2348_v25, %v2337_v24  ;;  %v7788_v32 = vpack.c.bf16 %v3425_v27, %v3414_v52  ;;  %v7864_v24 = vpack.c.bf16 %v2437_v10, %v2426_v21  ;;  %v2436_v25 = vld [vmem:[#allocation8 + $0x358] sm:$0xff]  ;;  %v3502_v52 = vld [vmem:[#allocation8 + $0x24a8] sm:$0xff]  ;;  %v3513_v27 = vld [vmem:[#allocation8 + $0x2500] sm:$0xff] }
 0x4ac   :  { %7773 = vmatprep.subr.bf16.mxu0 %v7772_v4  ;;  %v7852_v4 = vpack.c.bf16 %v2371_v29, %v2360_v28  ;;  %v2448_v28 = vld [vmem:[#allocation8 + $0x3b8] sm:$0xff]  ;;  %v2459_v29 = vld [vmem:[#allocation8 + $0x410] sm:$0xff]  ;;  %v2502_v10 = vld [vmem:[#allocation8 + $0x568] sm:$0xff] }
 0x4ae   :  { %7583 = vmatpush1.bf16.msra.mxu1 %v7582_v45  ;;  %v7790_v45 = vpack.c.bf16 %v3424_v34, %v3413_v33  ;;  %v3501_v33 = vld [vmem:[#allocation8 + $0x24a0] sm:$0xff]  ;;  %v3512_v34 = vld [vmem:[#allocation8 + $0x24f8] sm:$0xff] }
 0x4af   :  { %7775 = vmatpush1.bf16.msra.mxu0 %v7774_v46  ;;  %7585 = vmatprep.subr.bf16.mxu1 %v7584_v47  ;;  %v7854_v46 = vpack.c.bf16 %v2370_v37, %v2359_v36  ;;  %v7792_v47 = vpack.c.bf16 %v3447_v39, %v3436_v38  ;;  %v2447_v36 = vld [vmem:[#allocation8 + $0x3b0] sm:$0xff]  ;;  %v7868_v37 = vpack.c.bf16 %v2459_v29, %v2448_v28  ;;  %v2458_v38 = vld [vmem:[#allocation8 + $0x408] sm:$0xff]  ;;  %v3524_v39 = vld [vmem:[#allocation8 + $0x2558] sm:$0xff] }
 0x4b0   :  { %7777 = vmatprep.subr.bf16.mxu0 %v7776_v40  ;;  %v7856_v40 = vpack.c.bf16 %v2393_v43, %v2382_v42  ;;  %v3535_v42 = vld [vmem:[#allocation8 + $0x25b0] sm:$0xff]  ;;  %v2524_v29 = vld [vmem:[#allocation8 + $0x618] sm:$0xff] }
 0x4b2   :  { %7587 = vmatpush1.bf16.msra.mxu1 %v7586_v61  ;;  %v7794_v61 = vpack.c.bf16 %v3446_v50, %v3435_v49  ;;  %v7870_v49 = vpack.c.bf16 %v2458_v38, %v2447_v36  ;;  %v7808_v50 = vpack.c.bf16 %v3535_v42, %v3524_v39  ;;  %v3600_v38 = vld [vmem:[#allocation8 + $0x27b8] sm:$0xff]  ;;  %v2535_v39 = vld [vmem:[#allocation8 + $0x670] sm:$0xff] }
 0x4b3   :  { %7779 = vmatpush1.bf16.msra.mxu0 %v7778_v62  ;;  %7589 = vmatprep.subr.bf16.mxu1 %v7588_v63  ;;  %v7858_v62 = vpack.c.bf16 %v2392_v14, %v2381_v53  ;;  %v7796_v63 = vpack.c.bf16 %v3469_v13, %v3458_v54  ;;  %v3523_v53 = vld [vmem:[#allocation8 + $0x2550] sm:$0xff]  ;;  %v2469_v14 = vld [vmem:[#allocation8 + $0x460] sm:$0xff] }
 0x4b4   :  { %7781 = vmatprep.subr.bf16.mxu0 %v7780_v26  ;;  %v7860_v26 = vpack.c.bf16 %v2415_v60, %v2404_v59  ;;  %v2480_v59 = vld [vmem:[#allocation8 + $0x4b8] sm:$0xff]  ;;  %v3546_v60 = vld [vmem:[#allocation8 + $0x2608] sm:$0xff] }
 0x4b6   :  { %7591 = vmatpush1.bf16.msra.mxu1 %v7590_v11  ;;  %v7798_v11 = vpack.c.bf16 %v3468_v55, %v3457_v1  ;;  %v2503_v1 = vld [vmem:[#allocation8 + $0x570] sm:$0xff] }
 0x4b7   :  { %7783 = vmatpush1.bf16.msra.mxu0 %v7782_v0  ;;  %7849 = vmatprep.subr.bf16.mxu1 %v7848_v16  ;;  %v7862_v0 = vpack.c.bf16 %v2414_v6, %v2403_v3  ;;  %v7800_v16 = vpack.c.bf16 %v3491_v9, %v3480_v7  ;;  %v7874_v3 = vpack.c.bf16 %v2480_v59, %v2469_v14  ;;  %v3545_v6 = vld [vmem:[#allocation8 + $0x2600] sm:$0xff]  ;;  %v3556_v7 = vld [vmem:[#allocation8 + $0x2658] sm:$0xff]  ;;  %v2491_v9 = vld [vmem:[#allocation8 + $0x510] sm:$0xff] }
 0x4b8   :  { %7785 = vmatprep.subr.bf16.mxu0 %v7784_v17  ;;  %v3479_v17 = vld [vmem:[#allocation8 + $0x23f0] sm:$0xff] }
 0x4b9   :  { %4698 = vmatmul.mubr.f32.vlgmr.msra.gmra.mrb[22].mxu1 %v8764_v19  ;;  %v3611_v14 = vld [vmem:[#allocation8 + $0x2810] sm:$0xff] }
 0x4ba   :  { %4929 = vmatmul.mubr.f32.vlgmr.msra.gmra.mrb[22].mxu0 %v8735_v58  ;;  %4703 = vmatprep.mubr.f32.mxu1 %v8738_v12 }
 0x4bb   :  { %4934 = vmatprep.mubr.f32.mxu0 %v8688_v8  ;;  %7787 = vmatpush1.bf16.msra.mxu0 %v7786_v48  ;;  %v7802_v48 = vpack.c.bf16 %v3490_v18, %v3479_v17  ;;  %v2525_v17 = vld [vmem:[#allocation8 + $0x620] sm:$0xff]  ;;  %v7814_v18 = vpack.c.bf16 %v3556_v7, %v3545_v6  ;;  %v3644_v7 = vld [vmem:[#allocation8 + $0x2918] sm:$0xff] }
 0x4bc   :  { %7851 = vmatpush1.bf16.msra.mxu1 %v7850_v31  ;;  %7789 = vmatprep.subr.bf16.mxu0 %v7788_v32  ;;  %v7866_v31 = vpack.c.bf16 %v2436_v25, %v2425_v22  ;;  %v7804_v32 = vpack.c.bf16 %v3513_v27, %v3502_v52  ;;  %v7878_v22 = vpack.c.bf16 %v2502_v10, %v2491_v9  ;;  %v3567_v25 = vld [vmem:[#allocation8 + $0x26b0] sm:$0xff]  ;;  %v3578_v52 = vld [vmem:[#allocation8 + $0x2708] sm:$0xff]  ;;  %v2513_v27 = vld [vmem:[#allocation8 + $0x5c0] sm:$0xff] }
 0x4bd   :  { %4704 = vmatmul.mubr.f32.gmra.mrb[24].mxu1 %v8760_v5  ;;  %7853 = vmatprep.subr.bf16.mxu1 %v7852_v4  ;;  %v7882_v36 = vpack.c.bf16 %v2524_v29, %v2513_v27  ;;  %v3633_v6 = vld [vmem:[#allocation8 + $0x28c0] sm:$0xff]  ;;  %v2579_v9 = vld [vmem:[#allocation8 + $0x7d0] sm:$0xff]  ;;  %v2590_v10 = vld [vmem:[#allocation8 + $0x828] sm:$0xff] }
 0x4be   :  { %4935 = vmatmul.mubr.f32.gmra.mrb[24].mxu0 %v8730_v44  ;;  %5082 = vmatprep.mubr.f32.mxu1 %v8636_v57  ;;  %v2601_v27 = vld [vmem:[#allocation8 + $0x880] sm:$0xff]  ;;  %v2612_v29 = vld [vmem:[#allocation8 + $0x8d8] sm:$0xff] }
 0x4bf   :  { %7791 = vmatpush1.bf16.msra.mxu0 %v7790_v45  ;;  %5005 = vmatprep.mubr.f32.mxu0 %v8746_v30  ;;  %v2470_v45 = vld [vmem:[#allocation8 + $0x468] sm:$0xff] }
 0x4c0   :  { %7855 = vmatpush1.bf16.msra.mxu1 %v7854_v46  ;;  %7793 = vmatprep.subr.bf16.mxu0 %v7792_v47  ;;  %v2481_v46 = vld [vmem:[#allocation8 + $0x4c0] sm:$0xff]  ;;  %v7806_v47 = vpack.c.bf16 %v3512_v34, %v3501_v33  ;;  %v2547_v33 = vld [vmem:[#allocation8 + $0x6d0] sm:$0xff]  ;;  %v7818_v34 = vpack.c.bf16 %v3578_v52, %v3567_v25  ;;  %v3666_v52 = vld [vmem:[#allocation8 + $0x29c8] sm:$0xff] }
 0x4c1   :  { %7857 = vmatprep.subr.bf16.mxu1 %v7856_v40  ;;  %v3534_v40 = vld [vmem:[#allocation8 + $0x25a8] sm:$0xff]  ;;  %v7872_v13 = vpack.c.bf16 %v2481_v46, %v2470_v45  ;;  %v3612_v45 = vld [vmem:[#allocation8 + $0x2818] sm:$0xff]  ;;  %v3623_v46 = vld [vmem:[#allocation8 + $0x2870] sm:$0xff] }
 0x4c2   :  { %v7810_v55 = vpack.c.bf16 %v3534_v40, %v3523_v53  ;;  %v7824_v40 = vpack.c.bf16 %v3623_v46, %v3612_v45  ;;  %v3655_v25 = vld [vmem:[#allocation8 + $0x2970] sm:$0xff]  ;;  %v3700_v45 = vld [vmem:[#allocation8 + $0x2ad8] sm:$0xff] }
 0x4c3   :  { %7795 = vmatpush1.bf16.msra.mxu0 %v7794_v61  ;;  %v3557_v61 = vld [vmem:[#allocation8 + $0x2660] sm:$0xff]  ;;  %v3711_v46 = vld [vmem:[#allocation8 + $0x2b30] sm:$0xff] }
 0x4c4   :  { %7859 = vmatpush1.bf16.msra.mxu1 %v7858_v62  ;;  %7797 = vmatprep.subr.bf16.mxu0 %v7796_v63  ;;  %v2492_v63 = vld [vmem:[#allocation8 + $0x518] sm:$0xff] }
 0x4c5   :  { %7861 = vmatprep.subr.bf16.mxu1 %v7860_v26  ;;  %v7812_v26 = vpack.c.bf16 %v3557_v61, %v3546_v60  ;;  %v7876_v21 = vpack.c.bf16 %v2503_v1, %v2492_v63  ;;  %v2568_v60 = vld [vmem:[#allocation8 + $0x778] sm:$0xff]  ;;  %v3634_v61 = vld [vmem:[#allocation8 + $0x28c8] sm:$0xff]  ;;  %v2591_v1 = vld [vmem:[#allocation8 + $0x830] sm:$0xff] }
 0x4c6   :  { %v2580_v63 = vld [vmem:[#allocation8 + $0x7d8] sm:$0xff] }
 0x4c7   :  { %7799 = vmatpush1.bf16.msra.mxu0 %v7798_v11  ;;  %v3568_v11 = vld [vmem:[#allocation8 + $0x26b8] sm:$0xff] }
 0x4c8   :  { %7863 = vmatpush1.bf16.msra.mxu1 %v7862_v0  ;;  %7801 = vmatprep.subr.bf16.mxu0 %v7800_v16  ;;  %v3579_v0 = vld [vmem:[#allocation8 + $0x2710] sm:$0xff]  ;;  %v2514_v16 = vld [vmem:[#allocation8 + $0x5c8] sm:$0xff] }
 0x4c9   :  { %7865 = vmatprep.subr.bf16.mxu1 %v7864_v24  ;;  %v4391_v4 = vpop.f32.mrb[18].mxu0  ;;  %v7816_v24 = vpack.c.bf16 %v3579_v0, %v3568_v11  ;;  %v7880_v28 = vpack.c.bf16 %v2525_v17, %v2514_v16  ;;  %v3656_v11 = vld [vmem:[#allocation8 + $0x2978] sm:$0xff]  ;;  %v3667_v0 = vld [vmem:[#allocation8 + $0x29d0] sm:$0xff]  ;;  %v2602_v16 = vld [vmem:[#allocation8 + $0x888] sm:$0xff] }
 0x4ca   :  { %5669 = vst [vmem:[%s8923_s5 + $0xc0] sm:$0xff] %v4391_v4  ;;  %v4393_v43 = vpop.f32.mrb[19].mxu0  ;;  %v2613_v17 = vld [vmem:[#allocation8 + $0x8e0] sm:$0xff] }
 0x4cb   :  { %7803 = vmatpush1.bf16.msra.mxu0 %v7802_v48  ;;  %5670 = vst [vmem:[%s8923_s5 + $0xc8] sm:$0xff] %v4393_v43  ;;  %v3590_v48 = vld [vmem:[#allocation8 + $0x2768] sm:$0xff] }
 0x4cc   :  { %7867 = vmatpush1.bf16.msra.mxu1 %v7866_v31  ;;  %7805 = vmatprep.subr.bf16.mxu0 %v7804_v32  ;;  %v3601_v31 = vld [vmem:[#allocation8 + $0x27c0] sm:$0xff]  ;;  %v2536_v32 = vld [vmem:[#allocation8 + $0x678] sm:$0xff]  ;;  %v2546_v43 = vld [vmem:[#allocation8 + $0x6c8] sm:$0xff] }
 0x4cd   :  { %7869 = vmatprep.subr.bf16.mxu1 %v7868_v37  ;;  %v4397_v54 = vpop.f32.mrb[20].mxu0  ;;  %v7820_v4 = vpack.c.bf16 %v3601_v31, %v3590_v48  ;;  %v3589_v37 = vld [vmem:[#allocation8 + $0x2760] sm:$0xff]  ;;  %v7884_v42 = vpack.c.bf16 %v2547_v33, %v2536_v32  ;;  %v7886_v53 = vpack.c.bf16 %v2546_v43, %v2535_v39  ;;  %v3678_v48 = vld [vmem:[#allocation8 + $0x2a28] sm:$0xff]  ;;  %v2624_v32 = vld [vmem:[#allocation8 + $0x938] sm:$0xff] }
 0x4ce   :  { %5680 = vst [vmem:[%s8923_s5 + $0x118] sm:$0xf] %v4397_v54  ;;  %v4399_v62 = vpop.f32.mrb[21].mxu0  ;;  %v3622_v54 = vld [vmem:[#allocation8 + $0x2868] sm:$0xff]  ;;  %v3689_v31 = vld [vmem:[#allocation8 + $0x2a80] sm:$0xff]  ;;  %v2635_v33 = vld [vmem:[#allocation8 + $0x990] sm:$0xff] }
 0x4cf   :  { %7807 = vmatpush1.bf16.msra.mxu0 %v7806_v47  ;;  %5681 = vst [vmem:[%s8923_s5 + $0x120] sm:$0xf] %v4399_v62  ;;  %v2558_v47 = vld [vmem:[#allocation8 + $0x728] sm:$0xff]  ;;  %v3645_v62 = vld [vmem:[#allocation8 + $0x2920] sm:$0xff]  ;;  %v2623_v39 = vld [vmem:[#allocation8 + $0x930] sm:$0xff] }
 0x4d0   :  { %7871 = vmatpush1.bf16.msra.mxu1 %v7870_v49  ;;  %7809 = vmatprep.subr.bf16.mxu0 %v7808_v50  ;;  %v2569_v49 = vld [vmem:[#allocation8 + $0x780] sm:$0xff]  ;;  %v7822_v50 = vpack.c.bf16 %v3600_v38, %v3589_v37  ;;  %v3688_v38 = vld [vmem:[#allocation8 + $0x2a78] sm:$0xff]  ;;  %v2634_v43 = vld [vmem:[#allocation8 + $0x988] sm:$0xff] }
 0x4d1   :  { %7873 = vmatprep.subr.bf16.mxu1 %v7872_v13  ;;  %v2557_v13 = vld [vmem:[#allocation8 + $0x720] sm:$0xff]  ;;  %v7888_v59 = vpack.c.bf16 %v2569_v49, %v2558_v47  ;;  %v2646_v47 = vld [vmem:[#allocation8 + $0x9e8] sm:$0xff] }
 0x4d2   :  { %v3677_v37 = vld [vmem:[#allocation8 + $0x2a20] sm:$0xff] }
 0x4d3   :  { %7811 = vmatpush1.bf16.msra.mxu0 %v7810_v55  ;;  %v7826_v55 = vpack.c.bf16 %v3622_v54, %v3611_v14  ;;  %v2657_v49 = vld [vmem:[#allocation8 + $0xa40] sm:$0xff]  ;;  %v3699_v14 = vld [vmem:[#allocation8 + $0x2ad0] sm:$0xff]  ;;  %v3710_v54 = vld [vmem:[#allocation8 + $0x2b28] sm:$0xff] }
 0x4d4   :  { %7875 = vmatpush1.bf16.msra.mxu1 %v7874_v3  ;;  %7813 = vmatprep.subr.bf16.mxu0 %v7812_v26  ;;  %v7890_v3 = vpack.c.bf16 %v2568_v60, %v2557_v13  ;;  %v7828_v26 = vpack.c.bf16 %v3645_v62, %v3634_v61  ;;  %v2645_v13 = vld [vmem:[#allocation8 + $0x9e0] sm:$0xff]  ;;  %v2656_v60 = vld [vmem:[#allocation8 + $0xa38] sm:$0xff]  ;;  %v3722_v61 = vld [vmem:[#allocation8 + $0x2b88] sm:$0xff] }
 0x4d5   :  { %7877 = vmatprep.subr.bf16.mxu1 %v7876_v21  ;;  %v7892_v21 = vpack.c.bf16 %v2591_v1, %v2580_v63  ;;  %v3733_v62 = vld [vmem:[#allocation8 + $0x2be0] sm:$0xff]  ;;  %v2668_v63 = vld [vmem:[#allocation8 + $0xa98] sm:$0xff]  ;;  %v2679_v1 = vld [vmem:[#allocation8 + $0xaf0] sm:$0xff] }
 0x4d7   :  { %7815 = vmatpush1.bf16.msra.mxu0 %v7814_v18  ;;  %v7830_v18 = vpack.c.bf16 %v3644_v7, %v3633_v6  ;;  %v3721_v6 = vld [vmem:[#allocation8 + $0x2b80] sm:$0xff]  ;;  %v3732_v7 = vld [vmem:[#allocation8 + $0x2bd8] sm:$0xff] }
 0x4d8   :  { %7879 = vmatpush1.bf16.msra.mxu1 %v7878_v22  ;;  %7817 = vmatprep.subr.bf16.mxu0 %v7816_v24  ;;  %v7894_v22 = vpack.c.bf16 %v2590_v10, %v2579_v9  ;;  %v7832_v24 = vpack.c.bf16 %v3667_v0, %v3656_v11  ;;  %v2667_v9 = vld [vmem:[#allocation8 + $0xa90] sm:$0xff]  ;;  %v2678_v10 = vld [vmem:[#allocation8 + $0xae8] sm:$0xff] }
 0x4d9   :  { %7881 = vmatprep.subr.bf16.mxu1 %v7880_v28  ;;  %v7896_v28 = vpack.c.bf16 %v2613_v17, %v2602_v16  ;;  %v2515_v11 = vld [vmem:[#allocation8 + $0x5d0] sm:$0xff]  ;;  %v2526_v0 = vld [vmem:[#allocation8 + $0x628] sm:$0xff]  ;;  %v2701_v17 = vld [vmem:[#allocation8 + $0xba0] sm:$0xff] }
 0x4da   :  { %v2690_v16 = vld [vmem:[#allocation8 + $0xb48] sm:$0xff] }
 0x4db   :  { %7819 = vmatpush1.bf16.msra.mxu0 %v7818_v34  ;;  %v7834_v34 = vpack.c.bf16 %v3666_v52, %v3655_v25  ;;  %v7912_v25 = vpack.c.bf16 %v2701_v17, %v2690_v16  ;;  %v2689_v52 = vld [vmem:[#allocation8 + $0xb40] sm:$0xff]  ;;  %v2603_v16 = vld [vmem:[#allocation8 + $0x890] sm:$0xff] }
 0x4dc   :  { %7883 = vmatpush1.bf16.msra.mxu1 %v7882_v36  ;;  %7821 = vmatprep.subr.bf16.mxu0 %v7820_v4  ;;  %v7898_v36 = vpack.c.bf16 %v2612_v29, %v2601_v27  ;;  %v7836_v4 = vpack.c.bf16 %v3689_v31, %v3678_v48  ;;  %v2700_v27 = vld [vmem:[#allocation8 + $0xb98] sm:$0xff]  ;;  %v2350_v29 = vld [vmem:[#allocation8 + $0xa8] sm:$0xff]  ;;  %v2723_v31 = vld [vmem:[#allocation8 + $0xc50] sm:$0xff] }
 0x4dd   :  { %7885 = vmatprep.subr.bf16.mxu1 %v7884_v42  ;;  %v7900_v42 = vpack.c.bf16 %v2635_v33, %v2624_v32  ;;  %v2712_v48 = vld [vmem:[#allocation8 + $0xbf8] sm:$0xff]  ;;  %v2537_v32 = vld [vmem:[#allocation8 + $0x680] sm:$0xff] }
 0x4de   :  { %v2548_v33 = vld [vmem:[#allocation8 + $0x6d8] sm:$0xff] }
 0x4df   :  { %7823 = vmatpush1.bf16.msra.mxu0 %v7822_v50  ;;  %v7838_v50 = vpack.c.bf16 %v3688_v38, %v3677_v37  ;;  %v2711_v37 = vld [vmem:[#allocation8 + $0xbf0] sm:$0xff]  ;;  %v2722_v38 = vld [vmem:[#allocation8 + $0xc48] sm:$0xff] }
 0x4e0   :  { %7887 = vmatpush1.bf16.msra.mxu1 %v7886_v53  ;;  %7825 = vmatprep.subr.bf16.mxu0 %v7824_v40  ;;  %v7902_v53 = vpack.c.bf16 %v2634_v43, %v2623_v39  ;;  %v7840_v40 = vpack.c.bf16 %v3711_v46, %v3700_v45  ;;  %v2361_v39 = vld [vmem:[#allocation8 + $0x100] sm:$0xff]  ;;  %v2372_v43 = vld [vmem:[#allocation8 + $0x158] sm:$0xff]  ;;  %v2734_v45 = vld [vmem:[#allocation8 + $0xca8] sm:$0xff] }
 0x4e1   :  { %7889 = vmatprep.subr.bf16.mxu1 %v7888_v59  ;;  %v7904_v59 = vpack.c.bf16 %v2657_v49, %v2646_v47  ;;  %v2745_v46 = vld [vmem:[#allocation8 + $0xd00] sm:$0xff]  ;;  %v2559_v47 = vld [vmem:[#allocation8 + $0x730] sm:$0xff]  ;;  %v2570_v49 = vld [vmem:[#allocation8 + $0x788] sm:$0xff] }
 0x4e3   :  { %7827 = vmatpush1.bf16.msra.mxu0 %v7826_v55  ;;  %v7842_v55 = vpack.c.bf16 %v3710_v54, %v3699_v14  ;;  %v2733_v14 = vld [vmem:[#allocation8 + $0xca0] sm:$0xff]  ;;  %v2744_v54 = vld [vmem:[#allocation8 + $0xcf8] sm:$0xff] }
 0x4e4   :  { %7891 = vmatpush1.bf16.msra.mxu1 %v7890_v3  ;;  %7829 = vmatprep.subr.bf16.mxu0 %v7828_v26  ;;  %v7906_v3 = vpack.c.bf16 %v2656_v60, %v2645_v13  ;;  %v7844_v26 = vpack.c.bf16 %v3733_v62, %v3722_v61  ;;  %v2383_v13 = vld [vmem:[#allocation8 + $0x1b0] sm:$0xff]  ;;  %v2394_v60 = vld [vmem:[#allocation8 + $0x208] sm:$0xff]  ;;  %v2756_v61 = vld [vmem:[#allocation8 + $0xd58] sm:$0xff] }
 0x4e5   :  { %7893 = vmatprep.subr.bf16.mxu1 %v7892_v21  ;;  %v7908_v21 = vpack.c.bf16 %v2679_v1, %v2668_v63  ;;  %v2767_v62 = vld [vmem:[#allocation8 + $0xdb0] sm:$0xff]  ;;  %v2581_v63 = vld [vmem:[#allocation8 + $0x7e0] sm:$0xff]  ;;  %v2592_v1 = vld [vmem:[#allocation8 + $0x838] sm:$0xff] }
 0x4e7   :  { %7831 = vmatpush1.bf16.msra.mxu0 %v7830_v18  ;;  %v7846_v18 = vpack.c.bf16 %v3732_v7, %v3721_v6  ;;  %v2755_v6 = vld [vmem:[#allocation8 + $0xd50] sm:$0xff]  ;;  %v2766_v7 = vld [vmem:[#allocation8 + $0xda8] sm:$0xff] }
 0x4e8   :  { %7895 = vmatpush1.bf16.msra.mxu1 %v7894_v22  ;;  %7833 = vmatprep.subr.bf16.mxu0 %v7832_v24  ;;  %v7910_v22 = vpack.c.bf16 %v2678_v10, %v2667_v9  ;;  %v8104_v24 = vpack.c.bf16 %v2526_v0, %v2515_v11  ;;  %v2405_v9 = vld [vmem:[#allocation8 + $0x260] sm:$0xff]  ;;  %v2416_v10 = vld [vmem:[#allocation8 + $0x2b8] sm:$0xff]  ;;  %v2778_v11 = vld [vmem:[#allocation8 + $0xe08] sm:$0xff]  ;;  %v7926_v17 = vpack.c.bf16 %v2766_v7, %v2755_v6 }
 0x4e9   :  { %7897 = vmatprep.subr.bf16.mxu1 %v7896_v28  ;;  %v2339_v28 = vld [vmem:[#allocation8 + $0x50] sm:$0xff]  ;;  %v2789_v0 = vld [vmem:[#allocation8 + $0xe60] sm:$0xff]  ;;  %v2854_v6 = vld [vmem:[#allocation8 + $0x1068] sm:$0xff] }
 0x4ea   :  { %v2493_v7 = vld [vmem:[#allocation8 + $0x520] sm:$0xff] }
 0x4eb   :  { %7835 = vmatpush1.bf16.msra.mxu0 %v7834_v34  ;;  %v7914_v34 = vpack.c.bf16 %v2700_v27, %v2689_v52  ;;  %v2427_v52 = vld [vmem:[#allocation8 + $0x310] sm:$0xff] }
 0x4ec   :  { %7899 = vmatpush1.bf16.msra.mxu1 %v7898_v36  ;;  %7837 = vmatprep.subr.bf16.mxu0 %v7836_v4  ;;  %v8106_v36 = vpack.c.bf16 %v2350_v29, %v2339_v28  ;;  %v7916_v4 = vpack.c.bf16 %v2723_v31, %v2712_v48  ;;  %v2438_v28 = vld [vmem:[#allocation8 + $0x368] sm:$0xff]  ;;  %v2800_v29 = vld [vmem:[#allocation8 + $0xeb8] sm:$0xff]  ;;  %v2811_v48 = vld [vmem:[#allocation8 + $0xf10] sm:$0xff] }
 0x4ed   :  { %7901 = vmatprep.subr.bf16.mxu1 %v7900_v42  ;;  %v8108_v42 = vpack.c.bf16 %v2548_v33, %v2537_v32  ;;  %v2625_v31 = vld [vmem:[#allocation8 + $0x940] sm:$0xff]  ;;  %v2636_v32 = vld [vmem:[#allocation8 + $0x998] sm:$0xff] }
 0x4ef   :  { %7839 = vmatpush1.bf16.msra.mxu0 %v7838_v50  ;;  %v7918_v50 = vpack.c.bf16 %v2722_v38, %v2711_v37  ;;  %v2810_v37 = vld [vmem:[#allocation8 + $0xf08] sm:$0xff]  ;;  %v2449_v38 = vld [vmem:[#allocation8 + $0x3c0] sm:$0xff] }
 0x4f0   :  { %7903 = vmatpush1.bf16.msra.mxu1 %v7902_v53  ;;  %7841 = vmatprep.subr.bf16.mxu0 %v7840_v40  ;;  %v8110_v53 = vpack.c.bf16 %v2372_v43, %v2361_v39  ;;  %v7920_v40 = vpack.c.bf16 %v2745_v46, %v2734_v45  ;;  %v8124_v39 = vpack.c.bf16 %v2636_v32, %v2625_v31  ;;  %v2822_v43 = vld [vmem:[#allocation8 + $0xf68] sm:$0xff]  ;;  %v2833_v45 = vld [vmem:[#allocation8 + $0xfc0] sm:$0xff]  ;;  %v2647_v46 = vld [vmem:[#allocation8 + $0x9f0] sm:$0xff] }
 0x4f1   :  { %7905 = vmatprep.subr.bf16.mxu1 %v7904_v59  ;;  %v8112_v59 = vpack.c.bf16 %v2570_v49, %v2559_v47  ;;  %v2658_v47 = vld [vmem:[#allocation8 + $0xa48] sm:$0xff]  ;;  %v2900_v31 = vld [vmem:[#allocation8 + $0x11d8] sm:$0xff] }
 0x4f3   :  { %7843 = vmatpush1.bf16.msra.mxu0 %v7842_v55  ;;  %v7922_v55 = vpack.c.bf16 %v2744_v54, %v2733_v14  ;;  %v2832_v14 = vld [vmem:[#allocation8 + $0xfb8] sm:$0xff]  ;;  %v2471_v54 = vld [vmem:[#allocation8 + $0x470] sm:$0xff] }
 0x4f4   :  { %7907 = vmatpush1.bf16.msra.mxu1 %v7906_v3  ;;  %7845 = vmatprep.subr.bf16.mxu0 %v7844_v26  ;;  %v8114_v3 = vpack.c.bf16 %v2394_v60, %v2383_v13  ;;  %v7924_v26 = vpack.c.bf16 %v2767_v62, %v2756_v61  ;;  %v8128_v13 = vpack.c.bf16 %v2658_v47, %v2647_v46  ;;  %v2844_v60 = vld [vmem:[#allocation8 + $0x1018] sm:$0xff]  ;;  %v2855_v61 = vld [vmem:[#allocation8 + $0x1070] sm:$0xff]  ;;  %v2669_v62 = vld [vmem:[#allocation8 + $0xaa0] sm:$0xff] }
 0x4f5   :  { %7909 = vmatprep.subr.bf16.mxu1 %v7908_v21  ;;  %v8116_v21 = vpack.c.bf16 %v2592_v1, %v2581_v63  ;;  %v2680_v63 = vld [vmem:[#allocation8 + $0xaf8] sm:$0xff]  ;;  %v2922_v46 = vld [vmem:[#allocation8 + $0x1288] sm:$0xff] }
 0x4f7   :  { %7847 = vmatpush1.bf16.msra.mxu0 %v7846_v18  ;;  %v8118_v18 = vpack.c.bf16 %v2416_v10, %v2405_v9  ;;  %v8132_v9 = vpack.c.bf16 %v2680_v63, %v2669_v62  ;;  %v2866_v10 = vld [vmem:[#allocation8 + $0x10c8] sm:$0xff]  ;;  %v2944_v62 = vld [vmem:[#allocation8 + $0x1338] sm:$0xff] }
 0x4f8   :  { %7911 = vmatpush1.bf16.msra.mxu1 %v7910_v22  ;;  %8105 = vmatprep.subr.bf16.mxu0 %v8104_v24  ;;  %v7928_v22 = vpack.c.bf16 %v2789_v0, %v2778_v11  ;;  %v2777_v24 = vld [vmem:[#allocation8 + $0xe00] sm:$0xff]  ;;  %v2867_v0 = vld [vmem:[#allocation8 + $0x10d0] sm:$0xff] }
 0x4f9   :  { %7913 = vmatprep.subr.bf16.mxu1 %v7912_v25  ;;  %v2788_v25 = vld [vmem:[#allocation8 + $0xe58] sm:$0xff]  ;;  %v2877_v11 = vld [vmem:[#allocation8 + $0x1120] sm:$0xff] }
 0x4fa   :  { %5006 = vmatmul.mubr.f32.vlgmr.msra.gmra.mrb[22].mxu0 %v8764_v19  ;;  %v7930_v33 = vpack.c.bf16 %v2788_v25, %v2777_v24  ;;  %v2876_v24 = vld [vmem:[#allocation8 + $0x1118] sm:$0xff] }
 0x4fb   :  { %5083 = vmatmul.mubr.f32.vlgmr.msra.gmra.mrb[26].mxu1 %v8667_v35  ;;  %5011 = vmatprep.mubr.f32.mxu0 %v8738_v12 }
 0x4fc   :  { %5088 = vmatprep.mubr.f32.mxu1 %v8630_v15  ;;  %7915 = vmatpush1.bf16.msra.mxu1 %v7914_v34  ;;  %v8122_v34 = vpack.c.bf16 %v2438_v28, %v2427_v52  ;;  %v2691_v52 = vld [vmem:[#allocation8 + $0xb50] sm:$0xff]  ;;  %v2888_v28 = vld [vmem:[#allocation8 + $0x1178] sm:$0xff] }
 0x4fd   :  { %8107 = vmatpush3.bf16.msra.mxu0 %v8106_v36  ;;  %7917 = vmatprep.subr.bf16.mxu1 %v7916_v4  ;;  %v7932_v36 = vpack.c.bf16 %v2811_v48, %v2800_v29  ;;  %v2799_v4 = vld [vmem:[#allocation8 + $0xeb0] sm:$0xff]  ;;  %v2889_v48 = vld [vmem:[#allocation8 + $0x1180] sm:$0xff] }
 0x4fe   :  { %5012 = vmatmul.mubr.f32.gmra.mrb[24].mxu0 %v8760_v5  ;;  %8109 = vmatprep.subr.bf16.mxu0 %v8108_v42  ;;  %v2460_v42 = vld [vmem:[#allocation8 + $0x418] sm:$0xff]  ;;  %v7934_v49 = vpack.c.bf16 %v2810_v37, %v2799_v4  ;;  %v2899_v29 = vld [vmem:[#allocation8 + $0x11d0] sm:$0xff]  ;;  %v8140_v37 = vpack.c.bf16 %v2900_v31, %v2889_v48  ;;  %v2986_v31 = vld [vmem:[#allocation8 + $0x1488] sm:$0xff] }
 0x4ff   :  { %5089 = vmatmul.mubr.f32.gmra.mrb[28].mxu1 %v8663_v20  ;;  %5390 = vmatprep.mubr.f32.mxu0 %v8636_v57  ;;  %v2614_v57 = vld [vmem:[#allocation8 + $0x8e8] sm:$0xff]  ;;  %v7948_v4 = vpack.c.bf16 %v2899_v29, %v2888_v28  ;;  %v2975_v48 = vld [vmem:[#allocation8 + $0x1430] sm:$0xff] }
 0x500   :  { %7919 = vmatpush1.bf16.msra.mxu1 %v7918_v50  ;;  %5159 = vmatprep.mubr.f32.mxu1 %v8676_v56  ;;  %v8120_v27 = vpack.c.bf16 %v2614_v57, %v2603_v16  ;;  %v8126_v50 = vpack.c.bf16 %v2460_v42, %v2449_v38  ;;  %v2878_v16 = vld [vmem:[#allocation8 + $0x1128] sm:$0xff]  ;;  %v2713_v38 = vld [vmem:[#allocation8 + $0xc00] sm:$0xff] }
 0x501   :  { %8111 = vmatpush3.bf16.msra.mxu0 %v8110_v53  ;;  %7921 = vmatprep.subr.bf16.mxu1 %v7920_v40  ;;  %v7936_v53 = vpack.c.bf16 %v2833_v45, %v2822_v43  ;;  %v2821_v40 = vld [vmem:[#allocation8 + $0xf60] sm:$0xff]  ;;  %v8136_v25 = vpack.c.bf16 %v2878_v16, %v2867_v0  ;;  %v2910_v42 = vld [vmem:[#allocation8 + $0x1228] sm:$0xff]  ;;  %v2911_v45 = vld [vmem:[#allocation8 + $0x1230] sm:$0xff] }
 0x502   :  { %8113 = vmatprep.subr.bf16.mxu0 %v8112_v59  ;;  %v2482_v59 = vld [vmem:[#allocation8 + $0x4c8] sm:$0xff]  ;;  %v7938_v1 = vpack.c.bf16 %v2832_v14, %v2821_v40  ;;  %v2921_v43 = vld [vmem:[#allocation8 + $0x1280] sm:$0xff]  ;;  %v2735_v40 = vld [vmem:[#allocation8 + $0xcb0] sm:$0xff] }
 0x503   :  { %v7952_v14 = vpack.c.bf16 %v2921_v43, %v2910_v42  ;;  %v2964_v16 = vld [vmem:[#allocation8 + $0x13d8] sm:$0xff] }
 0x504   :  { %7923 = vmatpush1.bf16.msra.mxu1 %v7922_v55  ;;  %v8130_v55 = vpack.c.bf16 %v2482_v59, %v2471_v54  ;;  %v8144_v54 = vpack.c.bf16 %v2922_v46, %v2911_v45  ;;  %v2932_v59 = vld [vmem:[#allocation8 + $0x12d8] sm:$0xff]  ;;  %v2997_v45 = vld [vmem:[#allocation8 + $0x14e0] sm:$0xff] }
 0x505   :  { %8115 = vmatpush3.bf16.msra.mxu0 %v8114_v3  ;;  %7925 = vmatprep.subr.bf16.mxu1 %v7924_v26  ;;  %v7940_v3 = vpack.c.bf16 %v2855_v61, %v2844_v60  ;;  %v2843_v26 = vld [vmem:[#allocation8 + $0x1010] sm:$0xff]  ;;  %v2933_v61 = vld [vmem:[#allocation8 + $0x12e0] sm:$0xff]  ;;  %v3008_v46 = vld [vmem:[#allocation8 + $0x1538] sm:$0xff] }
 0x506   :  { %8117 = vmatprep.subr.bf16.mxu0 %v8116_v21  ;;  %v2504_v21 = vld [vmem:[#allocation8 + $0x578] sm:$0xff]  ;;  %v7942_v57 = vpack.c.bf16 %v2854_v6, %v2843_v26  ;;  %v2943_v60 = vld [vmem:[#allocation8 + $0x1330] sm:$0xff]  ;;  %v8148_v26 = vpack.c.bf16 %v2944_v62, %v2933_v61  ;;  %v3030_v62 = vld [vmem:[#allocation8 + $0x15e8] sm:$0xff] }
 0x507   :  { %v7956_v63 = vpack.c.bf16 %v2943_v60, %v2932_v59  ;;  %v2768_v6 = vld [vmem:[#allocation8 + $0xdb8] sm:$0xff]  ;;  %v3019_v61 = vld [vmem:[#allocation8 + $0x1590] sm:$0xff] }
 0x508   :  { %7927 = vmatpush1.bf16.msra.mxu1 %v7926_v17  ;;  %v8134_v17 = vpack.c.bf16 %v2504_v21, %v2493_v7  ;;  %v2954_v7 = vld [vmem:[#allocation8 + $0x1388] sm:$0xff]  ;;  %v2955_v21 = vld [vmem:[#allocation8 + $0x1390] sm:$0xff] }
 0x509   :  { %8119 = vmatpush3.bf16.msra.mxu0 %v8118_v18  ;;  %7929 = vmatprep.subr.bf16.mxu1 %v7928_v22  ;;  %v7944_v18 = vpack.c.bf16 %v2877_v11, %v2866_v10  ;;  %v2865_v22 = vld [vmem:[#allocation8 + $0x10c0] sm:$0xff]  ;;  %v2966_v10 = vld [vmem:[#allocation8 + $0x13e8] sm:$0xff] }
 0x50a   :  { %8121 = vmatprep.subr.bf16.mxu0 %v8120_v27  ;;  %v2702_v27 = vld [vmem:[#allocation8 + $0xba8] sm:$0xff]  ;;  %v7946_v32 = vpack.c.bf16 %v2876_v24, %v2865_v22  ;;  %v2976_v22 = vld [vmem:[#allocation8 + $0x1438] sm:$0xff]  ;;  %v2987_v24 = vld [vmem:[#allocation8 + $0x1490] sm:$0xff] }
 0x50b   :  { %v7964_v29 = vpack.c.bf16 %v2987_v24, %v2976_v22 }
 0x50c   :  { %7931 = vmatpush1.bf16.msra.mxu1 %v7930_v33  ;;  %v8138_v33 = vpack.c.bf16 %v2702_v27, %v2691_v52  ;;  %v2988_v52 = vld [vmem:[#allocation8 + $0x1498] sm:$0xff] }
 0x50d   :  { %8123 = vmatpush3.bf16.msra.mxu0 %v8122_v34  ;;  %7933 = vmatprep.subr.bf16.mxu1 %v7932_v36  ;;  %v2887_v34 = vld [vmem:[#allocation8 + $0x1170] sm:$0xff]  ;;  %v2898_v36 = vld [vmem:[#allocation8 + $0x11c8] sm:$0xff] }
 0x50e   :  { %8125 = vmatprep.subr.bf16.mxu0 %v8124_v39  ;;  %v2724_v39 = vld [vmem:[#allocation8 + $0xc58] sm:$0xff]  ;;  %v7950_v47 = vpack.c.bf16 %v2898_v36, %v2887_v34  ;;  %v2998_v36 = vld [vmem:[#allocation8 + $0x14e8] sm:$0xff] }
 0x50f   :  { %v2812_v34 = vld [vmem:[#allocation8 + $0xf18] sm:$0xff] }
 0x510   :  { %7935 = vmatpush1.bf16.msra.mxu1 %v7934_v49  ;;  %v8142_v49 = vpack.c.bf16 %v2724_v39, %v2713_v38  ;;  %v3010_v38 = vld [vmem:[#allocation8 + $0x1548] sm:$0xff]  ;;  %v7966_v39 = vpack.c.bf16 %v2986_v31, %v2975_v48  ;;  %v3097_v31 = vld [vmem:[#allocation8 + $0x1800] sm:$0xff] }
 0x511   :  { %8127 = vmatpush3.bf16.msra.mxu0 %v8126_v50  ;;  %7937 = vmatprep.subr.bf16.mxu1 %v7936_v53  ;;  %v2909_v50 = vld [vmem:[#allocation8 + $0x1220] sm:$0xff]  ;;  %v2920_v53 = vld [vmem:[#allocation8 + $0x1278] sm:$0xff]  ;;  %v3086_v48 = vld [vmem:[#allocation8 + $0x17a8] sm:$0xff] }
 0x512   :  { %8129 = vmatprep.subr.bf16.mxu0 %v8128_v13  ;;  %v2746_v13 = vld [vmem:[#allocation8 + $0xd08] sm:$0xff] }
 0x514   :  { %7939 = vmatpush1.bf16.msra.mxu1 %v7938_v1  ;;  %v2931_v1 = vld [vmem:[#allocation8 + $0x12d0] sm:$0xff] }
 0x515   :  { %8131 = vmatpush3.bf16.msra.mxu0 %v8130_v55  ;;  %7941 = vmatprep.subr.bf16.mxu1 %v7940_v3  ;;  %v2942_v55 = vld [vmem:[#allocation8 + $0x1328] sm:$0xff]  ;;  %v2757_v3 = vld [vmem:[#allocation8 + $0xd60] sm:$0xff] }
 0x516   :  { %8133 = vmatprep.subr.bf16.mxu0 %v8132_v9  ;;  %v2965_v9 = vld [vmem:[#allocation8 + $0x13e0] sm:$0xff]  ;;  %v8150_v11 = vpack.c.bf16 %v2768_v6, %v2757_v3  ;;  %v3219_v3 = vld [vmem:[#allocation8 + $0x1bd0] sm:$0xff]  ;;  %v7974_v6 = vpack.c.bf16 %v3030_v62, %v3019_v61  ;;  %v3318_v61 = vld [vmem:[#allocation8 + $0x1ee8] sm:$0xff] }
 0x517   :  { %v7960_v0 = vpack.c.bf16 %v2965_v9, %v2954_v7 }
 0x518   :  { %7943 = vmatpush1.bf16.msra.mxu1 %v7942_v57  ;;  %v2779_v57 = vld [vmem:[#allocation8 + $0xe10] sm:$0xff] }
 0x519   :  { %8135 = vmatpush3.bf16.msra.mxu0 %v8134_v17  ;;  %7945 = vmatprep.subr.bf16.mxu1 %v7944_v18  ;;  %v8152_v17 = vpack.c.bf16 %v2966_v10, %v2955_v21  ;;  %v2790_v18 = vld [vmem:[#allocation8 + $0xe68] sm:$0xff]  ;;  %v3041_v10 = vld [vmem:[#allocation8 + $0x1640] sm:$0xff] }
 0x51a   :  { %8137 = vmatprep.subr.bf16.mxu0 %v8136_v25  ;;  %v2977_v25 = vld [vmem:[#allocation8 + $0x1440] sm:$0xff]  ;;  %v8154_v28 = vpack.c.bf16 %v2790_v18, %v2779_v57 }
 0x51b   :  { %v3241_v57 = vld [vmem:[#allocation8 + $0x1c80] sm:$0xff] }
 0x51c   :  { %5391 = vmatmul.mubr.f32.vlgmr.msra.gmra.mrb[26].mxu0 %v8667_v35  ;;  %7947 = vmatpush1.bf16.msra.mxu1 %v7946_v32  ;;  %v7954_v35 = vpack.c.bf16 %v2920_v53, %v2909_v50  ;;  %v2801_v32 = vld [vmem:[#allocation8 + $0xec0] sm:$0xff]  ;;  %v2834_v50 = vld [vmem:[#allocation8 + $0xfc8] sm:$0xff]  ;;  %v3020_v53 = vld [vmem:[#allocation8 + $0x1598] sm:$0xff] }
 0x51d   :  { %5395 = vmatprep.mubr.f32.mxu0 %v8630_v15  ;;  %8139 = vmatpush3.bf16.msra.mxu0 %v8138_v33  ;;  %v8146_v15 = vpack.c.bf16 %v2746_v13, %v2735_v40  ;;  %v8156_v33 = vpack.c.bf16 %v2988_v52, %v2977_v25  ;;  %v8158_v42 = vpack.c.bf16 %v2812_v34, %v2801_v32  ;;  %v3031_v40 = vld [vmem:[#allocation8 + $0x15f0] sm:$0xff]  ;;  %v3074_v52 = vld [vmem:[#allocation8 + $0x1748] sm:$0xff] }
 0x51e   :  { %7949 = vmatprep.subr.bf16.mxu1 %v7948_v4  ;;  %8141 = vmatprep.subr.bf16.mxu0 %v8140_v37  ;;  %v3009_v4 = vld [vmem:[#allocation8 + $0x1540] sm:$0xff]  ;;  %v2999_v37 = vld [vmem:[#allocation8 + $0x14f0] sm:$0xff]  ;;  %v7970_v13 = vpack.c.bf16 %v3008_v46, %v2997_v45  ;;  %v7972_v60 = vpack.c.bf16 %v3031_v40, %v3020_v53  ;;  %v3296_v46 = vld [vmem:[#allocation8 + $0x1e38] sm:$0xff] }
 0x51f   :  { %v7968_v43 = vpack.c.bf16 %v3009_v4, %v2998_v36  ;;  %v3063_v25 = vld [vmem:[#allocation8 + $0x16f0] sm:$0xff]  ;;  %v7984_v4 = vpack.c.bf16 %v3097_v31, %v3086_v48  ;;  %v3118_v40 = vld [vmem:[#allocation8 + $0x18a8] sm:$0xff] }
 0x520   :  { %5396 = vmatmul.mubr.f32.gmra.mrb[28].mxu0 %v8663_v20  ;;  %7951 = vmatpush1.bf16.msra.mxu1 %v7950_v47  ;;  %v7958_v20 = vpack.c.bf16 %v2942_v55, %v2931_v1  ;;  %v2823_v47 = vld [vmem:[#allocation8 + $0xf70] sm:$0xff]  ;;  %v3042_v1 = vld [vmem:[#allocation8 + $0x1648] sm:$0xff]  ;;  %v3053_v55 = vld [vmem:[#allocation8 + $0x16a0] sm:$0xff]  ;;  %v7982_v34 = vpack.c.bf16 %v3074_v52, %v3063_v25 }
 0x521   :  { %8143 = vmatpush3.bf16.msra.mxu0 %v8142_v49  ;;  %5465 = vmatprep.mubr.f32.mxu0 %v8676_v56  ;;  %v2953_v56 = vld [vmem:[#allocation8 + $0x1380] sm:$0xff]  ;;  %v8160_v49 = vpack.c.bf16 %v3010_v38, %v2999_v37  ;;  %v8162_v59 = vpack.c.bf16 %v2834_v50, %v2823_v47  ;;  %v7976_v9 = vpack.c.bf16 %v3053_v55, %v3042_v1  ;;  %v3263_v32 = vld [vmem:[#allocation8 + $0x1d30] sm:$0xff]  ;;  %v3096_v38 = vld [vmem:[#allocation8 + $0x17f8] sm:$0xff] }
 0x522   :  { %7953 = vmatprep.subr.bf16.mxu1 %v7952_v14  ;;  %8145 = vmatprep.subr.bf16.mxu0 %v8144_v54  ;;  %v7962_v27 = vpack.c.bf16 %v2964_v16, %v2953_v56  ;;  %v3021_v14 = vld [vmem:[#allocation8 + $0x15a0] sm:$0xff]  ;;  %v3032_v54 = vld [vmem:[#allocation8 + $0x15f8] sm:$0xff]  ;;  %v3075_v16 = vld [vmem:[#allocation8 + $0x1750] sm:$0xff] }
 0x523   :  { %v3064_v56 = vld [vmem:[#allocation8 + $0x16f8] sm:$0xff]  ;;  %v3085_v37 = vld [vmem:[#allocation8 + $0x17a0] sm:$0xff]  ;;  %v3119_v45 = vld [vmem:[#allocation8 + $0x18b0] sm:$0xff] }
 0x524   :  { %7955 = vmatpush1.bf16.msra.mxu1 %v7954_v35  ;;  %v2845_v35 = vld [vmem:[#allocation8 + $0x1020] sm:$0xff]  ;;  %v7980_v24 = vpack.c.bf16 %v3075_v16, %v3064_v56  ;;  %v7986_v47 = vpack.c.bf16 %v3096_v38, %v3085_v37  ;;  %v3107_v53 = vld [vmem:[#allocation8 + $0x1850] sm:$0xff] }
 0x525   :  { %8147 = vmatpush3.bf16.msra.mxu0 %v8146_v15  ;;  %7957 = vmatprep.subr.bf16.mxu1 %v7956_v63  ;;  %v8164_v15 = vpack.c.bf16 %v3032_v54, %v3021_v14  ;;  %v2856_v63 = vld [vmem:[#allocation8 + $0x1078] sm:$0xff]  ;;  %v3109_v14 = vld [vmem:[#allocation8 + $0x1860] sm:$0xff]  ;;  %v7990_v62 = vpack.c.bf16 %v3118_v40, %v3107_v53  ;;  %v3131_v1 = vld [vmem:[#allocation8 + $0x1910] sm:$0xff] }
 0x526   :  { %8149 = vmatprep.subr.bf16.mxu0 %v8148_v26  ;;  %v3230_v26 = vld [vmem:[#allocation8 + $0x1c28] sm:$0xff]  ;;  %v8166_v7 = vpack.c.bf16 %v2856_v63, %v2845_v35  ;;  %v3140_v63 = vld [vmem:[#allocation8 + $0x1958] sm:$0xff]  ;;  %v3153_v56 = vld [vmem:[#allocation8 + $0x19c0] sm:$0xff] }
 0x527   :  { %v8168_v21 = vpack.c.bf16 %v3230_v26, %v3219_v3  ;;  %v3142_v3 = vld [vmem:[#allocation8 + $0x1968] sm:$0xff]  ;;  %v3152_v26 = vld [vmem:[#allocation8 + $0x19b8] sm:$0xff]  ;;  %v3175_v48 = vld [vmem:[#allocation8 + $0x1a70] sm:$0xff] }
 0x528   :  { %7959 = vmatpush1.bf16.msra.mxu1 %v7958_v20  ;;  %v3052_v20 = vld [vmem:[#allocation8 + $0x1698] sm:$0xff] }
 0x529   :  { %8151 = vmatpush3.bf16.msra.mxu0 %v8150_v11  ;;  %7961 = vmatprep.subr.bf16.mxu1 %v7960_v0  ;;  %v3043_v11 = vld [vmem:[#allocation8 + $0x1650] sm:$0xff]  ;;  %v3054_v0 = vld [vmem:[#allocation8 + $0x16a8] sm:$0xff]  ;;  %v7978_v18 = vpack.c.bf16 %v3052_v20, %v3041_v10  ;;  %v8186_v10 = vpack.c.bf16 %v3142_v3, %v3131_v1 }
 0x52a   :  { %8153 = vmatprep.subr.bf16.mxu0 %v8152_v17  ;;  %v3252_v17 = vld [vmem:[#allocation8 + $0x1cd8] sm:$0xff]  ;;  %v8170_v22 = vpack.c.bf16 %v3054_v0, %v3043_v11  ;;  %v3151_v11 = vld [vmem:[#allocation8 + $0x19b0] sm:$0xff]  ;;  %v3162_v0 = vld [vmem:[#allocation8 + $0x1a08] sm:$0xff] }
 0x52b   :  { %v7998_v25 = vpack.c.bf16 %v3162_v0, %v3151_v11  ;;  %v3239_v1 = vld [vmem:[#allocation8 + $0x1c70] sm:$0xff] }
 0x52c   :  { %7963 = vmatpush1.bf16.msra.mxu1 %v7962_v27  ;;  %v3065_v27 = vld [vmem:[#allocation8 + $0x1700] sm:$0xff] }
 0x52d   :  { %8155 = vmatpush3.bf16.msra.mxu0 %v8154_v28  ;;  %7965 = vmatprep.subr.bf16.mxu1 %v7964_v29  ;;  %v8172_v28 = vpack.c.bf16 %v3252_v17, %v3241_v57  ;;  %v3076_v29 = vld [vmem:[#allocation8 + $0x1758] sm:$0xff]  ;;  %v3174_v17 = vld [vmem:[#allocation8 + $0x1a68] sm:$0xff] }
 0x52e   :  { %8157 = vmatprep.subr.bf16.mxu0 %v8156_v33  ;;  %v3274_v33 = vld [vmem:[#allocation8 + $0x1d88] sm:$0xff]  ;;  %v8174_v36 = vpack.c.bf16 %v3076_v29, %v3065_v27  ;;  %v3164_v57 = vld [vmem:[#allocation8 + $0x1a18] sm:$0xff] }
 0x52f   :  { %v8190_v52 = vpack.c.bf16 %v3164_v57, %v3153_v56  ;;  %v3184_v29 = vld [vmem:[#allocation8 + $0x1ab8] sm:$0xff]  ;;  %v3261_v56 = vld [vmem:[#allocation8 + $0x1d20] sm:$0xff]  ;;  %v3439_v57 = vld [vmem:[#allocation8 + $0x22b0] sm:$0xff] }
 0x530   :  { %7967 = vmatpush1.bf16.msra.mxu1 %v7966_v39  ;;  %v3087_v39 = vld [vmem:[#allocation8 + $0x17b0] sm:$0xff] }
 0x531   :  { %8159 = vmatpush3.bf16.msra.mxu0 %v8158_v42  ;;  %7969 = vmatprep.subr.bf16.mxu1 %v7968_v43  ;;  %v8176_v42 = vpack.c.bf16 %v3274_v33, %v3263_v32  ;;  %v3108_v43 = vld [vmem:[#allocation8 + $0x1858] sm:$0xff]  ;;  %v3186_v32 = vld [vmem:[#allocation8 + $0x1ac8] sm:$0xff] }
 0x532   :  { %8161 = vmatprep.subr.bf16.mxu0 %v8160_v49  ;;  %v7988_v50 = vpack.c.bf16 %v3119_v45, %v3108_v43  ;;  %v3196_v33 = vld [vmem:[#allocation8 + $0x1b18] sm:$0xff]  ;;  %v8194_v38 = vpack.c.bf16 %v3186_v32, %v3175_v48  ;;  %v3197_v43 = vld [vmem:[#allocation8 + $0x1b20] sm:$0xff]  ;;  %v3294_v32 = vld [vmem:[#allocation8 + $0x1e28] sm:$0xff] }
 0x534   :  { %7971 = vmatpush1.bf16.msra.mxu1 %v7970_v13  ;;  %v3120_v13 = vld [vmem:[#allocation8 + $0x18b8] sm:$0xff] }
 0x535   :  { %8163 = vmatpush3.bf16.msra.mxu0 %v8162_v59  ;;  %7973 = vmatprep.subr.bf16.mxu1 %v7972_v60  ;;  %v3130_v59 = vld [vmem:[#allocation8 + $0x1908] sm:$0xff]  ;;  %v3307_v60 = vld [vmem:[#allocation8 + $0x1e90] sm:$0xff] }
 0x536   :  { %8165 = vmatprep.subr.bf16.mxu0 %v8164_v15  ;;  %v3129_v15 = vld [vmem:[#allocation8 + $0x1900] sm:$0xff]  ;;  %v8184_v55 = vpack.c.bf16 %v3318_v61, %v3307_v60  ;;  %v3406_v60 = vld [vmem:[#allocation8 + $0x21a8] sm:$0xff]  ;;  %v3240_v61 = vld [vmem:[#allocation8 + $0x1c78] sm:$0xff] }
 0x538   :  { %7975 = vmatpush1.bf16.msra.mxu1 %v7974_v6  ;;  %v3163_v6 = vld [vmem:[#allocation8 + $0x1a10] sm:$0xff] }
 0x539   :  { %8167 = vmatpush3.bf16.msra.mxu0 %v8166_v7  ;;  %7977 = vmatprep.subr.bf16.mxu1 %v7976_v9  ;;  %v3329_v7 = vld [vmem:[#allocation8 + $0x1f40] sm:$0xff]  ;;  %v3340_v9 = vld [vmem:[#allocation8 + $0x1f98] sm:$0xff]  ;;  %v7996_v20 = vpack.c.bf16 %v3163_v6, %v3152_v26 }
 0x53a   :  { %8169 = vmatprep.subr.bf16.mxu0 %v8168_v21  ;;  %v7994_v21 = vpack.c.bf16 %v3140_v63, %v3129_v15  ;;  %v8188_v16 = vpack.c.bf16 %v3340_v9, %v3329_v7  ;;  %v3417_v6 = vld [vmem:[#allocation8 + $0x2200] sm:$0xff]  ;;  %v3428_v7 = vld [vmem:[#allocation8 + $0x2258] sm:$0xff]  ;;  %v3262_v9 = vld [vmem:[#allocation8 + $0x1d28] sm:$0xff] }
 0x53b   :  { %5160 = vmatmul.mubr.f32.vlgmr.msra.gmra.mrb[26].mxu1 %v8685_v2  ;;  %v8206_v0 = vpack.c.bf16 %v3428_v7, %v3417_v6  ;;  %v3349_v6 = vld [vmem:[#allocation8 + $0x1fe0] sm:$0xff]  ;;  %v3360_v7 = vld [vmem:[#allocation8 + $0x2038] sm:$0xff] }
 0x53c   :  { %5466 = vmatmul.mubr.f32.vlgmr.msra.gmra.mrb[30].mxu0 %v8685_v2  ;;  %5165 = vmatprep.mubr.f32.mxu1 %v8670_v41  ;;  %v3098_v2 = vld [vmem:[#allocation8 + $0x1808] sm:$0xff] }
 0x53d   :  { %7979 = vmatpush1.bf16.msra.mxu1 %v7978_v18  ;;  %5470 = vmatprep.mubr.f32.mxu0 %v8670_v41  ;;  %v3285_v41 = vld [vmem:[#allocation8 + $0x1de0] sm:$0xff]  ;;  %v8178_v49 = vpack.c.bf16 %v3098_v2, %v3087_v39  ;;  %v3206_v2 = vld [vmem:[#allocation8 + $0x1b68] sm:$0xff] }
 0x53e   :  { %8171 = vmatpush3.bf16.msra.mxu0 %v8170_v22  ;;  %7981 = vmatprep.subr.bf16.mxu1 %v7980_v24  ;;  %v8180_v54 = vpack.c.bf16 %v3296_v46, %v3285_v41  ;;  %v3185_v18 = vld [vmem:[#allocation8 + $0x1ac0] sm:$0xff]  ;;  %v3351_v22 = vld [vmem:[#allocation8 + $0x1ff0] sm:$0xff]  ;;  %v3362_v24 = vld [vmem:[#allocation8 + $0x2048] sm:$0xff] }
 0x53f   :  { %5166 = vmatmul.mubr.f32.gmra.mrb[28].mxu1 %v8680_v51  ;;  %8173 = vmatprep.subr.bf16.mxu0 %v8172_v28  ;;  %v8000_v27 = vpack.c.bf16 %v3185_v18, %v3174_v17  ;;  %v3173_v28 = vld [vmem:[#allocation8 + $0x1a60] sm:$0xff]  ;;  %v8192_v31 = vpack.c.bf16 %v3362_v24, %v3351_v22  ;;  %v3208_v41 = vld [vmem:[#allocation8 + $0x1b78] sm:$0xff]  ;;  %v3218_v46 = vld [vmem:[#allocation8 + $0x1bc8] sm:$0xff] }
 0x540   :  { %5471 = vmatmul.mubr.f32.gmra.mrb[32].mxu0 %v8680_v51  ;;  %5236 = vmatprep.mubr.f32.mxu1 %v8696_v23  ;;  %v3141_v51 = vld [vmem:[#allocation8 + $0x1960] sm:$0xff]  ;;  %v8002_v37 = vpack.c.bf16 %v3184_v29, %v3173_v28  ;;  %v8198_v40 = vpack.c.bf16 %v3208_v41, %v3197_v43  ;;  %v3450_v22 = vld [vmem:[#allocation8 + $0x2308] sm:$0xff]  ;;  %v3284_v24 = vld [vmem:[#allocation8 + $0x1dd8] sm:$0xff] }
 0x541   :  { %7983 = vmatpush1.bf16.msra.mxu1 %v7982_v34  ;;  %5540 = vmatprep.mubr.f32.mxu0 %v8696_v23  ;;  %v8182_v23 = vpack.c.bf16 %v3120_v13, %v3109_v14  ;;  %v7992_v35 = vpack.c.bf16 %v3141_v51, %v3130_v59  ;;  %v3207_v34 = vld [vmem:[#allocation8 + $0x1b70] sm:$0xff]  ;;  %v3228_v13 = vld [vmem:[#allocation8 + $0x1c18] sm:$0xff]  ;;  %v8210_v29 = vpack.c.bf16 %v3450_v22, %v3439_v57  ;;  %v3382_v22 = vld [vmem:[#allocation8 + $0x20e8] sm:$0xff] }
 0x542   :  { %8175 = vmatpush3.bf16.msra.mxu0 %v8174_v36  ;;  %7985 = vmatprep.subr.bf16.mxu1 %v7984_v4  ;;  %v3373_v36 = vld [vmem:[#allocation8 + $0x20a0] sm:$0xff]  ;;  %v3384_v4 = vld [vmem:[#allocation8 + $0x20f8] sm:$0xff]  ;;  %v8004_v39 = vpack.c.bf16 %v3207_v34, %v3196_v33  ;;  %v3395_v51 = vld [vmem:[#allocation8 + $0x2150] sm:$0xff] }
 0x543   :  { %8177 = vmatprep.subr.bf16.mxu0 %v8176_v42  ;;  %v3195_v42 = vld [vmem:[#allocation8 + $0x1b10] sm:$0xff]  ;;  %v8196_v45 = vpack.c.bf16 %v3384_v4, %v3373_v36  ;;  %v8202_v63 = vpack.c.bf16 %v3406_v60, %v3395_v51  ;;  %v3461_v33 = vld [vmem:[#allocation8 + $0x2360] sm:$0xff]  ;;  %v3472_v36 = vld [vmem:[#allocation8 + $0x23b8] sm:$0xff] }
 0x544   :  { %v8006_v53 = vpack.c.bf16 %v3206_v2, %v3195_v42  ;;  %v3306_v4 = vld [vmem:[#allocation8 + $0x1e88] sm:$0xff]  ;;  %v8214_v2 = vpack.c.bf16 %v3472_v36, %v3461_v33  ;;  %v3316_v41 = vld [vmem:[#allocation8 + $0x1ed8] sm:$0xff]  ;;  %v3327_v51 = vld [vmem:[#allocation8 + $0x1f30] sm:$0xff] }
 0x545   :  { %7987 = vmatpush1.bf16.msra.mxu1 %v7986_v47  ;;  %v3229_v47 = vld [vmem:[#allocation8 + $0x1c20] sm:$0xff]  ;;  %v3338_v60 = vld [vmem:[#allocation8 + $0x1f88] sm:$0xff]  ;;  %v3404_v33 = vld [vmem:[#allocation8 + $0x2198] sm:$0xff] }
 0x546   :  { %8179 = vmatpush3.bf16.msra.mxu0 %v8178_v49  ;;  %7989 = vmatprep.subr.bf16.mxu1 %v7988_v50  ;;  %v3571_v49 = vld [vmem:[#allocation8 + $0x26d0] sm:$0xff]  ;;  %v3582_v50 = vld [vmem:[#allocation8 + $0x2728] sm:$0xff]  ;;  %v8008_v14 = vpack.c.bf16 %v3229_v47, %v3218_v46 }
 0x547   :  { %8181 = vmatprep.subr.bf16.mxu0 %v8180_v54  ;;  %v3217_v54 = vld [vmem:[#allocation8 + $0x1bc0] sm:$0xff]  ;;  %v8200_v59 = vpack.c.bf16 %v3582_v50, %v3571_v49  ;;  %v3483_v46 = vld [vmem:[#allocation8 + $0x2410] sm:$0xff]  ;;  %v3494_v49 = vld [vmem:[#allocation8 + $0x2468] sm:$0xff] }
 0x548   :  { %v8010_v15 = vpack.c.bf16 %v3228_v13, %v3217_v54  ;;  %v3328_v50 = vld [vmem:[#allocation8 + $0x1f38] sm:$0xff]  ;;  %v8218_v13 = vpack.c.bf16 %v3494_v49, %v3483_v46  ;;  %v3427_v36 = vld [vmem:[#allocation8 + $0x2250] sm:$0xff] }
 0x549   :  { %7991 = vmatpush1.bf16.msra.mxu1 %v7990_v62  ;;  %v3251_v62 = vld [vmem:[#allocation8 + $0x1cd0] sm:$0xff]  ;;  %v3448_v46 = vld [vmem:[#allocation8 + $0x22f8] sm:$0xff] }
 0x54a   :  { %8183 = vmatpush3.bf16.msra.mxu0 %v8182_v23  ;;  %7993 = vmatprep.subr.bf16.mxu1 %v7992_v35  ;;  %v3593_v23 = vld [vmem:[#allocation8 + $0x2780] sm:$0xff]  ;;  %v3604_v35 = vld [vmem:[#allocation8 + $0x27d8] sm:$0xff]  ;;  %v8012_v3 = vpack.c.bf16 %v3251_v62, %v3240_v61  ;;  %v3471_v49 = vld [vmem:[#allocation8 + $0x23b0] sm:$0xff] }
 0x54b   :  { %8185 = vmatprep.subr.bf16.mxu0 %v8184_v55  ;;  %v3250_v55 = vld [vmem:[#allocation8 + $0x1cc8] sm:$0xff]  ;;  %v8204_v26 = vpack.c.bf16 %v3604_v35, %v3593_v23  ;;  %v3505_v61 = vld [vmem:[#allocation8 + $0x24c0] sm:$0xff]  ;;  %v3516_v23 = vld [vmem:[#allocation8 + $0x2518] sm:$0xff] }
 0x54c   :  { %v8014_v11 = vpack.c.bf16 %v3250_v55, %v3239_v1  ;;  %v3350_v35 = vld [vmem:[#allocation8 + $0x1fe8] sm:$0xff]  ;;  %v8030_v55 = vpack.c.bf16 %v3338_v60, %v3327_v51  ;;  %v3504_v51 = vld [vmem:[#allocation8 + $0x24b8] sm:$0xff]  ;;  %v3515_v60 = vld [vmem:[#allocation8 + $0x2510] sm:$0xff] }
 0x54d   :  { %7995 = vmatpush1.bf16.msra.mxu1 %v7994_v21  ;;  %v3273_v21 = vld [vmem:[#allocation8 + $0x1d80] sm:$0xff]  ;;  %v3714_v1 = vld [vmem:[#allocation8 + $0x2b48] sm:$0xff] }
 0x54e   :  { %8187 = vmatpush3.bf16.msra.mxu0 %v8186_v10  ;;  %7997 = vmatprep.subr.bf16.mxu1 %v7996_v20  ;;  %v3615_v10 = vld [vmem:[#allocation8 + $0x2830] sm:$0xff]  ;;  %v3626_v20 = vld [vmem:[#allocation8 + $0x2888] sm:$0xff]  ;;  %v8016_v17 = vpack.c.bf16 %v3273_v21, %v3262_v9 }
 0x54f   :  { %8189 = vmatprep.subr.bf16.mxu0 %v8188_v16  ;;  %v3272_v16 = vld [vmem:[#allocation8 + $0x1d78] sm:$0xff]  ;;  %v8208_v18 = vpack.c.bf16 %v3626_v20, %v3615_v10  ;;  %v3527_v9 = vld [vmem:[#allocation8 + $0x2570] sm:$0xff]  ;;  %v3538_v10 = vld [vmem:[#allocation8 + $0x25c8] sm:$0xff] }
 0x550   :  { %v8018_v28 = vpack.c.bf16 %v3272_v16, %v3261_v56  ;;  %v3372_v20 = vld [vmem:[#allocation8 + $0x2098] sm:$0xff]  ;;  %v8034_v16 = vpack.c.bf16 %v3360_v7, %v3349_v6  ;;  %v8226_v57 = vpack.c.bf16 %v3538_v10, %v3527_v9 }
 0x551   :  { %7999 = vmatpush1.bf16.msra.mxu1 %v7998_v25  ;;  %v3295_v25 = vld [vmem:[#allocation8 + $0x1e30] sm:$0xff]  ;;  %v3736_v56 = vld [vmem:[#allocation8 + $0x2bf8] sm:$0xff] }
 0x552   :  { %8191 = vmatpush3.bf16.msra.mxu0 %v8190_v52  ;;  %8001 = vmatprep.subr.bf16.mxu1 %v8000_v27  ;;  %v3637_v52 = vld [vmem:[#allocation8 + $0x28e0] sm:$0xff]  ;;  %v3648_v27 = vld [vmem:[#allocation8 + $0x2938] sm:$0xff]  ;;  %v8020_v48 = vpack.c.bf16 %v3295_v25, %v3284_v24 }
 0x553   :  { %8193 = vmatprep.subr.bf16.mxu0 %v8192_v31  ;;  %v3283_v31 = vld [vmem:[#allocation8 + $0x1dd0] sm:$0xff]  ;;  %v8212_v34 = vpack.c.bf16 %v3648_v27, %v3637_v52  ;;  %v3549_v24 = vld [vmem:[#allocation8 + $0x2620] sm:$0xff]  ;;  %v3560_v52 = vld [vmem:[#allocation8 + $0x2678] sm:$0xff] }
 0x554   :  { %v8022_v42 = vpack.c.bf16 %v3294_v32, %v3283_v31  ;;  %v3394_v27 = vld [vmem:[#allocation8 + $0x2148] sm:$0xff]  ;;  %v3393_v32 = vld [vmem:[#allocation8 + $0x2140] sm:$0xff]  ;;  %v3536_v6 = vld [vmem:[#allocation8 + $0x25b8] sm:$0xff] }
 0x555   :  { %8003 = vmatpush1.bf16.msra.mxu1 %v8002_v37  ;;  %v3317_v37 = vld [vmem:[#allocation8 + $0x1ee0] sm:$0xff]  ;;  %v3548_v9 = vld [vmem:[#allocation8 + $0x2618] sm:$0xff] }
 0x556   :  { %8195 = vmatpush3.bf16.msra.mxu0 %v8194_v38  ;;  %8005 = vmatprep.subr.bf16.mxu1 %v8004_v39  ;;  %v3659_v38 = vld [vmem:[#allocation8 + $0x2990] sm:$0xff]  ;;  %v3670_v39 = vld [vmem:[#allocation8 + $0x29e8] sm:$0xff]  ;;  %v8024_v43 = vpack.c.bf16 %v3317_v37, %v3306_v4  ;;  %v8042_v4 = vpack.c.bf16 %v3404_v33, %v3393_v32  ;;  %v3625_v32 = vld [vmem:[#allocation8 + $0x2880] sm:$0xff] }
 0x557   :  { %8197 = vmatprep.subr.bf16.mxu0 %v8196_v45  ;;  %v3305_v45 = vld [vmem:[#allocation8 + $0x1e80] sm:$0xff]  ;;  %v8216_v47 = vpack.c.bf16 %v3670_v39, %v3659_v38  ;;  %v3415_v38 = vld [vmem:[#allocation8 + $0x21f0] sm:$0xff]  ;;  %v3426_v39 = vld [vmem:[#allocation8 + $0x2248] sm:$0xff] }
 0x558   :  { %v8026_v54 = vpack.c.bf16 %v3316_v41, %v3305_v45  ;;  %v3437_v41 = vld [vmem:[#allocation8 + $0x22a0] sm:$0xff] }
 0x559   :  { %8007 = vmatpush1.bf16.msra.mxu1 %v8006_v53  ;;  %v3339_v53 = vld [vmem:[#allocation8 + $0x1f90] sm:$0xff] }
 0x55a   :  { %8199 = vmatpush3.bf16.msra.mxu0 %v8198_v40  ;;  %8009 = vmatprep.subr.bf16.mxu1 %v8008_v14  ;;  %v3681_v40 = vld [vmem:[#allocation8 + $0x2a40] sm:$0xff]  ;;  %v3692_v14 = vld [vmem:[#allocation8 + $0x2a98] sm:$0xff] }
 0x55b   :  { %8201 = vmatprep.subr.bf16.mxu0 %v8200_v59  ;;  %v8028_v59 = vpack.c.bf16 %v3339_v53, %v3328_v50  ;;  %v8220_v62 = vpack.c.bf16 %v3692_v14, %v3681_v40  ;;  %v3459_v50 = vld [vmem:[#allocation8 + $0x2350] sm:$0xff]  ;;  %v3470_v53 = vld [vmem:[#allocation8 + $0x23a8] sm:$0xff]  ;;  %v3493_v14 = vld [vmem:[#allocation8 + $0x2460] sm:$0xff] }
 0x55c   :  { %v3482_v40 = vld [vmem:[#allocation8 + $0x2408] sm:$0xff] }
 0x55d   :  { %5541 = vmatmul.mubr.f32.vlgmr.msra.gmra.mrb[34].mxu0 %v8735_v58  ;;  %8011 = vmatpush1.bf16.msra.mxu1 %v8010_v15  ;;  %v3361_v15 = vld [vmem:[#allocation8 + $0x2040] sm:$0xff] }
 0x55e   :  { %5545 = vmatprep.mubr.f32.mxu0 %v8688_v8  ;;  %8203 = vmatpush3.bf16.msra.mxu0 %v8202_v63  ;;  %v3703_v63 = vld [vmem:[#allocation8 + $0x2af0] sm:$0xff] }
 0x55f   :  { %8013 = vmatprep.subr.bf16.mxu1 %v8012_v3  ;;  %8205 = vmatprep.subr.bf16.mxu0 %v8204_v26  ;;  %v8222_v3 = vpack.c.bf16 %v3516_v23, %v3505_v61  ;;  %v8032_v26 = vpack.c.bf16 %v3361_v15, %v3350_v35  ;;  %v8224_v21 = vpack.c.bf16 %v3714_v1, %v3703_v63  ;;  %v3514_v23 = vld [vmem:[#allocation8 + $0x2508] sm:$0xff]  ;;  %v3537_v63 = vld [vmem:[#allocation8 + $0x25c0] sm:$0xff] }
 0x560   :  { %v3526_v15 = vld [vmem:[#allocation8 + $0x2568] sm:$0xff] }
 0x561   :  { %5546 = vmatmul.mubr.f32.gmra.mrb[36].mxu0 %v8730_v44  ;;  %8015 = vmatpush1.bf16.msra.mxu1 %v8014_v11  ;;  %v3383_v11 = vld [vmem:[#allocation8 + $0x20f0] sm:$0xff] }
 0x562   :  { %8207 = vmatpush3.bf16.msra.mxu0 %v8206_v0  ;;  %5615 = vmatprep.mubr.f32.mxu0 %v8746_v30  ;;  %v3725_v0 = vld [vmem:[#allocation8 + $0x2ba0] sm:$0xff] }
 0x563   :  { %8017 = vmatprep.subr.bf16.mxu1 %v8016_v17  ;;  %8209 = vmatprep.subr.bf16.mxu0 %v8208_v18  ;;  %v8036_v17 = vpack.c.bf16 %v3383_v11, %v3372_v20  ;;  %v3371_v18 = vld [vmem:[#allocation8 + $0x2090] sm:$0xff]  ;;  %v8228_v25 = vpack.c.bf16 %v3736_v56, %v3725_v0  ;;  %v3558_v56 = vld [vmem:[#allocation8 + $0x2668] sm:$0xff] }
 0x564   :  { %v3547_v0 = vld [vmem:[#allocation8 + $0x2610] sm:$0xff] }
 0x565   :  { %8019 = vmatpush1.bf16.msra.mxu1 %v8018_v28  ;;  %v3405_v28 = vld [vmem:[#allocation8 + $0x21a0] sm:$0xff] }
 0x566   :  { %8211 = vmatpush3.bf16.msra.mxu0 %v8210_v29  ;;  %8021 = vmatprep.subr.bf16.mxu1 %v8020_v48  ;;  %v8038_v29 = vpack.c.bf16 %v3382_v22, %v3371_v18  ;;  %v8230_v48 = vpack.c.bf16 %v3560_v52, %v3549_v24  ;;  %v8040_v31 = vpack.c.bf16 %v3405_v28, %v3394_v27  ;;  %v3569_v22 = vld [vmem:[#allocation8 + $0x26c0] sm:$0xff]  ;;  %v3580_v24 = vld [vmem:[#allocation8 + $0x2718] sm:$0xff]  ;;  %v3603_v52 = vld [vmem:[#allocation8 + $0x27d0] sm:$0xff] }
 0x567   :  { %8213 = vmatprep.subr.bf16.mxu0 %v8212_v34  ;;  %v3416_v34 = vld [vmem:[#allocation8 + $0x21f8] sm:$0xff]  ;;  %v8074_v27 = vpack.c.bf16 %v3580_v24, %v3569_v22 }
 0x568   :  { %v8044_v37 = vpack.c.bf16 %v3427_v36, %v3416_v34  ;;  %v3613_v36 = vld [vmem:[#allocation8 + $0x2820] sm:$0xff] }
 0x569   :  { %8023 = vmatpush1.bf16.msra.mxu1 %v8022_v42  ;;  %v3438_v42 = vld [vmem:[#allocation8 + $0x22a8] sm:$0xff] }
 0x56a   :  { %8215 = vmatpush3.bf16.msra.mxu0 %v8214_v2  ;;  %8025 = vmatprep.subr.bf16.mxu1 %v8024_v43  ;;  %v3449_v2 = vld [vmem:[#allocation8 + $0x2300] sm:$0xff]  ;;  %v8046_v43 = vpack.c.bf16 %v3426_v39, %v3415_v38  ;;  %v3647_v38 = vld [vmem:[#allocation8 + $0x2930] sm:$0xff] }
 0x56b   :  { %8217 = vmatprep.subr.bf16.mxu0 %v8216_v47  ;;  %v8048_v45 = vpack.c.bf16 %v3449_v2, %v3438_v42  ;;  %v3460_v47 = vld [vmem:[#allocation8 + $0x2358] sm:$0xff]  ;;  %v3635_v2 = vld [vmem:[#allocation8 + $0x28d0] sm:$0xff] }
 0x56d   :  { %8027 = vmatpush1.bf16.msra.mxu1 %v8026_v54  ;;  %v8054_v54 = vpack.c.bf16 %v3470_v53, %v3459_v50  ;;  %v3691_v50 = vld [vmem:[#allocation8 + $0x2a90] sm:$0xff] }
 0x56e   :  { %8219 = vmatpush3.bf16.msra.mxu0 %v8218_v13  ;;  %8029 = vmatprep.subr.bf16.mxu1 %v8028_v59  ;;  %v8056_v13 = vpack.c.bf16 %v3493_v14, %v3482_v40  ;;  %v3481_v59 = vld [vmem:[#allocation8 + $0x2400] sm:$0xff]  ;;  %v3679_v14 = vld [vmem:[#allocation8 + $0x2a30] sm:$0xff] }
 0x56f   :  { %8221 = vmatprep.subr.bf16.mxu0 %v8220_v62  ;;  %v3503_v62 = vld [vmem:[#allocation8 + $0x24b0] sm:$0xff] }
 0x571   :  { %8031 = vmatpush1.bf16.msra.mxu1 %v8030_v55  ;;  %v8062_v55 = vpack.c.bf16 %v3514_v23, %v3503_v62  ;;  %v3735_v62 = vld [vmem:[#allocation8 + $0x2bf0] sm:$0xff] }
 0x572   :  { %8223 = vmatpush3.bf16.msra.mxu0 %v8222_v3  ;;  %8033 = vmatprep.subr.bf16.mxu1 %v8032_v26  ;;  %v8064_v3 = vpack.c.bf16 %v3537_v63, %v3526_v15  ;;  %v3525_v26 = vld [vmem:[#allocation8 + $0x2560] sm:$0xff]  ;;  %v3723_v15 = vld [vmem:[#allocation8 + $0x2b90] sm:$0xff]  ;;  %v3734_v63 = vld [vmem:[#allocation8 + $0x2be8] sm:$0xff] }
 0x573   :  { %8225 = vmatprep.subr.bf16.mxu0 %v8224_v21  ;;  %v3559_v21 = vld [vmem:[#allocation8 + $0x2670] sm:$0xff]  ;;  %v8066_v20 = vpack.c.bf16 %v3536_v6, %v3525_v26 }
 0x574   :  { %v8068_v11 = vpack.c.bf16 %v3559_v21, %v3548_v9 }
 0x575   :  { %8035 = vmatpush1.bf16.msra.mxu1 %v8034_v16  ;;  %v3570_v16 = vld [vmem:[#allocation8 + $0x26c8] sm:$0xff] }
 0x576   :  { %8227 = vmatpush3.bf16.msra.mxu0 %v8226_v57  ;;  %8037 = vmatprep.subr.bf16.mxu1 %v8036_v17  ;;  %v3581_v57 = vld [vmem:[#allocation8 + $0x2720] sm:$0xff]  ;;  %v8070_v17 = vpack.c.bf16 %v3558_v56, %v3547_v0 }
 0x577   :  { %8229 = vmatprep.subr.bf16.mxu0 %v8228_v25  ;;  %v8072_v18 = vpack.c.bf16 %v3581_v57, %v3570_v16  ;;  %v3592_v25 = vld [vmem:[#allocation8 + $0x2778] sm:$0xff] }
 0x578   :  { %v8076_v28 = vpack.c.bf16 %v3603_v52, %v3592_v25 }
 0x579   :  { %8039 = vmatpush1.bf16.msra.mxu1 %v8038_v29  ;;  %v3591_v29 = vld [vmem:[#allocation8 + $0x2770] sm:$0xff] }
 0x57a   :  { %8231 = vmatpush3.bf16.msra.mxu0 %v8230_v48  ;;  %8041 = vmatprep.subr.bf16.mxu1 %v8040_v31  ;;  %v3602_v48 = vld [vmem:[#allocation8 + $0x27c8] sm:$0xff] }
 0x57b   :  { %v3614_v31 = vld [vmem:[#allocation8 + $0x2828] sm:$0xff]  ;;  %v8078_v33 = vpack.c.bf16 %v3602_v48, %v3591_v29 }
 0x57c   :  { %5237 = vmatmul.mubr.f32.vlgmr.msra.gmra.mrb[26].mxu1 %v8735_v58  ;;  %v8050_v58 = vpack.c.bf16 %v3448_v46, %v3437_v41  ;;  %v8080_v34 = vpack.c.bf16 %v3625_v32, %v3614_v31  ;;  %v3669_v41 = vld [vmem:[#allocation8 + $0x29e0] sm:$0xff] }
 0x57d   :  { %5616 = vmatmul.mubr.f32.vlgmr.msra.gmra.mrb[38].mxu0 %v8764_v19  ;;  %5242 = vmatprep.mubr.f32.mxu1 %v8688_v8  ;;  %v8052_v8 = vpack.c.bf16 %v3471_v49, %v3460_v47  ;;  %v3657_v49 = vld [vmem:[#allocation8 + $0x2980] sm:$0xff] }
 0x57e   :  { %8043 = vmatpush1.bf16.msra.mxu1 %v8042_v4  ;;  %5620 = vmatprep.mubr.f32.mxu0 %v8738_v12  ;;  %v3624_v4 = vld [vmem:[#allocation8 + $0x2878] sm:$0xff] }
 0x57f   :  { %8045 = vmatprep.subr.bf16.mxu1 %v8044_v37  ;;  %v3636_v37 = vld [vmem:[#allocation8 + $0x28d8] sm:$0xff]  ;;  %v8082_v39 = vpack.c.bf16 %v3624_v4, %v3613_v36 }
 0x580   :  { %5243 = vmatmul.mubr.f32.gmra.mrb[28].mxu1 %v8730_v44  ;;  %v3492_v44 = vld [vmem:[#allocation8 + $0x2458] sm:$0xff]  ;;  %v8084_v42 = vpack.c.bf16 %v3647_v38, %v3636_v37 }
 0x581   :  { %5621 = vmatmul.mubr.f32.gmra.mrb[40].mxu0 %v8760_v5  ;;  %5313 = vmatprep.mubr.f32.mxu1 %v8746_v30  ;;  %v8058_v61 = vpack.c.bf16 %v3492_v44, %v3481_v59  ;;  %v8060_v30 = vpack.c.bf16 %v3515_v60, %v3504_v51  ;;  %v3713_v59 = vld [vmem:[#allocation8 + $0x2b40] sm:$0xff] }
 0x582   :  { %8047 = vmatpush1.bf16.msra.mxu1 %v8046_v43  ;;  %v3646_v43 = vld [vmem:[#allocation8 + $0x2928] sm:$0xff]  ;;  %v3701_v60 = vld [vmem:[#allocation8 + $0x2ae0] sm:$0xff] }
 0x583   :  { %8049 = vmatprep.subr.bf16.mxu1 %v8048_v45  ;;  %v3658_v45 = vld [vmem:[#allocation8 + $0x2988] sm:$0xff]  ;;  %v8086_v46 = vpack.c.bf16 %v3646_v43, %v3635_v2 }
 0x584   :  { %v8088_v47 = vpack.c.bf16 %v3669_v41, %v3658_v45 }
 0x586   :  { %8051 = vmatpush1.bf16.msra.mxu1 %v8050_v58  ;;  %v3668_v58 = vld [vmem:[#allocation8 + $0x29d8] sm:$0xff] }
 0x587   :  { %8053 = vmatprep.subr.bf16.mxu1 %v8052_v8  ;;  %v3680_v8 = vld [vmem:[#allocation8 + $0x2a38] sm:$0xff]  ;;  %v8090_v53 = vpack.c.bf16 %v3668_v58, %v3657_v49 }
 0x588   :  { %v8092_v40 = vpack.c.bf16 %v3691_v50, %v3680_v8 }
 0x58a   :  { %8055 = vmatpush1.bf16.msra.mxu1 %v8054_v54  ;;  %v3690_v54 = vld [vmem:[#allocation8 + $0x2a88] sm:$0xff] }
 0x58b   :  { %8057 = vmatprep.subr.bf16.mxu1 %v8056_v13  ;;  %v3702_v13 = vld [vmem:[#allocation8 + $0x2ae8] sm:$0xff]  ;;  %v8094_v44 = vpack.c.bf16 %v3690_v54, %v3679_v14 }
 0x58c   :  { %v4699_v35 = vpop.f32.mrb[22].mxu1  ;;  %v8096_v51 = vpack.c.bf16 %v3713_v59, %v3702_v13 }
 0x58d   :  { %5671 = vst [vmem:[%s8923_s5 + $0xd0] sm:$0xff] %v4699_v35  ;;  %v4701_v1 = vpop.f32.mrb[23].mxu1 }
 0x58e   :  { %8059 = vmatpush1.bf16.msra.mxu1 %v8058_v61  ;;  %5672 = vst [vmem:[%s8923_s5 + $0xd8] sm:$0xff] %v4701_v1  ;;  %v3712_v61 = vld [vmem:[#allocation8 + $0x2b38] sm:$0xff]  ;;  %v8102_v1 = vpack.c.bf16 %v3734_v63, %v3723_v15 }
 0x58f   :  { %8061 = vmatprep.subr.bf16.mxu1 %v8060_v30  ;;  %v3724_v30 = vld [vmem:[#allocation8 + $0x2b98] sm:$0xff]  ;;  %v8098_v23 = vpack.c.bf16 %v3712_v61, %v3701_v60 }
 0x590   :  { %v4705_v7 = vpop.f32.mrb[24].mxu1  ;;  %v8100_v35 = vpack.c.bf16 %v3735_v62, %v3724_v30 }
 0x591   :  { %5682 = vst [vmem:[%s8923_s5 + $0x128] sm:$0xf] %v4705_v7  ;;  %v4707_v10 = vpop.f32.mrb[25].mxu1 }
 0x592   :  { %8063 = vmatpush1.bf16.msra.mxu1 %v8062_v55  ;;  %5683 = vst [vmem:[%s8923_s5 + $0x130] sm:$0xf] %v4707_v10 }
 0x593   :  { %8065 = vmatprep.subr.bf16.mxu1 %v8064_v3 }
 0x596   :  { %8067 = vmatpush1.bf16.msra.mxu1 %v8066_v20 }
 0x597   :  { %8069 = vmatprep.subr.bf16.mxu1 %v8068_v11 }
 0x59a   :  { %8071 = vmatpush1.bf16.msra.mxu1 %v8070_v17 }
 0x59b   :  { %8073 = vmatprep.subr.bf16.mxu1 %v8072_v18 }
 0x59e   :  { %8075 = vmatpush1.bf16.msra.mxu1 %v8074_v27 }
 0x59f   :  { %8077 = vmatprep.subr.bf16.mxu1 %v8076_v28 }
 0x5a2   :  { %8079 = vmatpush1.bf16.msra.mxu1 %v8078_v33 }
 0x5a3   :  { %8081 = vmatprep.subr.bf16.mxu1 %v8080_v34 }
 0x5a6   :  { %8083 = vmatpush1.bf16.msra.mxu1 %v8082_v39 }
 0x5a7   :  { %8085 = vmatprep.subr.bf16.mxu1 %v8084_v42 }
 0x5aa   :  { %8087 = vmatpush1.bf16.msra.mxu1 %v8086_v46 }
 0x5ab   :  { %8089 = vmatprep.subr.bf16.mxu1 %v8088_v47 }
 0x5ae   :  { %8091 = vmatpush1.bf16.msra.mxu1 %v8090_v53 }
 0x5af   :  { %8093 = vmatprep.subr.bf16.mxu1 %v8092_v40 }
 0x5b2   :  { %8095 = vmatpush1.bf16.msra.mxu1 %v8094_v44 }
 0x5b3   :  { %8097 = vmatprep.subr.bf16.mxu1 %v8096_v51 }
 0x5b6   :  { %8099 = vmatpush1.bf16.msra.mxu1 %v8098_v23 }
 0x5b7   :  { %8101 = vmatprep.subr.bf16.mxu1 %v8100_v35 }
 0x5ba   :  { %8103 = vmatpush1.bf16.msra.mxu1 %v8102_v1 }
 0x5bd   :  { %5314 = vmatmul.mubr.f32.vlgmr.msra.gmra.mrb[26].mxu1 %v8764_v19 }
 0x5be   :  { %5319 = vmatprep.mubr.f32.mxu1 %v8738_v12 }
 0x5c1   :  { %5320 = vmatmul.mubr.f32.gmra.mrb[28].mxu1 %v8760_v5 }
 0x5cd   :  { %v5007_v55 = vpop.f32.mrb[22].mxu0 }
 0x5ce   :  { %5673 = vst [vmem:[%s8923_s5 + $0xe0] sm:$0xff] %v5007_v55  ;;  %v5009_v3 = vpop.f32.mrb[23].mxu0 }
 0x5cf   :  { %5674 = vst [vmem:[%s8923_s5 + $0xe8] sm:$0xff] %v5009_v3 }
 0x5d1   :  { %v5013_v26 = vpop.f32.mrb[24].mxu0 }
 0x5d2   :  { %5684 = vst [vmem:[%s8923_s5 + $0x138] sm:$0xf] %v5013_v26  ;;  %v5015_v19 = vpop.f32.mrb[25].mxu0 }
 0x5d3   :  { %5685 = vst [vmem:[%s8923_s5 + $0x140] sm:$0xf] %v5015_v19 }
 0x5ef   :  { %v5808_v12 = vpop.f32.mrb[26].mxu0 }
 0x5f0   :  { %v5809_v5 = vpop.f32.mrb[27].mxu0 }
 0x5f1   :  { %v5810_v6 = vadd.f32 %v5809_v5, %v5808_v12 }
 0x5f3   :  { %v5811_v7 = vpop.f32.mrb[28].mxu0 }
 0x5f4   :  { %v5812_v9 = vpop.f32.mrb[29].mxu0 }
 0x5f5   :  { %v5813_v21 = vadd.f32 %v5812_v9, %v5811_v7 }
 0x60f   :  { %v5846_v10 = vpop.f32.mrb[30].mxu0 }
 0x610   :  { %v5847_v20 = vpop.f32.mrb[31].mxu0 }
 0x611   :  { %v5848_v11 = vadd.f32 %v5847_v20, %v5846_v10 }
 0x613   :  { %v5468_v0 = vadd.f32 %v5848_v11, %v5810_v6  ;;  %v5849_v56 = vpop.f32.mrb[32].mxu0 }
 0x614   :  { %v5850_v16 = vpop.f32.mrb[33].mxu0 }
 0x615   :  { %v5851_v57 = vadd.f32 %v5850_v16, %v5849_v56 }
 0x617   :  { %v5473_v17 = vadd.f32 %v5851_v57, %v5813_v21 }
 0x630   :  { %v5884_v18 = vpop.f32.mrb[34].mxu0 }
 0x631   :  { %v5885_v22 = vpop.f32.mrb[35].mxu0 }
 0x632   :  { %v5886_v24 = vadd.f32 %v5885_v22, %v5884_v18 }
 0x634   :  { %v5543_v25 = vadd.f32 %v5886_v24, %v5468_v0  ;;  %v5887_v52 = vpop.f32.mrb[36].mxu0 }
 0x635   :  { %v5888_v27 = vpop.f32.mrb[37].mxu0 }
 0x636   :  { %v5889_v28 = vadd.f32 %v5888_v27, %v5887_v52 }
 0x638   :  { %v5548_v29 = vadd.f32 %v5889_v28, %v5473_v17 }
 0x650   :  { %v5922_v48 = vpop.f32.mrb[38].mxu0 }
 0x651   :  { %v5923_v31 = vpop.f32.mrb[39].mxu0 }
 0x652   :  { %v5924_v32 = vadd.f32 %v5923_v31, %v5922_v48 }
 0x654   :  { %v5618_v33 = vadd.f32 %v5924_v32, %v5543_v25  ;;  %v5925_v34 = vpop.f32.mrb[40].mxu0 }
 0x655   :  { %v5926_v36 = vpop.f32.mrb[41].mxu0 }
 0x656   :  { %5677 = vst [vmem:[%s8923_s5 + $0x100] sm:$0xff] %v5618_v33  ;;  %v5927_v4 = vadd.f32 %v5926_v36, %v5925_v34 }
 0x658   :  { %v5623_v37 = vadd.f32 %v5927_v4, %v5548_v29 }
 0x65a   :  { %5688 = vst [vmem:[%s8923_s5 + $0x158] sm:$0xf] %v5623_v37 }
 0x690   :  { %v5315_v38 = vpop.f32.mrb[26].mxu1 }
 0x691   :  { %5675 = vst [vmem:[%s8923_s5 + $0xf0] sm:$0xff] %v5315_v38  ;;  %v5317_v39 = vpop.f32.mrb[27].mxu1 }
 0x692   :  { %5676 = vst [vmem:[%s8923_s5 + $0xf8] sm:$0xff] %v5317_v39 }
 0x694   :  { %v5321_v42 = vpop.f32.mrb[28].mxu1 }
 0x695   :  { %5686 = vst [vmem:[%s8923_s5 + $0x148] sm:$0xf] %v5321_v42  ;;  %v5323_v2 = vpop.f32.mrb[29].mxu1 }
 0x696   :  { %5687 = vst [vmem:[%s8923_s5 + $0x150] sm:$0xf] %v5323_v2 }
 0x697   :  { %5664 = vsyncpa [#allocation4], 1 }
 0x698   :  { %5665 = vsyncpa [#allocation6], 1 }
 0x699   :  { %5666 = vsyncpa [#allocation9], 1 }

</bundles_post_ra>
